<compile_context>
chip_gen: v5e
topology: v5e:2x2
jax: 0.10.0
libtpu: 0.0.40
codegen_flags: <defaults>
</compile_context>

<pallas_src>
import math
import functools

import jax
import jax.numpy as jnp
from jax.experimental import pallas as pl
from jax.experimental.pallas import tpu as pltpu

# ------------------------- config -------------------------
NHEAD = 8
EMB = 64            # d_model (divisible by NHEAD)
DH = EMB // NHEAD
FF = 128            # dim_feedforward
VOCAB = 50          # tgt_vocab_size
VOCAB_PAD = 128     # lane-dense generator output, sliced back to VOCAB outside
NUM_ENC = 2
NUM_DEC = 2
PATCH = 4
IMG = 16
MAX_LEN = 64
NEG = -1e9
LN_EPS = 1e-5


# ------------------------- in-kernel helpers -------------------------
def _mm(x, w):
    """MXU matmul: bf16 operands, f32 accumulation."""
    return jnp.dot(x.astype(jnp.bfloat16), w.astype(jnp.bfloat16),
                   preferred_element_type=jnp.float32)


def _layernorm(x, g_ref, b_ref):
    mu = jnp.mean(x, axis=-1, keepdims=True)
    var = jnp.mean(jnp.square(x - mu), axis=-1, keepdims=True)
    return (x - mu) * jax.lax.rsqrt(var + LN_EPS) * g_ref[...] + b_ref[...]


def _ffn(x, w1_ref, b1_ref, w2_ref, b2_ref):
    h = jnp.maximum(_mm(x, w1_ref[...]) + b1_ref[...], 0.0)
    return _mm(h, w2_ref[...]) + b2_ref[...]


def _mha(q_all, k_all, v_all, wo_ref, bo_ref, add_mask, B, Lq, Lk):
    """Multi-head attention on flat activations.

    q_all: (B*Lq, EMB), k_all/v_all: (B*Lk, EMB), rows batch-major.
    add_mask: (B, Lq, Lk) additive f32 mask (shared across heads) or None.
    Heads are a statically-unrolled loop inside the fused kernel; the output
    projection is accumulated per head (sum_h o_h @ Wo[h]) so heads never need
    to be concatenated or transposed.
    """
    scale = 1.0 / math.sqrt(DH)
    out = jnp.zeros((B * Lq, EMB), jnp.float32)
    for h in range(NHEAD):
        sl = slice(h * DH, (h + 1) * DH)
        qh = q_all[:, sl].reshape(B, Lq, DH)
        kh = k_all[:, sl].reshape(B, Lk, DH)
        vh = v_all[:, sl].reshape(B, Lk, DH)
        s = jnp.einsum("bqd,bkd->bqk",
                       qh.astype(jnp.bfloat16), kh.astype(jnp.bfloat16),
                       preferred_element_type=jnp.float32) * scale
        if add_mask is not None:
            s = s + add_mask
        s = s - jnp.max(s, axis=-1, keepdims=True)
        p = jnp.exp(s)
        p = p * pl.reciprocal(jnp.sum(p, axis=-1, keepdims=True), approx=True)
        oh = jnp.einsum("bqk,bkd->bqd",
                        p.astype(jnp.bfloat16), vh.astype(jnp.bfloat16),
                        preferred_element_type=jnp.float32)
        out = out + _mm(oh.reshape(B * Lq, DH), wo_ref[sl, :])
    return out + bo_ref[...]


# ------------------------- fused Pallas kernels -------------------------
def _encoder_layer_kernel(x_ref, wqkv_ref, bqkv_ref, wo_ref, bo_ref,
                          ln1g_ref, ln1b_ref, w1_ref, b1_ref, w2_ref, b2_ref,
                          ln2g_ref, ln2b_ref, o_ref, *, B, L):
    # PyTorch TransformerEncoderLayer defaults: post-norm, relu, no src masks.
    x = x_ref[...]                                        # (B*L, EMB)
    qkv = _mm(x, wqkv_ref[...]) + bqkv_ref[...]           # fused QKV projection
    a = _mha(qkv[:, 0:EMB], qkv[:, EMB:2 * EMB], qkv[:, 2 * EMB:3 * EMB],
             wo_ref, bo_ref, None, B, L, L)
    x = _layernorm(x + a, ln1g_ref, ln1b_ref)
    x = _layernorm(x + _ffn(x, w1_ref, b1_ref, w2_ref, b2_ref),
                   ln2g_ref, ln2b_ref)
    o_ref[...] = x


def _decoder_layer_kernel(x_ref, mem_ref, smask_ref, cmask_ref,
                          s_wqkv_ref, s_bqkv_ref, s_wo_ref, s_bo_ref,
                          ln1g_ref, ln1b_ref,
                          c_wq_ref, c_bq_ref, c_wkv_ref, c_bkv_ref,
                          c_wo_ref, c_bo_ref, ln2g_ref, ln2b_ref,
                          w1_ref, b1_ref, w2_ref, b2_ref,
                          ln3g_ref, ln3b_ref, o_ref, *, B, T, S):
    # PyTorch TransformerDecoderLayer defaults: post-norm, relu.
    x = x_ref[...]                                        # (B*T, EMB)
    mem = mem_ref[...]                                    # (B*S, EMB)
    # masked self-attention
    qkv = _mm(x, s_wqkv_ref[...]) + s_bqkv_ref[...]
    a = _mha(qkv[:, 0:EMB], qkv[:, EMB:2 * EMB], qkv[:, 2 * EMB:3 * EMB],
             s_wo_ref, s_bo_ref, smask_ref[...], B, T, T)
    x = _layernorm(x + a, ln1g_ref, ln1b_ref)
    # cross-attention over encoder memory (fused KV projection)
    q = _mm(x, c_wq_ref[...]) + c_bq_ref[...]
    kv = _mm(mem, c_wkv_ref[...]) + c_bkv_ref[...]
    a = _mha(q, kv[:, 0:EMB], kv[:, EMB:2 * EMB],
             c_wo_ref, c_bo_ref, cmask_ref[...], B, T, S)
    x = _layernorm(x + a, ln2g_ref, ln2b_ref)
    # feed-forward
    x = _layernorm(x + _ffn(x, w1_ref, b1_ref, w2_ref, b2_ref),
                   ln3g_ref, ln3b_ref)
    o_ref[...] = x


def _linear_kernel(x_ref, w_ref, b_ref, o_ref):
    o_ref[...] = _mm(x_ref[...], w_ref[...]) + b_ref[...]


# ------------------------- pallas_call wrappers -------------------------
def _full_spec(shape):
    n = len(shape)

    def idx(i):
        return (0,) * n

    return pl.BlockSpec(shape, idx)


def _fused_call(kernel, out_shape, *arrays):
    return pl.pallas_call(
        kernel,
        out_shape=jax.ShapeDtypeStruct(out_shape, jnp.float32),
        grid=(1,),
        in_specs=[_full_spec(a.shape) for a in arrays],
        out_specs=_full_spec(out_shape),
        compiler_params=pltpu.CompilerParams(dimension_semantics=("arbitrary",)),
    )(*arrays)


def pallas_linear(x, w, b):
    """x: (M, K), w: (K, N), b: (1, N) -> (M, N) fp32 (bf16 MXU operands)."""
    return _fused_call(_linear_kernel, (x.shape[0], w.shape[1]), x, w, b)


def encoder_layer(x, p, B, L):
    kern = functools.partial(_encoder_layer_kernel, B=B, L=L)
    return _fused_call(kern, x.shape,
                       x, p["wqkv"], p["bqkv"], p["wo"], p["bo"],
                       p["ln1_g"], p["ln1_b"],
                       p["w1"], p["b1"], p["w2"], p["b2"],
                       p["ln2_g"], p["ln2_b"])


def decoder_layer(x, memory, self_mask, cross_mask, p, B, T, S):
    kern = functools.partial(_decoder_layer_kernel, B=B, T=T, S=S)
    return _fused_call(kern, x.shape,
                       x, memory, self_mask, cross_mask,
                       p["s_wqkv"], p["s_bqkv"], p["s_wo"], p["s_bo"],
                       p["ln1_g"], p["ln1_b"],
                       p["c_wq"], p["c_bq"], p["c_wkv"], p["c_bkv"],
                       p["c_wo"], p["c_bo"], p["ln2_g"], p["ln2_b"],
                       p["w1"], p["b1"], p["w2"], p["b2"],
                       p["ln3_g"], p["ln3_b"])


# ------------------------- model pieces -------------------------
def src_embed(src, p):
    # TODO(synk): EncoderCNNtrain18 (ResNet-18 image encoder) source was not
    # provided; deterministic patch-embedding stand-in producing (B, S_src, EMB).
    B, C, Himg, Wimg = src.shape
    P = PATCH
    x = jnp.transpose(src, (0, 2, 3, 1))                                  # NHWC
    x = x.reshape(B, Himg // P, P, Wimg // P, P, C)
    x = jnp.transpose(x, (0, 1, 3, 2, 4, 5)).reshape(
        B, (Himg // P) * (Wimg // P), P * P * C)
    S, D = x.shape[1], x.shape[2]
    return pallas_linear(x.reshape(B * S, D), p["w"], p["b"]).reshape(B, S, EMB)


def make_pe(max_len, d_model):
    pos = jnp.arange(max_len, dtype=jnp.float32)[:, None]
    div = jnp.exp(jnp.arange(0, d_model, 2, dtype=jnp.float32)
                  * (-math.log(10000.0) / d_model))
    pe = jnp.zeros((max_len, d_model), jnp.float32)
    pe = pe.at[:, 0::2].set(jnp.sin(pos * div))
    pe = pe.at[:, 1::2].set(jnp.cos(pos * div))
    return pe[:, None, :]                                                 # (max_len,1,E)


def seq2seq_forward(params, src, trg, tgt_mask, tgt_padding_mask,
                    memory_key_padding_mask):
    pe = params["pe"]
    B = src.shape[0]
    T = trg.shape[0]

    # Source embedding + positional encoding.  The reference applies PE *before*
    # .permute(1,0,2), i.e. pe[:x.size(0)] indexes the batch dim of a (B,S,E)
    # tensor; that op order (quirk included) is preserved here.
    src_feat = src_embed(src, params["src_emb"])                          # (B,S,E)
    S = src_feat.shape[1]
    src_e = src_feat + pe[:B]
    mem = src_e.reshape(B * S, EMB)                                       # batch-major rows

    # Target token embedding + positional encoding (seq-first, standard).
    tgt_e = jnp.take(params["tok_emb"], trg, axis=0) * math.sqrt(EMB)     # (T,B,E)
    tgt_e = tgt_e + pe[:T]
    x = jnp.transpose(tgt_e, (1, 0, 2)).reshape(B * T, EMB)               # batch-major rows

    # Additive masks, shared across heads: (B, Lq, Lk).
    self_mask = tgt_mask[None, :, :] + \
        jnp.where(tgt_padding_mask, NEG, 0.0)[:, None, :]                 # (B,T,T)
    cross_mask = jnp.broadcast_to(
        jnp.where(memory_key_padding_mask, NEG, 0.0)[:, None, :], (B, T, S))

    # Encoder (no masks, matches reference call).
    for lp in params["enc_layers"]:
        mem = encoder_layer(mem, lp, B, S)

    # Decoder.
    for lp in params["dec_layers"]:
        x = decoder_layer(x, mem, self_mask, cross_mask, lp, B, T, S)

    # Generator: lane-dense (padded to 128 cols), sliced back to VOCAB.
    logits = pallas_linear(x, params["gen_w"], params["gen_b"])           # (B*T,128)
    logits = logits.reshape(B, T, VOCAB_PAD)[:, :, :VOCAB]
    return jnp.transpose(logits, (1, 0, 2))                               # (T,B,VOCAB)


# ------------------------- deterministic parameter init -------------------------
def init_params(key):
    keys = iter(jax.random.split(key, 512))

    def w(shape, scale=0.02):
        return jax.random.normal(next(keys), shape, jnp.float32) * scale

    def ln():
        return jnp.ones((1, EMB), jnp.float32), jnp.zeros((1, EMB), jnp.float32)

    def enc_p():
        g1, bb1 = ln(); g2, bb2 = ln()
        return dict(wqkv=w((EMB, 3 * EMB)), bqkv=w((1, 3 * EMB)),
                    wo=w((EMB, EMB)), bo=w((1, EMB)),
                    ln1_g=g1, ln1_b=bb1,
                    w1=w((EMB, FF)), b1=w((1, FF)),
                    w2=w((FF, EMB)), b2=w((1, EMB)),
                    ln2_g=g2, ln2_b=bb2)

    def dec_p():
        g1, bb1 = ln(); g2, bb2 = ln(); g3, bb3 = ln()
        return dict(s_wqkv=w((EMB, 3 * EMB)), s_bqkv=w((1, 3 * EMB)),
                    s_wo=w((EMB, EMB)), s_bo=w((1, EMB)),
                    ln1_g=g1, ln1_b=bb1,
                    c_wq=w((EMB, EMB)), c_bq=w((1, EMB)),
                    c_wkv=w((EMB, 2 * EMB)), c_bkv=w((1, 2 * EMB)),
                    c_wo=w((EMB, EMB)), c_bo=w((1, EMB)),
                    ln2_g=g2, ln2_b=bb2,
                    w1=w((EMB, FF)), b1=w((1, FF)),
                    w2=w((FF, EMB)), b2=w((1, EMB)),
                    ln3_g=g3, ln3_b=bb3)

    gen_w = jnp.pad(w((EMB, VOCAB)), ((0, 0), (0, VOCAB_PAD - VOCAB)))
    gen_b = jnp.pad(w((1, VOCAB)), ((0, 0), (0, VOCAB_PAD - VOCAB)))

    return dict(
        src_emb=dict(w=w((PATCH * PATCH * 3, EMB)), b=w((1, EMB))),
        tok_emb=w((VOCAB, EMB), 1.0),
        pe=make_pe(MAX_LEN, EMB),
        enc_layers=[enc_p() for _ in range(NUM_ENC)],
        dec_layers=[dec_p() for _ in range(NUM_DEC)],
        gen_w=gen_w, gen_b=gen_b,
    )


# ------------------------- main -------------------------
if __name__ == "__main__":
    key = jax.random.PRNGKey(0)
    pkey, skey, tkey = jax.random.split(key, 3)
    params = init_params(pkey)

    B, T = 2, 8
    S = (IMG // PATCH) * (IMG // PATCH)                                   # 16 src tokens
    src = jax.random.normal(skey, (B, 3, IMG, IMG), jnp.float32)          # NCHW
    trg = jax.random.randint(tkey, (T, B), 0, VOCAB, jnp.int32)           # seq-first tokens

    # causal additive mask (generate_square_subsequent_mask analog, large-neg)
    tgt_mask = jnp.where(jnp.triu(jnp.ones((T, T), jnp.float32), k=1) > 0, NEG, 0.0)
    tgt_padding_mask = jnp.zeros((B, T), jnp.bool_).at[1, T - 1].set(True)
    memory_key_padding_mask = jnp.zeros((B, S), jnp.bool_)

    fwd = jax.jit(seq2seq_forward)
    out = fwd(params, src, trg, tgt_mask, tgt_padding_mask,
              memory_key_padding_mask)
    out = jax.block_until_ready(out)
    assert out.shape == (T, B, VOCAB), out.shape
    assert bool(jnp.all(jnp.isfinite(out)))
    print("KERNEL_OK")
</pallas_src>

<mosaic_0001>
module attributes {stable_mosaic.version = 11 : i64} {
  func.func @_linear_kernel(%arg0: i32, %arg1: memref<32x48xf32, #tpu.memory_space<vmem>>, %arg2: memref<48x64xf32, #tpu.memory_space<vmem>>, %arg3: memref<1x64xf32, #tpu.memory_space<vmem>>, %arg4: memref<32x64xf32, #tpu.memory_space<vmem>>) attributes {dimension_semantics = [#tpu.dimension_semantics<arbitrary>], iteration_bounds = array<i64: 1>, scalar_prefetch = 0 : i64, scratch_operands = 0 : i64, tpu.core_type = #tpu.core_type<tc>, window_params = [{pipeline_mode = #tpu.pipeline_mode<synchronous>, transform_indices = @transform_0, window_bounds = array<i64: 32, 48>}, {pipeline_mode = #tpu.pipeline_mode<synchronous>, transform_indices = @transform_1, window_bounds = array<i64: 48, 64>}, {pipeline_mode = #tpu.pipeline_mode<synchronous>, transform_indices = @transform_2, window_bounds = array<i64: 1, 64>}, {pipeline_mode = #tpu.pipeline_mode<synchronous>, transform_indices = @transform_3, window_bounds = array<i64: 32, 64>}]} {
    %c0 = arith.constant 0 : index
    %c0_0 = arith.constant 0 : index
    %0 = vector.load %arg1[%c0, %c0_0] : memref<32x48xf32, #tpu.memory_space<vmem>>, vector<32x48xf32>
    %c0_1 = arith.constant 0 : index
    %c0_2 = arith.constant 0 : index
    %1 = vector.load %arg2[%c0_1, %c0_2] : memref<48x64xf32, #tpu.memory_space<vmem>>, vector<48x64xf32>
    %2 = arith.truncf %0 : vector<32x48xf32> to vector<32x48xbf16>
    %3 = arith.truncf %1 : vector<48x64xf32> to vector<48x64xbf16>
    %cst = arith.constant dense<0.000000e+00> : vector<32x64xf32>
    %4 = tpu.matmul %2, %3, %cst {dimension_numbers = #tpu.dot_dimension_numbers<[1], [0], [0], [1], [0, 0, 1, 1], [], []>} : vector<32x48xbf16>, vector<48x64xbf16>, vector<32x64xf32> -> vector<32x64xf32>
    %c0_3 = arith.constant 0 : index
    %c0_4 = arith.constant 0 : index
    %5 = vector.load %arg3[%c0_3, %c0_4] : memref<1x64xf32, #tpu.memory_space<vmem>>, vector<1x64xf32>
    %6 = vector.broadcast %5 : vector<1x64xf32> to vector<32x64xf32>
    %7 = arith.addf %4, %6 : vector<32x64xf32>
    %c0_5 = arith.constant 0 : index
    %c0_6 = arith.constant 0 : index
    %8 = vector.load %arg4[%c0_5, %c0_6] : memref<32x64xf32, #tpu.memory_space<vmem>>, vector<32x64xf32>
    tpu.vector_store %arg4[%c0_5, %c0_6], %7 {strides = array<i32>} : memref<32x64xf32, #tpu.memory_space<vmem>>, vector<32x64xf32>,
    return
  }
  func.func @transform_0(%arg0: i32) -> (i32, i32) {
    %c0_i32 = arith.constant 0 : i32
    %c0_i32_0 = arith.constant 0 : i32
    %c0_i32_1 = arith.constant 0 : i32
    return %c0_i32, %c0_i32_0 : i32, i32
  }
  func.func @transform_1(%arg0: i32) -> (i32, i32) {
    %c0_i32 = arith.constant 0 : i32
    %c0_i32_0 = arith.constant 0 : i32
    %c0_i32_1 = arith.constant 0 : i32
    return %c0_i32, %c0_i32_0 : i32, i32
  }
  func.func @transform_2(%arg0: i32) -> (i32, i32) {
    %c0_i32 = arith.constant 0 : i32
    %c0_i32_0 = arith.constant 0 : i32
    %c0_i32_1 = arith.constant 0 : i32
    return %c0_i32, %c0_i32_0 : i32, i32
  }
  func.func @transform_3(%arg0: i32) -> (i32, i32) {
    %c0_i32 = arith.constant 0 : i32
    %c0_i32_0 = arith.constant 0 : i32
    %c0_i32_1 = arith.constant 0 : i32
    return %c0_i32, %c0_i32_0 : i32, i32
  }
}

module attributes {stable_mosaic.version = 11 : i64} {
  func.func @_encoder_layer_kernel(%arg0: i32, %arg1: memref<32x64xf32, #tpu.memory_space<vmem>>, %arg2: memref<64x192xf32, #tpu.memory_space<vmem>>, %arg3: memref<1x192xf32, #tpu.memory_space<vmem>>, %arg4: memref<64x64xf32, #tpu.memory_space<vmem>>, %arg5: memref<1x64xf32, #tpu.memory_space<vmem>>, %arg6: memref<1x64xf32, #tpu.memory_space<vmem>>, %arg7: memref<1x64xf32, #tpu.memory_space<vmem>>, %arg8: memref<64x128xf32, #tpu.memory_space<vmem>>, %arg9: memref<1x128xf32, #tpu.memory_space<vmem>>, %arg10: memref<128x64xf32, #tpu.memory_space<vmem>>, %arg11: memref<1x64xf32, #tpu.memory_space<vmem>>, %arg12: memref<1x64xf32, #tpu.memory_space<vmem>>, %arg13: memref<1x64xf32, #tpu.memory_space<vmem>>, %arg14: memref<32x64xf32, #tpu.memory_space<vmem>>) attributes {dimension_semantics = [#tpu.dimension_semantics<arbitrary>], iteration_bounds = array<i64: 1>, scalar_prefetch = 0 : i64, scratch_operands = 0 : i64, tpu.core_type = #tpu.core_type<tc>, window_params = [{pipeline_mode = #tpu.pipeline_mode<synchronous>, transform_indices = @transform_0, window_bounds = array<i64: 32, 64>}, {pipeline_mode = #tpu.pipeline_mode<synchronous>, transform_indices = @transform_1, window_bounds = array<i64: 64, 192>}, {pipeline_mode = #tpu.pipeline_mode<synchronous>, transform_indices = @transform_2, window_bounds = array<i64: 1, 192>}, {pipeline_mode = #tpu.pipeline_mode<synchronous>, transform_indices = @transform_3, window_bounds = array<i64: 64, 64>}, {pipeline_mode = #tpu.pipeline_mode<synchronous>, transform_indices = @transform_4, window_bounds = array<i64: 1, 64>}, {pipeline_mode = #tpu.pipeline_mode<synchronous>, transform_indices = @transform_5, window_bounds = array<i64: 1, 64>}, {pipeline_mode = #tpu.pipeline_mode<synchronous>, transform_indices = @transform_6, window_bounds = array<i64: 1, 64>}, {pipeline_mode = #tpu.pipeline_mode<synchronous>, transform_indices = @transform_7, window_bounds = array<i64: 64, 128>}, {pipeline_mode = #tpu.pipeline_mode<synchronous>, transform_indices = @transform_8, window_bounds = array<i64: 1, 128>}, {pipeline_mode = #tpu.pipeline_mode<synchronous>, transform_indices = @transform_9, window_bounds = array<i64: 128, 64>}, {pipeline_mode = #tpu.pipeline_mode<synchronous>, transform_indices = @transform_10, window_bounds = array<i64: 1, 64>}, {pipeline_mode = #tpu.pipeline_mode<synchronous>, transform_indices = @transform_11, window_bounds = array<i64: 1, 64>}, {pipeline_mode = #tpu.pipeline_mode<synchronous>, transform_indices = @transform_12, window_bounds = array<i64: 1, 64>}, {pipeline_mode = #tpu.pipeline_mode<synchronous>, transform_indices = @transform_13, window_bounds = array<i64: 32, 64>}]} {
    %c0 = arith.constant 0 : index
    %c0_0 = arith.constant 0 : index
    %0 = vector.load %arg1[%c0, %c0_0] : memref<32x64xf32, #tpu.memory_space<vmem>>, vector<32x64xf32>
    %c0_1 = arith.constant 0 : index
    %c0_2 = arith.constant 0 : index
    %1 = vector.load %arg2[%c0_1, %c0_2] : memref<64x192xf32, #tpu.memory_space<vmem>>, vector<64x192xf32>
    %2 = arith.truncf %0 : vector<32x64xf32> to vector<32x64xbf16>
    %3 = arith.truncf %1 : vector<64x192xf32> to vector<64x192xbf16>
    %cst = arith.constant dense<0.000000e+00> : vector<32x192xf32>
    %4 = tpu.matmul %2, %3, %cst {dimension_numbers = #tpu.dot_dimension_numbers<[1], [0], [0], [1], [0, 0, 1, 1], [], []>} : vector<32x64xbf16>, vector<64x192xbf16>, vector<32x192xf32> -> vector<32x192xf32>
    %c0_3 = arith.constant 0 : index
    %c0_4 = arith.constant 0 : index
    %5 = vector.load %arg3[%c0_3, %c0_4] : memref<1x192xf32, #tpu.memory_space<vmem>>, vector<1x192xf32>
    %6 = vector.broadcast %5 : vector<1x192xf32> to vector<32x192xf32>
    %7 = arith.addf %4, %6 : vector<32x192xf32>
    %8 = vector.extract_strided_slice %7 {offsets = [0, 0], sizes = [32, 64], strides = [1, 1]} : vector<32x192xf32> to vector<32x64xf32>
    %9 = vector.extract_strided_slice %7 {offsets = [0, 64], sizes = [32, 64], strides = [1, 1]} : vector<32x192xf32> to vector<32x64xf32>
    %10 = vector.extract_strided_slice %7 {offsets = [0, 128], sizes = [32, 64], strides = [1, 1]} : vector<32x192xf32> to vector<32x64xf32>
    %cst_5 = arith.constant 0.000000e+00 : f32
    %11 = vector.broadcast %cst_5 : f32 to vector<32x64xf32>
    %12 = vector.extract_strided_slice %8 {offsets = [0, 0], sizes = [32, 8], strides = [1, 1]} : vector<32x64xf32> to vector<32x8xf32>
    %13 = vector.shape_cast %12 : vector<32x8xf32> to vector<2x16x8xf32>
    %14 = vector.extract_strided_slice %9 {offsets = [0, 0], sizes = [32, 8], strides = [1, 1]} : vector<32x64xf32> to vector<32x8xf32>
    %15 = vector.shape_cast %14 : vector<32x8xf32> to vector<2x16x8xf32>
    %16 = vector.extract_strided_slice %10 {offsets = [0, 0], sizes = [32, 8], strides = [1, 1]} : vector<32x64xf32> to vector<32x8xf32>
    %17 = vector.shape_cast %16 : vector<32x8xf32> to vector<2x16x8xf32>
    %18 = arith.truncf %13 : vector<2x16x8xf32> to vector<2x16x8xbf16>
    %19 = arith.truncf %15 : vector<2x16x8xf32> to vector<2x16x8xbf16>
    "tpu.trace_start"() <{level = 10 : i32, message = "bqd,bkd->bqk"}> : () -> ()
    %cst_6 = arith.constant dense<0.000000e+00> : vector<2x16x16xf32>
    %20 = tpu.matmul %18, %19, %cst_6 {dimension_numbers = #tpu.dot_dimension_numbers<[2], [2], [1], [1], [0, 0, 0, 1, 1, 1], [0], [0]>} : vector<2x16x8xbf16>, vector<2x16x8xbf16>, vector<2x16x16xf32> -> vector<2x16x16xf32>
    "tpu.trace_stop"() : () -> ()
    %cst_7 = arith.constant 0.353553385 : f32
    %21 = vector.broadcast %cst_7 : f32 to vector<2x16x16xf32>
    %22 = arith.mulf %20, %21 : vector<2x16x16xf32>
    %cst_8 = arith.constant dense<0xFF800000> : vector<2x16xf32>
    %23 = vector.multi_reduction <maximumf>, %22, %cst_8 [2] : vector<2x16x16xf32> to vector<2x16xf32>
    %24 = vector.shape_cast %23 : vector<2x16xf32> to vector<2x16x1xf32>
    %25 = vector.broadcast %24 : vector<2x16x1xf32> to vector<2x16x16xf32>
    %26 = arith.subf %22, %25 : vector<2x16x16xf32>
    %27 = math.exp %26 : vector<2x16x16xf32>
    %cst_9 = arith.constant dense<0.000000e+00> : vector<2x16xf32>
    %28 = vector.multi_reduction <add>, %27, %cst_9 [2] : vector<2x16x16xf32> to vector<2x16xf32>
    %29 = vector.shape_cast %28 : vector<2x16xf32> to vector<2x16x1xf32>
    %30 = tpu.reciprocal %29 {approx = true} : vector<2x16x1xf32> -> vector<2x16x1xf32>
    %31 = vector.broadcast %30 : vector<2x16x1xf32> to vector<2x16x16xf32>
    %32 = arith.mulf %27, %31 : vector<2x16x16xf32>
    %33 = arith.truncf %32 : vector<2x16x16xf32> to vector<2x16x16xbf16>
    %34 = arith.truncf %17 : vector<2x16x8xf32> to vector<2x16x8xbf16>
    "tpu.trace_start"() <{level = 10 : i32, message = "bqk,bkd->bqd"}> : () -> ()
    %cst_10 = arith.constant dense<0.000000e+00> : vector<2x16x8xf32>
    %35 = tpu.matmul %33, %34, %cst_10 {dimension_numbers = #tpu.dot_dimension_numbers<[2], [1], [1], [2], [0, 0, 0, 1, 1, 2], [0], [0]>} : vector<2x16x16xbf16>, vector<2x16x8xbf16>, vector<2x16x8xf32> -> vector<2x16x8xf32>
    "tpu.trace_stop"() : () -> ()
    %36 = vector.shape_cast %35 : vector<2x16x8xf32> to vector<32x8xf32>
    %c0_11 = arith.constant 0 : index
    %c0_12 = arith.constant 0 : index
    %37 = vector.load %arg4[%c0_11, %c0_12] : memref<64x64xf32, #tpu.memory_space<vmem>>, vector<8x64xf32>
    %38 = arith.truncf %36 : vector<32x8xf32> to vector<32x8xbf16>
    %39 = arith.truncf %37 : vector<8x64xf32> to vector<8x64xbf16>
    %cst_13 = arith.constant dense<0.000000e+00> : vector<32x64xf32>
    %40 = tpu.matmul %38, %39, %cst_13 {dimension_numbers = #tpu.dot_dimension_numbers<[1], [0], [0], [1], [0, 0, 1, 1], [], []>} : vector<32x8xbf16>, vector<8x64xbf16>, vector<32x64xf32> -> vector<32x64xf32>
    %41 = arith.addf %11, %40 : vector<32x64xf32>
    %42 = vector.extract_strided_slice %8 {offsets = [0, 8], sizes = [32, 8], strides = [1, 1]} : vector<32x64xf32> to vector<32x8xf32>
    %43 = vector.shape_cast %42 : vector<32x8xf32> to vector<2x16x8xf32>
    %44 = vector.extract_strided_slice %9 {offsets = [0, 8], sizes = [32, 8], strides = [1, 1]} : vector<32x64xf32> to vector<32x8xf32>
    %45 = vector.shape_cast %44 : vector<32x8xf32> to vector<2x16x8xf32>
    %46 = vector.extract_strided_slice %10 {offsets = [0, 8], sizes = [32, 8], strides = [1, 1]} : vector<32x64xf32> to vector<32x8xf32>
    %47 = vector.shape_cast %46 : vector<32x8xf32> to vector<2x16x8xf32>
    %48 = arith.truncf %43 : vector<2x16x8xf32> to vector<2x16x8xbf16>
    %49 = arith.truncf %45 : vector<2x16x8xf32> to vector<2x16x8xbf16>
    "tpu.trace_start"() <{level = 10 : i32, message = "bqd,bkd->bqk"}> : () -> ()
    %cst_14 = arith.constant dense<0.000000e+00> : vector<2x16x16xf32>
    %50 = tpu.matmul %48, %49, %cst_14 {dimension_numbers = #tpu.dot_dimension_numbers<[2], [2], [1], [1], [0, 0, 0, 1, 1, 1], [0], [0]>} : vector<2x16x8xbf16>, vector<2x16x8xbf16>, vector<2x16x16xf32> -> vector<2x16x16xf32>
    "tpu.trace_stop"() : () -> ()
    %cst_15 = arith.constant 0.353553385 : f32
    %51 = vector.broadcast %cst_15 : f32 to vector<2x16x16xf32>
    %52 = arith.mulf %50, %51 : vector<2x16x16xf32>
    %cst_16 = arith.constant dense<0xFF800000> : vector<2x16xf32>
    %53 = vector.multi_reduction <maximumf>, %52, %cst_16 [2] : vector<2x16x16xf32> to vector<2x16xf32>
    %54 = vector.shape_cast %53 : vector<2x16xf32> to vector<2x16x1xf32>
    %55 = vector.broadcast %54 : vector<2x16x1xf32> to vector<2x16x16xf32>
    %56 = arith.subf %52, %55 : vector<2x16x16xf32>
    %57 = math.exp %56 : vector<2x16x16xf32>
    %cst_17 = arith.constant dense<0.000000e+00> : vector<2x16xf32>
    %58 = vector.multi_reduction <add>, %57, %cst_17 [2] : vector<2x16x16xf32> to vector<2x16xf32>
    %59 = vector.shape_cast %58 : vector<2x16xf32> to vector<2x16x1xf32>
    %60 = tpu.reciprocal %59 {approx = true} : vector<2x16x1xf32> -> vector<2x16x1xf32>
    %61 = vector.broadcast %60 : vector<2x16x1xf32> to vector<2x16x16xf32>
    %62 = arith.mulf %57, %61 : vector<2x16x16xf32>
    %63 = arith.truncf %62 : vector<2x16x16xf32> to vector<2x16x16xbf16>
    %64 = arith.truncf %47 : vector<2x16x8xf32> to vector<2x16x8xbf16>
    "tpu.trace_start"() <{level = 10 : i32, message = "bqk,bkd->bqd"}> : () -> ()
    %cst_18 = arith.constant dense<0.000000e+00> : vector<2x16x8xf32>
    %65 = tpu.matmul %63, %64, %cst_18 {dimension_numbers = #tpu.dot_dimension_numbers<[2], [1], [1], [2], [0, 0, 0, 1, 1, 2], [0], [0]>} : vector<2x16x16xbf16>, vector<2x16x8xbf16>, vector<2x16x8xf32> -> vector<2x16x8xf32>
    "tpu.trace_stop"() : () -> ()
    %66 = vector.shape_cast %65 : vector<2x16x8xf32> to vector<32x8xf32>
    %c8 = arith.constant 8 : index
    %c0_19 = arith.constant 0 : index
    %67 = vector.load %arg4[%c8, %c0_19] : memref<64x64xf32, #tpu.memory_space<vmem>>, vector<8x64xf32>
    %68 = arith.truncf %66 : vector<32x8xf32> to vector<32x8xbf16>
    %69 = arith.truncf %67 : vector<8x64xf32> to vector<8x64xbf16>
    %cst_20 = arith.constant dense<0.000000e+00> : vector<32x64xf32>
    %70 = tpu.matmul %68, %69, %cst_20 {dimension_numbers = #tpu.dot_dimension_numbers<[1], [0], [0], [1], [0, 0, 1, 1], [], []>} : vector<32x8xbf16>, vector<8x64xbf16>, vector<32x64xf32> -> vector<32x64xf32>
    %71 = arith.addf %41, %70 : vector<32x64xf32>
    %72 = vector.extract_strided_slice %8 {offsets = [0, 16], sizes = [32, 8], strides = [1, 1]} : vector<32x64xf32> to vector<32x8xf32>
    %73 = vector.shape_cast %72 : vector<32x8xf32> to vector<2x16x8xf32>
    %74 = vector.extract_strided_slice %9 {offsets = [0, 16], sizes = [32, 8], strides = [1, 1]} : vector<32x64xf32> to vector<32x8xf32>
    %75 = vector.shape_cast %74 : vector<32x8xf32> to vector<2x16x8xf32>
    %76 = vector.extract_strided_slice %10 {offsets = [0, 16], sizes = [32, 8], strides = [1, 1]} : vector<32x64xf32> to vector<32x8xf32>
    %77 = vector.shape_cast %76 : vector<32x8xf32> to vector<2x16x8xf32>
    %78 = arith.truncf %73 : vector<2x16x8xf32> to vector<2x16x8xbf16>
    %79 = arith.truncf %75 : vector<2x16x8xf32> to vector<2x16x8xbf16>
    "tpu.trace_start"() <{level = 10 : i32, message = "bqd,bkd->bqk"}> : () -> ()
    %cst_21 = arith.constant dense<0.000000e+00> : vector<2x16x16xf32>
    %80 = tpu.matmul %78, %79, %cst_21 {dimension_numbers = #tpu.dot_dimension_numbers<[2], [2], [1], [1], [0, 0, 0, 1, 1, 1], [0], [0]>} : vector<2x16x8xbf16>, vector<2x16x8xbf16>, vector<2x16x16xf32> -> vector<2x16x16xf32>
    "tpu.trace_stop"() : () -> ()
    %cst_22 = arith.constant 0.353553385 : f32
    %81 = vector.broadcast %cst_22 : f32 to vector<2x16x16xf32>
    %82 = arith.mulf %80, %81 : vector<2x16x16xf32>
    %cst_23 = arith.constant dense<0xFF800000> : vector<2x16xf32>
    %83 = vector.multi_reduction <maximumf>, %82, %cst_23 [2] : vector<2x16x16xf32> to vector<2x16xf32>
    %84 = vector.shape_cast %83 : vector<2x16xf32> to vector<2x16x1xf32>
    %85 = vector.broadcast %84 : vector<2x16x1xf32> to vector<2x16x16xf32>
    %86 = arith.subf %82, %85 : vector<2x16x16xf32>
    %87 = math.exp %86 : vector<2x16x16xf32>
    %cst_24 = arith.constant dense<0.000000e+00> : vector<2x16xf32>
    %88 = vector.multi_reduction <add>, %87, %cst_24 [2] : vector<2x16x16xf32> to vector<2x16xf32>
    %89 = vector.shape_cast %88 : vector<2x16xf32> to vector<2x16x1xf32>
    %90 = tpu.reciprocal %89 {approx = true} : vector<2x16x1xf32> -> vector<2x16x1xf32>
    %91 = vector.broadcast %90 : vector<2x16x1xf32> to vector<2x16x16xf32>
    %92 = arith.mulf %87, %91 : vector<2x16x16xf32>
    %93 = arith.truncf %92 : vector<2x16x16xf32> to vector<2x16x16xbf16>
    %94 = arith.truncf %77 : vector<2x16x8xf32> to vector<2x16x8xbf16>
    "tpu.trace_start"() <{level = 10 : i32, message = "bqk,bkd->bqd"}> : () -> ()
    %cst_25 = arith.constant dense<0.000000e+00> : vector<2x16x8xf32>
    %95 = tpu.matmul %93, %94, %cst_25 {dimension_numbers = #tpu.dot_dimension_numbers<[2], [1], [1], [2], [0, 0, 0, 1, 1, 2], [0], [0]>} : vector<2x16x16xbf16>, vector<2x16x8xbf16>, vector<2x16x8xf32> -> vector<2x16x8xf32>
    "tpu.trace_stop"() : () -> ()
    %96 = vector.shape_cast %95 : vector<2x16x8xf32> to vector<32x8xf32>
    %c16 = arith.constant 16 : index
    %c0_26 = arith.constant 0 : index
    %97 = vector.load %arg4[%c16, %c0_26] : memref<64x64xf32, #tpu.memory_space<vmem>>, vector<8x64xf32>
    %98 = arith.truncf %96 : vector<32x8xf32> to vector<32x8xbf16>
    %99 = arith.truncf %97 : vector<8x64xf32> to vector<8x64xbf16>
    %cst_27 = arith.constant dense<0.000000e+00> : vector<32x64xf32>
    %100 = tpu.matmul %98, %99, %cst_27 {dimension_numbers = #tpu.dot_dimension_numbers<[1], [0], [0], [1], [0, 0, 1, 1], [], []>} : vector<32x8xbf16>, vector<8x64xbf16>, vector<32x64xf32> -> vector<32x64xf32>
    %101 = arith.addf %71, %100 : vector<32x64xf32>
    %102 = vector.extract_strided_slice %8 {offsets = [0, 24], sizes = [32, 8], strides = [1, 1]} : vector<32x64xf32> to vector<32x8xf32>
    %103 = vector.shape_cast %102 : vector<32x8xf32> to vector<2x16x8xf32>
    %104 = vector.extract_strided_slice %9 {offsets = [0, 24], sizes = [32, 8], strides = [1, 1]} : vector<32x64xf32> to vector<32x8xf32>
    %105 = vector.shape_cast %104 : vector<32x8xf32> to vector<2x16x8xf32>
    %106 = vector.extract_strided_slice %10 {offsets = [0, 24], sizes = [32, 8], strides = [1, 1]} : vector<32x64xf32> to vector<32x8xf32>
    %107 = vector.shape_cast %106 : vector<32x8xf32> to vector<2x16x8xf32>
    %108 = arith.truncf %103 : vector<2x16x8xf32> to vector<2x16x8xbf16>
    %109 = arith.truncf %105 : vector<2x16x8xf32> to vector<2x16x8xbf16>
    "tpu.trace_start"() <{level = 10 : i32, message = "bqd,bkd->bqk"}> : () -> ()
    %cst_28 = arith.constant dense<0.000000e+00> : vector<2x16x16xf32>
    %110 = tpu.matmul %108, %109, %cst_28 {dimension_numbers = #tpu.dot_dimension_numbers<[2], [2], [1], [1], [0, 0, 0, 1, 1, 1], [0], [0]>} : vector<2x16x8xbf16>, vector<2x16x8xbf16>, vector<2x16x16xf32> -> vector<2x16x16xf32>
    "tpu.trace_stop"() : () -> ()
    %cst_29 = arith.constant 0.353553385 : f32
    %111 = vector.broadcast %cst_29 : f32 to vector<2x16x16xf32>
    %112 = arith.mulf %110, %111 : vector<2x16x16xf32>
    %cst_30 = arith.constant dense<0xFF800000> : vector<2x16xf32>
    %113 = vector.multi_reduction <maximumf>, %112, %cst_30 [2] : vector<2x16x16xf32> to vector<2x16xf32>
    %114 = vector.shape_cast %113 : vector<2x16xf32> to vector<2x16x1xf32>
    %115 = vector.broadcast %114 : vector<2x16x1xf32> to vector<2x16x16xf32>
    %116 = arith.subf %112, %115 : vector<2x16x16xf32>
    %117 = math.exp %116 : vector<2x16x16xf32>
    %cst_31 = arith.constant dense<0.000000e+00> : vector<2x16xf32>
    %118 = vector.multi_reduction <add>, %117, %cst_31 [2] : vector<2x16x16xf32> to vector<2x16xf32>
    %119 = vector.shape_cast %118 : vector<2x16xf32> to vector<2x16x1xf32>
    %120 = tpu.reciprocal %119 {approx = true} : vector<2x16x1xf32> -> vector<2x16x1xf32>
    %121 = vector.broadcast %120 : vector<2x16x1xf32> to vector<2x16x16xf32>
    %122 = arith.mulf %117, %121 : vector<2x16x16xf32>
    %123 = arith.truncf %122 : vector<2x16x16xf32> to vector<2x16x16xbf16>
    %124 = arith.truncf %107 : vector<2x16x8xf32> to vector<2x16x8xbf16>
    "tpu.trace_start"() <{level = 10 : i32, message = "bqk,bkd->bqd"}> : () -> ()
    %cst_32 = arith.constant dense<0.000000e+00> : vector<2x16x8xf32>
    %125 = tpu.matmul %123, %124, %cst_32 {dimension_numbers = #tpu.dot_dimension_numbers<[2], [1], [1], [2], [0, 0, 0, 1, 1, 2], [0], [0]>} : vector<2x16x16xbf16>, vector<2x16x8xbf16>, vector<2x16x8xf32> -> vector<2x16x8xf32>
    "tpu.trace_stop"() : () -> ()
    %126 = vector.shape_cast %125 : vector<2x16x8xf32> to vector<32x8xf32>
    %c24 = arith.constant 24 : index
    %c0_33 = arith.constant 0 : index
    %127 = vector.load %arg4[%c24, %c0_33] : memref<64x64xf32, #tpu.memory_space<vmem>>, vector<8x64xf32>
    %128 = arith.truncf %126 : vector<32x8xf32> to vector<32x8xbf16>
    %129 = arith.truncf %127 : vector<8x64xf32> to vector<8x64xbf16>
    %cst_34 = arith.constant dense<0.000000e+00> : vector<32x64xf32>
    %130 = tpu.matmul %128, %129, %cst_34 {dimension_numbers = #tpu.dot_dimension_numbers<[1], [0], [0], [1], [0, 0, 1, 1], [], []>} : vector<32x8xbf16>, vector<8x64xbf16>, vector<32x64xf32> -> vector<32x64xf32>
    %131 = arith.addf %101, %130 : vector<32x64xf32>
    %132 = vector.extract_strided_slice %8 {offsets = [0, 32], sizes = [32, 8], strides = [1, 1]} : vector<32x64xf32> to vector<32x8xf32>
    %133 = vector.shape_cast %132 : vector<32x8xf32> to vector<2x16x8xf32>
    %134 = vector.extract_strided_slice %9 {offsets = [0, 32], sizes = [32, 8], strides = [1, 1]} : vector<32x64xf32> to vector<32x8xf32>
    %135 = vector.shape_cast %134 : vector<32x8xf32> to vector<2x16x8xf32>
    %136 = vector.extract_strided_slice %10 {offsets = [0, 32], sizes = [32, 8], strides = [1, 1]} : vector<32x64xf32> to vector<32x8xf32>
    %137 = vector.shape_cast %136 : vector<32x8xf32> to vector<2x16x8xf32>
    %138 = arith.truncf %133 : vector<2x16x8xf32> to vector<2x16x8xbf16>
    %139 = arith.truncf %135 : vector<2x16x8xf32> to vector<2x16x8xbf16>
    "tpu.trace_start"() <{level = 10 : i32, message = "bqd,bkd->bqk"}> : () -> ()
    %cst_35 = arith.constant dense<0.000000e+00> : vector<2x16x16xf32>
    %140 = tpu.matmul %138, %139, %cst_35 {dimension_numbers = #tpu.dot_dimension_numbers<[2], [2], [1], [1], [0, 0, 0, 1, 1, 1], [0], [0]>} : vector<2x16x8xbf16>, vector<2x16x8xbf16>, vector<2x16x16xf32> -> vector<2x16x16xf32>
    "tpu.trace_stop"() : () -> ()
    %cst_36 = arith.constant 0.353553385 : f32
    %141 = vector.broadcast %cst_36 : f32 to vector<2x16x16xf32>
    %142 = arith.mulf %140, %141 : vector<2x16x16xf32>
    %cst_37 = arith.constant dense<0xFF800000> : vector<2x16xf32>
    %143 = vector.multi_reduction <maximumf>, %142, %cst_37 [2] : vector<2x16x16xf32> to vector<2x16xf32>
    %144 = vector.shape_cast %143 : vector<2x16xf32> to vector<2x16x1xf32>
    %145 = vector.broadcast %144 : vector<2x16x1xf32> to vector<2x16x16xf32>
    %146 = arith.subf %142, %145 : vector<2x16x16xf32>
    %147 = math.exp %146 : vector<2x16x16xf32>
    %cst_38 = arith.constant dense<0.000000e+00> : vector<2x16xf32>
    %148 = vector.multi_reduction <add>, %147, %cst_38 [2] : vector<2x16x16xf32> to vector<2x16xf32>
    %149 = vector.shape_cast %148 : vector<2x16xf32> to vector<2x16x1xf32>
    %150 = tpu.reciprocal %149 {approx = true} : vector<2x16x1xf32> -> vector<2x16x1xf32>
    %151 = vector.broadcast %150 : vector<2x16x1xf32> to vector<2x16x16xf32>
    %152 = arith.mulf %147, %151 : vector<2x16x16xf32>
    %153 = arith.truncf %152 : vector<2x16x16xf32> to vector<2x16x16xbf16>
    %154 = arith.truncf %137 : vector<2x16x8xf32> to vector<2x16x8xbf16>
    "tpu.trace_start"() <{level = 10 : i32, message = "bqk,bkd->bqd"}> : () -> ()
    %cst_39 = arith.constant dense<0.000000e+00> : vector<2x16x8xf32>
    %155 = tpu.matmul %153, %154, %cst_39 {dimension_numbers = #tpu.dot_dimension_numbers<[2], [1], [1], [2], [0, 0, 0, 1, 1, 2], [0], [0]>} : vector<2x16x16xbf16>, vector<2x16x8xbf16>, vector<2x16x8xf32> -> vector<2x16x8xf32>
    "tpu.trace_stop"() : () -> ()
    %156 = vector.shape_cast %155 : vector<2x16x8xf32> to vector<32x8xf32>
    %c32 = arith.constant 32 : index
    %c0_40 = arith.constant 0 : index
    %157 = vector.load %arg4[%c32, %c0_40] : memref<64x64xf32, #tpu.memory_space<vmem>>, vector<8x64xf32>
    %158 = arith.truncf %156 : vector<32x8xf32> to vector<32x8xbf16>
    %159 = arith.truncf %157 : vector<8x64xf32> to vector<8x64xbf16>
    %cst_41 = arith.constant dense<0.000000e+00> : vector<32x64xf32>
    %160 = tpu.matmul %158, %159, %cst_41 {dimension_numbers = #tpu.dot_dimension_numbers<[1], [0], [0], [1], [0, 0, 1, 1], [], []>} : vector<32x8xbf16>, vector<8x64xbf16>, vector<32x64xf32> -> vector<32x64xf32>
    %161 = arith.addf %131, %160 : vector<32x64xf32>
    %162 = vector.extract_strided_slice %8 {offsets = [0, 40], sizes = [32, 8], strides = [1, 1]} : vector<32x64xf32> to vector<32x8xf32>
    %163 = vector.shape_cast %162 : vector<32x8xf32> to vector<2x16x8xf32>
    %164 = vector.extract_strided_slice %9 {offsets = [0, 40], sizes = [32, 8], strides = [1, 1]} : vector<32x64xf32> to vector<32x8xf32>
    %165 = vector.shape_cast %164 : vector<32x8xf32> to vector<2x16x8xf32>
    %166 = vector.extract_strided_slice %10 {offsets = [0, 40], sizes = [32, 8], strides = [1, 1]} : vector<32x64xf32> to vector<32x8xf32>
    %167 = vector.shape_cast %166 : vector<32x8xf32> to vector<2x16x8xf32>
    %168 = arith.truncf %163 : vector<2x16x8xf32> to vector<2x16x8xbf16>
    %169 = arith.truncf %165 : vector<2x16x8xf32> to vector<2x16x8xbf16>
    "tpu.trace_start"() <{level = 10 : i32, message = "bqd,bkd->bqk"}> : () -> ()
    %cst_42 = arith.constant dense<0.000000e+00> : vector<2x16x16xf32>
    %170 = tpu.matmul %168, %169, %cst_42 {dimension_numbers = #tpu.dot_dimension_numbers<[2], [2], [1], [1], [0, 0, 0, 1, 1, 1], [0], [0]>} : vector<2x16x8xbf16>, vector<2x16x8xbf16>, vector<2x16x16xf32> -> vector<2x16x16xf32>
    "tpu.trace_stop"() : () -> ()
    %cst_43 = arith.constant 0.353553385 : f32
    %171 = vector.broadcast %cst_43 : f32 to vector<2x16x16xf32>
    %172 = arith.mulf %170, %171 : vector<2x16x16xf32>
    %cst_44 = arith.constant dense<0xFF800000> : vector<2x16xf32>
    %173 = vector.multi_reduction <maximumf>, %172, %cst_44 [2] : vector<2x16x16xf32> to vector<2x16xf32>
    %174 = vector.shape_cast %173 : vector<2x16xf32> to vector<2x16x1xf32>
    %175 = vector.broadcast %174 : vector<2x16x1xf32> to vector<2x16x16xf32>
    %176 = arith.subf %172, %175 : vector<2x16x16xf32>
    %177 = math.exp %176 : vector<2x16x16xf32>
    %cst_45 = arith.constant dense<0.000000e+00> : vector<2x16xf32>
    %178 = vector.multi_reduction <add>, %177, %cst_45 [2] : vector<2x16x16xf32> to vector<2x16xf32>
    %179 = vector.shape_cast %178 : vector<2x16xf32> to vector<2x16x1xf32>
    %180 = tpu.reciprocal %179 {approx = true} : vector<2x16x1xf32> -> vector<2x16x1xf32>
    %181 = vector.broadcast %180 : vector<2x16x1xf32> to vector<2x16x16xf32>
    %182 = arith.mulf %177, %181 : vector<2x16x16xf32>
    %183 = arith.truncf %182 : vector<2x16x16xf32> to vector<2x16x16xbf16>
    %184 = arith.truncf %167 : vector<2x16x8xf32> to vector<2x16x8xbf16>
    "tpu.trace_start"() <{level = 10 : i32, message = "bqk,bkd->bqd"}> : () -> ()
    %cst_46 = arith.constant dense<0.000000e+00> : vector<2x16x8xf32>
    %185 = tpu.matmul %183, %184, %cst_46 {dimension_numbers = #tpu.dot_dimension_numbers<[2], [1], [1], [2], [0, 0, 0, 1, 1, 2], [0], [0]>} : vector<2x16x16xbf16>, vector<2x16x8xbf16>, vector<2x16x8xf32> -> vector<2x16x8xf32>
    "tpu.trace_stop"() : () -> ()
    %186 = vector.shape_cast %185 : vector<2x16x8xf32> to vector<32x8xf32>
    %c40 = arith.constant 40 : index
    %c0_47 = arith.constant 0 : index
    %187 = vector.load %arg4[%c40, %c0_47] : memref<64x64xf32, #tpu.memory_space<vmem>>, vector<8x64xf32>
    %188 = arith.truncf %186 : vector<32x8xf32> to vector<32x8xbf16>
    %189 = arith.truncf %187 : vector<8x64xf32> to vector<8x64xbf16>
    %cst_48 = arith.constant dense<0.000000e+00> : vector<32x64xf32>
    %190 = tpu.matmul %188, %189, %cst_48 {dimension_numbers = #tpu.dot_dimension_numbers<[1], [0], [0], [1], [0, 0, 1, 1], [], []>} : vector<32x8xbf16>, vector<8x64xbf16>, vector<32x64xf32> -> vector<32x64xf32>
    %191 = arith.addf %161, %190 : vector<32x64xf32>
    %192 = vector.extract_strided_slice %8 {offsets = [0, 48], sizes = [32, 8], strides = [1, 1]} : vector<32x64xf32> to vector<32x8xf32>
    %193 = vector.shape_cast %192 : vector<32x8xf32> to vector<2x16x8xf32>
    %194 = vector.extract_strided_slice %9 {offsets = [0, 48], sizes = [32, 8], strides = [1, 1]} : vector<32x64xf32> to vector<32x8xf32>
    %195 = vector.shape_cast %194 : vector<32x8xf32> to vector<2x16x8xf32>
    %196 = vector.extract_strided_slice %10 {offsets = [0, 48], sizes = [32, 8], strides = [1, 1]} : vector<32x64xf32> to vector<32x8xf32>
    %197 = vector.shape_cast %196 : vector<32x8xf32> to vector<2x16x8xf32>
    %198 = arith.truncf %193 : vector<2x16x8xf32> to vector<2x16x8xbf16>
    %199 = arith.truncf %195 : vector<2x16x8xf32> to vector<2x16x8xbf16>
    "tpu.trace_start"() <{level = 10 : i32, message = "bqd,bkd->bqk"}> : () -> ()
    %cst_49 = arith.constant dense<0.000000e+00> : vector<2x16x16xf32>
    %200 = tpu.matmul %198, %199, %cst_49 {dimension_numbers = #tpu.dot_dimension_numbers<[2], [2], [1], [1], [0, 0, 0, 1, 1, 1], [0], [0]>} : vector<2x16x8xbf16>, vector<2x16x8xbf16>, vector<2x16x16xf32> -> vector<2x16x16xf32>
    "tpu.trace_stop"() : () -> ()
    %cst_50 = arith.constant 0.353553385 : f32
    %201 = vector.broadcast %cst_50 : f32 to vector<2x16x16xf32>
    %202 = arith.mulf %200, %201 : vector<2x16x16xf32>
    %cst_51 = arith.constant dense<0xFF800000> : vector<2x16xf32>
    %203 = vector.multi_reduction <maximumf>, %202, %cst_51 [2] : vector<2x16x16xf32> to vector<2x16xf32>
    %204 = vector.shape_cast %203 : vector<2x16xf32> to vector<2x16x1xf32>
    %205 = vector.broadcast %204 : vector<2x16x1xf32> to vector<2x16x16xf32>
    %206 = arith.subf %202, %205 : vector<2x16x16xf32>
    %207 = math.exp %206 : vector<2x16x16xf32>
    %cst_52 = arith.constant dense<0.000000e+00> : vector<2x16xf32>
    %208 = vector.multi_reduction <add>, %207, %cst_52 [2] : vector<2x16x16xf32> to vector<2x16xf32>
    %209 = vector.shape_cast %208 : vector<2x16xf32> to vector<2x16x1xf32>
    %210 = tpu.reciprocal %209 {approx = true} : vector<2x16x1xf32> -> vector<2x16x1xf32>
    %211 = vector.broadcast %210 : vector<2x16x1xf32> to vector<2x16x16xf32>
    %212 = arith.mulf %207, %211 : vector<2x16x16xf32>
    %213 = arith.truncf %212 : vector<2x16x16xf32> to vector<2x16x16xbf16>
    %214 = arith.truncf %197 : vector<2x16x8xf32> to vector<2x16x8xbf16>
    "tpu.trace_start"() <{level = 10 : i32, message = "bqk,bkd->bqd"}> : () -> ()
    %cst_53 = arith.constant dense<0.000000e+00> : vector<2x16x8xf32>
    %215 = tpu.matmul %213, %214, %cst_53 {dimension_numbers = #tpu.dot_dimension_numbers<[2], [1], [1], [2], [0, 0, 0, 1, 1, 2], [0], [0]>} : vector<2x16x16xbf16>, vector<2x16x8xbf16>, vector<2x16x8xf32> -> vector<2x16x8xf32>
    "tpu.trace_stop"() : () -> ()
    %216 = vector.shape_cast %215 : vector<2x16x8xf32> to vector<32x8xf32>
    %c48 = arith.constant 48 : index
    %c0_54 = arith.constant 0 : index
    %217 = vector.load %arg4[%c48, %c0_54] : memref<64x64xf32, #tpu.memory_space<vmem>>, vector<8x64xf32>
    %218 = arith.truncf %216 : vector<32x8xf32> to vector<32x8xbf16>
    %219 = arith.truncf %217 : vector<8x64xf32> to vector<8x64xbf16>
    %cst_55 = arith.constant dense<0.000000e+00> : vector<32x64xf32>
    %220 = tpu.matmul %218, %219, %cst_55 {dimension_numbers = #tpu.dot_dimension_numbers<[1], [0], [0], [1], [0, 0, 1, 1], [], []>} : vector<32x8xbf16>, vector<8x64xbf16>, vector<32x64xf32> -> vector<32x64xf32>
    %221 = arith.addf %191, %220 : vector<32x64xf32>
    %222 = vector.extract_strided_slice %8 {offsets = [0, 56], sizes = [32, 8], strides = [1, 1]} : vector<32x64xf32> to vector<32x8xf32>
    %223 = vector.shape_cast %222 : vector<32x8xf32> to vector<2x16x8xf32>
    %224 = vector.extract_strided_slice %9 {offsets = [0, 56], sizes = [32, 8], strides = [1, 1]} : vector<32x64xf32> to vector<32x8xf32>
    %225 = vector.shape_cast %224 : vector<32x8xf32> to vector<2x16x8xf32>
    %226 = vector.extract_strided_slice %10 {offsets = [0, 56], sizes = [32, 8], strides = [1, 1]} : vector<32x64xf32> to vector<32x8xf32>
    %227 = vector.shape_cast %226 : vector<32x8xf32> to vector<2x16x8xf32>
    %228 = arith.truncf %223 : vector<2x16x8xf32> to vector<2x16x8xbf16>
    %229 = arith.truncf %225 : vector<2x16x8xf32> to vector<2x16x8xbf16>
    "tpu.trace_start"() <{level = 10 : i32, message = "bqd,bkd->bqk"}> : () -> ()
    %cst_56 = arith.constant dense<0.000000e+00> : vector<2x16x16xf32>
    %230 = tpu.matmul %228, %229, %cst_56 {dimension_numbers = #tpu.dot_dimension_numbers<[2], [2], [1], [1], [0, 0, 0, 1, 1, 1], [0], [0]>} : vector<2x16x8xbf16>, vector<2x16x8xbf16>, vector<2x16x16xf32> -> vector<2x16x16xf32>
    "tpu.trace_stop"() : () -> ()
    %cst_57 = arith.constant 0.353553385 : f32
    %231 = vector.broadcast %cst_57 : f32 to vector<2x16x16xf32>
    %232 = arith.mulf %230, %231 : vector<2x16x16xf32>
    %cst_58 = arith.constant dense<0xFF800000> : vector<2x16xf32>
    %233 = vector.multi_reduction <maximumf>, %232, %cst_58 [2] : vector<2x16x16xf32> to vector<2x16xf32>
    %234 = vector.shape_cast %233 : vector<2x16xf32> to vector<2x16x1xf32>
    %235 = vector.broadcast %234 : vector<2x16x1xf32> to vector<2x16x16xf32>
    %236 = arith.subf %232, %235 : vector<2x16x16xf32>
    %237 = math.exp %236 : vector<2x16x16xf32>
    %cst_59 = arith.constant dense<0.000000e+00> : vector<2x16xf32>
    %238 = vector.multi_reduction <add>, %237, %cst_59 [2] : vector<2x16x16xf32> to vector<2x16xf32>
    %239 = vector.shape_cast %238 : vector<2x16xf32> to vector<2x16x1xf32>
    %240 = tpu.reciprocal %239 {approx = true} : vector<2x16x1xf32> -> vector<2x16x1xf32>
    %241 = vector.broadcast %240 : vector<2x16x1xf32> to vector<2x16x16xf32>
    %242 = arith.mulf %237, %241 : vector<2x16x16xf32>
    %243 = arith.truncf %242 : vector<2x16x16xf32> to vector<2x16x16xbf16>
    %244 = arith.truncf %227 : vector<2x16x8xf32> to vector<2x16x8xbf16>
    "tpu.trace_start"() <{level = 10 : i32, message = "bqk,bkd->bqd"}> : () -> ()
    %cst_60 = arith.constant dense<0.000000e+00> : vector<2x16x8xf32>
    %245 = tpu.matmul %243, %244, %cst_60 {dimension_numbers = #tpu.dot_dimension_numbers<[2], [1], [1], [2], [0, 0, 0, 1, 1, 2], [0], [0]>} : vector<2x16x16xbf16>, vector<2x16x8xbf16>, vector<2x16x8xf32> -> vector<2x16x8xf32>
    "tpu.trace_stop"() : () -> ()
    %246 = vector.shape_cast %245 : vector<2x16x8xf32> to vector<32x8xf32>
    %c56 = arith.constant 56 : index
    %c0_61 = arith.constant 0 : index
    %247 = vector.load %arg4[%c56, %c0_61] : memref<64x64xf32, #tpu.memory_space<vmem>>, vector<8x64xf32>
    %248 = arith.truncf %246 : vector<32x8xf32> to vector<32x8xbf16>
    %249 = arith.truncf %247 : vector<8x64xf32> to vector<8x64xbf16>
    %cst_62 = arith.constant dense<0.000000e+00> : vector<32x64xf32>
    %250 = tpu.matmul %248, %249, %cst_62 {dimension_numbers = #tpu.dot_dimension_numbers<[1], [0], [0], [1], [0, 0, 1, 1], [], []>} : vector<32x8xbf16>, vector<8x64xbf16>, vector<32x64xf32> -> vector<32x64xf32>
    %251 = arith.addf %221, %250 : vector<32x64xf32>
    %c0_63 = arith.constant 0 : index
    %c0_64 = arith.constant 0 : index
    %252 = vector.load %arg5[%c0_63, %c0_64] : memref<1x64xf32, #tpu.memory_space<vmem>>, vector<1x64xf32>
    %253 = vector.broadcast %252 : vector<1x64xf32> to vector<32x64xf32>
    %254 = arith.addf %251, %253 : vector<32x64xf32>
    %255 = arith.addf %0, %254 : vector<32x64xf32>
    %cst_65 = arith.constant dense<0.000000e+00> : vector<32xf32>
    %256 = vector.multi_reduction <add>, %255, %cst_65 [1] : vector<32x64xf32> to vector<32xf32>
    %257 = vector.shape_cast %256 : vector<32xf32> to vector<32x1xf32>
    %cst_66 = arith.constant 6.400000e+01 : f32
    %258 = vector.broadcast %cst_66 : f32 to vector<32x1xf32>
    %259 = arith.divf %257, %258 : vector<32x1xf32>
    %260 = vector.broadcast %259 : vector<32x1xf32> to vector<32x64xf32>
    %261 = arith.subf %255, %260 : vector<32x64xf32>
    %262 = arith.mulf %261, %261 : vector<32x64xf32>
    %cst_67 = arith.constant dense<0.000000e+00> : vector<32xf32>
    %263 = vector.multi_reduction <add>, %262, %cst_67 [1] : vector<32x64xf32> to vector<32xf32>
    %264 = vector.shape_cast %263 : vector<32xf32> to vector<32x1xf32>
    %cst_68 = arith.constant 6.400000e+01 : f32
    %265 = vector.broadcast %cst_68 : f32 to vector<32x1xf32>
    %266 = arith.divf %264, %265 : vector<32x1xf32>
    %267 = vector.broadcast %259 : vector<32x1xf32> to vector<32x64xf32>
    %268 = arith.subf %255, %267 : vector<32x64xf32>
    %cst_69 = arith.constant 9.99999974E-6 : f32
    %269 = vector.broadcast %cst_69 : f32 to vector<32x1xf32>
    %270 = arith.addf %266, %269 : vector<32x1xf32>
    %271 = math.rsqrt %270 : vector<32x1xf32>
    %272 = vector.broadcast %271 : vector<32x1xf32> to vector<32x64xf32>
    %273 = arith.mulf %268, %272 : vector<32x64xf32>
    %c0_70 = arith.constant 0 : index
    %c0_71 = arith.constant 0 : index
    %274 = vector.load %arg6[%c0_70, %c0_71] : memref<1x64xf32, #tpu.memory_space<vmem>>, vector<1x64xf32>
    %275 = vector.broadcast %274 : vector<1x64xf32> to vector<32x64xf32>
    %276 = arith.mulf %273, %275 : vector<32x64xf32>
    %c0_72 = arith.constant 0 : index
    %c0_73 = arith.constant 0 : index
    %277 = vector.load %arg7[%c0_72, %c0_73] : memref<1x64xf32, #tpu.memory_space<vmem>>, vector<1x64xf32>
    %278 = vector.broadcast %277 : vector<1x64xf32> to vector<32x64xf32>
    %279 = arith.addf %276, %278 : vector<32x64xf32>
    %c0_74 = arith.constant 0 : index
    %c0_75 = arith.constant 0 : index
    %280 = vector.load %arg8[%c0_74, %c0_75] : memref<64x128xf32, #tpu.memory_space<vmem>>, vector<64x128xf32>
    %281 = arith.truncf %279 : vector<32x64xf32> to vector<32x64xbf16>
    %282 = arith.truncf %280 : vector<64x128xf32> to vector<64x128xbf16>
    %cst_76 = arith.constant dense<0.000000e+00> : vector<32x128xf32>
    %283 = tpu.matmul %281, %282, %cst_76 {dimension_numbers = #tpu.dot_dimension_numbers<[1], [0], [0], [1], [0, 0, 1, 1], [], []>} : vector<32x64xbf16>, vector<64x128xbf16>, vector<32x128xf32> -> vector<32x128xf32>
    %c0_77 = arith.constant 0 : index
    %c0_78 = arith.constant 0 : index
    %284 = vector.load %arg9[%c0_77, %c0_78] : memref<1x128xf32, #tpu.memory_space<vmem>>, vector<1x128xf32>
    %285 = vector.broadcast %284 : vector<1x128xf32> to vector<32x128xf32>
    %286 = arith.addf %283, %285 : vector<32x128xf32>
    %cst_79 = arith.constant 0.000000e+00 : f32
    %287 = vector.broadcast %cst_79 : f32 to vector<32x128xf32>
    %288 = arith.maximumf %286, %287 : vector<32x128xf32>
    %c0_80 = arith.constant 0 : index
    %c0_81 = arith.constant 0 : index
    %289 = vector.load %arg10[%c0_80, %c0_81] : memref<128x64xf32, #tpu.memory_space<vmem>>, vector<128x64xf32>
    %290 = arith.truncf %288 : vector<32x128xf32> to vector<32x128xbf16>
    %291 = arith.truncf %289 : vector<128x64xf32> to vector<128x64xbf16>
    %cst_82 = arith.constant dense<0.000000e+00> : vector<32x64xf32>
    %292 = tpu.matmul %290, %291, %cst_82 {dimension_numbers = #tpu.dot_dimension_numbers<[1], [0], [0], [1], [0, 0, 1, 1], [], []>} : vector<32x128xbf16>, vector<128x64xbf16>, vector<32x64xf32> -> vector<32x64xf32>
    %c0_83 = arith.constant 0 : index
    %c0_84 = arith.constant 0 : index
    %293 = vector.load %arg11[%c0_83, %c0_84] : memref<1x64xf32, #tpu.memory_space<vmem>>, vector<1x64xf32>
    %294 = vector.broadcast %293 : vector<1x64xf32> to vector<32x64xf32>
    %295 = arith.addf %292, %294 : vector<32x64xf32>
    %296 = arith.addf %279, %295 : vector<32x64xf32>
    %cst_85 = arith.constant dense<0.000000e+00> : vector<32xf32>
    %297 = vector.multi_reduction <add>, %296, %cst_85 [1] : vector<32x64xf32> to vector<32xf32>
    %298 = vector.shape_cast %297 : vector<32xf32> to vector<32x1xf32>
    %cst_86 = arith.constant 6.400000e+01 : f32
    %299 = vector.broadcast %cst_86 : f32 to vector<32x1xf32>
    %300 = arith.divf %298, %299 : vector<32x1xf32>
    %301 = vector.broadcast %300 : vector<32x1xf32> to vector<32x64xf32>
    %302 = arith.subf %296, %301 : vector<32x64xf32>
    %303 = arith.mulf %302, %302 : vector<32x64xf32>
    %cst_87 = arith.constant dense<0.000000e+00> : vector<32xf32>
    %304 = vector.multi_reduction <add>, %303, %cst_87 [1] : vector<32x64xf32> to vector<32xf32>
    %305 = vector.shape_cast %304 : vector<32xf32> to vector<32x1xf32>
    %cst_88 = arith.constant 6.400000e+01 : f32
    %306 = vector.broadcast %cst_88 : f32 to vector<32x1xf32>
    %307 = arith.divf %305, %306 : vector<32x1xf32>
    %308 = vector.broadcast %300 : vector<32x1xf32> to vector<32x64xf32>
    %309 = arith.subf %296, %308 : vector<32x64xf32>
    %cst_89 = arith.constant 9.99999974E-6 : f32
    %310 = vector.broadcast %cst_89 : f32 to vector<32x1xf32>
    %311 = arith.addf %307, %310 : vector<32x1xf32>
    %312 = math.rsqrt %311 : vector<32x1xf32>
    %313 = vector.broadcast %312 : vector<32x1xf32> to vector<32x64xf32>
    %314 = arith.mulf %309, %313 : vector<32x64xf32>
    %c0_90 = arith.constant 0 : index
    %c0_91 = arith.constant 0 : index
    %315 = vector.load %arg12[%c0_90, %c0_91] : memref<1x64xf32, #tpu.memory_space<vmem>>, vector<1x64xf32>
    %316 = vector.broadcast %315 : vector<1x64xf32> to vector<32x64xf32>
    %317 = arith.mulf %314, %316 : vector<32x64xf32>
    %c0_92 = arith.constant 0 : index
    %c0_93 = arith.constant 0 : index
    %318 = vector.load %arg13[%c0_92, %c0_93] : memref<1x64xf32, #tpu.memory_space<vmem>>, vector<1x64xf32>
    %319 = vector.broadcast %318 : vector<1x64xf32> to vector<32x64xf32>
    %320 = arith.addf %317, %319 : vector<32x64xf32>
    %c0_94 = arith.constant 0 : index
    %c0_95 = arith.constant 0 : index
    %321 = vector.load %arg14[%c0_94, %c0_95] : memref<32x64xf32, #tpu.memory_space<vmem>>, vector<32x64xf32>
    tpu.vector_store %arg14[%c0_94, %c0_95], %320 {strides = array<i32>} : memref<32x64xf32, #tpu.memory_space<vmem>>, vector<32x64xf32>,
    return
  }
  func.func @transform_0(%arg0: i32) -> (i32, i32) {
    %c0_i32 = arith.constant 0 : i32
    %c0_i32_0 = arith.constant 0 : i32
    %c0_i32_1 = arith.constant 0 : i32
    return %c0_i32, %c0_i32_0 : i32, i32
  }
  func.func @transform_1(%arg0: i32) -> (i32, i32) {
    %c0_i32 = arith.constant 0 : i32
    %c0_i32_0 = arith.constant 0 : i32
    %c0_i32_1 = arith.constant 0 : i32
    return %c0_i32, %c0_i32_0 : i32, i32
  }
  func.func @transform_2(%arg0: i32) -> (i32, i32) {
    %c0_i32 = arith.constant 0 : i32
    %c0_i32_0 = arith.constant 0 : i32
    %c0_i32_1 = arith.constant 0 : i32
    return %c0_i32, %c0_i32_0 : i32, i32
  }
  func.func @transform_3(%arg0: i32) -> (i32, i32) {
    %c0_i32 = arith.constant 0 : i32
    %c0_i32_0 = arith.constant 0 : i32
    %c0_i32_1 = arith.constant 0 : i32
    return %c0_i32, %c0_i32_0 : i32, i32
  }
  func.func @transform_4(%arg0: i32) -> (i32, i32) {
    %c0_i32 = arith.constant 0 : i32
    %c0_i32_0 = arith.constant 0 : i32
    %c0_i32_1 = arith.constant 0 : i32
    return %c0_i32, %c0_i32_0 : i32, i32
  }
  func.func @transform_5(%arg0: i32) -> (i32, i32) {
    %c0_i32 = arith.constant 0 : i32
    %c0_i32_0 = arith.constant 0 : i32
    %c0_i32_1 = arith.constant 0 : i32
    return %c0_i32, %c0_i32_0 : i32, i32
  }
  func.func @transform_6(%arg0: i32) -> (i32, i32) {
    %c0_i32 = arith.constant 0 : i32
    %c0_i32_0 = arith.constant 0 : i32
    %c0_i32_1 = arith.constant 0 : i32
    return %c0_i32, %c0_i32_0 : i32, i32
  }
  func.func @transform_7(%arg0: i32) -> (i32, i32) {
    %c0_i32 = arith.constant 0 : i32
    %c0_i32_0 = arith.constant 0 : i32
    %c0_i32_1 = arith.constant 0 : i32
    return %c0_i32, %c0_i32_0 : i32, i32
  }
  func.func @transform_8(%arg0: i32) -> (i32, i32) {
    %c0_i32 = arith.constant 0 : i32
    %c0_i32_0 = arith.constant 0 : i32
    %c0_i32_1 = arith.constant 0 : i32
    return %c0_i32, %c0_i32_0 : i32, i32
  }
  func.func @transform_9(%arg0: i32) -> (i32, i32) {
    %c0_i32 = arith.constant 0 : i32
    %c0_i32_0 = arith.constant 0 : i32
    %c0_i32_1 = arith.constant 0 : i32
    return %c0_i32, %c0_i32_0 : i32, i32
  }
  func.func @transform_10(%arg0: i32) -> (i32, i32) {
    %c0_i32 = arith.constant 0 : i32
    %c0_i32_0 = arith.constant 0 : i32
    %c0_i32_1 = arith.constant 0 : i32
    return %c0_i32, %c0_i32_0 : i32, i32
  }
  func.func @transform_11(%arg0: i32) -> (i32, i32) {
    %c0_i32 = arith.constant 0 : i32
    %c0_i32_0 = arith.constant 0 : i32
    %c0_i32_1 = arith.constant 0 : i32
    return %c0_i32, %c0_i32_0 : i32, i32
  }
  func.func @transform_12(%arg0: i32) -> (i32, i32) {
    %c0_i32 = arith.constant 0 : i32
    %c0_i32_0 = arith.constant 0 : i32
    %c0_i32_1 = arith.constant 0 : i32
    return %c0_i32, %c0_i32_0 : i32, i32
  }
  func.func @transform_13(%arg0: i32) -> (i32, i32) {
    %c0_i32 = arith.constant 0 : i32
    %c0_i32_0 = arith.constant 0 : i32
    %c0_i32_1 = arith.constant 0 : i32
    return %c0_i32, %c0_i32_0 : i32, i32
  }
}

module attributes {stable_mosaic.version = 11 : i64} {
  func.func @_linear_kernel(%arg0: i32, %arg1: memref<16x64xf32, #tpu.memory_space<vmem>>, %arg2: memref<64x128xf32, #tpu.memory_space<vmem>>, %arg3: memref<1x128xf32, #tpu.memory_space<vmem>>, %arg4: memref<16x128xf32, #tpu.memory_space<vmem>>) attributes {dimension_semantics = [#tpu.dimension_semantics<arbitrary>], iteration_bounds = array<i64: 1>, scalar_prefetch = 0 : i64, scratch_operands = 0 : i64, tpu.core_type = #tpu.core_type<tc>, window_params = [{pipeline_mode = #tpu.pipeline_mode<synchronous>, transform_indices = @transform_0, window_bounds = array<i64: 16, 64>}, {pipeline_mode = #tpu.pipeline_mode<synchronous>, transform_indices = @transform_1, window_bounds = array<i64: 64, 128>}, {pipeline_mode = #tpu.pipeline_mode<synchronous>, transform_indices = @transform_2, window_bounds = array<i64: 1, 128>}, {pipeline_mode = #tpu.pipeline_mode<synchronous>, transform_indices = @transform_3, window_bounds = array<i64: 16, 128>}]} {
    %c0 = arith.constant 0 : index
    %c0_0 = arith.constant 0 : index
    %0 = vector.load %arg1[%c0, %c0_0] : memref<16x64xf32, #tpu.memory_space<vmem>>, vector<16x64xf32>
    %c0_1 = arith.constant 0 : index
    %c0_2 = arith.constant 0 : index
    %1 = vector.load %arg2[%c0_1, %c0_2] : memref<64x128xf32, #tpu.memory_space<vmem>>, vector<64x128xf32>
    %2 = arith.truncf %0 : vector<16x64xf32> to vector<16x64xbf16>
    %3 = arith.truncf %1 : vector<64x128xf32> to vector<64x128xbf16>
    %cst = arith.constant dense<0.000000e+00> : vector<16x128xf32>
    %4 = tpu.matmul %2, %3, %cst {dimension_numbers = #tpu.dot_dimension_numbers<[1], [0], [0], [1], [0, 0, 1, 1], [], []>} : vector<16x64xbf16>, vector<64x128xbf16>, vector<16x128xf32> -> vector<16x128xf32>
    %c0_3 = arith.constant 0 : index
    %c0_4 = arith.constant 0 : index
    %5 = vector.load %arg3[%c0_3, %c0_4] : memref<1x128xf32, #tpu.memory_space<vmem>>, vector<1x128xf32>
    %6 = vector.broadcast %5 : vector<1x128xf32> to vector<16x128xf32>
    %7 = arith.addf %4, %6 : vector<16x128xf32>
    %c0_5 = arith.constant 0 : index
    %c0_6 = arith.constant 0 : index
    %8 = vector.load %arg4[%c0_5, %c0_6] : memref<16x128xf32, #tpu.memory_space<vmem>>, vector<16x128xf32>
    tpu.vector_store %arg4[%c0_5, %c0_6], %7 {strides = array<i32>} : memref<16x128xf32, #tpu.memory_space<vmem>>, vector<16x128xf32>,
    return
  }
  func.func @transform_0(%arg0: i32) -> (i32, i32) {
    %c0_i32 = arith.constant 0 : i32
    %c0_i32_0 = arith.constant 0 : i32
    %c0_i32_1 = arith.constant 0 : i32
    return %c0_i32, %c0_i32_0 : i32, i32
  }
  func.func @transform_1(%arg0: i32) -> (i32, i32) {
    %c0_i32 = arith.constant 0 : i32
    %c0_i32_0 = arith.constant 0 : i32
    %c0_i32_1 = arith.constant 0 : i32
    return %c0_i32, %c0_i32_0 : i32, i32
  }
  func.func @transform_2(%arg0: i32) -> (i32, i32) {
    %c0_i32 = arith.constant 0 : i32
    %c0_i32_0 = arith.constant 0 : i32
    %c0_i32_1 = arith.constant 0 : i32
    return %c0_i32, %c0_i32_0 : i32, i32
  }
  func.func @transform_3(%arg0: i32) -> (i32, i32) {
    %c0_i32 = arith.constant 0 : i32
    %c0_i32_0 = arith.constant 0 : i32
    %c0_i32_1 = arith.constant 0 : i32
    return %c0_i32, %c0_i32_0 : i32, i32
  }
}

module attributes {stable_mosaic.version = 11 : i64} {
  func.func @_decoder_layer_kernel(%arg0: i32, %arg1: memref<16x64xf32, #tpu.memory_space<vmem>>, %arg2: memref<32x64xf32, #tpu.memory_space<vmem>>, %arg3: memref<2x8x8xf32, #tpu.memory_space<vmem>>, %arg4: memref<2x8x16xf32, #tpu.memory_space<vmem>>, %arg5: memref<64x192xf32, #tpu.memory_space<vmem>>, %arg6: memref<1x192xf32, #tpu.memory_space<vmem>>, %arg7: memref<64x64xf32, #tpu.memory_space<vmem>>, %arg8: memref<1x64xf32, #tpu.memory_space<vmem>>, %arg9: memref<1x64xf32, #tpu.memory_space<vmem>>, %arg10: memref<1x64xf32, #tpu.memory_space<vmem>>, %arg11: memref<64x64xf32, #tpu.memory_space<vmem>>, %arg12: memref<1x64xf32, #tpu.memory_space<vmem>>, %arg13: memref<64x128xf32, #tpu.memory_space<vmem>>, %arg14: memref<1x128xf32, #tpu.memory_space<vmem>>, %arg15: memref<64x64xf32, #tpu.memory_space<vmem>>, %arg16: memref<1x64xf32, #tpu.memory_space<vmem>>, %arg17: memref<1x64xf32, #tpu.memory_space<vmem>>, %arg18: memref<1x64xf32, #tpu.memory_space<vmem>>, %arg19: memref<64x128xf32, #tpu.memory_space<vmem>>, %arg20: memref<1x128xf32, #tpu.memory_space<vmem>>, %arg21: memref<128x64xf32, #tpu.memory_space<vmem>>, %arg22: memref<1x64xf32, #tpu.memory_space<vmem>>, %arg23: memref<1x64xf32, #tpu.memory_space<vmem>>, %arg24: memref<1x64xf32, #tpu.memory_space<vmem>>, %arg25: memref<16x64xf32, #tpu.memory_space<vmem>>) attributes {dimension_semantics = [#tpu.dimension_semantics<arbitrary>], iteration_bounds = array<i64: 1>, scalar_prefetch = 0 : i64, scratch_operands = 0 : i64, tpu.core_type = #tpu.core_type<tc>, window_params = [{pipeline_mode = #tpu.pipeline_mode<synchronous>, transform_indices = @transform_0, window_bounds = array<i64: 16, 64>}, {pipeline_mode = #tpu.pipeline_mode<synchronous>, transform_indices = @transform_1, window_bounds = array<i64: 32, 64>}, {pipeline_mode = #tpu.pipeline_mode<synchronous>, transform_indices = @transform_2, window_bounds = array<i64: 2, 8, 8>}, {pipeline_mode = #tpu.pipeline_mode<synchronous>, transform_indices = @transform_3, window_bounds = array<i64: 2, 8, 16>}, {pipeline_mode = #tpu.pipeline_mode<synchronous>, transform_indices = @transform_4, window_bounds = array<i64: 64, 192>}, {pipeline_mode = #tpu.pipeline_mode<synchronous>, transform_indices = @transform_5, window_bounds = array<i64: 1, 192>}, {pipeline_mode = #tpu.pipeline_mode<synchronous>, transform_indices = @transform_6, window_bounds = array<i64: 64, 64>}, {pipeline_mode = #tpu.pipeline_mode<synchronous>, transform_indices = @transform_7, window_bounds = array<i64: 1, 64>}, {pipeline_mode = #tpu.pipeline_mode<synchronous>, transform_indices = @transform_8, window_bounds = array<i64: 1, 64>}, {pipeline_mode = #tpu.pipeline_mode<synchronous>, transform_indices = @transform_9, window_bounds = array<i64: 1, 64>}, {pipeline_mode = #tpu.pipeline_mode<synchronous>, transform_indices = @transform_10, window_bounds = array<i64: 64, 64>}, {pipeline_mode = #tpu.pipeline_mode<synchronous>, transform_indices = @transform_11, window_bounds = array<i64: 1, 64>}, {pipeline_mode = #tpu.pipeline_mode<synchronous>, transform_indices = @transform_12, window_bounds = array<i64: 64, 128>}, {pipeline_mode = #tpu.pipeline_mode<synchronous>, transform_indices = @transform_13, window_bounds = array<i64: 1, 128>}, {pipeline_mode = #tpu.pipeline_mode<synchronous>, transform_indices = @transform_14, window_bounds = array<i64: 64, 64>}, {pipeline_mode = #tpu.pipeline_mode<synchronous>, transform_indices = @transform_15, window_bounds = array<i64: 1, 64>}, {pipeline_mode = #tpu.pipeline_mode<synchronous>, transform_indices = @transform_16, window_bounds = array<i64: 1, 64>}, {pipeline_mode = #tpu.pipeline_mode<synchronous>, transform_indices = @transform_17, window_bounds = array<i64: 1, 64>}, {pipeline_mode = #tpu.pipeline_mode<synchronous>, transform_indices = @transform_18, window_bounds = array<i64: 64, 128>}, {pipeline_mode = #tpu.pipeline_mode<synchronous>, transform_indices = @transform_19, window_bounds = array<i64: 1, 128>}, {pipeline_mode = #tpu.pipeline_mode<synchronous>, transform_indices = @transform_20, window_bounds = array<i64: 128, 64>}, {pipeline_mode = #tpu.pipeline_mode<synchronous>, transform_indices = @transform_21, window_bounds = array<i64: 1, 64>}, {pipeline_mode = #tpu.pipeline_mode<synchronous>, transform_indices = @transform_22, window_bounds = array<i64: 1, 64>}, {pipeline_mode = #tpu.pipeline_mode<synchronous>, transform_indices = @transform_23, window_bounds = array<i64: 1, 64>}, {pipeline_mode = #tpu.pipeline_mode<synchronous>, transform_indices = @transform_24, window_bounds = array<i64: 16, 64>}]} {
    %c0 = arith.constant 0 : index
    %c0_0 = arith.constant 0 : index
    %0 = vector.load %arg1[%c0, %c0_0] : memref<16x64xf32, #tpu.memory_space<vmem>>, vector<16x64xf32>
    %c0_1 = arith.constant 0 : index
    %c0_2 = arith.constant 0 : index
    %1 = vector.load %arg2[%c0_1, %c0_2] : memref<32x64xf32, #tpu.memory_space<vmem>>, vector<32x64xf32>
    %c0_3 = arith.constant 0 : index
    %c0_4 = arith.constant 0 : index
    %2 = vector.load %arg5[%c0_3, %c0_4] : memref<64x192xf32, #tpu.memory_space<vmem>>, vector<64x192xf32>
    %3 = arith.truncf %0 : vector<16x64xf32> to vector<16x64xbf16>
    %4 = arith.truncf %2 : vector<64x192xf32> to vector<64x192xbf16>
    %cst = arith.constant dense<0.000000e+00> : vector<16x192xf32>
    %5 = tpu.matmul %3, %4, %cst {dimension_numbers = #tpu.dot_dimension_numbers<[1], [0], [0], [1], [0, 0, 1, 1], [], []>} : vector<16x64xbf16>, vector<64x192xbf16>, vector<16x192xf32> -> vector<16x192xf32>
    %c0_5 = arith.constant 0 : index
    %c0_6 = arith.constant 0 : index
    %6 = vector.load %arg6[%c0_5, %c0_6] : memref<1x192xf32, #tpu.memory_space<vmem>>, vector<1x192xf32>
    %7 = vector.broadcast %6 : vector<1x192xf32> to vector<16x192xf32>
    %8 = arith.addf %5, %7 : vector<16x192xf32>
    %9 = vector.extract_strided_slice %8 {offsets = [0, 0], sizes = [16, 64], strides = [1, 1]} : vector<16x192xf32> to vector<16x64xf32>
    %10 = vector.extract_strided_slice %8 {offsets = [0, 64], sizes = [16, 64], strides = [1, 1]} : vector<16x192xf32> to vector<16x64xf32>
    %11 = vector.extract_strided_slice %8 {offsets = [0, 128], sizes = [16, 64], strides = [1, 1]} : vector<16x192xf32> to vector<16x64xf32>
    %c0_7 = arith.constant 0 : index
    %c0_8 = arith.constant 0 : index
    %c0_9 = arith.constant 0 : index
    %12 = vector.load %arg3[%c0_7, %c0_8, %c0_9] : memref<2x8x8xf32, #tpu.memory_space<vmem>>, vector<2x8x8xf32>
    %cst_10 = arith.constant 0.000000e+00 : f32
    %13 = vector.broadcast %cst_10 : f32 to vector<16x64xf32>
    %14 = vector.extract_strided_slice %9 {offsets = [0, 0], sizes = [16, 8], strides = [1, 1]} : vector<16x64xf32> to vector<16x8xf32>
    %15 = vector.shape_cast %14 : vector<16x8xf32> to vector<2x8x8xf32>
    %16 = vector.extract_strided_slice %10 {offsets = [0, 0], sizes = [16, 8], strides = [1, 1]} : vector<16x64xf32> to vector<16x8xf32>
    %17 = vector.shape_cast %16 : vector<16x8xf32> to vector<2x8x8xf32>
    %18 = vector.extract_strided_slice %11 {offsets = [0, 0], sizes = [16, 8], strides = [1, 1]} : vector<16x64xf32> to vector<16x8xf32>
    %19 = vector.shape_cast %18 : vector<16x8xf32> to vector<2x8x8xf32>
    %20 = arith.truncf %15 : vector<2x8x8xf32> to vector<2x8x8xbf16>
    %21 = arith.truncf %17 : vector<2x8x8xf32> to vector<2x8x8xbf16>
    "tpu.trace_start"() <{level = 10 : i32, message = "bqd,bkd->bqk"}> : () -> ()
    %cst_11 = arith.constant dense<0.000000e+00> : vector<2x8x8xf32>
    %22 = tpu.matmul %20, %21, %cst_11 {dimension_numbers = #tpu.dot_dimension_numbers<[2], [2], [1], [1], [0, 0, 0, 1, 1, 1], [0], [0]>} : vector<2x8x8xbf16>, vector<2x8x8xbf16>, vector<2x8x8xf32> -> vector<2x8x8xf32>
    "tpu.trace_stop"() : () -> ()
    %cst_12 = arith.constant 0.353553385 : f32
    %23 = vector.broadcast %cst_12 : f32 to vector<2x8x8xf32>
    %24 = arith.mulf %22, %23 : vector<2x8x8xf32>
    %25 = arith.addf %24, %12 : vector<2x8x8xf32>
    %cst_13 = arith.constant dense<0xFF800000> : vector<2x8xf32>
    %26 = vector.multi_reduction <maximumf>, %25, %cst_13 [2] : vector<2x8x8xf32> to vector<2x8xf32>
    %27 = vector.shape_cast %26 : vector<2x8xf32> to vector<2x8x1xf32>
    %28 = vector.broadcast %27 : vector<2x8x1xf32> to vector<2x8x8xf32>
    %29 = arith.subf %25, %28 : vector<2x8x8xf32>
    %30 = math.exp %29 : vector<2x8x8xf32>
    %cst_14 = arith.constant dense<0.000000e+00> : vector<2x8xf32>
    %31 = vector.multi_reduction <add>, %30, %cst_14 [2] : vector<2x8x8xf32> to vector<2x8xf32>
    %32 = vector.shape_cast %31 : vector<2x8xf32> to vector<2x8x1xf32>
    %33 = tpu.reciprocal %32 {approx = true} : vector<2x8x1xf32> -> vector<2x8x1xf32>
    %34 = vector.broadcast %33 : vector<2x8x1xf32> to vector<2x8x8xf32>
    %35 = arith.mulf %30, %34 : vector<2x8x8xf32>
    %36 = arith.truncf %35 : vector<2x8x8xf32> to vector<2x8x8xbf16>
    %37 = arith.truncf %19 : vector<2x8x8xf32> to vector<2x8x8xbf16>
    "tpu.trace_start"() <{level = 10 : i32, message = "bqk,bkd->bqd"}> : () -> ()
    %cst_15 = arith.constant dense<0.000000e+00> : vector<2x8x8xf32>
    %38 = tpu.matmul %36, %37, %cst_15 {dimension_numbers = #tpu.dot_dimension_numbers<[2], [1], [1], [2], [0, 0, 0, 1, 1, 2], [0], [0]>} : vector<2x8x8xbf16>, vector<2x8x8xbf16>, vector<2x8x8xf32> -> vector<2x8x8xf32>
    "tpu.trace_stop"() : () -> ()
    %39 = vector.shape_cast %38 : vector<2x8x8xf32> to vector<16x8xf32>
    %c0_16 = arith.constant 0 : index
    %c0_17 = arith.constant 0 : index
    %40 = vector.load %arg7[%c0_16, %c0_17] : memref<64x64xf32, #tpu.memory_space<vmem>>, vector<8x64xf32>
    %41 = arith.truncf %39 : vector<16x8xf32> to vector<16x8xbf16>
    %42 = arith.truncf %40 : vector<8x64xf32> to vector<8x64xbf16>
    %cst_18 = arith.constant dense<0.000000e+00> : vector<16x64xf32>
    %43 = tpu.matmul %41, %42, %cst_18 {dimension_numbers = #tpu.dot_dimension_numbers<[1], [0], [0], [1], [0, 0, 1, 1], [], []>} : vector<16x8xbf16>, vector<8x64xbf16>, vector<16x64xf32> -> vector<16x64xf32>
    %44 = arith.addf %13, %43 : vector<16x64xf32>
    %45 = vector.extract_strided_slice %9 {offsets = [0, 8], sizes = [16, 8], strides = [1, 1]} : vector<16x64xf32> to vector<16x8xf32>
    %46 = vector.shape_cast %45 : vector<16x8xf32> to vector<2x8x8xf32>
    %47 = vector.extract_strided_slice %10 {offsets = [0, 8], sizes = [16, 8], strides = [1, 1]} : vector<16x64xf32> to vector<16x8xf32>
    %48 = vector.shape_cast %47 : vector<16x8xf32> to vector<2x8x8xf32>
    %49 = vector.extract_strided_slice %11 {offsets = [0, 8], sizes = [16, 8], strides = [1, 1]} : vector<16x64xf32> to vector<16x8xf32>
    %50 = vector.shape_cast %49 : vector<16x8xf32> to vector<2x8x8xf32>
    %51 = arith.truncf %46 : vector<2x8x8xf32> to vector<2x8x8xbf16>
    %52 = arith.truncf %48 : vector<2x8x8xf32> to vector<2x8x8xbf16>
    "tpu.trace_start"() <{level = 10 : i32, message = "bqd,bkd->bqk"}> : () -> ()
    %cst_19 = arith.constant dense<0.000000e+00> : vector<2x8x8xf32>
    %53 = tpu.matmul %51, %52, %cst_19 {dimension_numbers = #tpu.dot_dimension_numbers<[2], [2], [1], [1], [0, 0, 0, 1, 1, 1], [0], [0]>} : vector<2x8x8xbf16>, vector<2x8x8xbf16>, vector<2x8x8xf32> -> vector<2x8x8xf32>
    "tpu.trace_stop"() : () -> ()
    %cst_20 = arith.constant 0.353553385 : f32
    %54 = vector.broadcast %cst_20 : f32 to vector<2x8x8xf32>
    %55 = arith.mulf %53, %54 : vector<2x8x8xf32>
    %56 = arith.addf %55, %12 : vector<2x8x8xf32>
    %cst_21 = arith.constant dense<0xFF800000> : vector<2x8xf32>
    %57 = vector.multi_reduction <maximumf>, %56, %cst_21 [2] : vector<2x8x8xf32> to vector<2x8xf32>
    %58 = vector.shape_cast %57 : vector<2x8xf32> to vector<2x8x1xf32>
    %59 = vector.broadcast %58 : vector<2x8x1xf32> to vector<2x8x8xf32>
    %60 = arith.subf %56, %59 : vector<2x8x8xf32>
    %61 = math.exp %60 : vector<2x8x8xf32>
    %cst_22 = arith.constant dense<0.000000e+00> : vector<2x8xf32>
    %62 = vector.multi_reduction <add>, %61, %cst_22 [2] : vector<2x8x8xf32> to vector<2x8xf32>
    %63 = vector.shape_cast %62 : vector<2x8xf32> to vector<2x8x1xf32>
    %64 = tpu.reciprocal %63 {approx = true} : vector<2x8x1xf32> -> vector<2x8x1xf32>
    %65 = vector.broadcast %64 : vector<2x8x1xf32> to vector<2x8x8xf32>
    %66 = arith.mulf %61, %65 : vector<2x8x8xf32>
    %67 = arith.truncf %66 : vector<2x8x8xf32> to vector<2x8x8xbf16>
    %68 = arith.truncf %50 : vector<2x8x8xf32> to vector<2x8x8xbf16>
    "tpu.trace_start"() <{level = 10 : i32, message = "bqk,bkd->bqd"}> : () -> ()
    %cst_23 = arith.constant dense<0.000000e+00> : vector<2x8x8xf32>
    %69 = tpu.matmul %67, %68, %cst_23 {dimension_numbers = #tpu.dot_dimension_numbers<[2], [1], [1], [2], [0, 0, 0, 1, 1, 2], [0], [0]>} : vector<2x8x8xbf16>, vector<2x8x8xbf16>, vector<2x8x8xf32> -> vector<2x8x8xf32>
    "tpu.trace_stop"() : () -> ()
    %70 = vector.shape_cast %69 : vector<2x8x8xf32> to vector<16x8xf32>
    %c8 = arith.constant 8 : index
    %c0_24 = arith.constant 0 : index
    %71 = vector.load %arg7[%c8, %c0_24] : memref<64x64xf32, #tpu.memory_space<vmem>>, vector<8x64xf32>
    %72 = arith.truncf %70 : vector<16x8xf32> to vector<16x8xbf16>
    %73 = arith.truncf %71 : vector<8x64xf32> to vector<8x64xbf16>
    %cst_25 = arith.constant dense<0.000000e+00> : vector<16x64xf32>
    %74 = tpu.matmul %72, %73, %cst_25 {dimension_numbers = #tpu.dot_dimension_numbers<[1], [0], [0], [1], [0, 0, 1, 1], [], []>} : vector<16x8xbf16>, vector<8x64xbf16>, vector<16x64xf32> -> vector<16x64xf32>
    %75 = arith.addf %44, %74 : vector<16x64xf32>
    %76 = vector.extract_strided_slice %9 {offsets = [0, 16], sizes = [16, 8], strides = [1, 1]} : vector<16x64xf32> to vector<16x8xf32>
    %77 = vector.shape_cast %76 : vector<16x8xf32> to vector<2x8x8xf32>
    %78 = vector.extract_strided_slice %10 {offsets = [0, 16], sizes = [16, 8], strides = [1, 1]} : vector<16x64xf32> to vector<16x8xf32>
    %79 = vector.shape_cast %78 : vector<16x8xf32> to vector<2x8x8xf32>
    %80 = vector.extract_strided_slice %11 {offsets = [0, 16], sizes = [16, 8], strides = [1, 1]} : vector<16x64xf32> to vector<16x8xf32>
    %81 = vector.shape_cast %80 : vector<16x8xf32> to vector<2x8x8xf32>
    %82 = arith.truncf %77 : vector<2x8x8xf32> to vector<2x8x8xbf16>
    %83 = arith.truncf %79 : vector<2x8x8xf32> to vector<2x8x8xbf16>
    "tpu.trace_start"() <{level = 10 : i32, message = "bqd,bkd->bqk"}> : () -> ()
    %cst_26 = arith.constant dense<0.000000e+00> : vector<2x8x8xf32>
    %84 = tpu.matmul %82, %83, %cst_26 {dimension_numbers = #tpu.dot_dimension_numbers<[2], [2], [1], [1], [0, 0, 0, 1, 1, 1], [0], [0]>} : vector<2x8x8xbf16>, vector<2x8x8xbf16>, vector<2x8x8xf32> -> vector<2x8x8xf32>
    "tpu.trace_stop"() : () -> ()
    %cst_27 = arith.constant 0.353553385 : f32
    %85 = vector.broadcast %cst_27 : f32 to vector<2x8x8xf32>
    %86 = arith.mulf %84, %85 : vector<2x8x8xf32>
    %87 = arith.addf %86, %12 : vector<2x8x8xf32>
    %cst_28 = arith.constant dense<0xFF800000> : vector<2x8xf32>
    %88 = vector.multi_reduction <maximumf>, %87, %cst_28 [2] : vector<2x8x8xf32> to vector<2x8xf32>
    %89 = vector.shape_cast %88 : vector<2x8xf32> to vector<2x8x1xf32>
    %90 = vector.broadcast %89 : vector<2x8x1xf32> to vector<2x8x8xf32>
    %91 = arith.subf %87, %90 : vector<2x8x8xf32>
    %92 = math.exp %91 : vector<2x8x8xf32>
    %cst_29 = arith.constant dense<0.000000e+00> : vector<2x8xf32>
    %93 = vector.multi_reduction <add>, %92, %cst_29 [2] : vector<2x8x8xf32> to vector<2x8xf32>
    %94 = vector.shape_cast %93 : vector<2x8xf32> to vector<2x8x1xf32>
    %95 = tpu.reciprocal %94 {approx = true} : vector<2x8x1xf32> -> vector<2x8x1xf32>
    %96 = vector.broadcast %95 : vector<2x8x1xf32> to vector<2x8x8xf32>
    %97 = arith.mulf %92, %96 : vector<2x8x8xf32>
    %98 = arith.truncf %97 : vector<2x8x8xf32> to vector<2x8x8xbf16>
    %99 = arith.truncf %81 : vector<2x8x8xf32> to vector<2x8x8xbf16>
    "tpu.trace_start"() <{level = 10 : i32, message = "bqk,bkd->bqd"}> : () -> ()
    %cst_30 = arith.constant dense<0.000000e+00> : vector<2x8x8xf32>
    %100 = tpu.matmul %98, %99, %cst_30 {dimension_numbers = #tpu.dot_dimension_numbers<[2], [1], [1], [2], [0, 0, 0, 1, 1, 2], [0], [0]>} : vector<2x8x8xbf16>, vector<2x8x8xbf16>, vector<2x8x8xf32> -> vector<2x8x8xf32>
    "tpu.trace_stop"() : () -> ()
    %101 = vector.shape_cast %100 : vector<2x8x8xf32> to vector<16x8xf32>
    %c16 = arith.constant 16 : index
    %c0_31 = arith.constant 0 : index
    %102 = vector.load %arg7[%c16, %c0_31] : memref<64x64xf32, #tpu.memory_space<vmem>>, vector<8x64xf32>
    %103 = arith.truncf %101 : vector<16x8xf32> to vector<16x8xbf16>
    %104 = arith.truncf %102 : vector<8x64xf32> to vector<8x64xbf16>
    %cst_32 = arith.constant dense<0.000000e+00> : vector<16x64xf32>
    %105 = tpu.matmul %103, %104, %cst_32 {dimension_numbers = #tpu.dot_dimension_numbers<[1], [0], [0], [1], [0, 0, 1, 1], [], []>} : vector<16x8xbf16>, vector<8x64xbf16>, vector<16x64xf32> -> vector<16x64xf32>
    %106 = arith.addf %75, %105 : vector<16x64xf32>
    %107 = vector.extract_strided_slice %9 {offsets = [0, 24], sizes = [16, 8], strides = [1, 1]} : vector<16x64xf32> to vector<16x8xf32>
    %108 = vector.shape_cast %107 : vector<16x8xf32> to vector<2x8x8xf32>
    %109 = vector.extract_strided_slice %10 {offsets = [0, 24], sizes = [16, 8], strides = [1, 1]} : vector<16x64xf32> to vector<16x8xf32>
    %110 = vector.shape_cast %109 : vector<16x8xf32> to vector<2x8x8xf32>
    %111 = vector.extract_strided_slice %11 {offsets = [0, 24], sizes = [16, 8], strides = [1, 1]} : vector<16x64xf32> to vector<16x8xf32>
    %112 = vector.shape_cast %111 : vector<16x8xf32> to vector<2x8x8xf32>
    %113 = arith.truncf %108 : vector<2x8x8xf32> to vector<2x8x8xbf16>
    %114 = arith.truncf %110 : vector<2x8x8xf32> to vector<2x8x8xbf16>
    "tpu.trace_start"() <{level = 10 : i32, message = "bqd,bkd->bqk"}> : () -> ()
    %cst_33 = arith.constant dense<0.000000e+00> : vector<2x8x8xf32>
    %115 = tpu.matmul %113, %114, %cst_33 {dimension_numbers = #tpu.dot_dimension_numbers<[2], [2], [1], [1], [0, 0, 0, 1, 1, 1], [0], [0]>} : vector<2x8x8xbf16>, vector<2x8x8xbf16>, vector<2x8x8xf32> -> vector<2x8x8xf32>
    "tpu.trace_stop"() : () -> ()
    %cst_34 = arith.constant 0.353553385 : f32
    %116 = vector.broadcast %cst_34 : f32 to vector<2x8x8xf32>
    %117 = arith.mulf %115, %116 : vector<2x8x8xf32>
    %118 = arith.addf %117, %12 : vector<2x8x8xf32>
    %cst_35 = arith.constant dense<0xFF800000> : vector<2x8xf32>
    %119 = vector.multi_reduction <maximumf>, %118, %cst_35 [2] : vector<2x8x8xf32> to vector<2x8xf32>
    %120 = vector.shape_cast %119 : vector<2x8xf32> to vector<2x8x1xf32>
    %121 = vector.broadcast %120 : vector<2x8x1xf32> to vector<2x8x8xf32>
    %122 = arith.subf %118, %121 : vector<2x8x8xf32>
    %123 = math.exp %122 : vector<2x8x8xf32>
    %cst_36 = arith.constant dense<0.000000e+00> : vector<2x8xf32>
    %124 = vector.multi_reduction <add>, %123, %cst_36 [2] : vector<2x8x8xf32> to vector<2x8xf32>
    %125 = vector.shape_cast %124 : vector<2x8xf32> to vector<2x8x1xf32>
    %126 = tpu.reciprocal %125 {approx = true} : vector<2x8x1xf32> -> vector<2x8x1xf32>
    %127 = vector.broadcast %126 : vector<2x8x1xf32> to vector<2x8x8xf32>
    %128 = arith.mulf %123, %127 : vector<2x8x8xf32>
    %129 = arith.truncf %128 : vector<2x8x8xf32> to vector<2x8x8xbf16>
    %130 = arith.truncf %112 : vector<2x8x8xf32> to vector<2x8x8xbf16>
    "tpu.trace_start"() <{level = 10 : i32, message = "bqk,bkd->bqd"}> : () -> ()
    %cst_37 = arith.constant dense<0.000000e+00> : vector<2x8x8xf32>
    %131 = tpu.matmul %129, %130, %cst_37 {dimension_numbers = #tpu.dot_dimension_numbers<[2], [1], [1], [2], [0, 0, 0, 1, 1, 2], [0], [0]>} : vector<2x8x8xbf16>, vector<2x8x8xbf16>, vector<2x8x8xf32> -> vector<2x8x8xf32>
    "tpu.trace_stop"() : () -> ()
    %132 = vector.shape_cast %131 : vector<2x8x8xf32> to vector<16x8xf32>
    %c24 = arith.constant 24 : index
    %c0_38 = arith.constant 0 : index
    %133 = vector.load %arg7[%c24, %c0_38] : memref<64x64xf32, #tpu.memory_space<vmem>>, vector<8x64xf32>
    %134 = arith.truncf %132 : vector<16x8xf32> to vector<16x8xbf16>
    %135 = arith.truncf %133 : vector<8x64xf32> to vector<8x64xbf16>
    %cst_39 = arith.constant dense<0.000000e+00> : vector<16x64xf32>
    %136 = tpu.matmul %134, %135, %cst_39 {dimension_numbers = #tpu.dot_dimension_numbers<[1], [0], [0], [1], [0, 0, 1, 1], [], []>} : vector<16x8xbf16>, vector<8x64xbf16>, vector<16x64xf32> -> vector<16x64xf32>
    %137 = arith.addf %106, %136 : vector<16x64xf32>
    %138 = vector.extract_strided_slice %9 {offsets = [0, 32], sizes = [16, 8], strides = [1, 1]} : vector<16x64xf32> to vector<16x8xf32>
    %139 = vector.shape_cast %138 : vector<16x8xf32> to vector<2x8x8xf32>
    %140 = vector.extract_strided_slice %10 {offsets = [0, 32], sizes = [16, 8], strides = [1, 1]} : vector<16x64xf32> to vector<16x8xf32>
    %141 = vector.shape_cast %140 : vector<16x8xf32> to vector<2x8x8xf32>
    %142 = vector.extract_strided_slice %11 {offsets = [0, 32], sizes = [16, 8], strides = [1, 1]} : vector<16x64xf32> to vector<16x8xf32>
    %143 = vector.shape_cast %142 : vector<16x8xf32> to vector<2x8x8xf32>
    %144 = arith.truncf %139 : vector<2x8x8xf32> to vector<2x8x8xbf16>
    %145 = arith.truncf %141 : vector<2x8x8xf32> to vector<2x8x8xbf16>
    "tpu.trace_start"() <{level = 10 : i32, message = "bqd,bkd->bqk"}> : () -> ()
    %cst_40 = arith.constant dense<0.000000e+00> : vector<2x8x8xf32>
    %146 = tpu.matmul %144, %145, %cst_40 {dimension_numbers = #tpu.dot_dimension_numbers<[2], [2], [1], [1], [0, 0, 0, 1, 1, 1], [0], [0]>} : vector<2x8x8xbf16>, vector<2x8x8xbf16>, vector<2x8x8xf32> -> vector<2x8x8xf32>
    "tpu.trace_stop"() : () -> ()
    %cst_41 = arith.constant 0.353553385 : f32
    %147 = vector.broadcast %cst_41 : f32 to vector<2x8x8xf32>
    %148 = arith.mulf %146, %147 : vector<2x8x8xf32>
    %149 = arith.addf %148, %12 : vector<2x8x8xf32>
    %cst_42 = arith.constant dense<0xFF800000> : vector<2x8xf32>
    %150 = vector.multi_reduction <maximumf>, %149, %cst_42 [2] : vector<2x8x8xf32> to vector<2x8xf32>
    %151 = vector.shape_cast %150 : vector<2x8xf32> to vector<2x8x1xf32>
    %152 = vector.broadcast %151 : vector<2x8x1xf32> to vector<2x8x8xf32>
    %153 = arith.subf %149, %152 : vector<2x8x8xf32>
    %154 = math.exp %153 : vector<2x8x8xf32>
    %cst_43 = arith.constant dense<0.000000e+00> : vector<2x8xf32>
    %155 = vector.multi_reduction <add>, %154, %cst_43 [2] : vector<2x8x8xf32> to vector<2x8xf32>
    %156 = vector.shape_cast %155 : vector<2x8xf32> to vector<2x8x1xf32>
    %157 = tpu.reciprocal %156 {approx = true} : vector<2x8x1xf32> -> vector<2x8x1xf32>
    %158 = vector.broadcast %157 : vector<2x8x1xf32> to vector<2x8x8xf32>
    %159 = arith.mulf %154, %158 : vector<2x8x8xf32>
    %160 = arith.truncf %159 : vector<2x8x8xf32> to vector<2x8x8xbf16>
    %161 = arith.truncf %143 : vector<2x8x8xf32> to vector<2x8x8xbf16>
    "tpu.trace_start"() <{level = 10 : i32, message = "bqk,bkd->bqd"}> : () -> ()
    %cst_44 = arith.constant dense<0.000000e+00> : vector<2x8x8xf32>
    %162 = tpu.matmul %160, %161, %cst_44 {dimension_numbers = #tpu.dot_dimension_numbers<[2], [1], [1], [2], [0, 0, 0, 1, 1, 2], [0], [0]>} : vector<2x8x8xbf16>, vector<2x8x8xbf16>, vector<2x8x8xf32> -> vector<2x8x8xf32>
    "tpu.trace_stop"() : () -> ()
    %163 = vector.shape_cast %162 : vector<2x8x8xf32> to vector<16x8xf32>
    %c32 = arith.constant 32 : index
    %c0_45 = arith.constant 0 : index
    %164 = vector.load %arg7[%c32, %c0_45] : memref<64x64xf32, #tpu.memory_space<vmem>>, vector<8x64xf32>
    %165 = arith.truncf %163 : vector<16x8xf32> to vector<16x8xbf16>
    %166 = arith.truncf %164 : vector<8x64xf32> to vector<8x64xbf16>
    %cst_46 = arith.constant dense<0.000000e+00> : vector<16x64xf32>
    %167 = tpu.matmul %165, %166, %cst_46 {dimension_numbers = #tpu.dot_dimension_numbers<[1], [0], [0], [1], [0, 0, 1, 1], [], []>} : vector<16x8xbf16>, vector<8x64xbf16>, vector<16x64xf32> -> vector<16x64xf32>
    %168 = arith.addf %137, %167 : vector<16x64xf32>
    %169 = vector.extract_strided_slice %9 {offsets = [0, 40], sizes = [16, 8], strides = [1, 1]} : vector<16x64xf32> to vector<16x8xf32>
    %170 = vector.shape_cast %169 : vector<16x8xf32> to vector<2x8x8xf32>
    %171 = vector.extract_strided_slice %10 {offsets = [0, 40], sizes = [16, 8], strides = [1, 1]} : vector<16x64xf32> to vector<16x8xf32>
    %172 = vector.shape_cast %171 : vector<16x8xf32> to vector<2x8x8xf32>
    %173 = vector.extract_strided_slice %11 {offsets = [0, 40], sizes = [16, 8], strides = [1, 1]} : vector<16x64xf32> to vector<16x8xf32>
    %174 = vector.shape_cast %173 : vector<16x8xf32> to vector<2x8x8xf32>
    %175 = arith.truncf %170 : vector<2x8x8xf32> to vector<2x8x8xbf16>
    %176 = arith.truncf %172 : vector<2x8x8xf32> to vector<2x8x8xbf16>
    "tpu.trace_start"() <{level = 10 : i32, message = "bqd,bkd->bqk"}> : () -> ()
    %cst_47 = arith.constant dense<0.000000e+00> : vector<2x8x8xf32>
    %177 = tpu.matmul %175, %176, %cst_47 {dimension_numbers = #tpu.dot_dimension_numbers<[2], [2], [1], [1], [0, 0, 0, 1, 1, 1], [0], [0]>} : vector<2x8x8xbf16>, vector<2x8x8xbf16>, vector<2x8x8xf32> -> vector<2x8x8xf32>
    "tpu.trace_stop"() : () -> ()
    %cst_48 = arith.constant 0.353553385 : f32
    %178 = vector.broadcast %cst_48 : f32 to vector<2x8x8xf32>
    %179 = arith.mulf %177, %178 : vector<2x8x8xf32>
    %180 = arith.addf %179, %12 : vector<2x8x8xf32>
    %cst_49 = arith.constant dense<0xFF800000> : vector<2x8xf32>
    %181 = vector.multi_reduction <maximumf>, %180, %cst_49 [2] : vector<2x8x8xf32> to vector<2x8xf32>
    %182 = vector.shape_cast %181 : vector<2x8xf32> to vector<2x8x1xf32>
    %183 = vector.broadcast %182 : vector<2x8x1xf32> to vector<2x8x8xf32>
    %184 = arith.subf %180, %183 : vector<2x8x8xf32>
    %185 = math.exp %184 : vector<2x8x8xf32>
    %cst_50 = arith.constant dense<0.000000e+00> : vector<2x8xf32>
    %186 = vector.multi_reduction <add>, %185, %cst_50 [2] : vector<2x8x8xf32> to vector<2x8xf32>
    %187 = vector.shape_cast %186 : vector<2x8xf32> to vector<2x8x1xf32>
    %188 = tpu.reciprocal %187 {approx = true} : vector<2x8x1xf32> -> vector<2x8x1xf32>
    %189 = vector.broadcast %188 : vector<2x8x1xf32> to vector<2x8x8xf32>
    %190 = arith.mulf %185, %189 : vector<2x8x8xf32>
    %191 = arith.truncf %190 : vector<2x8x8xf32> to vector<2x8x8xbf16>
    %192 = arith.truncf %174 : vector<2x8x8xf32> to vector<2x8x8xbf16>
    "tpu.trace_start"() <{level = 10 : i32, message = "bqk,bkd->bqd"}> : () -> ()
    %cst_51 = arith.constant dense<0.000000e+00> : vector<2x8x8xf32>
    %193 = tpu.matmul %191, %192, %cst_51 {dimension_numbers = #tpu.dot_dimension_numbers<[2], [1], [1], [2], [0, 0, 0, 1, 1, 2], [0], [0]>} : vector<2x8x8xbf16>, vector<2x8x8xbf16>, vector<2x8x8xf32> -> vector<2x8x8xf32>
    "tpu.trace_stop"() : () -> ()
    %194 = vector.shape_cast %193 : vector<2x8x8xf32> to vector<16x8xf32>
    %c40 = arith.constant 40 : index
    %c0_52 = arith.constant 0 : index
    %195 = vector.load %arg7[%c40, %c0_52] : memref<64x64xf32, #tpu.memory_space<vmem>>, vector<8x64xf32>
    %196 = arith.truncf %194 : vector<16x8xf32> to vector<16x8xbf16>
    %197 = arith.truncf %195 : vector<8x64xf32> to vector<8x64xbf16>
    %cst_53 = arith.constant dense<0.000000e+00> : vector<16x64xf32>
    %198 = tpu.matmul %196, %197, %cst_53 {dimension_numbers = #tpu.dot_dimension_numbers<[1], [0], [0], [1], [0, 0, 1, 1], [], []>} : vector<16x8xbf16>, vector<8x64xbf16>, vector<16x64xf32> -> vector<16x64xf32>
    %199 = arith.addf %168, %198 : vector<16x64xf32>
    %200 = vector.extract_strided_slice %9 {offsets = [0, 48], sizes = [16, 8], strides = [1, 1]} : vector<16x64xf32> to vector<16x8xf32>
    %201 = vector.shape_cast %200 : vector<16x8xf32> to vector<2x8x8xf32>
    %202 = vector.extract_strided_slice %10 {offsets = [0, 48], sizes = [16, 8], strides = [1, 1]} : vector<16x64xf32> to vector<16x8xf32>
    %203 = vector.shape_cast %202 : vector<16x8xf32> to vector<2x8x8xf32>
    %204 = vector.extract_strided_slice %11 {offsets = [0, 48], sizes = [16, 8], strides = [1, 1]} : vector<16x64xf32> to vector<16x8xf32>
    %205 = vector.shape_cast %204 : vector<16x8xf32> to vector<2x8x8xf32>
    %206 = arith.truncf %201 : vector<2x8x8xf32> to vector<2x8x8xbf16>
    %207 = arith.truncf %203 : vector<2x8x8xf32> to vector<2x8x8xbf16>
    "tpu.trace_start"() <{level = 10 : i32, message = "bqd,bkd->bqk"}> : () -> ()
    %cst_54 = arith.constant dense<0.000000e+00> : vector<2x8x8xf32>
    %208 = tpu.matmul %206, %207, %cst_54 {dimension_numbers = #tpu.dot_dimension_numbers<[2], [2], [1], [1], [0, 0, 0, 1, 1, 1], [0], [0]>} : vector<2x8x8xbf16>, vector<2x8x8xbf16>, vector<2x8x8xf32> -> vector<2x8x8xf32>
    "tpu.trace_stop"() : () -> ()
    %cst_55 = arith.constant 0.353553385 : f32
    %209 = vector.broadcast %cst_55 : f32 to vector<2x8x8xf32>
    %210 = arith.mulf %208, %209 : vector<2x8x8xf32>
    %211 = arith.addf %210, %12 : vector<2x8x8xf32>
    %cst_56 = arith.constant dense<0xFF800000> : vector<2x8xf32>
    %212 = vector.multi_reduction <maximumf>, %211, %cst_56 [2] : vector<2x8x8xf32> to vector<2x8xf32>
    %213 = vector.shape_cast %212 : vector<2x8xf32> to vector<2x8x1xf32>
    %214 = vector.broadcast %213 : vector<2x8x1xf32> to vector<2x8x8xf32>
    %215 = arith.subf %211, %214 : vector<2x8x8xf32>
    %216 = math.exp %215 : vector<2x8x8xf32>
    %cst_57 = arith.constant dense<0.000000e+00> : vector<2x8xf32>
    %217 = vector.multi_reduction <add>, %216, %cst_57 [2] : vector<2x8x8xf32> to vector<2x8xf32>
    %218 = vector.shape_cast %217 : vector<2x8xf32> to vector<2x8x1xf32>
    %219 = tpu.reciprocal %218 {approx = true} : vector<2x8x1xf32> -> vector<2x8x1xf32>
    %220 = vector.broadcast %219 : vector<2x8x1xf32> to vector<2x8x8xf32>
    %221 = arith.mulf %216, %220 : vector<2x8x8xf32>
    %222 = arith.truncf %221 : vector<2x8x8xf32> to vector<2x8x8xbf16>
    %223 = arith.truncf %205 : vector<2x8x8xf32> to vector<2x8x8xbf16>
    "tpu.trace_start"() <{level = 10 : i32, message = "bqk,bkd->bqd"}> : () -> ()
    %cst_58 = arith.constant dense<0.000000e+00> : vector<2x8x8xf32>
    %224 = tpu.matmul %222, %223, %cst_58 {dimension_numbers = #tpu.dot_dimension_numbers<[2], [1], [1], [2], [0, 0, 0, 1, 1, 2], [0], [0]>} : vector<2x8x8xbf16>, vector<2x8x8xbf16>, vector<2x8x8xf32> -> vector<2x8x8xf32>
    "tpu.trace_stop"() : () -> ()
    %225 = vector.shape_cast %224 : vector<2x8x8xf32> to vector<16x8xf32>
    %c48 = arith.constant 48 : index
    %c0_59 = arith.constant 0 : index
    %226 = vector.load %arg7[%c48, %c0_59] : memref<64x64xf32, #tpu.memory_space<vmem>>, vector<8x64xf32>
    %227 = arith.truncf %225 : vector<16x8xf32> to vector<16x8xbf16>
    %228 = arith.truncf %226 : vector<8x64xf32> to vector<8x64xbf16>
    %cst_60 = arith.constant dense<0.000000e+00> : vector<16x64xf32>
    %229 = tpu.matmul %227, %228, %cst_60 {dimension_numbers = #tpu.dot_dimension_numbers<[1], [0], [0], [1], [0, 0, 1, 1], [], []>} : vector<16x8xbf16>, vector<8x64xbf16>, vector<16x64xf32> -> vector<16x64xf32>
    %230 = arith.addf %199, %229 : vector<16x64xf32>
    %231 = vector.extract_strided_slice %9 {offsets = [0, 56], sizes = [16, 8], strides = [1, 1]} : vector<16x64xf32> to vector<16x8xf32>
    %232 = vector.shape_cast %231 : vector<16x8xf32> to vector<2x8x8xf32>
    %233 = vector.extract_strided_slice %10 {offsets = [0, 56], sizes = [16, 8], strides = [1, 1]} : vector<16x64xf32> to vector<16x8xf32>
    %234 = vector.shape_cast %233 : vector<16x8xf32> to vector<2x8x8xf32>
    %235 = vector.extract_strided_slice %11 {offsets = [0, 56], sizes = [16, 8], strides = [1, 1]} : vector<16x64xf32> to vector<16x8xf32>
    %236 = vector.shape_cast %235 : vector<16x8xf32> to vector<2x8x8xf32>
    %237 = arith.truncf %232 : vector<2x8x8xf32> to vector<2x8x8xbf16>
    %238 = arith.truncf %234 : vector<2x8x8xf32> to vector<2x8x8xbf16>
    "tpu.trace_start"() <{level = 10 : i32, message = "bqd,bkd->bqk"}> : () -> ()
    %cst_61 = arith.constant dense<0.000000e+00> : vector<2x8x8xf32>
    %239 = tpu.matmul %237, %238, %cst_61 {dimension_numbers = #tpu.dot_dimension_numbers<[2], [2], [1], [1], [0, 0, 0, 1, 1, 1], [0], [0]>} : vector<2x8x8xbf16>, vector<2x8x8xbf16>, vector<2x8x8xf32> -> vector<2x8x8xf32>
    "tpu.trace_stop"() : () -> ()
    %cst_62 = arith.constant 0.353553385 : f32
    %240 = vector.broadcast %cst_62 : f32 to vector<2x8x8xf32>
    %241 = arith.mulf %239, %240 : vector<2x8x8xf32>
    %242 = arith.addf %241, %12 : vector<2x8x8xf32>
    %cst_63 = arith.constant dense<0xFF800000> : vector<2x8xf32>
    %243 = vector.multi_reduction <maximumf>, %242, %cst_63 [2] : vector<2x8x8xf32> to vector<2x8xf32>
    %244 = vector.shape_cast %243 : vector<2x8xf32> to vector<2x8x1xf32>
    %245 = vector.broadcast %244 : vector<2x8x1xf32> to vector<2x8x8xf32>
    %246 = arith.subf %242, %245 : vector<2x8x8xf32>
    %247 = math.exp %246 : vector<2x8x8xf32>
    %cst_64 = arith.constant dense<0.000000e+00> : vector<2x8xf32>
    %248 = vector.multi_reduction <add>, %247, %cst_64 [2] : vector<2x8x8xf32> to vector<2x8xf32>
    %249 = vector.shape_cast %248 : vector<2x8xf32> to vector<2x8x1xf32>
    %250 = tpu.reciprocal %249 {approx = true} : vector<2x8x1xf32> -> vector<2x8x1xf32>
    %251 = vector.broadcast %250 : vector<2x8x1xf32> to vector<2x8x8xf32>
    %252 = arith.mulf %247, %251 : vector<2x8x8xf32>
    %253 = arith.truncf %252 : vector<2x8x8xf32> to vector<2x8x8xbf16>
    %254 = arith.truncf %236 : vector<2x8x8xf32> to vector<2x8x8xbf16>
    "tpu.trace_start"() <{level = 10 : i32, message = "bqk,bkd->bqd"}> : () -> ()
    %cst_65 = arith.constant dense<0.000000e+00> : vector<2x8x8xf32>
    %255 = tpu.matmul %253, %254, %cst_65 {dimension_numbers = #tpu.dot_dimension_numbers<[2], [1], [1], [2], [0, 0, 0, 1, 1, 2], [0], [0]>} : vector<2x8x8xbf16>, vector<2x8x8xbf16>, vector<2x8x8xf32> -> vector<2x8x8xf32>
    "tpu.trace_stop"() : () -> ()
    %256 = vector.shape_cast %255 : vector<2x8x8xf32> to vector<16x8xf32>
    %c56 = arith.constant 56 : index
    %c0_66 = arith.constant 0 : index
    %257 = vector.load %arg7[%c56, %c0_66] : memref<64x64xf32, #tpu.memory_space<vmem>>, vector<8x64xf32>
    %258 = arith.truncf %256 : vector<16x8xf32> to vector<16x8xbf16>
    %259 = arith.truncf %257 : vector<8x64xf32> to vector<8x64xbf16>
    %cst_67 = arith.constant dense<0.000000e+00> : vector<16x64xf32>
    %260 = tpu.matmul %258, %259, %cst_67 {dimension_numbers = #tpu.dot_dimension_numbers<[1], [0], [0], [1], [0, 0, 1, 1], [], []>} : vector<16x8xbf16>, vector<8x64xbf16>, vector<16x64xf32> -> vector<16x64xf32>
    %261 = arith.addf %230, %260 : vector<16x64xf32>
    %c0_68 = arith.constant 0 : index
    %c0_69 = arith.constant 0 : index
    %262 = vector.load %arg8[%c0_68, %c0_69] : memref<1x64xf32, #tpu.memory_space<vmem>>, vector<1x64xf32>
    %263 = vector.broadcast %262 : vector<1x64xf32> to vector<16x64xf32>
    %264 = arith.addf %261, %263 : vector<16x64xf32>
    %265 = arith.addf %0, %264 : vector<16x64xf32>
    %cst_70 = arith.constant dense<0.000000e+00> : vector<16xf32>
    %266 = vector.multi_reduction <add>, %265, %cst_70 [1] : vector<16x64xf32> to vector<16xf32>
    %267 = vector.shape_cast %266 : vector<16xf32> to vector<16x1xf32>
    %cst_71 = arith.constant 6.400000e+01 : f32
    %268 = vector.broadcast %cst_71 : f32 to vector<16x1xf32>
    %269 = arith.divf %267, %268 : vector<16x1xf32>
    %270 = vector.broadcast %269 : vector<16x1xf32> to vector<16x64xf32>
    %271 = arith.subf %265, %270 : vector<16x64xf32>
    %272 = arith.mulf %271, %271 : vector<16x64xf32>
    %cst_72 = arith.constant dense<0.000000e+00> : vector<16xf32>
    %273 = vector.multi_reduction <add>, %272, %cst_72 [1] : vector<16x64xf32> to vector<16xf32>
    %274 = vector.shape_cast %273 : vector<16xf32> to vector<16x1xf32>
    %cst_73 = arith.constant 6.400000e+01 : f32
    %275 = vector.broadcast %cst_73 : f32 to vector<16x1xf32>
    %276 = arith.divf %274, %275 : vector<16x1xf32>
    %277 = vector.broadcast %269 : vector<16x1xf32> to vector<16x64xf32>
    %278 = arith.subf %265, %277 : vector<16x64xf32>
    %cst_74 = arith.constant 9.99999974E-6 : f32
    %279 = vector.broadcast %cst_74 : f32 to vector<16x1xf32>
    %280 = arith.addf %276, %279 : vector<16x1xf32>
    %281 = math.rsqrt %280 : vector<16x1xf32>
    %282 = vector.broadcast %281 : vector<16x1xf32> to vector<16x64xf32>
    %283 = arith.mulf %278, %282 : vector<16x64xf32>
    %c0_75 = arith.constant 0 : index
    %c0_76 = arith.constant 0 : index
    %284 = vector.load %arg9[%c0_75, %c0_76] : memref<1x64xf32, #tpu.memory_space<vmem>>, vector<1x64xf32>
    %285 = vector.broadcast %284 : vector<1x64xf32> to vector<16x64xf32>
    %286 = arith.mulf %283, %285 : vector<16x64xf32>
    %c0_77 = arith.constant 0 : index
    %c0_78 = arith.constant 0 : index
    %287 = vector.load %arg10[%c0_77, %c0_78] : memref<1x64xf32, #tpu.memory_space<vmem>>, vector<1x64xf32>
    %288 = vector.broadcast %287 : vector<1x64xf32> to vector<16x64xf32>
    %289 = arith.addf %286, %288 : vector<16x64xf32>
    %c0_79 = arith.constant 0 : index
    %c0_80 = arith.constant 0 : index
    %290 = vector.load %arg11[%c0_79, %c0_80] : memref<64x64xf32, #tpu.memory_space<vmem>>, vector<64x64xf32>
    %291 = arith.truncf %289 : vector<16x64xf32> to vector<16x64xbf16>
    %292 = arith.truncf %290 : vector<64x64xf32> to vector<64x64xbf16>
    %cst_81 = arith.constant dense<0.000000e+00> : vector<16x64xf32>
    %293 = tpu.matmul %291, %292, %cst_81 {dimension_numbers = #tpu.dot_dimension_numbers<[1], [0], [0], [1], [0, 0, 1, 1], [], []>} : vector<16x64xbf16>, vector<64x64xbf16>, vector<16x64xf32> -> vector<16x64xf32>
    %c0_82 = arith.constant 0 : index
    %c0_83 = arith.constant 0 : index
    %294 = vector.load %arg12[%c0_82, %c0_83] : memref<1x64xf32, #tpu.memory_space<vmem>>, vector<1x64xf32>
    %295 = vector.broadcast %294 : vector<1x64xf32> to vector<16x64xf32>
    %296 = arith.addf %293, %295 : vector<16x64xf32>
    %c0_84 = arith.constant 0 : index
    %c0_85 = arith.constant 0 : index
    %297 = vector.load %arg13[%c0_84, %c0_85] : memref<64x128xf32, #tpu.memory_space<vmem>>, vector<64x128xf32>
    %298 = arith.truncf %1 : vector<32x64xf32> to vector<32x64xbf16>
    %299 = arith.truncf %297 : vector<64x128xf32> to vector<64x128xbf16>
    %cst_86 = arith.constant dense<0.000000e+00> : vector<32x128xf32>
    %300 = tpu.matmul %298, %299, %cst_86 {dimension_numbers = #tpu.dot_dimension_numbers<[1], [0], [0], [1], [0, 0, 1, 1], [], []>} : vector<32x64xbf16>, vector<64x128xbf16>, vector<32x128xf32> -> vector<32x128xf32>
    %c0_87 = arith.constant 0 : index
    %c0_88 = arith.constant 0 : index
    %301 = vector.load %arg14[%c0_87, %c0_88] : memref<1x128xf32, #tpu.memory_space<vmem>>, vector<1x128xf32>
    %302 = vector.broadcast %301 : vector<1x128xf32> to vector<32x128xf32>
    %303 = arith.addf %300, %302 : vector<32x128xf32>
    %304 = vector.extract_strided_slice %303 {offsets = [0, 0], sizes = [32, 64], strides = [1, 1]} : vector<32x128xf32> to vector<32x64xf32>
    %305 = vector.extract_strided_slice %303 {offsets = [0, 64], sizes = [32, 64], strides = [1, 1]} : vector<32x128xf32> to vector<32x64xf32>
    %c0_89 = arith.constant 0 : index
    %c0_90 = arith.constant 0 : index
    %c0_91 = arith.constant 0 : index
    %306 = vector.load %arg4[%c0_89, %c0_90, %c0_91] : memref<2x8x16xf32, #tpu.memory_space<vmem>>, vector<2x8x16xf32>
    %307 = vector.shape_cast %306 : vector<2x8x16xf32> to vector<2x8x16xf32>
    %cst_92 = arith.constant 0.000000e+00 : f32
    %308 = vector.broadcast %cst_92 : f32 to vector<16x64xf32>
    %309 = vector.extract_strided_slice %296 {offsets = [0, 0], sizes = [16, 8], strides = [1, 1]} : vector<16x64xf32> to vector<16x8xf32>
    %310 = vector.shape_cast %309 : vector<16x8xf32> to vector<2x8x8xf32>
    %311 = vector.extract_strided_slice %304 {offsets = [0, 0], sizes = [32, 8], strides = [1, 1]} : vector<32x64xf32> to vector<32x8xf32>
    %312 = vector.shape_cast %311 : vector<32x8xf32> to vector<2x16x8xf32>
    %313 = vector.extract_strided_slice %305 {offsets = [0, 0], sizes = [32, 8], strides = [1, 1]} : vector<32x64xf32> to vector<32x8xf32>
    %314 = vector.shape_cast %313 : vector<32x8xf32> to vector<2x16x8xf32>
    %315 = arith.truncf %310 : vector<2x8x8xf32> to vector<2x8x8xbf16>
    %316 = arith.truncf %312 : vector<2x16x8xf32> to vector<2x16x8xbf16>
    "tpu.trace_start"() <{level = 10 : i32, message = "bqd,bkd->bqk"}> : () -> ()
    %cst_93 = arith.constant dense<0.000000e+00> : vector<2x8x16xf32>
    %317 = tpu.matmul %315, %316, %cst_93 {dimension_numbers = #tpu.dot_dimension_numbers<[2], [2], [1], [1], [0, 0, 0, 1, 1, 1], [0], [0]>} : vector<2x8x8xbf16>, vector<2x16x8xbf16>, vector<2x8x16xf32> -> vector<2x8x16xf32>
    "tpu.trace_stop"() : () -> ()
    %cst_94 = arith.constant 0.353553385 : f32
    %318 = vector.broadcast %cst_94 : f32 to vector<2x8x16xf32>
    %319 = arith.mulf %317, %318 : vector<2x8x16xf32>
    %320 = arith.addf %319, %307 : vector<2x8x16xf32>
    %cst_95 = arith.constant dense<0xFF800000> : vector<2x8xf32>
    %321 = vector.multi_reduction <maximumf>, %320, %cst_95 [2] : vector<2x8x16xf32> to vector<2x8xf32>
    %322 = vector.shape_cast %321 : vector<2x8xf32> to vector<2x8x1xf32>
    %323 = vector.broadcast %322 : vector<2x8x1xf32> to vector<2x8x16xf32>
    %324 = arith.subf %320, %323 : vector<2x8x16xf32>
    %325 = math.exp %324 : vector<2x8x16xf32>
    %cst_96 = arith.constant dense<0.000000e+00> : vector<2x8xf32>
    %326 = vector.multi_reduction <add>, %325, %cst_96 [2] : vector<2x8x16xf32> to vector<2x8xf32>
    %327 = vector.shape_cast %326 : vector<2x8xf32> to vector<2x8x1xf32>
    %328 = tpu.reciprocal %327 {approx = true} : vector<2x8x1xf32> -> vector<2x8x1xf32>
    %329 = vector.broadcast %328 : vector<2x8x1xf32> to vector<2x8x16xf32>
    %330 = arith.mulf %325, %329 : vector<2x8x16xf32>
    %331 = arith.truncf %330 : vector<2x8x16xf32> to vector<2x8x16xbf16>
    %332 = arith.truncf %314 : vector<2x16x8xf32> to vector<2x16x8xbf16>
    "tpu.trace_start"() <{level = 10 : i32, message = "bqk,bkd->bqd"}> : () -> ()
    %cst_97 = arith.constant dense<0.000000e+00> : vector<2x8x8xf32>
    %333 = tpu.matmul %331, %332, %cst_97 {dimension_numbers = #tpu.dot_dimension_numbers<[2], [1], [1], [2], [0, 0, 0, 1, 1, 2], [0], [0]>} : vector<2x8x16xbf16>, vector<2x16x8xbf16>, vector<2x8x8xf32> -> vector<2x8x8xf32>
    "tpu.trace_stop"() : () -> ()
    %334 = vector.shape_cast %333 : vector<2x8x8xf32> to vector<16x8xf32>
    %c0_98 = arith.constant 0 : index
    %c0_99 = arith.constant 0 : index
    %335 = vector.load %arg15[%c0_98, %c0_99] : memref<64x64xf32, #tpu.memory_space<vmem>>, vector<8x64xf32>
    %336 = arith.truncf %334 : vector<16x8xf32> to vector<16x8xbf16>
    %337 = arith.truncf %335 : vector<8x64xf32> to vector<8x64xbf16>
    %cst_100 = arith.constant dense<0.000000e+00> : vector<16x64xf32>
    %338 = tpu.matmul %336, %337, %cst_100 {dimension_numbers = #tpu.dot_dimension_numbers<[1], [0], [0], [1], [0, 0, 1, 1], [], []>} : vector<16x8xbf16>, vector<8x64xbf16>, vector<16x64xf32> -> vector<16x64xf32>
    %339 = arith.addf %308, %338 : vector<16x64xf32>
    %340 = vector.extract_strided_slice %296 {offsets = [0, 8], sizes = [16, 8], strides = [1, 1]} : vector<16x64xf32> to vector<16x8xf32>
    %341 = vector.shape_cast %340 : vector<16x8xf32> to vector<2x8x8xf32>
    %342 = vector.extract_strided_slice %304 {offsets = [0, 8], sizes = [32, 8], strides = [1, 1]} : vector<32x64xf32> to vector<32x8xf32>
    %343 = vector.shape_cast %342 : vector<32x8xf32> to vector<2x16x8xf32>
    %344 = vector.extract_strided_slice %305 {offsets = [0, 8], sizes = [32, 8], strides = [1, 1]} : vector<32x64xf32> to vector<32x8xf32>
    %345 = vector.shape_cast %344 : vector<32x8xf32> to vector<2x16x8xf32>
    %346 = arith.truncf %341 : vector<2x8x8xf32> to vector<2x8x8xbf16>
    %347 = arith.truncf %343 : vector<2x16x8xf32> to vector<2x16x8xbf16>
    "tpu.trace_start"() <{level = 10 : i32, message = "bqd,bkd->bqk"}> : () -> ()
    %cst_101 = arith.constant dense<0.000000e+00> : vector<2x8x16xf32>
    %348 = tpu.matmul %346, %347, %cst_101 {dimension_numbers = #tpu.dot_dimension_numbers<[2], [2], [1], [1], [0, 0, 0, 1, 1, 1], [0], [0]>} : vector<2x8x8xbf16>, vector<2x16x8xbf16>, vector<2x8x16xf32> -> vector<2x8x16xf32>
    "tpu.trace_stop"() : () -> ()
    %cst_102 = arith.constant 0.353553385 : f32
    %349 = vector.broadcast %cst_102 : f32 to vector<2x8x16xf32>
    %350 = arith.mulf %348, %349 : vector<2x8x16xf32>
    %351 = arith.addf %350, %307 : vector<2x8x16xf32>
    %cst_103 = arith.constant dense<0xFF800000> : vector<2x8xf32>
    %352 = vector.multi_reduction <maximumf>, %351, %cst_103 [2] : vector<2x8x16xf32> to vector<2x8xf32>
    %353 = vector.shape_cast %352 : vector<2x8xf32> to vector<2x8x1xf32>
    %354 = vector.broadcast %353 : vector<2x8x1xf32> to vector<2x8x16xf32>
    %355 = arith.subf %351, %354 : vector<2x8x16xf32>
    %356 = math.exp %355 : vector<2x8x16xf32>
    %cst_104 = arith.constant dense<0.000000e+00> : vector<2x8xf32>
    %357 = vector.multi_reduction <add>, %356, %cst_104 [2] : vector<2x8x16xf32> to vector<2x8xf32>
    %358 = vector.shape_cast %357 : vector<2x8xf32> to vector<2x8x1xf32>
    %359 = tpu.reciprocal %358 {approx = true} : vector<2x8x1xf32> -> vector<2x8x1xf32>
    %360 = vector.broadcast %359 : vector<2x8x1xf32> to vector<2x8x16xf32>
    %361 = arith.mulf %356, %360 : vector<2x8x16xf32>
    %362 = arith.truncf %361 : vector<2x8x16xf32> to vector<2x8x16xbf16>
    %363 = arith.truncf %345 : vector<2x16x8xf32> to vector<2x16x8xbf16>
    "tpu.trace_start"() <{level = 10 : i32, message = "bqk,bkd->bqd"}> : () -> ()
    %cst_105 = arith.constant dense<0.000000e+00> : vector<2x8x8xf32>
    %364 = tpu.matmul %362, %363, %cst_105 {dimension_numbers = #tpu.dot_dimension_numbers<[2], [1], [1], [2], [0, 0, 0, 1, 1, 2], [0], [0]>} : vector<2x8x16xbf16>, vector<2x16x8xbf16>, vector<2x8x8xf32> -> vector<2x8x8xf32>
    "tpu.trace_stop"() : () -> ()
    %365 = vector.shape_cast %364 : vector<2x8x8xf32> to vector<16x8xf32>
    %c8_106 = arith.constant 8 : index
    %c0_107 = arith.constant 0 : index
    %366 = vector.load %arg15[%c8_106, %c0_107] : memref<64x64xf32, #tpu.memory_space<vmem>>, vector<8x64xf32>
    %367 = arith.truncf %365 : vector<16x8xf32> to vector<16x8xbf16>
    %368 = arith.truncf %366 : vector<8x64xf32> to vector<8x64xbf16>
    %cst_108 = arith.constant dense<0.000000e+00> : vector<16x64xf32>
    %369 = tpu.matmul %367, %368, %cst_108 {dimension_numbers = #tpu.dot_dimension_numbers<[1], [0], [0], [1], [0, 0, 1, 1], [], []>} : vector<16x8xbf16>, vector<8x64xbf16>, vector<16x64xf32> -> vector<16x64xf32>
    %370 = arith.addf %339, %369 : vector<16x64xf32>
    %371 = vector.extract_strided_slice %296 {offsets = [0, 16], sizes = [16, 8], strides = [1, 1]} : vector<16x64xf32> to vector<16x8xf32>
    %372 = vector.shape_cast %371 : vector<16x8xf32> to vector<2x8x8xf32>
    %373 = vector.extract_strided_slice %304 {offsets = [0, 16], sizes = [32, 8], strides = [1, 1]} : vector<32x64xf32> to vector<32x8xf32>
    %374 = vector.shape_cast %373 : vector<32x8xf32> to vector<2x16x8xf32>
    %375 = vector.extract_strided_slice %305 {offsets = [0, 16], sizes = [32, 8], strides = [1, 1]} : vector<32x64xf32> to vector<32x8xf32>
    %376 = vector.shape_cast %375 : vector<32x8xf32> to vector<2x16x8xf32>
    %377 = arith.truncf %372 : vector<2x8x8xf32> to vector<2x8x8xbf16>
    %378 = arith.truncf %374 : vector<2x16x8xf32> to vector<2x16x8xbf16>
    "tpu.trace_start"() <{level = 10 : i32, message = "bqd,bkd->bqk"}> : () -> ()
    %cst_109 = arith.constant dense<0.000000e+00> : vector<2x8x16xf32>
    %379 = tpu.matmul %377, %378, %cst_109 {dimension_numbers = #tpu.dot_dimension_numbers<[2], [2], [1], [1], [0, 0, 0, 1, 1, 1], [0], [0]>} : vector<2x8x8xbf16>, vector<2x16x8xbf16>, vector<2x8x16xf32> -> vector<2x8x16xf32>
    "tpu.trace_stop"() : () -> ()
    %cst_110 = arith.constant 0.353553385 : f32
    %380 = vector.broadcast %cst_110 : f32 to vector<2x8x16xf32>
    %381 = arith.mulf %379, %380 : vector<2x8x16xf32>
    %382 = arith.addf %381, %307 : vector<2x8x16xf32>
    %cst_111 = arith.constant dense<0xFF800000> : vector<2x8xf32>
    %383 = vector.multi_reduction <maximumf>, %382, %cst_111 [2] : vector<2x8x16xf32> to vector<2x8xf32>
    %384 = vector.shape_cast %383 : vector<2x8xf32> to vector<2x8x1xf32>
    %385 = vector.broadcast %384 : vector<2x8x1xf32> to vector<2x8x16xf32>
    %386 = arith.subf %382, %385 : vector<2x8x16xf32>
    %387 = math.exp %386 : vector<2x8x16xf32>
    %cst_112 = arith.constant dense<0.000000e+00> : vector<2x8xf32>
    %388 = vector.multi_reduction <add>, %387, %cst_112 [2] : vector<2x8x16xf32> to vector<2x8xf32>
    %389 = vector.shape_cast %388 : vector<2x8xf32> to vector<2x8x1xf32>
    %390 = tpu.reciprocal %389 {approx = true} : vector<2x8x1xf32> -> vector<2x8x1xf32>
    %391 = vector.broadcast %390 : vector<2x8x1xf32> to vector<2x8x16xf32>
    %392 = arith.mulf %387, %391 : vector<2x8x16xf32>
    %393 = arith.truncf %392 : vector<2x8x16xf32> to vector<2x8x16xbf16>
    %394 = arith.truncf %376 : vector<2x16x8xf32> to vector<2x16x8xbf16>
    "tpu.trace_start"() <{level = 10 : i32, message = "bqk,bkd->bqd"}> : () -> ()
    %cst_113 = arith.constant dense<0.000000e+00> : vector<2x8x8xf32>
    %395 = tpu.matmul %393, %394, %cst_113 {dimension_numbers = #tpu.dot_dimension_numbers<[2], [1], [1], [2], [0, 0, 0, 1, 1, 2], [0], [0]>} : vector<2x8x16xbf16>, vector<2x16x8xbf16>, vector<2x8x8xf32> -> vector<2x8x8xf32>
    "tpu.trace_stop"() : () -> ()
    %396 = vector.shape_cast %395 : vector<2x8x8xf32> to vector<16x8xf32>
    %c16_114 = arith.constant 16 : index
    %c0_115 = arith.constant 0 : index
    %397 = vector.load %arg15[%c16_114, %c0_115] : memref<64x64xf32, #tpu.memory_space<vmem>>, vector<8x64xf32>
    %398 = arith.truncf %396 : vector<16x8xf32> to vector<16x8xbf16>
    %399 = arith.truncf %397 : vector<8x64xf32> to vector<8x64xbf16>
    %cst_116 = arith.constant dense<0.000000e+00> : vector<16x64xf32>
    %400 = tpu.matmul %398, %399, %cst_116 {dimension_numbers = #tpu.dot_dimension_numbers<[1], [0], [0], [1], [0, 0, 1, 1], [], []>} : vector<16x8xbf16>, vector<8x64xbf16>, vector<16x64xf32> -> vector<16x64xf32>
    %401 = arith.addf %370, %400 : vector<16x64xf32>
    %402 = vector.extract_strided_slice %296 {offsets = [0, 24], sizes = [16, 8], strides = [1, 1]} : vector<16x64xf32> to vector<16x8xf32>
    %403 = vector.shape_cast %402 : vector<16x8xf32> to vector<2x8x8xf32>
    %404 = vector.extract_strided_slice %304 {offsets = [0, 24], sizes = [32, 8], strides = [1, 1]} : vector<32x64xf32> to vector<32x8xf32>
    %405 = vector.shape_cast %404 : vector<32x8xf32> to vector<2x16x8xf32>
    %406 = vector.extract_strided_slice %305 {offsets = [0, 24], sizes = [32, 8], strides = [1, 1]} : vector<32x64xf32> to vector<32x8xf32>
    %407 = vector.shape_cast %406 : vector<32x8xf32> to vector<2x16x8xf32>
    %408 = arith.truncf %403 : vector<2x8x8xf32> to vector<2x8x8xbf16>
    %409 = arith.truncf %405 : vector<2x16x8xf32> to vector<2x16x8xbf16>
    "tpu.trace_start"() <{level = 10 : i32, message = "bqd,bkd->bqk"}> : () -> ()
    %cst_117 = arith.constant dense<0.000000e+00> : vector<2x8x16xf32>
    %410 = tpu.matmul %408, %409, %cst_117 {dimension_numbers = #tpu.dot_dimension_numbers<[2], [2], [1], [1], [0, 0, 0, 1, 1, 1], [0], [0]>} : vector<2x8x8xbf16>, vector<2x16x8xbf16>, vector<2x8x16xf32> -> vector<2x8x16xf32>
    "tpu.trace_stop"() : () -> ()
    %cst_118 = arith.constant 0.353553385 : f32
    %411 = vector.broadcast %cst_118 : f32 to vector<2x8x16xf32>
    %412 = arith.mulf %410, %411 : vector<2x8x16xf32>
    %413 = arith.addf %412, %307 : vector<2x8x16xf32>
    %cst_119 = arith.constant dense<0xFF800000> : vector<2x8xf32>
    %414 = vector.multi_reduction <maximumf>, %413, %cst_119 [2] : vector<2x8x16xf32> to vector<2x8xf32>
    %415 = vector.shape_cast %414 : vector<2x8xf32> to vector<2x8x1xf32>
    %416 = vector.broadcast %415 : vector<2x8x1xf32> to vector<2x8x16xf32>
    %417 = arith.subf %413, %416 : vector<2x8x16xf32>
    %418 = math.exp %417 : vector<2x8x16xf32>
    %cst_120 = arith.constant dense<0.000000e+00> : vector<2x8xf32>
    %419 = vector.multi_reduction <add>, %418, %cst_120 [2] : vector<2x8x16xf32> to vector<2x8xf32>
    %420 = vector.shape_cast %419 : vector<2x8xf32> to vector<2x8x1xf32>
    %421 = tpu.reciprocal %420 {approx = true} : vector<2x8x1xf32> -> vector<2x8x1xf32>
    %422 = vector.broadcast %421 : vector<2x8x1xf32> to vector<2x8x16xf32>
    %423 = arith.mulf %418, %422 : vector<2x8x16xf32>
    %424 = arith.truncf %423 : vector<2x8x16xf32> to vector<2x8x16xbf16>
    %425 = arith.truncf %407 : vector<2x16x8xf32> to vector<2x16x8xbf16>
    "tpu.trace_start"() <{level = 10 : i32, message = "bqk,bkd->bqd"}> : () -> ()
    %cst_121 = arith.constant dense<0.000000e+00> : vector<2x8x8xf32>
    %426 = tpu.matmul %424, %425, %cst_121 {dimension_numbers = #tpu.dot_dimension_numbers<[2], [1], [1], [2], [0, 0, 0, 1, 1, 2], [0], [0]>} : vector<2x8x16xbf16>, vector<2x16x8xbf16>, vector<2x8x8xf32> -> vector<2x8x8xf32>
    "tpu.trace_stop"() : () -> ()
    %427 = vector.shape_cast %426 : vector<2x8x8xf32> to vector<16x8xf32>
    %c24_122 = arith.constant 24 : index
    %c0_123 = arith.constant 0 : index
    %428 = vector.load %arg15[%c24_122, %c0_123] : memref<64x64xf32, #tpu.memory_space<vmem>>, vector<8x64xf32>
    %429 = arith.truncf %427 : vector<16x8xf32> to vector<16x8xbf16>
    %430 = arith.truncf %428 : vector<8x64xf32> to vector<8x64xbf16>
    %cst_124 = arith.constant dense<0.000000e+00> : vector<16x64xf32>
    %431 = tpu.matmul %429, %430, %cst_124 {dimension_numbers = #tpu.dot_dimension_numbers<[1], [0], [0], [1], [0, 0, 1, 1], [], []>} : vector<16x8xbf16>, vector<8x64xbf16>, vector<16x64xf32> -> vector<16x64xf32>
    %432 = arith.addf %401, %431 : vector<16x64xf32>
    %433 = vector.extract_strided_slice %296 {offsets = [0, 32], sizes = [16, 8], strides = [1, 1]} : vector<16x64xf32> to vector<16x8xf32>
    %434 = vector.shape_cast %433 : vector<16x8xf32> to vector<2x8x8xf32>
    %435 = vector.extract_strided_slice %304 {offsets = [0, 32], sizes = [32, 8], strides = [1, 1]} : vector<32x64xf32> to vector<32x8xf32>
    %436 = vector.shape_cast %435 : vector<32x8xf32> to vector<2x16x8xf32>
    %437 = vector.extract_strided_slice %305 {offsets = [0, 32], sizes = [32, 8], strides = [1, 1]} : vector<32x64xf32> to vector<32x8xf32>
    %438 = vector.shape_cast %437 : vector<32x8xf32> to vector<2x16x8xf32>
    %439 = arith.truncf %434 : vector<2x8x8xf32> to vector<2x8x8xbf16>
    %440 = arith.truncf %436 : vector<2x16x8xf32> to vector<2x16x8xbf16>
    "tpu.trace_start"() <{level = 10 : i32, message = "bqd,bkd->bqk"}> : () -> ()
    %cst_125 = arith.constant dense<0.000000e+00> : vector<2x8x16xf32>
    %441 = tpu.matmul %439, %440, %cst_125 {dimension_numbers = #tpu.dot_dimension_numbers<[2], [2], [1], [1], [0, 0, 0, 1, 1, 1], [0], [0]>} : vector<2x8x8xbf16>, vector<2x16x8xbf16>, vector<2x8x16xf32> -> vector<2x8x16xf32>
    "tpu.trace_stop"() : () -> ()
    %cst_126 = arith.constant 0.353553385 : f32
    %442 = vector.broadcast %cst_126 : f32 to vector<2x8x16xf32>
    %443 = arith.mulf %441, %442 : vector<2x8x16xf32>
    %444 = arith.addf %443, %307 : vector<2x8x16xf32>
    %cst_127 = arith.constant dense<0xFF800000> : vector<2x8xf32>
    %445 = vector.multi_reduction <maximumf>, %444, %cst_127 [2] : vector<2x8x16xf32> to vector<2x8xf32>
    %446 = vector.shape_cast %445 : vector<2x8xf32> to vector<2x8x1xf32>
    %447 = vector.broadcast %446 : vector<2x8x1xf32> to vector<2x8x16xf32>
    %448 = arith.subf %444, %447 : vector<2x8x16xf32>
    %449 = math.exp %448 : vector<2x8x16xf32>
    %cst_128 = arith.constant dense<0.000000e+00> : vector<2x8xf32>
    %450 = vector.multi_reduction <add>, %449, %cst_128 [2] : vector<2x8x16xf32> to vector<2x8xf32>
    %451 = vector.shape_cast %450 : vector<2x8xf32> to vector<2x8x1xf32>
    %452 = tpu.reciprocal %451 {approx = true} : vector<2x8x1xf32> -> vector<2x8x1xf32>
    %453 = vector.broadcast %452 : vector<2x8x1xf32> to vector<2x8x16xf32>
    %454 = arith.mulf %449, %453 : vector<2x8x16xf32>
    %455 = arith.truncf %454 : vector<2x8x16xf32> to vector<2x8x16xbf16>
    %456 = arith.truncf %438 : vector<2x16x8xf32> to vector<2x16x8xbf16>
    "tpu.trace_start"() <{level = 10 : i32, message = "bqk,bkd->bqd"}> : () -> ()
    %cst_129 = arith.constant dense<0.000000e+00> : vector<2x8x8xf32>
    %457 = tpu.matmul %455, %456, %cst_129 {dimension_numbers = #tpu.dot_dimension_numbers<[2], [1], [1], [2], [0, 0, 0, 1, 1, 2], [0], [0]>} : vector<2x8x16xbf16>, vector<2x16x8xbf16>, vector<2x8x8xf32> -> vector<2x8x8xf32>
    "tpu.trace_stop"() : () -> ()
    %458 = vector.shape_cast %457 : vector<2x8x8xf32> to vector<16x8xf32>
    %c32_130 = arith.constant 32 : index
    %c0_131 = arith.constant 0 : index
    %459 = vector.load %arg15[%c32_130, %c0_131] : memref<64x64xf32, #tpu.memory_space<vmem>>, vector<8x64xf32>
    %460 = arith.truncf %458 : vector<16x8xf32> to vector<16x8xbf16>
    %461 = arith.truncf %459 : vector<8x64xf32> to vector<8x64xbf16>
    %cst_132 = arith.constant dense<0.000000e+00> : vector<16x64xf32>
    %462 = tpu.matmul %460, %461, %cst_132 {dimension_numbers = #tpu.dot_dimension_numbers<[1], [0], [0], [1], [0, 0, 1, 1], [], []>} : vector<16x8xbf16>, vector<8x64xbf16>, vector<16x64xf32> -> vector<16x64xf32>
    %463 = arith.addf %432, %462 : vector<16x64xf32>
    %464 = vector.extract_strided_slice %296 {offsets = [0, 40], sizes = [16, 8], strides = [1, 1]} : vector<16x64xf32> to vector<16x8xf32>
    %465 = vector.shape_cast %464 : vector<16x8xf32> to vector<2x8x8xf32>
    %466 = vector.extract_strided_slice %304 {offsets = [0, 40], sizes = [32, 8], strides = [1, 1]} : vector<32x64xf32> to vector<32x8xf32>
    %467 = vector.shape_cast %466 : vector<32x8xf32> to vector<2x16x8xf32>
    %468 = vector.extract_strided_slice %305 {offsets = [0, 40], sizes = [32, 8], strides = [1, 1]} : vector<32x64xf32> to vector<32x8xf32>
    %469 = vector.shape_cast %468 : vector<32x8xf32> to vector<2x16x8xf32>
    %470 = arith.truncf %465 : vector<2x8x8xf32> to vector<2x8x8xbf16>
    %471 = arith.truncf %467 : vector<2x16x8xf32> to vector<2x16x8xbf16>
    "tpu.trace_start"() <{level = 10 : i32, message = "bqd,bkd->bqk"}> : () -> ()
    %cst_133 = arith.constant dense<0.000000e+00> : vector<2x8x16xf32>
    %472 = tpu.matmul %470, %471, %cst_133 {dimension_numbers = #tpu.dot_dimension_numbers<[2], [2], [1], [1], [0, 0, 0, 1, 1, 1], [0], [0]>} : vector<2x8x8xbf16>, vector<2x16x8xbf16>, vector<2x8x16xf32> -> vector<2x8x16xf32>
    "tpu.trace_stop"() : () -> ()
    %cst_134 = arith.constant 0.353553385 : f32
    %473 = vector.broadcast %cst_134 : f32 to vector<2x8x16xf32>
    %474 = arith.mulf %472, %473 : vector<2x8x16xf32>
    %475 = arith.addf %474, %307 : vector<2x8x16xf32>
    %cst_135 = arith.constant dense<0xFF800000> : vector<2x8xf32>
    %476 = vector.multi_reduction <maximumf>, %475, %cst_135 [2] : vector<2x8x16xf32> to vector<2x8xf32>
    %477 = vector.shape_cast %476 : vector<2x8xf32> to vector<2x8x1xf32>
    %478 = vector.broadcast %477 : vector<2x8x1xf32> to vector<2x8x16xf32>
    %479 = arith.subf %475, %478 : vector<2x8x16xf32>
    %480 = math.exp %479 : vector<2x8x16xf32>
    %cst_136 = arith.constant dense<0.000000e+00> : vector<2x8xf32>
    %481 = vector.multi_reduction <add>, %480, %cst_136 [2] : vector<2x8x16xf32> to vector<2x8xf32>
    %482 = vector.shape_cast %481 : vector<2x8xf32> to vector<2x8x1xf32>
    %483 = tpu.reciprocal %482 {approx = true} : vector<2x8x1xf32> -> vector<2x8x1xf32>
    %484 = vector.broadcast %483 : vector<2x8x1xf32> to vector<2x8x16xf32>
    %485 = arith.mulf %480, %484 : vector<2x8x16xf32>
    %486 = arith.truncf %485 : vector<2x8x16xf32> to vector<2x8x16xbf16>
    %487 = arith.truncf %469 : vector<2x16x8xf32> to vector<2x16x8xbf16>
    "tpu.trace_start"() <{level = 10 : i32, message = "bqk,bkd->bqd"}> : () -> ()
    %cst_137 = arith.constant dense<0.000000e+00> : vector<2x8x8xf32>
    %488 = tpu.matmul %486, %487, %cst_137 {dimension_numbers = #tpu.dot_dimension_numbers<[2], [1], [1], [2], [0, 0, 0, 1, 1, 2], [0], [0]>} : vector<2x8x16xbf16>, vector<2x16x8xbf16>, vector<2x8x8xf32> -> vector<2x8x8xf32>
    "tpu.trace_stop"() : () -> ()
    %489 = vector.shape_cast %488 : vector<2x8x8xf32> to vector<16x8xf32>
    %c40_138 = arith.constant 40 : index
    %c0_139 = arith.constant 0 : index
    %490 = vector.load %arg15[%c40_138, %c0_139] : memref<64x64xf32, #tpu.memory_space<vmem>>, vector<8x64xf32>
    %491 = arith.truncf %489 : vector<16x8xf32> to vector<16x8xbf16>
    %492 = arith.truncf %490 : vector<8x64xf32> to vector<8x64xbf16>
    %cst_140 = arith.constant dense<0.000000e+00> : vector<16x64xf32>
    %493 = tpu.matmul %491, %492, %cst_140 {dimension_numbers = #tpu.dot_dimension_numbers<[1], [0], [0], [1], [0, 0, 1, 1], [], []>} : vector<16x8xbf16>, vector<8x64xbf16>, vector<16x64xf32> -> vector<16x64xf32>
    %494 = arith.addf %463, %493 : vector<16x64xf32>
    %495 = vector.extract_strided_slice %296 {offsets = [0, 48], sizes = [16, 8], strides = [1, 1]} : vector<16x64xf32> to vector<16x8xf32>
    %496 = vector.shape_cast %495 : vector<16x8xf32> to vector<2x8x8xf32>
    %497 = vector.extract_strided_slice %304 {offsets = [0, 48], sizes = [32, 8], strides = [1, 1]} : vector<32x64xf32> to vector<32x8xf32>
    %498 = vector.shape_cast %497 : vector<32x8xf32> to vector<2x16x8xf32>
    %499 = vector.extract_strided_slice %305 {offsets = [0, 48], sizes = [32, 8], strides = [1, 1]} : vector<32x64xf32> to vector<32x8xf32>
    %500 = vector.shape_cast %499 : vector<32x8xf32> to vector<2x16x8xf32>
    %501 = arith.truncf %496 : vector<2x8x8xf32> to vector<2x8x8xbf16>
    %502 = arith.truncf %498 : vector<2x16x8xf32> to vector<2x16x8xbf16>
    "tpu.trace_start"() <{level = 10 : i32, message = "bqd,bkd->bqk"}> : () -> ()
    %cst_141 = arith.constant dense<0.000000e+00> : vector<2x8x16xf32>
    %503 = tpu.matmul %501, %502, %cst_141 {dimension_numbers = #tpu.dot_dimension_numbers<[2], [2], [1], [1], [0, 0, 0, 1, 1, 1], [0], [0]>} : vector<2x8x8xbf16>, vector<2x16x8xbf16>, vector<2x8x16xf32> -> vector<2x8x16xf32>
    "tpu.trace_stop"() : () -> ()
    %cst_142 = arith.constant 0.353553385 : f32
    %504 = vector.broadcast %cst_142 : f32 to vector<2x8x16xf32>
    %505 = arith.mulf %503, %504 : vector<2x8x16xf32>
    %506 = arith.addf %505, %307 : vector<2x8x16xf32>
    %cst_143 = arith.constant dense<0xFF800000> : vector<2x8xf32>
    %507 = vector.multi_reduction <maximumf>, %506, %cst_143 [2] : vector<2x8x16xf32> to vector<2x8xf32>
    %508 = vector.shape_cast %507 : vector<2x8xf32> to vector<2x8x1xf32>
    %509 = vector.broadcast %508 : vector<2x8x1xf32> to vector<2x8x16xf32>
    %510 = arith.subf %506, %509 : vector<2x8x16xf32>
    %511 = math.exp %510 : vector<2x8x16xf32>
    %cst_144 = arith.constant dense<0.000000e+00> : vector<2x8xf32>
    %512 = vector.multi_reduction <add>, %511, %cst_144 [2] : vector<2x8x16xf32> to vector<2x8xf32>
    %513 = vector.shape_cast %512 : vector<2x8xf32> to vector<2x8x1xf32>
    %514 = tpu.reciprocal %513 {approx = true} : vector<2x8x1xf32> -> vector<2x8x1xf32>
    %515 = vector.broadcast %514 : vector<2x8x1xf32> to vector<2x8x16xf32>
    %516 = arith.mulf %511, %515 : vector<2x8x16xf32>
    %517 = arith.truncf %516 : vector<2x8x16xf32> to vector<2x8x16xbf16>
    %518 = arith.truncf %500 : vector<2x16x8xf32> to vector<2x16x8xbf16>
    "tpu.trace_start"() <{level = 10 : i32, message = "bqk,bkd->bqd"}> : () -> ()
    %cst_145 = arith.constant dense<0.000000e+00> : vector<2x8x8xf32>
    %519 = tpu.matmul %517, %518, %cst_145 {dimension_numbers = #tpu.dot_dimension_numbers<[2], [1], [1], [2], [0, 0, 0, 1, 1, 2], [0], [0]>} : vector<2x8x16xbf16>, vector<2x16x8xbf16>, vector<2x8x8xf32> -> vector<2x8x8xf32>
    "tpu.trace_stop"() : () -> ()
    %520 = vector.shape_cast %519 : vector<2x8x8xf32> to vector<16x8xf32>
    %c48_146 = arith.constant 48 : index
    %c0_147 = arith.constant 0 : index
    %521 = vector.load %arg15[%c48_146, %c0_147] : memref<64x64xf32, #tpu.memory_space<vmem>>, vector<8x64xf32>
    %522 = arith.truncf %520 : vector<16x8xf32> to vector<16x8xbf16>
    %523 = arith.truncf %521 : vector<8x64xf32> to vector<8x64xbf16>
    %cst_148 = arith.constant dense<0.000000e+00> : vector<16x64xf32>
    %524 = tpu.matmul %522, %523, %cst_148 {dimension_numbers = #tpu.dot_dimension_numbers<[1], [0], [0], [1], [0, 0, 1, 1], [], []>} : vector<16x8xbf16>, vector<8x64xbf16>, vector<16x64xf32> -> vector<16x64xf32>
    %525 = arith.addf %494, %524 : vector<16x64xf32>
    %526 = vector.extract_strided_slice %296 {offsets = [0, 56], sizes = [16, 8], strides = [1, 1]} : vector<16x64xf32> to vector<16x8xf32>
    %527 = vector.shape_cast %526 : vector<16x8xf32> to vector<2x8x8xf32>
    %528 = vector.extract_strided_slice %304 {offsets = [0, 56], sizes = [32, 8], strides = [1, 1]} : vector<32x64xf32> to vector<32x8xf32>
    %529 = vector.shape_cast %528 : vector<32x8xf32> to vector<2x16x8xf32>
    %530 = vector.extract_strided_slice %305 {offsets = [0, 56], sizes = [32, 8], strides = [1, 1]} : vector<32x64xf32> to vector<32x8xf32>
    %531 = vector.shape_cast %530 : vector<32x8xf32> to vector<2x16x8xf32>
    %532 = arith.truncf %527 : vector<2x8x8xf32> to vector<2x8x8xbf16>
    %533 = arith.truncf %529 : vector<2x16x8xf32> to vector<2x16x8xbf16>
    "tpu.trace_start"() <{level = 10 : i32, message = "bqd,bkd->bqk"}> : () -> ()
    %cst_149 = arith.constant dense<0.000000e+00> : vector<2x8x16xf32>
    %534 = tpu.matmul %532, %533, %cst_149 {dimension_numbers = #tpu.dot_dimension_numbers<[2], [2], [1], [1], [0, 0, 0, 1, 1, 1], [0], [0]>} : vector<2x8x8xbf16>, vector<2x16x8xbf16>, vector<2x8x16xf32> -> vector<2x8x16xf32>
    "tpu.trace_stop"() : () -> ()
    %cst_150 = arith.constant 0.353553385 : f32
    %535 = vector.broadcast %cst_150 : f32 to vector<2x8x16xf32>
    %536 = arith.mulf %534, %535 : vector<2x8x16xf32>
    %537 = arith.addf %536, %307 : vector<2x8x16xf32>
    %cst_151 = arith.constant dense<0xFF800000> : vector<2x8xf32>
    %538 = vector.multi_reduction <maximumf>, %537, %cst_151 [2] : vector<2x8x16xf32> to vector<2x8xf32>
    %539 = vector.shape_cast %538 : vector<2x8xf32> to vector<2x8x1xf32>
    %540 = vector.broadcast %539 : vector<2x8x1xf32> to vector<2x8x16xf32>
    %541 = arith.subf %537, %540 : vector<2x8x16xf32>
    %542 = math.exp %541 : vector<2x8x16xf32>
    %cst_152 = arith.constant dense<0.000000e+00> : vector<2x8xf32>
    %543 = vector.multi_reduction <add>, %542, %cst_152 [2] : vector<2x8x16xf32> to vector<2x8xf32>
    %544 = vector.shape_cast %543 : vector<2x8xf32> to vector<2x8x1xf32>
    %545 = tpu.reciprocal %544 {approx = true} : vector<2x8x1xf32> -> vector<2x8x1xf32>
    %546 = vector.broadcast %545 : vector<2x8x1xf32> to vector<2x8x16xf32>
    %547 = arith.mulf %542, %546 : vector<2x8x16xf32>
    %548 = arith.truncf %547 : vector<2x8x16xf32> to vector<2x8x16xbf16>
    %549 = arith.truncf %531 : vector<2x16x8xf32> to vector<2x16x8xbf16>
    "tpu.trace_start"() <{level = 10 : i32, message = "bqk,bkd->bqd"}> : () -> ()
    %cst_153 = arith.constant dense<0.000000e+00> : vector<2x8x8xf32>
    %550 = tpu.matmul %548, %549, %cst_153 {dimension_numbers = #tpu.dot_dimension_numbers<[2], [1], [1], [2], [0, 0, 0, 1, 1, 2], [0], [0]>} : vector<2x8x16xbf16>, vector<2x16x8xbf16>, vector<2x8x8xf32> -> vector<2x8x8xf32>
    "tpu.trace_stop"() : () -> ()
    %551 = vector.shape_cast %550 : vector<2x8x8xf32> to vector<16x8xf32>
    %c56_154 = arith.constant 56 : index
    %c0_155 = arith.constant 0 : index
    %552 = vector.load %arg15[%c56_154, %c0_155] : memref<64x64xf32, #tpu.memory_space<vmem>>, vector<8x64xf32>
    %553 = arith.truncf %551 : vector<16x8xf32> to vector<16x8xbf16>
    %554 = arith.truncf %552 : vector<8x64xf32> to vector<8x64xbf16>
    %cst_156 = arith.constant dense<0.000000e+00> : vector<16x64xf32>
    %555 = tpu.matmul %553, %554, %cst_156 {dimension_numbers = #tpu.dot_dimension_numbers<[1], [0], [0], [1], [0, 0, 1, 1], [], []>} : vector<16x8xbf16>, vector<8x64xbf16>, vector<16x64xf32> -> vector<16x64xf32>
    %556 = arith.addf %525, %555 : vector<16x64xf32>
    %c0_157 = arith.constant 0 : index
    %c0_158 = arith.constant 0 : index
    %557 = vector.load %arg16[%c0_157, %c0_158] : memref<1x64xf32, #tpu.memory_space<vmem>>, vector<1x64xf32>
    %558 = vector.broadcast %557 : vector<1x64xf32> to vector<16x64xf32>
    %559 = arith.addf %556, %558 : vector<16x64xf32>
    %560 = arith.addf %289, %559 : vector<16x64xf32>
    %cst_159 = arith.constant dense<0.000000e+00> : vector<16xf32>
    %561 = vector.multi_reduction <add>, %560, %cst_159 [1] : vector<16x64xf32> to vector<16xf32>
    %562 = vector.shape_cast %561 : vector<16xf32> to vector<16x1xf32>
    %cst_160 = arith.constant 6.400000e+01 : f32
    %563 = vector.broadcast %cst_160 : f32 to vector<16x1xf32>
    %564 = arith.divf %562, %563 : vector<16x1xf32>
    %565 = vector.broadcast %564 : vector<16x1xf32> to vector<16x64xf32>
    %566 = arith.subf %560, %565 : vector<16x64xf32>
    %567 = arith.mulf %566, %566 : vector<16x64xf32>
    %cst_161 = arith.constant dense<0.000000e+00> : vector<16xf32>
    %568 = vector.multi_reduction <add>, %567, %cst_161 [1] : vector<16x64xf32> to vector<16xf32>
    %569 = vector.shape_cast %568 : vector<16xf32> to vector<16x1xf32>
    %cst_162 = arith.constant 6.400000e+01 : f32
    %570 = vector.broadcast %cst_162 : f32 to vector<16x1xf32>
    %571 = arith.divf %569, %570 : vector<16x1xf32>
    %572 = vector.broadcast %564 : vector<16x1xf32> to vector<16x64xf32>
    %573 = arith.subf %560, %572 : vector<16x64xf32>
    %cst_163 = arith.constant 9.99999974E-6 : f32
    %574 = vector.broadcast %cst_163 : f32 to vector<16x1xf32>
    %575 = arith.addf %571, %574 : vector<16x1xf32>
    %576 = math.rsqrt %575 : vector<16x1xf32>
    %577 = vector.broadcast %576 : vector<16x1xf32> to vector<16x64xf32>
    %578 = arith.mulf %573, %577 : vector<16x64xf32>
    %c0_164 = arith.constant 0 : index
    %c0_165 = arith.constant 0 : index
    %579 = vector.load %arg17[%c0_164, %c0_165] : memref<1x64xf32, #tpu.memory_space<vmem>>, vector<1x64xf32>
    %580 = vector.broadcast %579 : vector<1x64xf32> to vector<16x64xf32>
    %581 = arith.mulf %578, %580 : vector<16x64xf32>
    %c0_166 = arith.constant 0 : index
    %c0_167 = arith.constant 0 : index
    %582 = vector.load %arg18[%c0_166, %c0_167] : memref<1x64xf32, #tpu.memory_space<vmem>>, vector<1x64xf32>
    %583 = vector.broadcast %582 : vector<1x64xf32> to vector<16x64xf32>
    %584 = arith.addf %581, %583 : vector<16x64xf32>
    %c0_168 = arith.constant 0 : index
    %c0_169 = arith.constant 0 : index
    %585 = vector.load %arg19[%c0_168, %c0_169] : memref<64x128xf32, #tpu.memory_space<vmem>>, vector<64x128xf32>
    %586 = arith.truncf %584 : vector<16x64xf32> to vector<16x64xbf16>
    %587 = arith.truncf %585 : vector<64x128xf32> to vector<64x128xbf16>
    %cst_170 = arith.constant dense<0.000000e+00> : vector<16x128xf32>
    %588 = tpu.matmul %586, %587, %cst_170 {dimension_numbers = #tpu.dot_dimension_numbers<[1], [0], [0], [1], [0, 0, 1, 1], [], []>} : vector<16x64xbf16>, vector<64x128xbf16>, vector<16x128xf32> -> vector<16x128xf32>
    %c0_171 = arith.constant 0 : index
    %c0_172 = arith.constant 0 : index
    %589 = vector.load %arg20[%c0_171, %c0_172] : memref<1x128xf32, #tpu.memory_space<vmem>>, vector<1x128xf32>
    %590 = vector.broadcast %589 : vector<1x128xf32> to vector<16x128xf32>
    %591 = arith.addf %588, %590 : vector<16x128xf32>
    %cst_173 = arith.constant 0.000000e+00 : f32
    %592 = vector.broadcast %cst_173 : f32 to vector<16x128xf32>
    %593 = arith.maximumf %591, %592 : vector<16x128xf32>
    %c0_174 = arith.constant 0 : index
    %c0_175 = arith.constant 0 : index
    %594 = vector.load %arg21[%c0_174, %c0_175] : memref<128x64xf32, #tpu.memory_space<vmem>>, vector<128x64xf32>
    %595 = arith.truncf %593 : vector<16x128xf32> to vector<16x128xbf16>
    %596 = arith.truncf %594 : vector<128x64xf32> to vector<128x64xbf16>
    %cst_176 = arith.constant dense<0.000000e+00> : vector<16x64xf32>
    %597 = tpu.matmul %595, %596, %cst_176 {dimension_numbers = #tpu.dot_dimension_numbers<[1], [0], [0], [1], [0, 0, 1, 1], [], []>} : vector<16x128xbf16>, vector<128x64xbf16>, vector<16x64xf32> -> vector<16x64xf32>
    %c0_177 = arith.constant 0 : index
    %c0_178 = arith.constant 0 : index
    %598 = vector.load %arg22[%c0_177, %c0_178] : memref<1x64xf32, #tpu.memory_space<vmem>>, vector<1x64xf32>
    %599 = vector.broadcast %598 : vector<1x64xf32> to vector<16x64xf32>
    %600 = arith.addf %597, %599 : vector<16x64xf32>
    %601 = arith.addf %584, %600 : vector<16x64xf32>
    %cst_179 = arith.constant dense<0.000000e+00> : vector<16xf32>
    %602 = vector.multi_reduction <add>, %601, %cst_179 [1] : vector<16x64xf32> to vector<16xf32>
    %603 = vector.shape_cast %602 : vector<16xf32> to vector<16x1xf32>
    %cst_180 = arith.constant 6.400000e+01 : f32
    %604 = vector.broadcast %cst_180 : f32 to vector<16x1xf32>
    %605 = arith.divf %603, %604 : vector<16x1xf32>
    %606 = vector.broadcast %605 : vector<16x1xf32> to vector<16x64xf32>
    %607 = arith.subf %601, %606 : vector<16x64xf32>
    %608 = arith.mulf %607, %607 : vector<16x64xf32>
    %cst_181 = arith.constant dense<0.000000e+00> : vector<16xf32>
    %609 = vector.multi_reduction <add>, %608, %cst_181 [1] : vector<16x64xf32> to vector<16xf32>
    %610 = vector.shape_cast %609 : vector<16xf32> to vector<16x1xf32>
    %cst_182 = arith.constant 6.400000e+01 : f32
    %611 = vector.broadcast %cst_182 : f32 to vector<16x1xf32>
    %612 = arith.divf %610, %611 : vector<16x1xf32>
    %613 = vector.broadcast %605 : vector<16x1xf32> to vector<16x64xf32>
    %614 = arith.subf %601, %613 : vector<16x64xf32>
    %cst_183 = arith.constant 9.99999974E-6 : f32
    %615 = vector.broadcast %cst_183 : f32 to vector<16x1xf32>
    %616 = arith.addf %612, %615 : vector<16x1xf32>
    %617 = math.rsqrt %616 : vector<16x1xf32>
    %618 = vector.broadcast %617 : vector<16x1xf32> to vector<16x64xf32>
    %619 = arith.mulf %614, %618 : vector<16x64xf32>
    %c0_184 = arith.constant 0 : index
    %c0_185 = arith.constant 0 : index
    %620 = vector.load %arg23[%c0_184, %c0_185] : memref<1x64xf32, #tpu.memory_space<vmem>>, vector<1x64xf32>
    %621 = vector.broadcast %620 : vector<1x64xf32> to vector<16x64xf32>
    %622 = arith.mulf %619, %621 : vector<16x64xf32>
    %c0_186 = arith.constant 0 : index
    %c0_187 = arith.constant 0 : index
    %623 = vector.load %arg24[%c0_186, %c0_187] : memref<1x64xf32, #tpu.memory_space<vmem>>, vector<1x64xf32>
    %624 = vector.broadcast %623 : vector<1x64xf32> to vector<16x64xf32>
    %625 = arith.addf %622, %624 : vector<16x64xf32>
    %c0_188 = arith.constant 0 : index
    %c0_189 = arith.constant 0 : index
    %626 = vector.load %arg25[%c0_188, %c0_189] : memref<16x64xf32, #tpu.memory_space<vmem>>, vector<16x64xf32>
    tpu.vector_store %arg25[%c0_188, %c0_189], %625 {strides = array<i32>} : memref<16x64xf32, #tpu.memory_space<vmem>>, vector<16x64xf32>,
    return
  }
  func.func @transform_0(%arg0: i32) -> (i32, i32) {
    %c0_i32 = arith.constant 0 : i32
    %c0_i32_0 = arith.constant 0 : i32
    %c0_i32_1 = arith.constant 0 : i32
    return %c0_i32, %c0_i32_0 : i32, i32
  }
  func.func @transform_1(%arg0: i32) -> (i32, i32) {
    %c0_i32 = arith.constant 0 : i32
    %c0_i32_0 = arith.constant 0 : i32
    %c0_i32_1 = arith.constant 0 : i32
    return %c0_i32, %c0_i32_0 : i32, i32
  }
  func.func @transform_2(%arg0: i32) -> (i32, i32, i32) {
    %c0_i32 = arith.constant 0 : i32
    %c0_i32_0 = arith.constant 0 : i32
    %c0_i32_1 = arith.constant 0 : i32
    %c0_i32_2 = arith.constant 0 : i32
    return %c0_i32, %c0_i32_0, %c0_i32_1 : i32, i32, i32
  }
  func.func @transform_3(%arg0: i32) -> (i32, i32, i32) {
    %c0_i32 = arith.constant 0 : i32
    %c0_i32_0 = arith.constant 0 : i32
    %c0_i32_1 = arith.constant 0 : i32
    %c0_i32_2 = arith.constant 0 : i32
    return %c0_i32, %c0_i32_0, %c0_i32_1 : i32, i32, i32
  }
  func.func @transform_4(%arg0: i32) -> (i32, i32) {
    %c0_i32 = arith.constant 0 : i32
    %c0_i32_0 = arith.constant 0 : i32
    %c0_i32_1 = arith.constant 0 : i32
    return %c0_i32, %c0_i32_0 : i32, i32
  }
  func.func @transform_5(%arg0: i32) -> (i32, i32) {
    %c0_i32 = arith.constant 0 : i32
    %c0_i32_0 = arith.constant 0 : i32
    %c0_i32_1 = arith.constant 0 : i32
    return %c0_i32, %c0_i32_0 : i32, i32
  }
  func.func @transform_6(%arg0: i32) -> (i32, i32) {
    %c0_i32 = arith.constant 0 : i32
    %c0_i32_0 = arith.constant 0 : i32
    %c0_i32_1 = arith.constant 0 : i32
    return %c0_i32, %c0_i32_0 : i32, i32
  }
  func.func @transform_7(%arg0: i32) -> (i32, i32) {
    %c0_i32 = arith.constant 0 : i32
    %c0_i32_0 = arith.constant 0 : i32
    %c0_i32_1 = arith.constant 0 : i32
    return %c0_i32, %c0_i32_0 : i32, i32
  }
  func.func @transform_8(%arg0: i32) -> (i32, i32) {
    %c0_i32 = arith.constant 0 : i32
    %c0_i32_0 = arith.constant 0 : i32
    %c0_i32_1 = arith.constant 0 : i32
    return %c0_i32, %c0_i32_0 : i32, i32
  }
  func.func @transform_9(%arg0: i32) -> (i32, i32) {
    %c0_i32 = arith.constant 0 : i32
    %c0_i32_0 = arith.constant 0 : i32
    %c0_i32_1 = arith.constant 0 : i32
    return %c0_i32, %c0_i32_0 : i32, i32
  }
  func.func @transform_10(%arg0: i32) -> (i32, i32) {
    %c0_i32 = arith.constant 0 : i32
    %c0_i32_0 = arith.constant 0 : i32
    %c0_i32_1 = arith.constant 0 : i32
    return %c0_i32, %c0_i32_0 : i32, i32
  }
  func.func @transform_11(%arg0: i32) -> (i32, i32) {
    %c0_i32 = arith.constant 0 : i32
    %c0_i32_0 = arith.constant 0 : i32
    %c0_i32_1 = arith.constant 0 : i32
    return %c0_i32, %c0_i32_0 : i32, i32
  }
  func.func @transform_12(%arg0: i32) -> (i32, i32) {
    %c0_i32 = arith.constant 0 : i32
    %c0_i32_0 = arith.constant 0 : i32
    %c0_i32_1 = arith.constant 0 : i32
    return %c0_i32, %c0_i32_0 : i32, i32
  }
  func.func @transform_13(%arg0: i32) -> (i32, i32) {
    %c0_i32 = arith.constant 0 : i32
    %c0_i32_0 = arith.constant 0 : i32
    %c0_i32_1 = arith.constant 0 : i32
    return %c0_i32, %c0_i32_0 : i32, i32
  }
  func.func @transform_14(%arg0: i32) -> (i32, i32) {
    %c0_i32 = arith.constant 0 : i32
    %c0_i32_0 = arith.constant 0 : i32
    %c0_i32_1 = arith.constant 0 : i32
    return %c0_i32, %c0_i32_0 : i32, i32
  }
  func.func @transform_15(%arg0: i32) -> (i32, i32) {
    %c0_i32 = arith.constant 0 : i32
    %c0_i32_0 = arith.constant 0 : i32
    %c0_i32_1 = arith.constant 0 : i32
    return %c0_i32, %c0_i32_0 : i32, i32
  }
  func.func @transform_16(%arg0: i32) -> (i32, i32) {
    %c0_i32 = arith.constant 0 : i32
    %c0_i32_0 = arith.constant 0 : i32
    %c0_i32_1 = arith.constant 0 : i32
    return %c0_i32, %c0_i32_0 : i32, i32
  }
  func.func @transform_17(%arg0: i32) -> (i32, i32) {
    %c0_i32 = arith.constant 0 : i32
    %c0_i32_0 = arith.constant 0 : i32
    %c0_i32_1 = arith.constant 0 : i32
    return %c0_i32, %c0_i32_0 : i32, i32
  }
  func.func @transform_18(%arg0: i32) -> (i32, i32) {
    %c0_i32 = arith.constant 0 : i32
    %c0_i32_0 = arith.constant 0 : i32
    %c0_i32_1 = arith.constant 0 : i32
    return %c0_i32, %c0_i32_0 : i32, i32
  }
  func.func @transform_19(%arg0: i32) -> (i32, i32) {
    %c0_i32 = arith.constant 0 : i32
    %c0_i32_0 = arith.constant 0 : i32
    %c0_i32_1 = arith.constant 0 : i32
    return %c0_i32, %c0_i32_0 : i32, i32
  }
  func.func @transform_20(%arg0: i32) -> (i32, i32) {
    %c0_i32 = arith.constant 0 : i32
    %c0_i32_0 = arith.constant 0 : i32
    %c0_i32_1 = arith.constant 0 : i32
    return %c0_i32, %c0_i32_0 : i32, i32
  }
  func.func @transform_21(%arg0: i32) -> (i32, i32) {
    %c0_i32 = arith.constant 0 : i32
    %c0_i32_0 = arith.constant 0 : i32
    %c0_i32_1 = arith.constant 0 : i32
    return %c0_i32, %c0_i32_0 : i32, i32
  }
  func.func @transform_22(%arg0: i32) -> (i32, i32) {
    %c0_i32 = arith.constant 0 : i32
    %c0_i32_0 = arith.constant 0 : i32
    %c0_i32_1 = arith.constant 0 : i32
    return %c0_i32, %c0_i32_0 : i32, i32
  }
  func.func @transform_23(%arg0: i32) -> (i32, i32) {
    %c0_i32 = arith.constant 0 : i32
    %c0_i32_0 = arith.constant 0 : i32
    %c0_i32_1 = arith.constant 0 : i32
    return %c0_i32, %c0_i32_0 : i32, i32
  }
  func.func @transform_24(%arg0: i32) -> (i32, i32) {
    %c0_i32 = arith.constant 0 : i32
    %c0_i32_0 = arith.constant 0 : i32
    %c0_i32_1 = arith.constant 0 : i32
    return %c0_i32, %c0_i32_0 : i32, i32
  }
}

</mosaic_0001>

<bundles_post_ra>
// kernel: seq2seq_forward.6
= control target key start
LH: loop header
LB: loop body
LE: loop exit
PB: predicated region body
PF: predicated region fallthrough
CT: control target
= control target key end

     0   :  { %vm34_vm0 = vcmask 392192   ;;  %vm60_vm1 = vcmask 523264   ;;  %s140_s1 = inlined_call_operand.vmem [shape: f32[48,64], index: 1, kind: input, shape index: {}]   ;;  %s141_s2 = inlined_call_operand.vmem [shape: f32[1,64], index: 2, kind: input, shape index: {}]   ;;  %s142_s0 = inlined_call_operand.vmem [shape: f32[32,48], index: 0, kind: input, shape index: {}]   ;;  %s143_s3 = inlined_call_operand.vmem [shape: f32[32,64], index: 3, kind: output, shape index: {}]  }
   0x1   :  { %v23_v0 = vld [vmem:[%s140_s1 + $0x20] sm:$0xff]  ;;  %v24_v1 = vld [vmem:[%s140_s1 + $0x28] sm:$0xff]  ;;  %v21_v2 = vld [vmem:[%s140_s1 + $0x10] sm:$0xff] }
   0x2   :  { %v29_v3 = vpack.c.bf16 %v24_v1, %v23_v0  ;;  %v22_v4 = vld [vmem:[%s140_s1 + $0x18] sm:$0xff]  ;;  %v19_v6 = vld [vmem:[%s140_s1] sm:$0xff]  ;;  %v20_v7 = vld [vmem:[%s140_s1 + $0x8] sm:$0xff] }
   0x3   :  { %v28_v5 = vpack.c.bf16 %v22_v4, %v21_v2  ;;  %v15_v8 = vld [vmem:[%s142_s0] sm:$0xff]  ;;  %v27_v9 = vpack.c.bf16 %v20_v7, %v19_v6  ;;  %v16_v10 = vld [vmem:[%s142_s0 + $0x8] sm:$0xff]  ;;  %v17_v11 = vld [vmem:[%s142_s0 + $0x10] sm:$0xff] }
   0x4   :  { %46 = vmatpush.bf16.msra.mxu0 %v29_v3  ;;  %71 = vmatpush.bf16.msra.mxu1 %v29_v3  ;;  %v18_v12 = vld [vmem:[%s142_s0 + $0x18] sm:$0xff]  ;;  %v25_v13 = vpack.c.bf16 %v16_v10, %v15_v8  ;;  %v74_v15 = vld [vmem:[%s141_s2] ss:$0 sm:$0xff] }
   0x5   :  { %v26_v14 = vpack.c.bf16 %v18_v12, %v17_v11 }
   0x8   :  { %47 = vmatpush.bf16.msra.mxu0 %v28_v5  ;;  %72 = vmatpush.bf16.msra.mxu1 %v28_v5 }
   0xc   :  { %48 = vmatpush.bf16.msra.mxu0 %v27_v9  ;;  %73 = vmatpush.bf16.msra.mxu1 %v27_v9 }
   0xf   :  { %69 = vmatmul.msk.bf16.vlgmr.msra.gmra.mxu0 %vm34_vm0, %v25_v13  ;;  %70 = vmatmul.msk.bf16.vlgmr.msra.gmra.mxu1 %vm34_vm0, %v26_v14 }
  0x8c   :  { %v50_v16 = vpop.f32.mrf.mxu0  ;;  %v55_v17 = vpop.f32.mrf.mxu1 }
  0x8d   :  { %v51_v18 = vadd.f32 %v74_v15, %v50_v16  ;;  %v56_v19 = vadd.f32 %v74_v15, %v55_v17 }
  0x8f   :  { %61 = vst.msk [vmem:[%s143_s3] sm:$0xff] %vm60_vm1, %v51_v18 }
  0x90   :  { %63 = vst.msk [vmem:[%s143_s3 + $0x10] sm:$0xff] %vm60_vm1, %v56_v19 }
  0x94   :  { %v52_v20 = vpop.f32.mrf.mxu0  ;;  %v57_v21 = vpop.f32.mrf.mxu1 }
  0x95   :  { %v53_v22 = vadd.f32 %v74_v15, %v52_v20  ;;  %v58_v23 = vadd.f32 %v74_v15, %v57_v21 }
  0x97   :  { %62 = vst.msk [vmem:[%s143_s3 + $0x8] sm:$0xff] %vm60_vm1, %v53_v22 }
  0x98   :  { %64 = vst.msk [vmem:[%s143_s3 + $0x18] sm:$0xff] %vm60_vm1, %v58_v23 }

// kernel: seq2seq_forward.11
= control target key start
LH: loop header
LB: loop body
LE: loop exit
PB: predicated region body
PF: predicated region fallthrough
CT: control target
= control target key end

     0   :  { %8 = vsyncpa [#allocation3], 0  ;;  %s102_s15 = smov [#allocation2]   ;;  %s162_s0 = inlined_call_operand.vmem [shape: f32[16,64], index: 0, kind: input, shape index: {}]   ;;  %s163_s1 = inlined_call_operand.vmem [shape: f32[64,128], index: 1, kind: input, shape index: {}]   ;;  %s164_s2 = inlined_call_operand.hbm [shape: f32[1,128], index: 2, kind: input, shape index: {}]   ;;  %s165_s3 = inlined_call_operand.vmem [shape: f32[16,128], index: 3, kind: output, shape index: {}]  }
   0x1   :  { %s18_s14 = sshll.u32 %s164_s2, 4  ;;  %s20_s16 = sshll.u32 %s102_s15, 4  ;;  %s19_s14 = int_to_ptr.hbm [resolvable:$true] %s18_s14  ;;  %s21_s16 = int_to_ptr.vmem [resolvable:$true] %s20_s16 }
   0x2   :  { %23 = dma.hbm_to_vmem [thread:$0]  %s19_s14, 16, %s21_s16, [#allocation3]  }
   0x3   :  { %100 = dma.done.wait [#allocation3], 16  }
   0x4   :  { %101 = vsyncadd [#allocation3], 4294967280  ;;  %v37_v0 = vld [vmem:[%s163_s1 + $0x30] sm:$0xff]  ;;  %v38_v1 = vld [vmem:[%s163_s1 + $0x38] sm:$0xff]  ;;  %vm48_vm0 = vcmask 523264  }
   0x5   :  { %v35_v2 = vld [vmem:[%s163_s1 + $0x20] sm:$0xff]  ;;  %v43_v3 = vpack.c.bf16 %v38_v1, %v37_v0  ;;  %v36_v4 = vld [vmem:[%s163_s1 + $0x28] sm:$0xff]  ;;  %v33_v6 = vld [vmem:[%s163_s1 + $0x10] sm:$0xff] }
   0x6   :  { %v42_v5 = vpack.c.bf16 %v36_v4, %v35_v2  ;;  %v34_v7 = vld [vmem:[%s163_s1 + $0x18] sm:$0xff]  ;;  %v31_v9 = vld [vmem:[%s163_s1] sm:$0xff]  ;;  %v32_v10 = vld [vmem:[%s163_s1 + $0x8] sm:$0xff] }
   0x7   :  { %56 = vmatpush.bf16.msra.mxu0 %v43_v3  ;;  %v41_v8 = vpack.c.bf16 %v34_v7, %v33_v6  ;;  %v40_v11 = vpack.c.bf16 %v32_v10, %v31_v9  ;;  %v29_v12 = vld [vmem:[%s162_s0] sm:$0xff]  ;;  %v30_v13 = vld [vmem:[%s162_s0 + $0x8] sm:$0xff] }
   0x8   :  { %v39_v14 = vpack.c.bf16 %v30_v13, %v29_v12  ;;  %v75_v15 = vld [vmem:[#allocation2] ss:$0 sm:$0xff] }
   0xb   :  { %57 = vmatpush.bf16.msra.mxu0 %v42_v5 }
   0xf   :  { %58 = vmatpush.bf16.msra.mxu0 %v41_v8 }
  0x13   :  { %59 = vmatpush.bf16.msra.mxu0 %v40_v11 }
  0x16   :  { %73 = vmatmul.msk.bf16.vlgmr.msra.gmra.mxu0 %vm48_vm0, %v39_v14 }
  0x93   :  { %v61_v16 = vpop.f32.mrf.mxu0 }
  0x94   :  { %v62_v17 = vadd.f32 %v75_v15, %v61_v16 }
  0x96   :  { %66 = vst [vmem:[%s165_s3] sm:$0xff] %v62_v17 }
  0x9b   :  { %v63_v18 = vpop.f32.mrf.mxu0 }
  0x9c   :  { %v64_v19 = vadd.f32 %v75_v15, %v63_v18 }
  0x9e   :  { %67 = vst [vmem:[%s165_s3 + $0x8] sm:$0xff] %v64_v19 }
  0x9f   :  { %72 = vsyncpa [#allocation3], 1 }

// kernel: seq2seq_forward.7
= control target key start
LH: loop header
LB: loop body
LE: loop exit
PB: predicated region body
PF: predicated region fallthrough
CT: control target
= control target key end

     0   :  { %vm81_vm0 = vcmask 523264   ;;  %s2191_s17 = smov 64   ;;  %vm137_vm1 = vcmask 64512   ;;  %vm189_vm2 = vcmask 130048   ;;  %s2193_s16 = smov 120   ;;  %vm462_vm3 = vcmask 1043456   ;;  %s2874_s1 = inlined_call_operand.vmem [shape: f32[64,192], index: 1, kind: input, shape index: {}]   ;;  %s2875_s0 = inlined_call_operand.vmem [shape: f32[32,64], index: 0, kind: input, shape index: {}]   ;;  %s2876_s2 = inlined_call_operand.vmem [shape: f32[1,192], index: 2, kind: input, shape index: {}]   ;;  %s2877_s3 = inlined_call_operand.vmem [shape: f32[64,64], index: 3, kind: input, shape index: {}]   ;;  %s2878_s4 = inlined_call_operand.vmem [shape: f32[1,64], index: 4, kind: input, shape index: {}]   ;;  %s2879_s5 = inlined_call_operand.vmem [shape: f32[1,64], index: 5, kind: input, shape index: {}]   ;;  %s2880_s6 = inlined_call_operand.vmem [shape: f32[1,64], index: 6, kind: input, shape index: {}]   ;;  %s2881_s8 = inlined_call_operand.vmem [shape: f32[1,128], index: 8, kind: input, shape index: {}]   ;;  %s2882_s7 = inlined_call_operand.vmem [shape: f32[64,128], index: 7, kind: input, shape index: {}]   ;;  %s2883_s9 = inlined_call_operand.vmem [shape: f32[128,64], index: 9, kind: input, shape index: {}]   ;;  %s2884_s10 = inlined_call_operand.vmem [shape: f32[1,64], index: 10, kind: input, shape index: {}]   ;;  %s2885_s11 = inlined_call_operand.vmem [shape: f32[1,64], index: 11, kind: input, shape index: {}]   ;;  %s2886_s12 = inlined_call_operand.vmem [shape: f32[1,64], index: 12, kind: input, shape index: {}]   ;;  %s2887_s13 = inlined_call_operand.vmem [shape: f32[32,64], index: 13, kind: output, shape index: {}]  }
   0x1   :  { %v61_v0 = vld [vmem:[%s2874_s1 + $0x60] sm:$0xff]  ;;  %v63_v1 = vld [vmem:[%s2874_s1 + $0x70] sm:$0xff]  ;;  %v46_v13 = vld [vmem:[%s2875_s0 + $0x8] sm:$0xff]  ;;  %s2194_s18 = smov 48   ;;  %s2195_s19 = smov 40  }
   0x2   :  { %v57_v2 = vld [vmem:[%s2874_s1 + $0x40] sm:$0xff]  ;;  %v73_v3 = vpack.c.bf16 %v63_v1, %v61_v0  ;;  %v59_v4 = vld [vmem:[%s2874_s1 + $0x50] sm:$0xff]  ;;  %v48_v16 = vld [vmem:[%s2875_s0 + $0x18] sm:$0xff]  ;;  %s2196_s20 = smov 112   ;;  %s2197_s21 = smov 104  }
   0x3   :  { %v71_v5 = vpack.c.bf16 %v59_v4, %v57_v2  ;;  %v53_v6 = vld [vmem:[%s2874_s1 + $0x20] sm:$0xff]  ;;  %v55_v7 = vld [vmem:[%s2874_s1 + $0x30] sm:$0xff]  ;;  %v62_v38 = vld [vmem:[%s2874_s1 + $0x68] sm:$0xff]  ;;  %s2198_s24 = smov 96   ;;  %s2199_s25 = smov 32  }
   0x4   :  { %92 = vmatpush.bf16.msra.mxu0 %v73_v3  ;;  %v69_v8 = vpack.c.bf16 %v55_v7, %v53_v6  ;;  %v49_v9 = vld [vmem:[%s2874_s1] sm:$0xff]  ;;  %v51_v10 = vld [vmem:[%s2874_s1 + $0x10] sm:$0xff]  ;;  %v64_v39 = vld [vmem:[%s2874_s1 + $0x78] sm:$0xff]  ;;  %s2200_s30 = smov 24   ;;  %s2201_s14 = smov 88  }
   0x5   :  { %v67_v11 = vpack.c.bf16 %v51_v10, %v49_v9  ;;  %v45_v12 = vld [vmem:[%s2875_s0] sm:$0xff]  ;;  %v47_v15 = vld [vmem:[%s2875_s0 + $0x10] sm:$0xff]  ;;  %v58_v40 = vld [vmem:[%s2874_s1 + $0x48] sm:$0xff]  ;;  %v74_v41 = vpack.c.bf16 %v64_v39, %v62_v38 }
   0x6   :  { %v65_v14 = vpack.c.bf16 %v46_v13, %v45_v12  ;;  %v66_v17 = vpack.c.bf16 %v48_v16, %v47_v15  ;;  %v2318_v18 = vld [vmem:[%s2876_s2] sm:$0x3]  ;;  %v60_v42 = vld [vmem:[%s2874_s1 + $0x58] sm:$0xff]  ;;  %v54_v48 = vld [vmem:[%s2874_s1 + $0x28] sm:$0xff]  ;;  %s2204_s2 = smov 8  }
   0x7   :  { %v77_v20 = vperm.slane %v2318_v18, 0  ;;  %111 = vmatpush.bf16.msra.mxu1 %v74_v41  ;;  %v72_v43 = vpack.c.bf16 %v60_v42, %v58_v40  ;;  %v56_v49 = vld [vmem:[%s2874_s1 + $0x38] sm:$0xff]  ;;  %v50_v51 = vld [vmem:[%s2874_s1 + $0x8] sm:$0xff]  ;;  %v78_v2 = vperm.slane %v2318_v18, 1 }
   0x8   :  { %93 = vmatpush.bf16.msra.mxu0 %v71_v5  ;;  %v70_v50 = vpack.c.bf16 %v56_v49, %v54_v48  ;;  %v52_v52 = vld [vmem:[%s2874_s1 + $0x18] sm:$0xff]  ;;  %s2192_s1 = smov 56  }
   0x9   :  { %v68_v53 = vpack.c.bf16 %v52_v52, %v50_v51 }
   0xb   :  { %112 = vmatpush.bf16.msra.mxu1 %v72_v43 }
   0xc   :  { %94 = vmatpush.bf16.msra.mxu0 %v69_v8 }
   0xf   :  { %113 = vmatpush.bf16.msra.mxu1 %v70_v50 }
  0x10   :  { %95 = vmatpush.bf16.msra.mxu0 %v67_v11 }
  0x13   :  { %1964 = vmatmul.msk.bf16.vlgmr.msra.gmra.mxu0 %vm81_vm0, %v65_v14  ;;  %114 = vmatpush.bf16.msra.mxu1 %v68_v53 }
  0x16   :  { %1966 = vmatmul.msk.bf16.vlgmr.msra.gmra.mxu1 %vm81_vm0, %v65_v14 }
  0x23   :  { %1965 = vmatmul.msk.bf16.gmra.mxu0 %vm81_vm0, %v66_v17 }
  0x26   :  { %1967 = vmatmul.msk.bf16.gmra.mxu1 %vm81_vm0, %v66_v17 }
  0x90   :  { %v97_v19 = vpop.f32.mrf.mxu0 }
  0x91   :  { %v98_v21 = vadd.f32 %v97_v19, %v77_v20 }
  0x93   :  { %v126_v23 = vpack.c.bf16 %v98_v21, %v98_v21  ;;  %v116_v3 = vpop.f32.mrf.mxu1 }
  0x94   :  { %v117_v4 = vadd.f32 %v116_v3, %v78_v2 }
  0x95   :  { %v132_v26 = vunpack.c.l.b16 %v126_v23 }
  0x96   :  { %v238_v5 = vpack.c.bf16 %v117_v4, %v117_v4 }
  0x98   :  { %v99_v22 = vpop.f32.mrf.mxu0  ;;  %v249_v8 = vunpack.c.l.b16 %v238_v5 }
  0x99   :  { %v100_v24 = vadd.f32 %v99_v22, %v77_v20 }
  0x9b   :  { %v127_v25 = vpack.c.bf16 %v100_v24, %v100_v24  ;;  %v118_v6 = vpop.f32.mrf.mxu1 }
  0x9c   :  { %v119_v7 = vadd.f32 %v118_v6, %v78_v2 }
  0x9d   :  { %v133_v27 = vunpack.c.l.b16 %v127_v25 }
  0x9e   :  { %v239_v9 = vpack.c.bf16 %v119_v7, %v119_v7  ;;  %v298_v7 = vld [vmem:[%s2877_s3] sm:$0xff] }
  0x9f   :  { %v2321_v28 = vpack.c.b16 %v133_v27, %v132_v26 }
  0xa0   :  { %v102_v29 = vpop.f32.mrf.mxu0  ;;  %v250_v10 = vunpack.c.l.b16 %v239_v9 }
  0xa1   :  { %135 = vrot.lane.b32.xlu0 %v2321_v28, %s2191_s17  ;;  %v103_v30 = vadd.f32 %v102_v29, %v77_v20 }
  0xa2   :  { %v2366_v11 = vpack.c.b16 %v250_v10, %v249_v8  ;;  %v301_v8 = vpack.c.bf16 %v298_v7, %v298_v7 }
  0xa3   :  { %v128_v31 = vpack.c.bf16 %v103_v30, %v103_v30 }
  0xa4   :  { %263 = vmatpush.bf16.msra.mxu2 %v2366_v11  ;;  %v492_v9 = vsel %vm462_vm3, %v301_v8, 0 }
  0xa5   :  { %v160_v34 = vunpack.c.l.b16 %v128_v31 }
  0xa8   :  { %v104_v32 = vpop.f32.mrf.mxu0 }
  0xa9   :  { %v105_v33 = vadd.f32 %v104_v32, %v77_v20 }
  0xab   :  { %v129_v35 = vpack.c.bf16 %v105_v33, %v105_v33 }
  0xad   :  { %v161_v36 = vunpack.c.l.b16 %v129_v35  ;;  %v121_v35 = vpop.f32.mrf.mxu1 }
  0xaf   :  { %v2324_v37 = vpack.c.b16 %v161_v36, %v160_v34  ;;  %v122_v36 = vadd.f32 %v121_v35, %v78_v2 }
  0xb1   :  { %163 = vrot.lane.b32.xlu0 %v2324_v37, %s2191_s17  ;;  %v240_v40 = vpack.c.bf16 %v122_v36, %v122_v36  ;;  %s2203_s17 = smov 16  }
  0xb3   :  { %v277_v43 = vunpack.c.l.b16 %v240_v40 }
  0xb5   :  { %v123_v38 = vpop.f32.mrf.mxu1 }
  0xb6   :  { %v124_v39 = vadd.f32 %v123_v38, %v78_v2 }
  0xb8   :  { %v241_v41 = vpack.c.bf16 %v124_v39, %v124_v39 }
 0x113   :  { %v136_v44 = vpop.permute.xlu0 %135 }
 0x114   :  { %v142_v45 = vsel %vm137_vm1, %v136_v44, 0  ;;  %v278_v44 = vunpack.c.l.b16 %v241_v41 }
 0x115   :  { %151 = vmatpush.bf16.xpose.msra.mxu3 %v142_v45 }
 0x116   :  { %v2380_v45 = vpack.c.b16 %v278_v44, %v277_v43 }
 0x11c   :  { %1968 = vmatmul.msk.bf16.vlgmr.msra.gmra.mxu3 %vm137_vm1, %v2321_v28 }
 0x123   :  { %v164_v46 = vpop.permute.xlu0 %163 }
 0x124   :  { %v169_v47 = vsel %vm137_vm1, %v164_v46, 0 }
 0x125   :  { %178 = vmatpush.bf16.xpose.msrb.mxu3 %v169_v47 }
 0x12c   :  { %1969 = vmatmul.msk.bf16.vlgmr.msrb.gmra.mxu3 %vm137_vm1, %v2324_v37 }
 0x12d   :  { %291 = vmatpush.bf16.msra.mxu3 %v2380_v45 }
 0x19f   :  { %v153_v54 = vpop.f32.mrf.mxu3 }
 0x1a0   :  { %v185_v55 = vmul.f32 0.35355338, %v153_v54 }
 0x1a2   :  { %v190_v56 = vsel %vm189_vm2, %v185_v55, -inf }
 0x1a3   :  { %191 = vmax.xlane.f32.xlu1 %v190_v56 }
 0x1a7   :  { %v155_v57 = vpop.f32.mrf.mxu3 }
 0x1a8   :  { %v186_v58 = vmul.f32 0.35355338, %v155_v57 }
 0x1aa   :  { %v193_v59 = vsel %vm189_vm2, %v186_v58, -inf }
 0x1ab   :  { %194 = vmax.xlane.f32.xlu1 %v193_v59 }
 0x1af   :  { %v180_v60 = vpop.f32.mrf.mxu3 }
 0x1b0   :  { %v187_v61 = vmul.f32 0.35355338, %v180_v60 }
 0x1b2   :  { %v196_v62 = vsel %vm189_vm2, %v187_v61, -inf }
 0x1b3   :  { %197 = vmax.xlane.f32.xlu2 %v196_v62 }
 0x1b7   :  { %v182_v63 = vpop.f32.mrf.mxu3 }
 0x1b8   :  { %v188_v0 = vmul.f32 0.35355338, %v182_v63 }
 0x1ba   :  { %v199_v1 = vsel %vm189_vm2, %v188_v0, -inf }
 0x1bb   :  { %200 = vmax.xlane.f32.xlu2 %v199_v1 }
 0x1d3   :  { %304 = vrot.lane.b32.xlu2 %v2321_v28, %s2192_s1 }
 0x216   :  { %v192_v12 = vpop.xlane.xlu1 %191 }
 0x217   :  { %v202_v13 = vsub.f32 %v185_v55, %v192_v12 }
 0x219   :  { %v206_v14 = vmul.f32 1.442695, %v202_v13 }
 0x21b   :  { %2041 = vpow2.f32 %v206_v14 }
 0x21e   :  { %v195_v15 = vpop.xlane.xlu1 %194 }
 0x21f   :  { %v203_v16 = vsub.f32 %v186_v58, %v195_v15 }
 0x221   :  { %v2042_v17 = vpop.eup %2041  ;;  %v208_v18 = vmul.f32 1.442695, %v203_v16 }
 0x222   :  { %v214_v19 = vsel %vm189_vm2, %v2042_v17, 0.0 }
 0x223   :  { %2043 = vpow2.f32 %v208_v18  ;;  %215 = vadd.xlane.f32.xlu0 %v214_v19 }
 0x226   :  { %v198_v20 = vpop.xlane.xlu2 %197 }
 0x227   :  { %v204_v21 = vsub.f32 %v187_v61, %v198_v20 }
 0x229   :  { %v2044_v22 = vpop.eup %2043  ;;  %v210_v23 = vmul.f32 1.442695, %v204_v21 }
 0x22a   :  { %v217_v24 = vsel %vm189_vm2, %v2044_v22, 0.0 }
 0x22b   :  { %2045 = vpow2.f32 %v210_v23  ;;  %218 = vadd.xlane.f32.xlu1 %v217_v24 }
 0x22e   :  { %v201_v25 = vpop.xlane.xlu2 %200 }
 0x22f   :  { %v205_v26 = vsub.f32 %v188_v0, %v201_v25 }
 0x231   :  { %v2046_v27 = vpop.eup %2045  ;;  %v212_v29 = vmul.f32 1.442695, %v205_v26 }
 0x232   :  { %v220_v30 = vsel %vm189_vm2, %v2046_v27, 0.0 }
 0x233   :  { %2047 = vpow2.f32 %v212_v29  ;;  %221 = vadd.xlane.f32.xlu2 %v220_v30 }
 0x236   :  { %v305_v31 = vpop.permute.xlu2 %304 }
 0x237   :  { %v310_v32 = vsel %vm137_vm1, %v305_v31, 0 }
 0x238   :  { %319 = vmatpush.bf16.xpose.msrb.mxu2 %v310_v32 }
 0x239   :  { %v2048_v33 = vpop.eup %2047 }
 0x23a   :  { %v223_v34 = vsel %vm189_vm2, %v2048_v33, 0.0 }
 0x23b   :  { %224 = vadd.xlane.f32.xlu1 %v223_v34 }
 0x24b   :  { %302 = vrot.lane.b32.xlu2 %v2321_v28, %s2193_s16 }
 0x253   :  { %326 = vrot.lane.b32.xlu2 %v2324_v37, %s2193_s16 }
 0x254   :  { %328 = vrot.lane.b32.xlu1 %v2324_v37, %s2192_s1 }
 0x296   :  { %v216_v42 = vpop.xlane.xlu0 %215 }
 0x297   :  { %2049 = vrcp.f32 %v216_v42 }
 0x29d   :  { %v2050_v47 = vpop.eup %2049 }
 0x29e   :  { %v219_v46 = vpop.xlane.xlu1 %218  ;;  %v230_v48 = vmul.f32 %v2050_v47, %v2042_v17 }
 0x29f   :  { %2051 = vrcp.f32 %v219_v46 }
 0x2a0   :  { %v234_v52 = vpack.c.bf16 %v230_v48, %v230_v48 }
 0x2a2   :  { %v244_v54 = vunpack.c.l.b16 %v234_v52 }
 0x2a5   :  { %v2052_v49 = vpop.eup %2051 }
 0x2a6   :  { %v222_v50 = vpop.xlane.xlu2 %221  ;;  %v231_v51 = vmul.f32 %v2052_v49, %v2044_v22 }
 0x2a7   :  { %2053 = vrcp.f32 %v222_v50 }
 0x2a8   :  { %v235_v53 = vpack.c.bf16 %v231_v51, %v231_v51 }
 0x2aa   :  { %v245_v55 = vunpack.c.l.b16 %v235_v53 }
 0x2ac   :  { %v246_v56 = vpack.c.b16 %v245_v55, %v244_v54 }
 0x2ad   :  { %v2054_v58 = vpop.eup %2053 }
 0x2ae   :  { %v225_v57 = vpop.xlane.xlu1 %224  ;;  %1970 = vmatmul.msk.bf16.vlgmr.msra.gmra.mxu2 %vm189_vm2, %v246_v56  ;;  %v232_v59 = vmul.f32 %v2054_v58, %v2046_v27  ;;  %v303_v3 = vpop.permute.xlu2 %302 }
 0x2af   :  { %2055 = vrcp.f32 %v225_v57 }
 0x2b0   :  { %v236_v61 = vpack.c.bf16 %v232_v59, %v232_v59 }
 0x2b2   :  { %v272_v0 = vunpack.c.l.b16 %v236_v61 }
 0x2b5   :  { %v2056_v60 = vpop.eup %2055 }
 0x2b6   :  { %v233_v62 = vmul.f32 %v2056_v60, %v2048_v33  ;;  %v327_v6 = vpop.permute.xlu2 %326 }
 0x2b8   :  { %v237_v63 = vpack.c.bf16 %v233_v62, %v233_v62 }
 0x2ba   :  { %v273_v1 = vunpack.c.l.b16 %v237_v63 }
 0x2bc   :  { %v274_v2 = vpack.c.b16 %v273_v1, %v272_v0 }
 0x2be   :  { %1971 = vmatmul.msk.bf16.vlgmr.msra.gmra.mxu3 %vm189_vm2, %v274_v2  ;;  %1972 = vmatmul.msk.bf16.vlgmr.msrb.gmra.mxu2 %vm137_vm1, %v303_v3 }
 0x2c6   :  { %v329_v4 = vpop.permute.xlu1 %328 }
 0x2c7   :  { %v334_v5 = vsel %vm137_vm1, %v329_v4, 0 }
 0x2c8   :  { %343 = vmatpush.bf16.xpose.msrb.mxu3 %v334_v5 }
 0x2cf   :  { %1973 = vmatmul.msk.bf16.vlgmr.msrb.gmra.mxu3 %vm137_vm1, %v327_v6 }
 0x2d0   :  { %501 = vmatpush.bf16.msra.mxu3 %v492_v9 }
 0x331   :  { %v265_v10 = vpop.f32.mrf.mxu2 }
 0x339   :  { %v267_v12 = vpop.f32.mrf.mxu2 }
 0x33a   :  { %v299_v13 = vpack.c.bf16 %v267_v12, %v265_v10 }
 0x33c   :  { %1978 = vmatmul.msk.bf16.vlgmr.msra.gmra.mxu3 %vm137_vm1, %v299_v13 }
 0x341   :  { %v293_v14 = vpop.f32.mrf.mxu3  ;;  %v321_v15 = vpop.f32.mrf.mxu2 }
 0x342   :  { %v350_v16 = vmul.f32 0.35355338, %v321_v15 }
 0x344   :  { %v354_v17 = vsel %vm189_vm2, %v350_v16, -inf }
 0x345   :  { %355 = vmax.xlane.f32.xlu1 %v354_v17 }
 0x349   :  { %v295_v18 = vpop.f32.mrf.mxu3  ;;  %v323_v19 = vpop.f32.mrf.mxu2 }
 0x34a   :  { %v300_v20 = vpack.c.bf16 %v295_v18, %v293_v14  ;;  %v351_v21 = vmul.f32 0.35355338, %v323_v19 }
 0x34c   :  { %1979 = vmatmul.msk.bf16.gmra.mxu3 %vm137_vm1, %v300_v20  ;;  %v357_v22 = vsel %vm189_vm2, %v351_v21, -inf }
 0x34d   :  { %358 = vmax.xlane.f32.xlu0 %v357_v22  ;;  %v452_v22 = vld [vmem:[%s2877_s3 + $0x8] sm:$0xff] }
 0x352   :  { %v345_v23 = vpop.f32.mrf.mxu3 }
 0x353   :  { %v352_v24 = vmul.f32 0.35355338, %v345_v23  ;;  %v455_v23 = vpack.c.bf16 %v452_v22, %v452_v22 }
 0x355   :  { %v360_v25 = vsel %vm189_vm2, %v352_v24, -inf }
 0x356   :  { %361 = vmax.xlane.f32.xlu2 %v360_v25 }
 0x35a   :  { %v347_v26 = vpop.f32.mrf.mxu3 }
 0x35b   :  { %v353_v27 = vmul.f32 0.35355338, %v347_v26 }
 0x35d   :  { %v363_v29 = vsel %vm189_vm2, %v353_v27, -inf }
 0x35e   :  { %407 = vrot.lane.b32.xlu1 %v2366_v11, %s2193_s16 }
 0x361   :  { %515 = vrot.lane.b32.xlu0 %v2321_v28, %s2194_s18 }
 0x366   :  { %539 = vrot.lane.b32.xlu1 %v2324_v37, %s2194_s18  ;;  %s2205_s18 = smov 72  }
 0x36e   :  { %432 = vrot.lane.b32.xlu2 %v2380_v45, %s2193_s16  ;;  %701 = vrot.lane.b32.xlu1 %v2321_v28, %s2195_s19  ;;  %s2202_s16 = smov 80  }
 0x376   :  { %537 = vrot.lane.b32.xlu2 %v2324_v37, %s2196_s20 }
 0x38b   :  { %364 = vmax.xlane.f32.xlu0 %v363_v29 }
 0x39f   :  { %513 = vrot.lane.b32.xlu0 %v2321_v28, %s2196_s20 }
 0x3b8   :  { %v356_v30 = vpop.xlane.xlu1 %355 }
 0x3b9   :  { %v366_v31 = vsub.f32 %v350_v16, %v356_v30 }
 0x3bb   :  { %v370_v32 = vmul.f32 1.442695, %v366_v31 }
 0x3bd   :  { %2057 = vpow2.f32 %v370_v32 }
 0x3c0   :  { %v359_v33 = vpop.xlane.xlu0 %358 }
 0x3c1   :  { %v367_v34 = vsub.f32 %v351_v21, %v359_v33 }
 0x3c3   :  { %v372_v35 = vmul.f32 1.442695, %v367_v34  ;;  %v2058_v36 = vpop.eup %2057 }
 0x3c4   :  { %v378_v38 = vsel %vm189_vm2, %v2058_v36, 0.0 }
 0x3c5   :  { %2059 = vpow2.f32 %v372_v35  ;;  %v2434_v35 = vpop.f32.mrf.mxu3 }
 0x3c9   :  { %v362_v39 = vpop.xlane.xlu2 %361  ;;  %379 = vadd.xlane.f32.xlu0 %v378_v38 }
 0x3ca   :  { %v368_v40 = vsub.f32 %v352_v24, %v362_v39  ;;  %v464_v24 = vsel %vm462_vm3, %v455_v23, 0 }
 0x3cb   :  { %v2060_v42 = vpop.eup %2059  ;;  %473 = vmatpush.bf16.msra.mxu2 %v464_v24 }
 0x3cc   :  { %v374_v41 = vmul.f32 1.442695, %v368_v40  ;;  %v381_v44 = vsel %vm189_vm2, %v2060_v42, 0.0 }
 0x3ce   :  { %2061 = vpow2.f32 %v374_v41 }
 0x3d0   :  { %v408_v43 = vpop.permute.xlu1 %407 }
 0x3d1   :  { %v433_v46 = vpop.permute.xlu2 %432  ;;  %420 = vmatpush.bf16.msrb.mxu0 %v408_v43  ;;  %382 = vadd.xlane.f32.xlu0 %v381_v44 }
 0x3d2   :  { %445 = vmatpush.bf16.msrb.mxu1 %v433_v46 }
 0x3d3   :  { %v516_v47 = vpop.permute.xlu0 %515 }
 0x3d4   :  { %v521_v48 = vsel %vm137_vm1, %v516_v47, 0  ;;  %v2062_v49 = vpop.eup %2061 }
 0x3d5   :  { %530 = vmatpush.bf16.xpose.msra.mxu0 %v521_v48  ;;  %v384_v51 = vsel %vm189_vm2, %v2062_v49, 0.0 }
 0x3d8   :  { %v540_v50 = vpop.permute.xlu1 %539 }
 0x3d9   :  { %v545_v52 = vsel %vm137_vm1, %v540_v50, 0  ;;  %385 = vadd.xlane.f32.xlu0 %v384_v51  ;;  %v538_v21 = vpop.permute.xlu2 %537 }
 0x3da   :  { %554 = vmatpush.bf16.xpose.msra.mxu1 %v545_v52 }
 0x3e0   :  { %v702_v53 = vpop.permute.xlu1 %701 }
 0x3e1   :  { %v707_v54 = vsel %vm137_vm1, %v702_v53, 0 }
 0x3e2   :  { %716 = vmatpush.bf16.xpose.msrb.mxu3 %v707_v54 }
 0x3fe   :  { %v365_v55 = vpop.xlane.xlu0 %364 }
 0x3ff   :  { %v369_v56 = vsub.f32 %v353_v27, %v365_v55 }
 0x401   :  { %v376_v57 = vmul.f32 1.442695, %v369_v56 }
 0x403   :  { %2063 = vpow2.f32 %v376_v57 }
 0x409   :  { %v2064_v58 = vpop.eup %2063 }
 0x40a   :  { %v387_v59 = vsel %vm189_vm2, %v2064_v58, 0.0 }
 0x40b   :  { %388 = vadd.xlane.f32.xlu0 %v387_v59 }
 0x411   :  { %v514_v60 = vpop.permute.xlu0 %513 }
 0x41f   :  { %699 = vrot.lane.b32.xlu0 %v2321_v28, %s2197_s21 }
 0x43c   :  { %v380_v61 = vpop.xlane.xlu0 %379 }
 0x43d   :  { %2065 = vrcp.f32 %v380_v61 }
 0x443   :  { %v2066_v63 = vpop.eup %2065 }
 0x444   :  { %v383_v62 = vpop.xlane.xlu0 %382  ;;  %v394_v0 = vmul.f32 %v2066_v63, %v2058_v36  ;;  %v2436_v36 = vpop.f32.mrf.mxu3 }
 0x445   :  { %2067 = vrcp.f32 %v383_v62 }
 0x446   :  { %v398_v2 = vpack.c.bf16 %v394_v0, %v394_v0 }
 0x448   :  { %v404_v5 = vunpack.c.l.b16 %v398_v2 }
 0x44b   :  { %v2068_v1 = vpop.eup %2067 }
 0x44c   :  { %v395_v3 = vmul.f32 %v2068_v1, %v2060_v42  ;;  %v386_v8 = vpop.xlane.xlu0 %385  ;;  %v2438_v38 = vpop.f32.mrf.mxu3 }
 0x44d   :  { %2069 = vrcp.f32 %v386_v8 }
 0x44e   :  { %v399_v4 = vpack.c.bf16 %v395_v3, %v395_v3 }
 0x450   :  { %v405_v6 = vunpack.c.l.b16 %v399_v4 }
 0x452   :  { %v406_v7 = vpack.c.b16 %v405_v6, %v404_v5 }
 0x453   :  { %v2070_v10 = vpop.eup %2069 }
 0x454   :  { %1974 = vmatmul.msk.bf16.vlgmr.msrb.gmra.mxu0 %vm189_vm2, %v406_v7  ;;  %v396_v12 = vmul.f32 %v2070_v10, %v2062_v49  ;;  %v2440_v40 = vpop.f32.mrf.mxu3 }
 0x456   :  { %v400_v14 = vpack.c.bf16 %v396_v12, %v396_v12 }
 0x458   :  { %v429_v17 = vunpack.c.l.b16 %v400_v14 }
 0x464   :  { %1980 = vmatmul.msk.bf16.vlgmr.msra.gmra.mxu0 %vm137_vm1, %v514_v60 }
 0x47e   :  { %v389_v9 = vpop.xlane.xlu0 %388 }
 0x47f   :  { %2071 = vrcp.f32 %v389_v9 }
 0x485   :  { %v2072_v13 = vpop.eup %2071 }
 0x486   :  { %v397_v15 = vmul.f32 %v2072_v13, %v2064_v58 }
 0x488   :  { %v401_v16 = vpack.c.bf16 %v397_v15, %v397_v15 }
 0x48a   :  { %v430_v18 = vunpack.c.l.b16 %v401_v16 }
 0x48c   :  { %v431_v19 = vpack.c.b16 %v430_v18, %v429_v17 }
 0x48e   :  { %1975 = vmatmul.msk.bf16.vlgmr.msrb.gmra.mxu1 %vm189_vm2, %v431_v19 }
 0x491   :  { %v700_v20 = vpop.permute.xlu0 %699 }
 0x492   :  { %1986 = vmatmul.msk.bf16.vlgmr.msrb.gmra.mxu3 %vm137_vm1, %v700_v20 }
 0x49e   :  { %1981 = vmatmul.msk.bf16.vlgmr.msra.gmra.mxu1 %vm137_vm1, %v538_v21 }
 0x4d1   :  { %v422_v25 = vpop.f32.mrf.mxu0 }
 0x4d9   :  { %v424_v26 = vpop.f32.mrf.mxu0 }
 0x4da   :  { %v453_v27 = vpack.c.bf16 %v424_v26, %v422_v25 }
 0x4dc   :  { %1976 = vmatmul.msk.bf16.vlgmr.msra.gmra.mxu2 %vm137_vm1, %v453_v27 }
 0x4e1   :  { %v532_v29 = vpop.f32.mrf.mxu0 }
 0x4e2   :  { %v2429_v30 = vmul.f32 0.35355338, %v532_v29 }
 0x4e4   :  { %v565_v31 = vsel %vm189_vm2, %v2429_v30, -inf }
 0x4e5   :  { %566 = vmax.xlane.f32.xlu2 %v565_v31 }
 0x4e9   :  { %v534_v32 = vpop.f32.mrf.mxu0 }
 0x4ea   :  { %v562_v33 = vmul.f32 0.35355338, %v534_v32 }
 0x4ec   :  { %v568_v34 = vsel %vm189_vm2, %v562_v33, -inf }
 0x4ed   :  { %569 = vmax.xlane.f32.xlu1 %v568_v34 }
 0x50b   :  { %v447_v39 = vpop.f32.mrf.mxu1 }
 0x513   :  { %v449_v41 = vpop.f32.mrf.mxu1 }
 0x514   :  { %v454_v42 = vpack.c.bf16 %v449_v41, %v447_v39 }
 0x515   :  { %v718_v43 = vpop.f32.mrf.mxu3 }
 0x516   :  { %v747_v44 = vmul.f32 0.35355338, %v718_v43  ;;  %1977 = vmatmul.msk.bf16.gmra.mxu2 %vm137_vm1, %v454_v42 }
 0x518   :  { %v751_v46 = vsel %vm189_vm2, %v747_v44, -inf }
 0x519   :  { %752 = vmax.xlane.f32.xlu1 %v751_v46 }
 0x51b   :  { %v556_v47 = vpop.f32.mrf.mxu1 }
 0x51c   :  { %v563_v48 = vmul.f32 0.35355338, %v556_v47 }
 0x51d   :  { %v720_v50 = vpop.f32.mrf.mxu3 }
 0x51e   :  { %v571_v49 = vsel %vm189_vm2, %v563_v48, -inf  ;;  %v748_v51 = vmul.f32 0.35355338, %v720_v50 }
 0x51f   :  { %572 = vmax.xlane.f32.xlu0 %v571_v49 }
 0x520   :  { %v754_v55 = vsel %vm189_vm2, %v748_v51, -inf }
 0x523   :  { %v558_v52 = vpop.f32.mrf.mxu1 }
 0x524   :  { %v564_v53 = vmul.f32 0.35355338, %v558_v52 }
 0x526   :  { %v574_v54 = vsel %vm189_vm2, %v564_v53, -inf }
 0x527   :  { %575 = vmax.xlane.f32.xlu2 %v574_v54  ;;  %755 = vmax.xlane.f32.xlu0 %v754_v55 }
 0x532   :  { %618 = vrot.lane.b32.xlu1 %v2366_v11, %s2196_s20 }
 0x53b   :  { %643 = vrot.lane.b32.xlu0 %v2380_v45, %s2196_s20 }
 0x558   :  { %v567_v6 = vpop.xlane.xlu2 %566 }
 0x559   :  { %v577_v10 = vsub.f32 %v2429_v30, %v567_v6 }
 0x55b   :  { %v581_v13 = vmul.f32 1.442695, %v577_v10 }
 0x560   :  { %v570_v56 = vpop.xlane.xlu1 %569 }
 0x561   :  { %v578_v57 = vsub.f32 %v562_v33, %v570_v56 }
 0x563   :  { %v583_v58 = vmul.f32 1.442695, %v578_v57 }
 0x565   :  { %2073 = vpow2.f32 %v583_v58 }
 0x56b   :  { %v2074_v59 = vpop.eup %2073 }
 0x56c   :  { %v592_v60 = vsel %vm189_vm2, %v2074_v59, 0.0 }
 0x56d   :  { %593 = vadd.xlane.f32.xlu1 %v592_v60 }
 0x586   :  { %723 = vrot.lane.b32.xlu1 %v2324_v37, %s2197_s21 }
 0x58c   :  { %v753_v61 = vpop.xlane.xlu1 %752 }
 0x58d   :  { %v763_v62 = vsub.f32 %v747_v44, %v753_v61 }
 0x58e   :  { %885 = vrot.lane.b32.xlu1 %v2321_v28, %s2198_s24 }
 0x58f   :  { %v767_v63 = vmul.f32 1.442695, %v763_v62 }
 0x591   :  { %2075 = vpow2.f32 %v767_v63 }
 0x592   :  { %v573_v0 = vpop.xlane.xlu0 %572 }
 0x593   :  { %v579_v1 = vsub.f32 %v563_v48, %v573_v0 }
 0x595   :  { %v585_v2 = vmul.f32 1.442695, %v579_v1 }
 0x597   :  { %v2456_v3 = vpop.eup %2075  ;;  %2077 = vpow2.f32 %v585_v2 }
 0x598   :  { %v775_v4 = vsel %vm189_vm2, %v2456_v3, 0.0 }
 0x599   :  { %776 = vadd.xlane.f32.xlu2 %v775_v4 }
 0x59a   :  { %v756_v5 = vpop.xlane.xlu0 %755  ;;  %v576_v14 = vpop.xlane.xlu2 %575 }
 0x59b   :  { %v764_v7 = vsub.f32 %v748_v51, %v756_v5  ;;  %v580_v17 = vsub.f32 %v564_v53, %v576_v14 }
 0x59d   :  { %v2078_v8 = vpop.eup %2077  ;;  %v769_v9 = vmul.f32 1.442695, %v764_v7  ;;  %v587_v19 = vmul.f32 1.442695, %v580_v17 }
 0x59e   :  { %v595_v12 = vsel %vm189_vm2, %v2078_v8, 0.0 }
 0x59f   :  { %596 = vadd.xlane.f32.xlu0 %v595_v12  ;;  %2079 = vpow2.f32 %v769_v9  ;;  %v663_v9 = vld [vmem:[%s2877_s3 + $0x10] sm:$0xff]  ;;  %v849_v12 = vld [vmem:[%s2877_s3 + $0x18] sm:$0xff] }
 0x5a0   :  { %2081 = vpow2.f32 %v581_v13  ;;  %v666_v10 = vpack.c.bf16 %v663_v9, %v663_v9  ;;  %v852_v13 = vpack.c.bf16 %v849_v12, %v849_v12 }
 0x5a1   :  { %2083 = vpow2.f32 %v587_v19 }
 0x5a4   :  { %v619_v15 = vpop.permute.xlu1 %618 }
 0x5a5   :  { %631 = vmatpush.bf16.msrb.mxu0 %v619_v15  ;;  %v2080_v16 = vpop.eup %2079  ;;  %v860_v15 = vsel %vm462_vm3, %v852_v13, 0 }
 0x5a6   :  { %v778_v18 = vsel %vm189_vm2, %v2080_v16, 0.0  ;;  %v2082_v20 = vpop.eup %2081 }
 0x5a7   :  { %779 = vadd.xlane.f32.xlu2 %v778_v18  ;;  %v589_v22 = vsel %vm189_vm2, %v2082_v20, 0.0  ;;  %v2084_v23 = vpop.eup %2083 }
 0x5a8   :  { %v598_v24 = vsel %vm189_vm2, %v2084_v23, 0.0 }
 0x5ad   :  { %v644_v21 = vpop.permute.xlu0 %643 }
 0x5ae   :  { %656 = vmatpush.bf16.msrb.mxu1 %v644_v21 }
 0x5af   :  { %590 = vadd.xlane.f32.xlu2 %v589_v22 }
 0x5b3   :  { %804 = vrot.lane.b32.xlu0 %v2366_v11, %s2197_s21 }
 0x5b7   :  { %599 = vadd.xlane.f32.xlu2 %v598_v24 }
 0x5bb   :  { %887 = vrot.lane.b32.xlu0 %v2321_v28, %s2199_s25 }
 0x5cf   :  { %725 = vrot.lane.b32.xlu2 %v2324_v37, %s2195_s19 }
 0x5e0   :  { %v594_v26 = vpop.xlane.xlu1 %593 }
 0x5e1   :  { %2085 = vrcp.f32 %v594_v26 }
 0x5e7   :  { %v2086_v31 = vpop.eup %2085 }
 0x5e8   :  { %v606_v33 = vmul.f32 %v2086_v31, %v2074_v59 }
 0x5ea   :  { %v610_v39 = vpack.c.bf16 %v606_v33, %v606_v33 }
 0x5ec   :  { %v616_v46 = vunpack.c.l.b16 %v610_v39 }
 0x5f8   :  { %v724_v2 = vpop.permute.xlu1 %723 }
 0x60c   :  { %v777_v25 = vpop.xlane.xlu2 %776 }
 0x612   :  { %v597_v29 = vpop.xlane.xlu0 %596 }
 0x61a   :  { %v780_v27 = vpop.xlane.xlu2 %779 }
 0x622   :  { %v591_v30 = vpop.xlane.xlu2 %590 }
 0x623   :  { %2087 = vrcp.f32 %v591_v30 }
 0x624   :  { %2089 = vrcp.f32 %v597_v29 }
 0x625   :  { %v805_v32 = vpop.permute.xlu0 %804 }
 0x626   :  { %817 = vmatpush.bf16.msra.mxu1 %v805_v32 }
 0x629   :  { %v2088_v34 = vpop.eup %2087 }
 0x62a   :  { %v605_v41 = vmul.f32 %v2088_v34, %v2082_v20  ;;  %v600_v42 = vpop.xlane.xlu2 %599  ;;  %v2090_v43 = vpop.eup %2089 }
 0x62b   :  { %2091 = vrcp.f32 %v600_v42  ;;  %v607_v47 = vmul.f32 %v2090_v43, %v2078_v8  ;;  %v886_v8 = vpop.permute.xlu1 %885  ;;  %v475_v42 = vpop.f32.mrf.mxu2 }
 0x62c   :  { %v609_v44 = vpack.c.bf16 %v605_v41, %v605_v41  ;;  %2093 = vrcp.f32 %v780_v27 }
 0x62d   :  { %v611_v51 = vpack.c.bf16 %v607_v47, %v607_v47  ;;  %2095 = vrcp.f32 %v777_v25  ;;  %v888_v58 = vpop.permute.xlu0 %887 }
 0x62e   :  { %v615_v48 = vunpack.c.l.b16 %v609_v44  ;;  %v893_v61 = vsel %vm137_vm1, %v888_v58, 0 }
 0x62f   :  { %v640_v56 = vunpack.c.l.b16 %v611_v51 }
 0x630   :  { %v617_v49 = vpack.c.b16 %v616_v46, %v615_v48 }
 0x631   :  { %v2092_v50 = vpop.eup %2091 }
 0x632   :  { %v608_v52 = vmul.f32 %v2092_v50, %v2084_v23  ;;  %1982 = vmatmul.msk.bf16.vlgmr.msrb.gmra.mxu0 %vm189_vm2, %v617_v49  ;;  %v726_v53 = vpop.permute.xlu2 %725  ;;  %v2094_v60 = vpop.eup %2093  ;;  %v504_v50 = vadd.f32 %v2434_v35, %v475_v42 }
 0x633   :  { %v731_v54 = vsel %vm137_vm1, %v726_v53, 0  ;;  %v2096_v62 = vpop.eup %2095  ;;  %v792_v63 = vmul.f32 %v2094_v60, %v2080_v16  ;;  %v477_v43 = vpop.f32.mrf.mxu2 }
 0x634   :  { %v612_v55 = vpack.c.bf16 %v608_v52, %v608_v52  ;;  %740 = vmatpush.bf16.xpose.msra.mxu0 %v731_v54  ;;  %v791_v0 = vmul.f32 %v2096_v62, %v2456_v3  ;;  %v674_v3 = vsel %vm462_vm3, %v666_v10, 0  ;;  %v506_v58 = vadd.f32 %v2436_v36, %v477_v43 }
 0x635   :  { %v796_v1 = vpack.c.bf16 %v792_v63, %v792_v63  ;;  %683 = vmatpush.bf16.msrb.mxu2 %v674_v3 }
 0x636   :  { %v641_v57 = vunpack.c.l.b16 %v612_v55  ;;  %v795_v4 = vpack.c.bf16 %v791_v0, %v791_v0 }
 0x637   :  { %v802_v5 = vunpack.c.l.b16 %v796_v1 }
 0x638   :  { %v642_v59 = vpack.c.b16 %v641_v57, %v640_v56  ;;  %v801_v6 = vunpack.c.l.b16 %v795_v4 }
 0x63a   :  { %1983 = vmatmul.msk.bf16.vlgmr.msrb.gmra.mxu1 %vm189_vm2, %v642_v59  ;;  %v803_v7 = vpack.c.b16 %v802_v5, %v801_v6 }
 0x63b   :  { %902 = vmatpush.bf16.xpose.msrb.mxu1 %v893_v61  ;;  %v480_v44 = vpop.f32.mrf.mxu2 }
 0x63c   :  { %869 = vmatpush.bf16.msrb.mxu0 %v860_v15  ;;  %v509_v35 = vadd.f32 %v2438_v38, %v480_v44 }
 0x642   :  { %1987 = vmatmul.msk.bf16.vlgmr.msra.gmra.mxu0 %vm137_vm1, %v724_v2 }
 0x643   :  { %v2502_v46 = vpop.f32.mrf.mxu2 }
 0x64a   :  { %1988 = vmatmul.msk.bf16.vlgmr.msra.gmra.mxu1 %vm189_vm2, %v803_v7 }
 0x65a   :  { %1992 = vmatmul.msk.bf16.vlgmr.msrb.gmra.mxu1 %vm137_vm1, %v886_v8 }
 0x6af   :  { %v633_v14 = vpop.f32.mrf.mxu0 }
 0x6b7   :  { %v635_v16 = vpop.f32.mrf.mxu0  ;;  %v658_v17 = vpop.f32.mrf.mxu1 }
 0x6b8   :  { %v664_v18 = vpack.c.bf16 %v635_v16, %v633_v14 }
 0x6ba   :  { %1984 = vmatmul.msk.bf16.vlgmr.msrb.gmra.mxu2 %vm137_vm1, %v664_v18 }
 0x6bf   :  { %v660_v19 = vpop.f32.mrf.mxu1  ;;  %v742_v20 = vpop.f32.mrf.mxu0 }
 0x6c0   :  { %v749_v21 = vmul.f32 0.35355338, %v742_v20  ;;  %v665_v25 = vpack.c.bf16 %v660_v19, %v658_v17 }
 0x6c2   :  { %v757_v22 = vsel %vm189_vm2, %v749_v21, -inf }
 0x6c3   :  { %758 = vmax.xlane.f32.xlu0 %v757_v22 }
 0x6c7   :  { %v744_v23 = vpop.f32.mrf.mxu0  ;;  %v819_v24 = vpop.f32.mrf.mxu1 }
 0x6c8   :  { %v750_v26 = vmul.f32 0.35355338, %v744_v23 }
 0x6ca   :  { %1985 = vmatmul.msk.bf16.gmra.mxu2 %vm137_vm1, %v665_v25  ;;  %v760_v27 = vsel %vm189_vm2, %v750_v26, -inf }
 0x6cb   :  { %761 = vmax.xlane.f32.xlu1 %v760_v27 }
 0x6cf   :  { %v821_v29 = vpop.f32.mrf.mxu1 }
 0x6d0   :  { %v850_v30 = vpack.c.bf16 %v821_v29, %v819_v24 }
 0x6d2   :  { %1990 = vmatmul.msk.bf16.vlgmr.msrb.gmra.mxu0 %vm137_vm1, %v850_v30 }
 0x6d7   :  { %v904_v31 = vpop.f32.mrf.mxu1 }
 0x6d8   :  { %v933_v32 = vmul.f32 0.35355338, %v904_v31 }
 0x6da   :  { %v937_v33 = vsel %vm189_vm2, %v933_v32, -inf }
 0x6db   :  { %938 = vmax.xlane.f32.xlu2 %v937_v33 }
 0x6df   :  { %v906_v34 = vpop.f32.mrf.mxu1 }
 0x6e0   :  { %v934_v39 = vmul.f32 0.35355338, %v906_v34 }
 0x6e2   :  { %v940_v41 = vsel %vm189_vm2, %v934_v39, -inf }
 0x6e3   :  { %941 = vmax.xlane.f32.xlu0 %v940_v41 }
 0x6f7   :  { %829 = vrot.lane.b32.xlu0 %v2380_v45, %s2197_s21 }
 0x6ff   :  { %909 = vrot.lane.b32.xlu0 %v2324_v37, %s2198_s24 }
 0x707   :  { %1073 = vrot.lane.b32.xlu0 %v2321_v28, %s2200_s30 }
 0x70f   :  { %1071 = vrot.lane.b32.xlu0 %v2321_v28, %s2201_s14 }
 0x736   :  { %v759_v47 = vpop.xlane.xlu0 %758 }
 0x737   :  { %v765_v48 = vsub.f32 %v749_v21, %v759_v47 }
 0x739   :  { %v771_v49 = vmul.f32 1.442695, %v765_v48 }
 0x73b   :  { %2097 = vpow2.f32 %v771_v49 }
 0x73d   :  { %v685_v51 = vpop.f32.mrf.mxu2 }
 0x73e   :  { %v695_v52 = vadd.f32 %v685_v51, %v504_v50  ;;  %v762_v53 = vpop.xlane.xlu1 %761 }
 0x73f   :  { %v766_v54 = vsub.f32 %v750_v26, %v762_v53 }
 0x741   :  { %v2098_v55 = vpop.eup %2097  ;;  %v773_v56 = vmul.f32 1.442695, %v766_v54 }
 0x742   :  { %v781_v57 = vsel %vm189_vm2, %v2098_v55, 0.0 }
 0x743   :  { %2099 = vpow2.f32 %v773_v56  ;;  %782 = vadd.xlane.f32.xlu1 %v781_v57 }
 0x745   :  { %v687_v59 = vpop.f32.mrf.mxu2 }
 0x746   :  { %v2507_v60 = vadd.f32 %v687_v59, %v506_v58 }
 0x749   :  { %v2100_v61 = vpop.eup %2099 }
 0x74a   :  { %v784_v62 = vsel %vm189_vm2, %v2100_v61, 0.0 }
 0x74b   :  { %785 = vadd.xlane.f32.xlu2 %v784_v62 }
 0x74d   :  { %v690_v63 = vpop.f32.mrf.mxu2 }
 0x74e   :  { %v2511_v0 = vadd.f32 %v690_v63, %v509_v35  ;;  %v939_v1 = vpop.xlane.xlu2 %938 }
 0x74f   :  { %v949_v2 = vsub.f32 %v933_v32, %v939_v1  ;;  %v871_v4 = vpop.f32.mrf.mxu0 }
 0x750   :  { %v2513_v5 = vadd.f32 %v871_v4, %v695_v52  ;;  %v1035_v52 = vld [vmem:[%s2877_s3 + $0x20] sm:$0xff] }
 0x751   :  { %v953_v6 = vmul.f32 1.442695, %v949_v2  ;;  %v1038_v53 = vpack.c.bf16 %v1035_v52, %v1035_v52 }
 0x753   :  { %2101 = vpow2.f32 %v953_v6 }
 0x755   :  { %v2537_v59 = vpop.f32.mrf.mxu2 }
 0x756   :  { %v942_v36 = vpop.xlane.xlu0 %941 }
 0x757   :  { %v950_v7 = vsub.f32 %v934_v39, %v942_v36 }
 0x759   :  { %v2102_v8 = vpop.eup %2101  ;;  %v955_v9 = vmul.f32 1.442695, %v950_v7 }
 0x75a   :  { %v961_v10 = vsel %vm189_vm2, %v2102_v8, 0.0 }
 0x75b   :  { %2103 = vpow2.f32 %v955_v9  ;;  %962 = vadd.xlane.f32.xlu1 %v961_v10 }
 0x761   :  { %v2104_v3 = vpop.eup %2103 }
 0x762   :  { %v964_v38 = vsel %vm189_vm2, %v2104_v3, 0.0 }
 0x763   :  { %965 = vadd.xlane.f32.xlu2 %v964_v38 }
 0x769   :  { %v830_v12 = vpop.permute.xlu0 %829 }
 0x76a   :  { %842 = vmatpush.bf16.msra.mxu3 %v830_v12  ;;  %v2549_v12 = vpop.f32.mrf.mxu0 }
 0x771   :  { %v910_v25 = vpop.permute.xlu0 %909 }
 0x774   :  { %911 = vrot.lane.b32.xlu1 %v2324_v37, %s2199_s25 }
 0x779   :  { %v1074_v30 = vpop.permute.xlu0 %1073 }
 0x77a   :  { %v1079_v39 = vsel %vm137_vm1, %v1074_v30, 0 }
 0x77b   :  { %990 = vrot.lane.b32.xlu2 %v2366_v11, %s2198_s24 }
 0x77c   :  { %1097 = vrot.lane.b32.xlu1 %v2324_v37, %s2200_s30 }
 0x781   :  { %v1072_v51 = vpop.permute.xlu0 %1071 }
 0x783   :  { %1095 = vrot.lane.b32.xlu2 %v2324_v37, %s2201_s14 }
 0x7b6   :  { %v783_v13 = vpop.xlane.xlu1 %782 }
 0x7b7   :  { %2105 = vrcp.f32 %v783_v13 }
 0x7bd   :  { %v2106_v15 = vpop.eup %2105 }
 0x7be   :  { %v786_v14 = vpop.xlane.xlu2 %785  ;;  %v793_v16 = vmul.f32 %v2106_v15, %v2098_v55  ;;  %v1046_v55 = vsel %vm462_vm3, %v1038_v53, 0 }
 0x7bf   :  { %2107 = vrcp.f32 %v786_v14 }
 0x7c0   :  { %v797_v18 = vpack.c.bf16 %v793_v16, %v793_v16 }
 0x7c2   :  { %v826_v21 = vunpack.c.l.b16 %v797_v18 }
 0x7c5   :  { %v2108_v17 = vpop.eup %2107 }
 0x7c6   :  { %v794_v19 = vmul.f32 %v2108_v17, %v2100_v61 }
 0x7c8   :  { %v798_v20 = vpack.c.bf16 %v794_v19, %v794_v19 }
 0x7ca   :  { %v827_v22 = vunpack.c.l.b16 %v798_v20 }
 0x7cc   :  { %v828_v23 = vpack.c.b16 %v827_v22, %v826_v21 }
 0x7ce   :  { %v963_v24 = vpop.xlane.xlu1 %962  ;;  %1989 = vmatmul.msk.bf16.vlgmr.msra.gmra.mxu3 %vm189_vm2, %v828_v23 }
 0x7cf   :  { %2109 = vrcp.f32 %v963_v24 }
 0x7d5   :  { %v2110_v27 = vpop.eup %2109 }
 0x7d6   :  { %v966_v26 = vpop.xlane.xlu2 %965  ;;  %v977_v29 = vmul.f32 %v2110_v27, %v2102_v8 }
 0x7d7   :  { %2111 = vrcp.f32 %v966_v26 }
 0x7d8   :  { %v981_v32 = vpack.c.bf16 %v977_v29, %v977_v29 }
 0x7da   :  { %v987_v42 = vunpack.c.l.b16 %v981_v32 }
 0x7dd   :  { %v2112_v31 = vpop.eup %2111 }
 0x7de   :  { %v978_v33 = vmul.f32 %v2112_v31, %v2104_v3  ;;  %v991_v34 = vpop.permute.xlu2 %990 }
 0x7df   :  { %1003 = vmatpush.bf16.msrb.mxu3 %v991_v34 }
 0x7e0   :  { %v982_v41 = vpack.c.bf16 %v978_v33, %v978_v33 }
 0x7e2   :  { %v988_v43 = vunpack.c.l.b16 %v982_v41 }
 0x7e3   :  { %1088 = vmatpush.bf16.xpose.msra.mxu3 %v1079_v39 }
 0x7e4   :  { %v989_v44 = vpack.c.b16 %v988_v43, %v987_v42 }
 0x7e6   :  { %v912_v47 = vpop.permute.xlu1 %911  ;;  %1994 = vmatmul.msk.bf16.vlgmr.msrb.gmra.mxu3 %vm189_vm2, %v989_v44  ;;  %v1096_v61 = vpop.permute.xlu2 %1095 }
 0x7e7   :  { %v917_v48 = vsel %vm137_vm1, %v912_v47, 0 }
 0x7e8   :  { %926 = vmatpush.bf16.xpose.msra.mxu2 %v917_v48 }
 0x7ee   :  { %v1098_v49 = vpop.permute.xlu1 %1097 }
 0x7ef   :  { %v1103_v50 = vsel %vm137_vm1, %v1098_v49, 0  ;;  %1993 = vmatmul.msk.bf16.vlgmr.msra.gmra.mxu2 %vm137_vm1, %v910_v25 }
 0x7f0   :  { %1112 = vmatpush.bf16.xpose.msra.mxu0 %v1103_v50  ;;  %1055 = vmatpush.bf16.msrb.mxu2 %v1046_v55 }
 0x7f6   :  { %1998 = vmatmul.msk.bf16.vlgmr.msra.gmra.mxu3 %vm137_vm1, %v1072_v51 }
 0x851   :  { %v844_v54 = vpop.f32.mrf.mxu3 }
 0x859   :  { %v846_v56 = vpop.f32.mrf.mxu3 }
 0x85a   :  { %v851_v57 = vpack.c.bf16 %v846_v56, %v844_v54 }
 0x85c   :  { %1991 = vmatmul.msk.bf16.gmra.mxu0 %vm137_vm1, %v851_v57 }
 0x869   :  { %v1005_v58 = vpop.f32.mrf.mxu3 }
 0x86c   :  { %1999 = vmatmul.msk.bf16.vlgmr.msra.gmra.mxu0 %vm137_vm1, %v1096_v61 }
 0x871   :  { %v1007_v62 = vpop.f32.mrf.mxu3 }
 0x872   :  { %v1036_v35 = vpack.c.bf16 %v1007_v62, %v1005_v58  ;;  %v928_v63 = vpop.f32.mrf.mxu2 }
 0x873   :  { %v935_v1 = vmul.f32 0.35355338, %v928_v63 }
 0x874   :  { %1996 = vmatmul.msk.bf16.vlgmr.msrb.gmra.mxu2 %vm137_vm1, %v1036_v35 }
 0x875   :  { %v943_v2 = vsel %vm189_vm2, %v935_v1, -inf }
 0x876   :  { %944 = vmax.xlane.f32.xlu0 %v943_v2 }
 0x879   :  { %v1090_v4 = vpop.f32.mrf.mxu3 }
 0x87a   :  { %v1119_v6 = vmul.f32 0.35355338, %v1090_v4  ;;  %v930_v36 = vpop.f32.mrf.mxu2 }
 0x87b   :  { %v936_v7 = vmul.f32 0.35355338, %v930_v36 }
 0x87c   :  { %v1123_v8 = vsel %vm189_vm2, %v1119_v6, -inf }
 0x87d   :  { %1124 = vmax.xlane.f32.xlu2 %v1123_v8  ;;  %v946_v9 = vsel %vm189_vm2, %v936_v7, -inf }
 0x87e   :  { %947 = vmax.xlane.f32.xlu1 %v946_v9 }
 0x881   :  { %v1092_v10 = vpop.f32.mrf.mxu3 }
 0x882   :  { %v1120_v3 = vmul.f32 0.35355338, %v1092_v10 }
 0x884   :  { %v1126_v38 = vsel %vm189_vm2, %v1120_v3, -inf }
 0x885   :  { %1127 = vmax.xlane.f32.xlu0 %v1126_v38 }
 0x899   :  { %1015 = vrot.lane.b32.xlu0 %v2380_v45, %s2198_s24 }
 0x8a1   :  { %1257 = vrot.lane.b32.xlu0 %v2321_v28, %s2202_s16 }
 0x8d9   :  { %v876_v13 = vpop.f32.mrf.mxu0 }
 0x8da   :  { %v2552_v14 = vadd.f32 %v876_v13, %v2511_v0 }
 0x8e1   :  { %v2554_v15 = vpop.f32.mrf.mxu0 }
 0x8e9   :  { %v1114_v16 = vpop.f32.mrf.mxu0  ;;  %v945_v17 = vpop.xlane.xlu0 %944 }
 0x8ea   :  { %v1121_v18 = vmul.f32 0.35355338, %v1114_v16  ;;  %v951_v19 = vsub.f32 %v935_v1, %v945_v17 }
 0x8ec   :  { %v957_v20 = vmul.f32 1.442695, %v951_v19  ;;  %v1129_v21 = vsel %vm189_vm2, %v1121_v18, -inf }
 0x8ed   :  { %1130 = vmax.xlane.f32.xlu0 %v1129_v21 }
 0x8ee   :  { %2113 = vpow2.f32 %v957_v20 }
 0x8f0   :  { %v1125_v22 = vpop.xlane.xlu2 %1124 }
 0x8f1   :  { %v1135_v23 = vsub.f32 %v1119_v6, %v1125_v22  ;;  %v948_v24 = vpop.xlane.xlu1 %947 }
 0x8f2   :  { %v952_v25 = vsub.f32 %v936_v7, %v948_v24 }
 0x8f3   :  { %v1139_v26 = vmul.f32 1.442695, %v1135_v23 }
 0x8f4   :  { %v2114_v27 = vpop.eup %2113  ;;  %v959_v29 = vmul.f32 1.442695, %v952_v25 }
 0x8f5   :  { %2115 = vpow2.f32 %v1139_v26  ;;  %v967_v0 = vsel %vm189_vm2, %v2114_v27, 0.0 }
 0x8f6   :  { %2117 = vpow2.f32 %v959_v29  ;;  %968 = vadd.xlane.f32.xlu1 %v967_v0  ;;  %v1221_v29 = vld [vmem:[%s2877_s3 + $0x28] sm:$0xff] }
 0x8f7   :  { %v1057_v30 = vpop.f32.mrf.mxu2  ;;  %v1224_v0 = vpack.c.bf16 %v1221_v29, %v1221_v29 }
 0x8f8   :  { %v2559_v31 = vadd.f32 %v1057_v30, %v2513_v5  ;;  %v1128_v32 = vpop.xlane.xlu0 %1127  ;;  %v1116_v5 = vpop.f32.mrf.mxu0 }
 0x8f9   :  { %v1136_v33 = vsub.f32 %v1120_v3, %v1128_v32  ;;  %v1122_v49 = vmul.f32 0.35355338, %v1116_v5  ;;  %v1232_v30 = vsel %vm462_vm3, %v1224_v0, 0 }
 0x8fa   :  { %1241 = vmatpush.bf16.msrb.mxu0 %v1232_v30 }
 0x8fb   :  { %v2116_v34 = vpop.eup %2115  ;;  %v1141_v39 = vmul.f32 1.442695, %v1136_v33  ;;  %v1132_v50 = vsel %vm189_vm2, %v1122_v49, -inf }
 0x8fc   :  { %v2118_v41 = vpop.eup %2117  ;;  %v1147_v42 = vsel %vm189_vm2, %v2116_v34, 0.0 }
 0x8fd   :  { %2119 = vpow2.f32 %v1141_v39  ;;  %v970_v43 = vsel %vm189_vm2, %v2118_v41, 0.0 }
 0x8fe   :  { %971 = vadd.xlane.f32.xlu2 %v970_v43  ;;  %1148 = vadd.xlane.f32.xlu1 %v1147_v42 }
 0x903   :  { %v2120_v44 = vpop.eup %2119 }
 0x904   :  { %v1150_v47 = vsel %vm189_vm2, %v2120_v44, 0.0 }
 0x906   :  { %1151 = vadd.xlane.f32.xlu2 %v1150_v47 }
 0x90b   :  { %v1016_v48 = vpop.permute.xlu0 %1015 }
 0x90c   :  { %1028 = vmatpush.bf16.msra.mxu1 %v1016_v48 }
 0x913   :  { %v1258_v51 = vpop.permute.xlu0 %1257 }
 0x917   :  { %1176 = vrot.lane.b32.xlu1 %v2366_v11, %s2201_s14 }
 0x91e   :  { %1259 = vrot.lane.b32.xlu2 %v2321_v28, %s2203_s17 }
 0x947   :  { %1133 = vmax.xlane.f32.xlu2 %v1132_v50 }
 0x95f   :  { %1201 = vrot.lane.b32.xlu2 %v2380_v45, %s2201_s14 }
 0x960   :  { %v1131_v52 = vpop.xlane.xlu0 %1130 }
 0x961   :  { %v1137_v53 = vsub.f32 %v1121_v18, %v1131_v52 }
 0x963   :  { %v1143_v54 = vmul.f32 1.442695, %v1137_v53 }
 0x965   :  { %2121 = vpow2.f32 %v1143_v54 }
 0x967   :  { %1281 = vrot.lane.b32.xlu2 %v2324_v37, %s2202_s16 }
 0x969   :  { %v969_v55 = vpop.xlane.xlu1 %968 }
 0x96a   :  { %2123 = vrcp.f32 %v969_v55 }
 0x96b   :  { %v2573_v56 = vpop.eup %2121 }
 0x96c   :  { %v1153_v57 = vsel %vm189_vm2, %v2573_v56, 0.0 }
 0x96d   :  { %1154 = vadd.xlane.f32.xlu1 %v1153_v57 }
 0x96f   :  { %1445 = vrot.lane.b32.xlu2 %v2321_v28, %s2204_s2 }
 0x970   :  { %v2124_v61 = vpop.eup %2123 }
 0x971   :  { %v972_v58 = vpop.xlane.xlu2 %971  ;;  %v979_v62 = vmul.f32 %v2124_v61, %v2114_v27  ;;  %v1149_v2 = vpop.xlane.xlu1 %1148 }
 0x972   :  { %2125 = vrcp.f32 %v972_v58 }
 0x973   :  { %v983_v63 = vpack.c.bf16 %v979_v62, %v979_v62 }
 0x975   :  { %v1012_v36 = vunpack.c.l.b16 %v983_v63  ;;  %v2598_v63 = vpop.f32.mrf.mxu2 }
 0x977   :  { %1443 = vrot.lane.b32.xlu2 %v2321_v28, %s2205_s18 }
 0x978   :  { %v2126_v35 = vpop.eup %2125 }
 0x979   :  { %v980_v1 = vmul.f32 %v2126_v35, %v2118_v41  ;;  %v1152_v4 = vpop.xlane.xlu2 %1151 }
 0x97a   :  { %2127 = vrcp.f32 %v1152_v4 }
 0x97b   :  { %v984_v6 = vpack.c.bf16 %v980_v1, %v980_v1  ;;  %2129 = vrcp.f32 %v1149_v2 }
 0x97d   :  { %v1013_v7 = vunpack.c.l.b16 %v984_v6 }
 0x97f   :  { %v1014_v8 = vpack.c.b16 %v1013_v7, %v1012_v36 }
 0x980   :  { %v2128_v9 = vpop.eup %2127 }
 0x981   :  { %1995 = vmatmul.msk.bf16.vlgmr.msra.gmra.mxu1 %vm189_vm2, %v1014_v8  ;;  %v2130_v10 = vpop.eup %2129  ;;  %v1164_v3 = vmul.f32 %v2128_v9, %v2120_v44  ;;  %v1260_v16 = vpop.permute.xlu2 %1259 }
 0x982   :  { %v1163_v38 = vmul.f32 %v2130_v10, %v2116_v34  ;;  %v1265_v18 = vsel %vm137_vm1, %v1260_v16, 0 }
 0x983   :  { %v1168_v13 = vpack.c.bf16 %v1164_v3, %v1164_v3 }
 0x984   :  { %v1167_v28 = vpack.c.bf16 %v1163_v38, %v1163_v38 }
 0x985   :  { %v1174_v19 = vunpack.c.l.b16 %v1168_v13 }
 0x986   :  { %v1173_v20 = vunpack.c.l.b16 %v1167_v28 }
 0x988   :  { %v1175_v21 = vpack.c.b16 %v1174_v19, %v1173_v20 }
 0x989   :  { %v1177_v17 = vpop.permute.xlu1 %1176 }
 0x98a   :  { %1189 = vmatpush.bf16.msrb.mxu1 %v1177_v17 }
 0x98e   :  { %1274 = vmatpush.bf16.xpose.msra.mxu1 %v1265_v18 }
 0x991   :  { %2000 = vmatmul.msk.bf16.vlgmr.msrb.gmra.mxu1 %vm189_vm2, %v1175_v21 }
 0x9a1   :  { %2004 = vmatmul.msk.bf16.vlgmr.msra.gmra.mxu1 %vm137_vm1, %v1258_v51 }
 0x9ba   :  { %v1134_v22 = vpop.xlane.xlu2 %1133 }
 0x9bb   :  { %v1138_v23 = vsub.f32 %v1122_v49, %v1134_v22 }
 0x9bd   :  { %v1145_v24 = vmul.f32 1.442695, %v1138_v23 }
 0x9bf   :  { %2131 = vpow2.f32 %v1145_v24 }
 0x9c2   :  { %v1202_v25 = vpop.permute.xlu2 %1201 }
 0x9c3   :  { %1214 = vmatpush.bf16.msrb.mxu3 %v1202_v25 }
 0x9c5   :  { %v2132_v26 = vpop.eup %2131 }
 0x9c6   :  { %v1156_v27 = vsel %vm189_vm2, %v2132_v26, 0.0 }
 0x9c7   :  { %1157 = vadd.xlane.f32.xlu0 %v1156_v27 }
 0x9ca   :  { %v1282_v13 = vpop.permute.xlu2 %1281 }
 0x9d2   :  { %v1446_v28 = vpop.permute.xlu2 %1445 }
 0x9e0   :  { %v1155_v50 = vpop.xlane.xlu1 %1154 }
 0x9e1   :  { %2133 = vrcp.f32 %v1155_v50 }
 0x9e7   :  { %v2134_v52 = vpop.eup %2133 }
 0x9e8   :  { %v1165_v53 = vmul.f32 %v2134_v52, %v2573_v56 }
 0x9ea   :  { %v1169_v55 = vpack.c.bf16 %v1165_v53, %v1165_v53 }
 0x9ec   :  { %v1198_v61 = vunpack.c.l.b16 %v1169_v55 }
 0x9fe   :  { %v1030_v32 = vpop.f32.mrf.mxu1 }
 0xa06   :  { %v1032_v33 = vpop.f32.mrf.mxu1 }
 0xa07   :  { %v1037_v34 = vpack.c.bf16 %v1032_v33, %v1030_v32 }
 0xa09   :  { %1997 = vmatmul.msk.bf16.gmra.mxu2 %vm137_vm1, %v1037_v34 }
 0xa0e   :  { %v1191_v39 = vpop.f32.mrf.mxu1 }
 0xa16   :  { %v1193_v41 = vpop.f32.mrf.mxu1 }
 0xa17   :  { %v1222_v42 = vpack.c.bf16 %v1193_v41, %v1191_v39 }
 0xa19   :  { %2002 = vmatmul.msk.bf16.vlgmr.msrb.gmra.mxu0 %vm137_vm1, %v1222_v42  ;;  %v1444_v42 = vpop.permute.xlu2 %1443 }
 0xa1e   :  { %v1276_v43 = vpop.f32.mrf.mxu1 }
 0xa1f   :  { %v1305_v44 = vmul.f32 0.35355338, %v1276_v43 }
 0xa21   :  { %v1309_v47 = vsel %vm189_vm2, %v1305_v44, -inf }
 0xa22   :  { %1310 = vmax.xlane.f32.xlu1 %v1309_v47 }
 0xa26   :  { %v1278_v48 = vpop.f32.mrf.mxu1 }
 0xa27   :  { %v1306_v5 = vmul.f32 0.35355338, %v1278_v48  ;;  %v1407_v48 = vld [vmem:[%s2877_s3 + $0x30] sm:$0xff] }
 0xa29   :  { %v1312_v49 = vsel %vm189_vm2, %v1306_v5, -inf }
 0xa2a   :  { %1313 = vmax.xlane.f32.xlu0 %v1312_v49 }
 0xa3a   :  { %v1158_v51 = vpop.xlane.xlu0 %1157 }
 0xa3b   :  { %2135 = vrcp.f32 %v1158_v51 }
 0xa3e   :  { %1362 = vrot.lane.b32.xlu0 %v2366_v11, %s2202_s16 }
 0xa41   :  { %v2136_v54 = vpop.eup %2135 }
 0xa42   :  { %v1166_v57 = vmul.f32 %v2136_v54, %v2132_v26 }
 0xa44   :  { %v1170_v58 = vpack.c.bf16 %v1166_v57, %v1166_v57 }
 0xa46   :  { %v1199_v62 = vunpack.c.l.b16 %v1170_v58 }
 0xa48   :  { %v1200_v35 = vpack.c.b16 %v1199_v62, %v1198_v61 }
 0xa4a   :  { %2001 = vmatmul.msk.bf16.vlgmr.msrb.gmra.mxu3 %vm189_vm2, %v1200_v35 }
 0xa8c   :  { %v1062_v1 = vpop.f32.mrf.mxu2 }
 0xa8d   :  { %v1069_v2 = vadd.f32 %v1062_v1, %v2552_v14 }
 0xa94   :  { %v2628_v51 = vpop.f32.mrf.mxu2 }
 0xa95   :  { %v1311_v4 = vpop.xlane.xlu1 %1310 }
 0xa96   :  { %v1321_v6 = vsub.f32 %v1305_v44, %v1311_v4  ;;  %v1243_v56 = vpop.f32.mrf.mxu0 }
 0xa97   :  { %v2602_v36 = vadd.f32 %v1243_v56, %v2559_v31  ;;  %v1451_v31 = vsel %vm137_vm1, %v1446_v28, 0 }
 0xa98   :  { %v1325_v7 = vmul.f32 1.442695, %v1321_v6 }
 0xa9a   :  { %2137 = vpow2.f32 %v1325_v7 }
 0xa9d   :  { %v1314_v8 = vpop.xlane.xlu0 %1313 }
 0xa9e   :  { %v1322_v9 = vsub.f32 %v1306_v5, %v1314_v8  ;;  %v2620_v43 = vpop.f32.mrf.mxu0  ;;  %v1410_v5 = vpack.c.bf16 %v1407_v48, %v1407_v48 }
 0xaa0   :  { %v2138_v10 = vpop.eup %2137  ;;  %v1327_v3 = vmul.f32 1.442695, %v1322_v9  ;;  %v1418_v49 = vsel %vm462_vm3, %v1410_v5, 0 }
 0xaa1   :  { %v1333_v38 = vsel %vm189_vm2, %v2138_v10, 0.0 }
 0xaa2   :  { %2139 = vpow2.f32 %v1327_v3  ;;  %1334 = vadd.xlane.f32.xlu1 %v1333_v38 }
 0xaa8   :  { %v2140_v16 = vpop.eup %2139 }
 0xaa9   :  { %v1336_v14 = vsel %vm189_vm2, %v2140_v16, 0.0 }
 0xaaa   :  { %1337 = vadd.xlane.f32.xlu0 %v1336_v14 }
 0xab0   :  { %v1363_v17 = vpop.permute.xlu0 %1362 }
 0xab1   :  { %1375 = vmatpush.bf16.msra.mxu3 %v1363_v17 }
 0xab5   :  { %1460 = vmatpush.bf16.xpose.msrb.mxu3 %v1451_v31 }
 0xabb   :  { %1283 = vrot.lane.b32.xlu1 %v2324_v37, %s2203_s17 }
 0xabe   :  { %1469 = vrot.lane.b32.xlu0 %v2324_v37, %s2204_s2 }
 0xac3   :  { %1467 = vrot.lane.b32.xlu1 %v2324_v37, %s2205_s18 }
 0xacd   :  { %v1216_v18 = vpop.f32.mrf.mxu3 }
 0xad5   :  { %v1218_v19 = vpop.f32.mrf.mxu3 }
 0xad6   :  { %v1223_v20 = vpack.c.bf16 %v1218_v19, %v1216_v18 }
 0xad8   :  { %2003 = vmatmul.msk.bf16.gmra.mxu0 %vm137_vm1, %v1223_v20 }
 0xb15   :  { %v1335_v21 = vpop.xlane.xlu1 %1334 }
 0xb16   :  { %2141 = vrcp.f32 %v1335_v21 }
 0xb1c   :  { %v2142_v23 = vpop.eup %2141 }
 0xb1d   :  { %v1338_v22 = vpop.xlane.xlu0 %1337  ;;  %v1349_v24 = vmul.f32 %v2142_v23, %v2138_v10 }
 0xb1e   :  { %2143 = vrcp.f32 %v1338_v22 }
 0xb1f   :  { %v1353_v26 = vpack.c.bf16 %v1349_v24, %v1349_v24 }
 0xb21   :  { %v1359_v0 = vunpack.c.l.b16 %v1353_v26 }
 0xb24   :  { %v2144_v25 = vpop.eup %2143 }
 0xb25   :  { %v1350_v27 = vmul.f32 %v2144_v25, %v2140_v16 }
 0xb27   :  { %v1354_v29 = vpack.c.bf16 %v1350_v27, %v1350_v27 }
 0xb29   :  { %v1360_v30 = vunpack.c.l.b16 %v1354_v29 }
 0xb2b   :  { %v1361_v32 = vpack.c.b16 %v1360_v30, %v1359_v0 }
 0xb2d   :  { %v1284_v33 = vpop.permute.xlu1 %1283  ;;  %2006 = vmatmul.msk.bf16.vlgmr.msra.gmra.mxu3 %vm189_vm2, %v1361_v32 }
 0xb2e   :  { %v1289_v37 = vsel %vm137_vm1, %v1284_v33, 0 }
 0xb2f   :  { %1298 = vmatpush.bf16.xpose.msra.mxu2 %v1289_v37 }
 0xb30   :  { %v1470_v34 = vpop.permute.xlu0 %1469 }
 0xb31   :  { %v1475_v39 = vsel %vm137_vm1, %v1470_v34, 0 }
 0xb32   :  { %1484 = vmatpush.bf16.xpose.msra.mxu0 %v1475_v39 }
 0xb35   :  { %v1468_v41 = vpop.permute.xlu1 %1467 }
 0xb36   :  { %2005 = vmatmul.msk.bf16.vlgmr.msra.gmra.mxu2 %vm137_vm1, %v1282_v13 }
 0xb37   :  { %1427 = vmatpush.bf16.msrb.mxu2 %v1418_v49 }
 0xb39   :  { %2011 = vmatmul.msk.bf16.vlgmr.msra.gmra.mxu0 %vm137_vm1, %v1468_v41 }
 0xb3d   :  { %2010 = vmatmul.msk.bf16.vlgmr.msrb.gmra.mxu3 %vm137_vm1, %v1444_v42 }
 0xb55   :  { %v1248_v44 = vpop.f32.mrf.mxu0 }
 0xb56   :  { %v2622_v47 = vadd.f32 %v1248_v44, %v1069_v2 }
 0xb5d   :  { %v2630_v52 = vpop.f32.mrf.mxu0 }
 0xbb0   :  { %v1377_v50 = vpop.f32.mrf.mxu3 }
 0xbb6   :  { %v1486_v57 = vpop.f32.mrf.mxu0 }
 0xbb7   :  { %v1493_v8 = vmul.f32 0.35355338, %v1486_v57 }
 0xbb8   :  { %v1379_v53 = vpop.f32.mrf.mxu3 }
 0xbb9   :  { %v1408_v54 = vpack.c.bf16 %v1379_v53, %v1377_v50  ;;  %v1300_v55 = vpop.f32.mrf.mxu2  ;;  %v1501_v13 = vsel %vm189_vm2, %v1493_v8, -inf }
 0xbba   :  { %v1307_v58 = vmul.f32 0.35355338, %v1300_v55 }
 0xbbb   :  { %2008 = vmatmul.msk.bf16.vlgmr.msrb.gmra.mxu2 %vm137_vm1, %v1408_v54 }
 0xbbc   :  { %v1315_v61 = vsel %vm189_vm2, %v1307_v58, -inf }
 0xbbd   :  { %1316 = vmax.xlane.f32.xlu2 %v1315_v61 }
 0xbbe   :  { %v1488_v6 = vpop.f32.mrf.mxu0 }
 0xbbf   :  { %v1494_v7 = vmul.f32 0.35355338, %v1488_v6 }
 0xbc0   :  { %v1462_v62 = vpop.f32.mrf.mxu3 }
 0xbc1   :  { %v1491_v35 = vmul.f32 0.35355338, %v1462_v62  ;;  %v1302_v1 = vpop.f32.mrf.mxu2  ;;  %v1504_v38 = vsel %vm189_vm2, %v1494_v7, -inf }
 0xbc2   :  { %v1308_v2 = vmul.f32 0.35355338, %v1302_v1 }
 0xbc3   :  { %v1495_v4 = vsel %vm189_vm2, %v1491_v35, -inf }
 0xbc4   :  { %1496 = vmax.xlane.f32.xlu1 %v1495_v4  ;;  %v1318_v56 = vsel %vm189_vm2, %v1308_v2, -inf }
 0xbc5   :  { %1319 = vmax.xlane.f32.xlu0 %v1318_v56 }
 0xbc8   :  { %v1464_v9 = vpop.f32.mrf.mxu3 }
 0xbc9   :  { %v1492_v10 = vmul.f32 0.35355338, %v1464_v9 }
 0xbcb   :  { %v1498_v3 = vsel %vm189_vm2, %v1492_v10, -inf }
 0xbcc   :  { %1499 = vmax.xlane.f32.xlu2 %v1498_v3  ;;  %1505 = vmax.xlane.f32.xlu1 %v1504_v38 }
 0xbcd   :  { %1502 = vmax.xlane.f32.xlu0 %v1501_v13 }
 0xbe5   :  { %1387 = vrot.lane.b32.xlu1 %v2380_v45, %s2202_s16 }
 0xc30   :  { %v1317_v16 = vpop.xlane.xlu2 %1316 }
 0xc31   :  { %v1323_v14 = vsub.f32 %v1307_v58, %v1317_v16 }
 0xc33   :  { %v1329_v28 = vmul.f32 1.442695, %v1323_v14 }
 0xc35   :  { %2145 = vpow2.f32 %v1329_v28 }
 0xc37   :  { %v1497_v17 = vpop.xlane.xlu1 %1496 }
 0xc38   :  { %v1320_v31 = vpop.xlane.xlu0 %1319  ;;  %v1507_v32 = vsub.f32 %v1491_v35, %v1497_v17 }
 0xc39   :  { %v1324_v18 = vsub.f32 %v1308_v2, %v1320_v31 }
 0xc3a   :  { %v1511_v34 = vmul.f32 1.442695, %v1507_v32 }
 0xc3b   :  { %v2146_v19 = vpop.eup %2145  ;;  %v1331_v20 = vmul.f32 1.442695, %v1324_v18 }
 0xc3c   :  { %v1339_v21 = vsel %vm189_vm2, %v2146_v19, 0.0 }
 0xc3d   :  { %2147 = vpow2.f32 %v1331_v20  ;;  %1340 = vadd.xlane.f32.xlu2 %v1339_v21 }
 0xc3f   :  { %v1506_v22 = vpop.xlane.xlu1 %1505  ;;  %v1500_v23 = vpop.xlane.xlu2 %1499 }
 0xc40   :  { %v1510_v24 = vsub.f32 %v1494_v7, %v1506_v22  ;;  %v1503_v25 = vpop.xlane.xlu0 %1502  ;;  %v1508_v0 = vsub.f32 %v1492_v10, %v1500_v23 }
 0xc41   :  { %v1509_v26 = vsub.f32 %v1493_v8, %v1503_v25 }
 0xc42   :  { %v1517_v27 = vmul.f32 1.442695, %v1510_v24  ;;  %v1513_v37 = vmul.f32 1.442695, %v1508_v0 }
 0xc43   :  { %v2148_v29 = vpop.eup %2147  ;;  %v1515_v30 = vmul.f32 1.442695, %v1509_v26 }
 0xc44   :  { %v1342_v33 = vsel %vm189_vm2, %v2148_v29, 0.0  ;;  %2149 = vpow2.f32 %v1517_v27  ;;  %v1593_v27 = vld [vmem:[%s2877_s3 + $0x38] sm:$0xff] }
 0xc45   :  { %1343 = vadd.xlane.f32.xlu0 %v1342_v33  ;;  %2151 = vpow2.f32 %v1515_v30 }
 0xc46   :  { %2153 = vpow2.f32 %v1513_v37 }
 0xc47   :  { %2155 = vpow2.f32 %v1511_v34 }
 0xc4a   :  { %v2150_v39 = vpop.eup %2149 }
 0xc4b   :  { %v2152_v41 = vpop.eup %2151  ;;  %v1528_v42 = vsel %vm189_vm2, %v2150_v39, 0.0 }
 0xc4c   :  { %v1525_v44 = vsel %vm189_vm2, %v2152_v41, 0.0  ;;  %v2154_v48 = vpop.eup %2153 }
 0xc4d   :  { %1529 = vadd.xlane.f32.xlu0 %v1528_v42  ;;  %1526 = vadd.xlane.f32.xlu2 %v1525_v44  ;;  %v2156_v5 = vpop.eup %2155  ;;  %v1522_v49 = vsel %vm189_vm2, %v2154_v48, 0.0 }
 0xc4e   :  { %v1519_v50 = vsel %vm189_vm2, %v2156_v5, 0.0 }
 0xc55   :  { %1523 = vadd.xlane.f32.xlu0 %v1522_v49  ;;  %1520 = vadd.xlane.f32.xlu2 %v1519_v50  ;;  %v2034_v49 = vld [vmem:[%s2878_s4] ss:$0 sm:$0xff] }
 0xc57   :  { %v1388_v53 = vpop.permute.xlu1 %1387 }
 0xc58   :  { %1400 = vmatpush.bf16.msrb.mxu1 %v1388_v53  ;;  %v882_v53 = vadd.f32 %v2549_v12, %v2507_v60  ;;  %v511_v12 = vadd.f32 %v2440_v40, %v2502_v46 }
 0xc69   :  { %1573 = vrot.lane.b32.xlu0 %v2380_v45, %s2205_s18 }
 0xc6d   :  { %1548 = vrot.lane.b32.xlu2 %v2366_v11, %s2205_s18 }
 0xcb0   :  { %v1341_v54 = vpop.xlane.xlu2 %1340 }
 0xcb1   :  { %2157 = vrcp.f32 %v1341_v54 }
 0xcb7   :  { %v2158_v57 = vpop.eup %2157 }
 0xcb8   :  { %v1344_v55 = vpop.xlane.xlu0 %1343  ;;  %v1351_v58 = vmul.f32 %v2158_v57, %v2146_v19  ;;  %v1068_v57 = vadd.f32 %v2598_v63, %v882_v53  ;;  %v2188_v63 = vld [vmem:[%s2875_s0 + $0x8] sm:$0xff]  ;;  %v1758_v53 = vld [vmem:[%s2882_s7 + $0x30] sm:$0xff] }
 0xcb9   :  { %2159 = vrcp.f32 %v1344_v55 }
 0xcba   :  { %v1355_v62 = vpack.c.bf16 %v1351_v58, %v1351_v58 }
 0xcbc   :  { %v1384_v6 = vunpack.c.l.b16 %v1355_v62  ;;  %v2187_v62 = vld [vmem:[%s2875_s0] sm:$0xff] }
 0xcbf   :  { %v2160_v61 = vpop.eup %2159 }
 0xcc0   :  { %v1352_v35 = vmul.f32 %v2160_v61, %v2148_v29  ;;  %v1530_v1 = vpop.xlane.xlu0 %1529  ;;  %v1527_v2 = vpop.xlane.xlu2 %1526  ;;  %v1596_v29 = vpack.c.bf16 %v1593_v27, %v1593_v27  ;;  %v1254_v61 = vadd.f32 %v2620_v43, %v1068_v57  ;;  %v1756_v57 = vld [vmem:[%s2882_s7 + $0x20] sm:$0xff] }
 0xcc1   :  { %2161 = vrcp.f32 %v1530_v1 }
 0xcc2   :  { %v1356_v4 = vpack.c.bf16 %v1352_v35, %v1352_v35  ;;  %2163 = vrcp.f32 %v1527_v2  ;;  %v1604_v0 = vsel %vm462_vm3, %v1596_v29, 0 }
 0xcc3   :  { %1613 = vmatpush.bf16.msrb.mxu0 %v1604_v0 }
 0xcc4   :  { %v1385_v56 = vunpack.c.l.b16 %v1356_v4 }
 0xcc6   :  { %v1386_v7 = vpack.c.b16 %v1385_v56, %v1384_v6  ;;  %v698_v56 = vadd.f32 %v2537_v59, %v511_v12 }
 0xcc7   :  { %v2162_v8 = vpop.eup %2161 }
 0xcc8   :  { %2007 = vmatmul.msk.bf16.vlgmr.msrb.gmra.mxu1 %vm189_vm2, %v1386_v7  ;;  %v1524_v11 = vpop.xlane.xlu0 %1523  ;;  %v1521_v45 = vpop.xlane.xlu2 %1520  ;;  %v1538_v16 = vmul.f32 %v2162_v8, %v2150_v39  ;;  %v884_v8 = vadd.f32 %v2554_v15, %v698_v56  ;;  %v2190_v15 = vld [vmem:[%s2875_s0 + $0x18] sm:$0xff] }
 0xcc9   :  { %2165 = vrcp.f32 %v1524_v11  ;;  %v2164_v9 = vpop.eup %2163 }
 0xcca   :  { %2167 = vrcp.f32 %v1521_v45  ;;  %v1537_v13 = vmul.f32 %v2164_v9, %v2152_v41  ;;  %v1542_v20 = vpack.c.bf16 %v1538_v16, %v1538_v16 }
 0xccc   :  { %v1541_v19 = vpack.c.bf16 %v1537_v13, %v1537_v13  ;;  %v1571_v24 = vunpack.c.l.b16 %v1542_v20 }
 0xcce   :  { %v1570_v23 = vunpack.c.l.b16 %v1541_v19 }
 0xccf   :  { %v2166_v10 = vpop.eup %2165 }
 0xcd0   :  { %v2168_v3 = vpop.eup %2167  ;;  %v1536_v38 = vmul.f32 %v2166_v10, %v2154_v48  ;;  %v1549_v28 = vpop.permute.xlu2 %1548  ;;  %v1572_v26 = vpack.c.b16 %v1571_v24, %v1570_v23  ;;  %v1070_v10 = vadd.f32 %v2628_v51, %v884_v8 }
 0xcd1   :  { %v1535_v14 = vmul.f32 %v2168_v3, %v2156_v5  ;;  %1561 = vmatpush.bf16.msra.mxu1 %v1549_v28  ;;  %v1429_v48 = vpop.f32.mrf.mxu2 }
 0xcd2   :  { %v1540_v17 = vpack.c.bf16 %v1536_v38, %v1536_v38  ;;  %v1439_v5 = vadd.f32 %v1429_v48, %v2602_v36  ;;  %v1256_v46 = vadd.f32 %v2630_v52, %v1070_v10  ;;  %v2189_v38 = vld [vmem:[%s2875_s0 + $0x10] sm:$0xff]  ;;  %v2206_v52 = vmov 64.0  }
 0xcd3   :  { %v1539_v31 = vpack.c.bf16 %v1535_v14, %v1535_v14  ;;  %2169 = vrcp.f32 %v2206_v52 }
 0xcd4   :  { %v1546_v18 = vunpack.c.l.b16 %v1540_v17 }
 0xcd5   :  { %v1545_v21 = vunpack.c.l.b16 %v1539_v31 }
 0xcd7   :  { %v1547_v22 = vpack.c.b16 %v1546_v18, %v1545_v21 }
 0xcd9   :  { %2012 = vmatmul.msk.bf16.vlgmr.msra.gmra.mxu1 %vm189_vm2, %v1547_v22  ;;  %v1431_v55 = vpop.f32.mrf.mxu2  ;;  %v2170_v31 = vpop.eup %2169 }
 0xcda   :  { %v1440_v35 = vadd.f32 %v1431_v55, %v1254_v61  ;;  %v1654_v18 = vmul.f32 64.0, %v2170_v31  ;;  %vm1658_vm4 = vweird.f32 %v2170_v31 }
 0xcdb   :  { %v1574_v25 = vpop.permute.xlu0 %1573 }
 0xcdc   :  { %1586 = vmatpush.bf16.msra.mxu3 %v1574_v25  ;;  %v1655_v19 = vsub.f32 1.0, %v1654_v18 }
 0xcde   :  { %v1656_v20 = vmul.f32 %v2170_v31, %v1655_v19 }
 0xcdf   :  { %2013 = vmatmul.msk.bf16.vlgmr.msra.gmra.mxu3 %vm189_vm2, %v1572_v26 }
 0xce0   :  { %v1657_v21 = vadd.f32 %v2170_v31, %v1656_v20 }
 0xce2   :  { %v2692_v22 = vsel %vm1658_vm4, %v2170_v31, %v1657_v21  ;;  %v1812_v31 = vld [vmem:[%s2883_s9 + $0x68] sm:$0xff] }
 0xd45   :  { %v1402_v30 = vpop.f32.mrf.mxu1 }
 0xd4d   :  { %v1404_v32 = vpop.f32.mrf.mxu1 }
 0xd4e   :  { %v1409_v33 = vpack.c.bf16 %v1404_v32, %v1402_v30 }
 0xd50   :  { %2009 = vmatmul.msk.bf16.gmra.mxu2 %vm137_vm1, %v1409_v33 }
 0xd56   :  { %v1563_v37 = vpop.f32.mrf.mxu1 }
 0xd5e   :  { %v1565_v34 = vpop.f32.mrf.mxu1 }
 0xd5f   :  { %v1594_v39 = vpack.c.bf16 %v1565_v34, %v1563_v37 }
 0xd61   :  { %2014 = vmatmul.msk.bf16.vlgmr.msrb.gmra.mxu0 %vm137_vm1, %v1594_v39 }
 0xd62   :  { %v1588_v41 = vpop.f32.mrf.mxu3 }
 0xd6a   :  { %v1590_v42 = vpop.f32.mrf.mxu3 }
 0xd6b   :  { %v1595_v44 = vpack.c.bf16 %v1590_v42, %v1588_v41 }
 0xd71   :  { %2015 = vmatmul.msk.bf16.gmra.mxu0 %vm137_vm1, %v1595_v44 }
 0xdd3   :  { %v1434_v6 = vpop.f32.mrf.mxu2 }
 0xdd4   :  { %v1441_v7 = vadd.f32 %v1434_v6, %v2622_v47  ;;  %v1753_v6 = vld [vmem:[%s2882_s7 + $0x8] sm:$0xff] }
 0xddb   :  { %v1436_v40 = vpop.f32.mrf.mxu2 }
 0xddc   :  { %v1442_v13 = vadd.f32 %v1436_v40, %v1256_v46 }
 0xdde   :  { %v1615_v50 = vpop.f32.mrf.mxu0 }
 0xddf   :  { %v1625_v54 = vadd.f32 %v1615_v50, %v1439_v5 }
 0xde1   :  { %v1633_v58 = vadd.f32 %v2034_v49, %v1625_v54  ;;  %v1759_v54 = vld [vmem:[%s2882_s7 + $0x38] sm:$0xff] }
 0xde2   :  { %v1765_v55 = vpack.c.bf16 %v1759_v54, %v1758_v53 }
 0xde3   :  { %v1637_v36 = vadd.f32 %v2187_v62, %v1633_v58  ;;  %v1757_v58 = vld [vmem:[%s2882_s7 + $0x28] sm:$0xff]  ;;  %v1754_v62 = vld [vmem:[%s2882_s7 + $0x10] sm:$0xff] }
 0xde4   :  { %1780 = vmatpush.bf16.msrb.mxu1 %v1765_v55  ;;  %v1764_v61 = vpack.c.bf16 %v1757_v58, %v1756_v57 }
 0xde5   :  { %v1641_v1 = vsel %vm81_vm0, %v1637_v36, 0.0 }
 0xde6   :  { %v1617_v2 = vpop.f32.mrf.mxu0  ;;  %1642 = vadd.xlane.f32.xlu1 %v1641_v1 }
 0xde7   :  { %v1626_v4 = vadd.f32 %v1617_v2, %v1440_v35 }
 0xde8   :  { %1781 = vmatpush.bf16.msrb.mxu1 %v1764_v61 }
 0xde9   :  { %v1634_v60 = vadd.f32 %v2034_v49, %v1626_v4  ;;  %v1752_v4 = vld [vmem:[%s2882_s7] sm:$0xff] }
 0xdeb   :  { %v1638_v43 = vadd.f32 %v2188_v63, %v1634_v60  ;;  %v1762_v60 = vpack.c.bf16 %v1753_v6, %v1752_v4 }
 0xded   :  { %v1644_v11 = vsel %vm81_vm0, %v1638_v43, 0.0 }
 0xdee   :  { %v1620_v45 = vpop.f32.mrf.mxu0  ;;  %1645 = vadd.xlane.f32.xlu0 %v1644_v11 }
 0xdef   :  { %v1627_v9 = vadd.f32 %v1620_v45, %v1441_v7 }
 0xdf1   :  { %v1635_v3 = vadd.f32 %v2034_v49, %v1627_v9 }
 0xdf3   :  { %v1639_v59 = vadd.f32 %v2189_v38, %v1635_v3 }
 0xdf5   :  { %v1647_v47 = vsel %vm81_vm0, %v1639_v59, 0.0 }
 0xdf6   :  { %v1622_v16 = vpop.f32.mrf.mxu0  ;;  %1648 = vadd.xlane.f32.xlu2 %v1647_v47 }
 0xdf7   :  { %v1628_v14 = vadd.f32 %v1622_v16, %v1442_v13  ;;  %v1813_v16 = vld [vmem:[%s2883_s9 + $0x70] sm:$0xff] }
 0xdf9   :  { %v1636_v28 = vadd.f32 %v2034_v49, %v1628_v14  ;;  %v1814_v14 = vld [vmem:[%s2883_s9 + $0x78] sm:$0xff] }
 0xdfa   :  { %v1824_v52 = vpack.c.bf16 %v1814_v14, %v1813_v16  ;;  %v2037_v16 = vld [vmem:[%s2881_s8] ss:$0 sm:$0xff] }
 0xdfb   :  { %v1640_v51 = vadd.f32 %v2190_v15, %v1636_v28  ;;  %v1811_v28 = vld [vmem:[%s2883_s9 + $0x60] sm:$0xff] }
 0xdfc   :  { %1829 = vmatpush.bf16.msra.mxu2 %v1824_v52  ;;  %v1823_v20 = vpack.c.bf16 %v1812_v31, %v1811_v28 }
 0xdfd   :  { %v1650_v17 = vsel %vm81_vm0, %v1640_v51, 0.0 }
 0xdfe   :  { %1651 = vadd.xlane.f32.xlu1 %v1650_v17 }
 0xe00   :  { %1830 = vmatpush.bf16.msra.mxu2 %v1823_v20 }
 0xe59   :  { %v1643_v23 = vpop.xlane.xlu1 %1642 }
 0xe5a   :  { %v1660_v24 = vmul.f32 %v2692_v22, %v1643_v23  ;;  %v2035_v23 = vld [vmem:[%s2879_s5] ss:$0 sm:$0xff] }
 0xe5c   :  { %v2695_v25 = vsub.f32 %v1637_v36, %v1660_v24  ;;  %v1755_v36 = vld [vmem:[%s2882_s7 + $0x18] sm:$0xff] }
 0xe5d   :  { %v1763_v35 = vpack.c.bf16 %v1755_v36, %v1754_v62 }
 0xe5e   :  { %v1668_v26 = vmul.f32 %v2695_v25, %v2695_v25 }
 0xe5f   :  { %1782 = vmatpush.bf16.msrb.mxu1 %v1763_v35 }
 0xe60   :  { %v1672_v27 = vsel %vm81_vm0, %v1668_v26, 0.0 }
 0xe61   :  { %v1646_v29 = vpop.xlane.xlu0 %1645  ;;  %1673 = vadd.xlane.f32.xlu1 %v1672_v27  ;;  %v1809_v27 = vld [vmem:[%s2883_s9 + $0x50] sm:$0xff] }
 0xe62   :  { %v1661_v0 = vmul.f32 %v2692_v22, %v1646_v29  ;;  %v1810_v29 = vld [vmem:[%s2883_s9 + $0x58] sm:$0xff] }
 0xe63   :  { %1783 = vmatpush.bf16.msrb.mxu1 %v1762_v60 }
 0xe64   :  { %v2701_v30 = vsub.f32 %v1638_v43, %v1661_v0 }
 0xe66   :  { %v1669_v32 = vmul.f32 %v2701_v30, %v2701_v30 }
 0xe68   :  { %v1675_v33 = vsel %vm81_vm0, %v1669_v32, 0.0 }
 0xe69   :  { %v1649_v37 = vpop.xlane.xlu2 %1648  ;;  %1676 = vadd.xlane.f32.xlu1 %v1675_v33 }
 0xe6a   :  { %v1662_v34 = vmul.f32 %v2692_v22, %v1649_v37 }
 0xe6c   :  { %v2707_v39 = vsub.f32 %v1639_v59, %v1662_v34  ;;  %v1822_v34 = vpack.c.bf16 %v1810_v29, %v1809_v27 }
 0xe6e   :  { %v1670_v41 = vmul.f32 %v2707_v39, %v2707_v39  ;;  %1831 = vmatpush.bf16.msra.mxu2 %v1822_v34 }
 0xe70   :  { %v1678_v42 = vsel %vm81_vm0, %v1670_v41, 0.0 }
 0xe71   :  { %1679 = vadd.xlane.f32.xlu0 %v1678_v42  ;;  %v1652_v44 = vpop.xlane.xlu1 %1651 }
 0xe72   :  { %v1663_v48 = vmul.f32 %v2692_v22, %v1652_v44  ;;  %v1807_v44 = vld [vmem:[%s2883_s9 + $0x40] sm:$0xff] }
 0xe74   :  { %v2713_v5 = vsub.f32 %v1640_v51, %v1663_v48  ;;  %v1808_v48 = vld [vmem:[%s2883_s9 + $0x48] sm:$0xff] }
 0xe75   :  { %v1821_v54 = vpack.c.bf16 %v1808_v48, %v1807_v44 }
 0xe76   :  { %v1671_v49 = vmul.f32 %v2713_v5, %v2713_v5 }
 0xe77   :  { %1832 = vmatpush.bf16.msra.mxu2 %v1821_v54 }
 0xe78   :  { %v1681_v50 = vsel %vm81_vm0, %v1671_v49, 0.0 }
 0xe79   :  { %1682 = vadd.xlane.f32.xlu2 %v1681_v50 }
 0xed4   :  { %v1674_v1 = vpop.xlane.xlu1 %1673 }
 0xed5   :  { %v1684_v2 = vmul.f32 %v1674_v1, %v2692_v22 }
 0xed7   :  { %v1688_v12 = vadd.f32 1e-05, %v1684_v2 }
 0xed9   :  { %2171 = vrsqrt.f32 %v1688_v12  ;;  %vm1698_vm6 = vweird.f32 %v1688_v12 }
 0xedc   :  { %v1677_v63 = vpop.xlane.xlu1 %1676 }
 0xedd   :  { %v1685_v43 = vmul.f32 %v1677_v63, %v2692_v22 }
 0xedf   :  { %v2172_v56 = vpop.eup %2171  ;;  %v1689_v7 = vadd.f32 1e-05, %v1685_v43 }
 0xee0   :  { %v1693_v11 = vmul.f32 %v2172_v56, %v1688_v12  ;;  %vm1699_vm5 = vweird.f32 %v2172_v56 }
 0xee1   :  { %2173 = vrsqrt.f32 %v1689_v7  ;;  %vm2745_vm7 = vmor %vm1698_vm6, %vm1699_vm5  ;;  %vm1708_vm9 = vweird.f32 %v1689_v7 }
 0xee2   :  { %v1694_v45 = vmul.f32 %v2172_v56, %v1693_v11 }
 0xee4   :  { %v1695_v8 = vmul.f32 0.5, %v1694_v45  ;;  %v1680_v9 = vpop.xlane.xlu0 %1679  ;;  %v1805_v45 = vld [vmem:[%s2883_s9 + $0x30] sm:$0xff] }
 0xee5   :  { %v1686_v10 = vmul.f32 %v1680_v9, %v2692_v22  ;;  %v1804_v9 = vld [vmem:[%s2883_s9 + $0x28] sm:$0xff] }
 0xee6   :  { %v1696_v3 = vsub.f32 1.5, %v1695_v8 }
 0xee7   :  { %v2174_v40 = vpop.eup %2173  ;;  %v1690_v46 = vadd.f32 1e-05, %v1686_v10 }
 0xee8   :  { %v1697_v38 = vmul.f32 %v2172_v56, %v1696_v3  ;;  %v1703_v59 = vmul.f32 %v2174_v40, %v1689_v7  ;;  %vm1709_vm8 = vweird.f32 %v2174_v40  ;;  %v1801_v3 = vld [vmem:[%s2883_s9 + $0x10] sm:$0xff] }
 0xee9   :  { %2175 = vrsqrt.f32 %v1690_v46  ;;  %vm1710_vm10 = vmor %vm1708_vm9, %vm1709_vm8  ;;  %vm1718_vm12 = vweird.f32 %v1690_v46 }
 0xeea   :  { %v1704_v47 = vmul.f32 %v2174_v40, %v1703_v59  ;;  %v1701_v15 = vsel %vm2745_vm7, %v2172_v56, %v1697_v38  ;;  %v1799_v38 = vld [vmem:[%s2883_s9] sm:$0xff]  ;;  %v1800_v59 = vld [vmem:[%s2883_s9 + $0x8] sm:$0xff] }
 0xeeb   :  { %v1732_v24 = vmul.f32 %v1701_v15, %v2695_v25  ;;  %v2036_v25 = vld [vmem:[%s2880_s6] ss:$0 sm:$0xff]  ;;  %v1817_v13 = vpack.c.bf16 %v1800_v59, %v1799_v38 }
 0xeec   :  { %v1705_v51 = vmul.f32 0.5, %v1704_v47  ;;  %v1683_v17 = vpop.xlane.xlu2 %1682 }
 0xeed   :  { %v1687_v18 = vmul.f32 %v1683_v17, %v2692_v22  ;;  %v1740_v41 = vmul.f32 %v2035_v23, %v1732_v24 }
 0xeee   :  { %v1706_v19 = vsub.f32 1.5, %v1705_v51 }
 0xeef   :  { %v2176_v21 = vpop.eup %2175  ;;  %v1691_v26 = vadd.f32 1e-05, %v1687_v18  ;;  %v2784_v57 = vadd.f32 %v2036_v25, %v1740_v41 }
 0xef0   :  { %v1707_v0 = vmul.f32 %v2174_v40, %v1706_v19  ;;  %v1713_v32 = vmul.f32 %v2176_v21, %v1690_v46  ;;  %vm1719_vm11 = vweird.f32 %v2176_v21 }
 0xef1   :  { %2177 = vrsqrt.f32 %v1691_v26  ;;  %vm1720_vm13 = vmor %vm1718_vm12, %vm1719_vm11  ;;  %vm1728_vm15 = vweird.f32 %v1691_v26 }
 0xef2   :  { %v1711_v33 = vsel %vm1710_vm10, %v2174_v40, %v1707_v0  ;;  %v1714_v37 = vmul.f32 %v2176_v21, %v1713_v32  ;;  %v1802_v40 = vld [vmem:[%s2883_s9 + $0x18] sm:$0xff] }
 0xef3   :  { %v1733_v42 = vmul.f32 %v1711_v33, %v2701_v30  ;;  %v1818_v46 = vpack.c.bf16 %v1802_v40, %v1801_v3 }
 0xef4   :  { %v1715_v49 = vmul.f32 0.5, %v1714_v37 }
 0xef5   :  { %v1741_v50 = vmul.f32 %v2035_v23, %v1733_v42 }
 0xef6   :  { %v1716_v53 = vsub.f32 1.5, %v1715_v49 }
 0xef7   :  { %v2178_v55 = vpop.eup %2177  ;;  %v2786_v58 = vadd.f32 %v2036_v25, %v1741_v50 }
 0xef8   :  { %v1717_v61 = vmul.f32 %v2176_v21, %v1716_v53  ;;  %v1723_v30 = vmul.f32 %v2178_v55, %v1691_v26  ;;  %vm1729_vm14 = vweird.f32 %v2178_v55  ;;  %v2038_v26 = vld [vmem:[%s2884_s10] ss:$0 sm:$0xff] }
 0xef9   :  { %v1760_v62 = vpack.c.bf16 %v2786_v58, %v2784_v57  ;;  %vm1730_vm1 = vmor %vm1728_vm15, %vm1729_vm14 }
 0xefa   :  { %v1724_v36 = vmul.f32 %v2178_v55, %v1723_v30  ;;  %v1721_v35 = vsel %vm1720_vm13, %v2176_v21, %v1717_v61 }
 0xefb   :  { %2016 = vmatmul.msk.bf16.vlgmr.msrb.gmra.mxu1 %vm81_vm0, %v1760_v62  ;;  %v1734_v4 = vmul.f32 %v1721_v35, %v2707_v39  ;;  %v1806_v39 = vld [vmem:[%s2883_s9 + $0x38] sm:$0xff] }
 0xefc   :  { %v1725_v1 = vmul.f32 0.5, %v1724_v36  ;;  %v1820_v8 = vpack.c.bf16 %v1806_v39, %v1805_v45 }
 0xefd   :  { %v1742_v63 = vmul.f32 %v2035_v23, %v1734_v4 }
 0xefe   :  { %v1726_v2 = vsub.f32 1.5, %v1725_v1  ;;  %1833 = vmatpush.bf16.msra.mxu2 %v1820_v8 }
 0xeff   :  { %v1750_v56 = vadd.f32 %v2036_v25, %v1742_v63 }
 0xf00   :  { %v1727_v6 = vmul.f32 %v2178_v55, %v1726_v2 }
 0xf02   :  { %v1731_v60 = vsel %vm1730_vm1, %v2178_v55, %v1727_v6 }
 0xf03   :  { %v1735_v12 = vmul.f32 %v1731_v60, %v2713_v5  ;;  %v1803_v5 = vld [vmem:[%s2883_s9 + $0x20] sm:$0xff] }
 0xf04   :  { %v1819_v10 = vpack.c.bf16 %v1804_v9, %v1803_v5 }
 0xf05   :  { %v1743_v43 = vmul.f32 %v2035_v23, %v1735_v12 }
 0xf06   :  { %1834 = vmatpush.bf16.msra.mxu2 %v1819_v10 }
 0xf07   :  { %v1751_v7 = vadd.f32 %v2036_v25, %v1743_v43 }
 0xf09   :  { %v1761_v11 = vpack.c.bf16 %v1751_v7, %v1750_v56 }
 0xf0a   :  { %1835 = vmatpush.bf16.msra.mxu2 %v1818_v46 }
 0xf0b   :  { %2017 = vmatmul.msk.bf16.gmra.mxu1 %vm81_vm0, %v1761_v11 }
 0xf0e   :  { %1836 = vmatpush.bf16.msra.mxu2 %v1817_v13 }
 0xf78   :  { %v1785_v47 = vpop.f32.mrf.mxu1 }
 0xf79   :  { %v1786_v14 = vadd.f32 %v2037_v16, %v1785_v47 }
 0xf7b   :  { %v1795_v51 = vmax.f32 %v1786_v14, 0.0 }
 0xf80   :  { %v1787_v28 = vpop.f32.mrf.mxu1 }
 0xf81   :  { %v1788_v15 = vadd.f32 %v2037_v16, %v1787_v28 }
 0xf83   :  { %v1796_v17 = vmax.f32 %v1788_v15, 0.0 }
 0xf85   :  { %v1815_v52 = vpack.c.bf16 %v1796_v17, %v1795_v51  ;;  %v2039_v17 = vld [vmem:[%s2885_s11] ss:$0 sm:$0xff] }
 0xf87   :  { %1837 = vmatmul.bf16.vlgmr.msra.gmra.mxu2 %v1815_v52 }
 0xf88   :  { %v1790_v31 = vpop.f32.mrf.mxu1 }
 0xf89   :  { %v1791_v18 = vadd.f32 %v2037_v16, %v1790_v31 }
 0xf8b   :  { %v1797_v21 = vmax.f32 %v1791_v18, 0.0  ;;  %v2040_v18 = vld [vmem:[%s2886_s12] ss:$0 sm:$0xff] }
 0xf90   :  { %v1792_v19 = vpop.f32.mrf.mxu1 }
 0xf91   :  { %v1793_v20 = vadd.f32 %v2037_v16, %v1792_v19 }
 0xf93   :  { %v1798_v23 = vmax.f32 %v1793_v20, 0.0 }
 0xf95   :  { %v1816_v24 = vpack.c.bf16 %v1798_v23, %v1797_v21 }
 0xf97   :  { %1842 = vmatmul.bf16.gmra.mxu2 %v1816_v24 }
0x100a   :  { %v1838_v27 = vpop.f32.mrf.mxu2 }
0x100b   :  { %v1839_v29 = vadd.f32 %v2038_v26, %v1838_v27 }
0x100d   :  { %v1848_v0 = vadd.f32 %v1839_v29, %v2784_v57 }
0x100f   :  { %v1852_v32 = vsel %vm81_vm0, %v1848_v0, 0.0 }
0x1010   :  { %1853 = vadd.xlane.f32.xlu1 %v1852_v32 }
0x1012   :  { %v1840_v33 = vpop.f32.mrf.mxu2 }
0x1013   :  { %v1841_v37 = vadd.f32 %v2038_v26, %v1840_v33 }
0x1015   :  { %v1849_v34 = vadd.f32 %v1841_v37, %v2786_v58 }
0x1017   :  { %v1855_v25 = vsel %vm81_vm0, %v1849_v34, 0.0 }
0x1018   :  { %1856 = vadd.xlane.f32.xlu0 %v1855_v25 }
0x101a   :  { %v1843_v41 = vpop.f32.mrf.mxu2 }
0x101b   :  { %v1844_v42 = vadd.f32 %v2038_v26, %v1843_v41 }
0x101d   :  { %v1850_v44 = vadd.f32 %v1844_v42, %v1750_v56 }
0x101f   :  { %v1858_v48 = vsel %vm81_vm0, %v1850_v44, 0.0 }
0x1020   :  { %1859 = vadd.xlane.f32.xlu2 %v1858_v48 }
0x1022   :  { %v1845_v49 = vpop.f32.mrf.mxu2 }
0x1023   :  { %v1846_v50 = vadd.f32 %v2038_v26, %v1845_v49 }
0x1025   :  { %v1851_v53 = vadd.f32 %v1846_v50, %v1751_v7 }
0x1027   :  { %v1861_v54 = vsel %vm81_vm0, %v1851_v53, 0.0 }
0x1028   :  { %1862 = vadd.xlane.f32.xlu1 %v1861_v54 }
0x1083   :  { %v1854_v55 = vpop.xlane.xlu1 %1853 }
0x1084   :  { %v1864_v57 = vmul.f32 %v1854_v55, %v2692_v22 }
0x1086   :  { %v1868_v61 = vsub.f32 %v1848_v0, %v1864_v57 }
0x1088   :  { %v1872_v58 = vmul.f32 %v1868_v61, %v1868_v61 }
0x108a   :  { %v1876_v30 = vsel %vm81_vm0, %v1872_v58, 0.0 }
0x108b   :  { %v1857_v62 = vpop.xlane.xlu0 %1856  ;;  %1877 = vadd.xlane.f32.xlu0 %v1876_v30 }
0x108c   :  { %v1865_v36 = vmul.f32 %v1857_v62, %v2692_v22 }
0x108e   :  { %v1869_v35 = vsub.f32 %v1849_v34, %v1865_v36 }
0x1090   :  { %v1873_v1 = vmul.f32 %v1869_v35, %v1869_v35 }
0x1092   :  { %v1879_v2 = vsel %vm81_vm0, %v1873_v1, 0.0 }
0x1093   :  { %v1860_v4 = vpop.xlane.xlu2 %1859  ;;  %1880 = vadd.xlane.f32.xlu2 %v1879_v2 }
0x1094   :  { %v1866_v6 = vmul.f32 %v1860_v4, %v2692_v22 }
0x1096   :  { %v2835_v60 = vsub.f32 %v1850_v44, %v1866_v6 }
0x1098   :  { %v1874_v12 = vmul.f32 %v2835_v60, %v2835_v60 }
0x109a   :  { %v1882_v63 = vsel %vm81_vm0, %v1874_v12, 0.0 }
0x109b   :  { %1883 = vadd.xlane.f32.xlu1 %v1882_v63  ;;  %v1863_v43 = vpop.xlane.xlu1 %1862 }
0x109c   :  { %v1867_v56 = vmul.f32 %v1863_v43, %v2692_v22 }
0x109e   :  { %v2841_v7 = vsub.f32 %v1851_v53, %v1867_v56 }
0x10a0   :  { %v1875_v11 = vmul.f32 %v2841_v7, %v2841_v7 }
0x10a2   :  { %v1885_v45 = vsel %vm81_vm0, %v1875_v11, 0.0 }
0x10a3   :  { %1886 = vadd.xlane.f32.xlu0 %v1885_v45 }
0x10fe   :  { %v1878_v39 = vpop.xlane.xlu0 %1877 }
0x10ff   :  { %v1888_v8 = vmul.f32 %v1878_v39, %v2692_v22 }
0x1101   :  { %v1892_v5 = vadd.f32 1e-05, %v1888_v8 }
0x1103   :  { %2179 = vrsqrt.f32 %v1892_v5  ;;  %vm1902_vm3 = vweird.f32 %v1892_v5 }
0x1106   :  { %v1881_v9 = vpop.xlane.xlu2 %1880 }
0x1107   :  { %v1889_v10 = vmul.f32 %v1881_v9, %v2692_v22 }
0x1109   :  { %v2180_v3 = vpop.eup %2179  ;;  %v1893_v40 = vadd.f32 1e-05, %v1889_v10 }
0x110a   :  { %v1897_v46 = vmul.f32 %v2180_v3, %v1892_v5  ;;  %vm1903_vm2 = vweird.f32 %v2180_v3 }
0x110b   :  { %2181 = vrsqrt.f32 %v1893_v40  ;;  %vm1904_vm4 = vmor %vm1902_vm3, %vm1903_vm2  ;;  %vm1912_vm6 = vweird.f32 %v1893_v40 }
0x110c   :  { %v1898_v38 = vmul.f32 %v2180_v3, %v1897_v46 }
0x110e   :  { %v1899_v59 = vmul.f32 0.5, %v1898_v38  ;;  %v1884_v13 = vpop.xlane.xlu1 %1883 }
0x110f   :  { %v1890_v47 = vmul.f32 %v1884_v13, %v2692_v22 }
0x1110   :  { %v1900_v16 = vsub.f32 1.5, %v1899_v59 }
0x1111   :  { %v2182_v14 = vpop.eup %2181  ;;  %v1894_v28 = vadd.f32 1e-05, %v1890_v47 }
0x1112   :  { %v1901_v15 = vmul.f32 %v2180_v3, %v1900_v16  ;;  %v1907_v51 = vmul.f32 %v2182_v14, %v1893_v40  ;;  %vm1913_vm5 = vweird.f32 %v2182_v14 }
0x1113   :  { %2183 = vrsqrt.f32 %v1894_v28  ;;  %vm1914_vm7 = vmor %vm1912_vm6, %vm1913_vm5  ;;  %vm1922_vm9 = vweird.f32 %v1894_v28 }
0x1114   :  { %v1905_v52 = vsel %vm1904_vm4, %v2180_v3, %v1901_v15  ;;  %v1908_v31 = vmul.f32 %v2182_v14, %v1907_v51 }
0x1115   :  { %v1936_v19 = vmul.f32 %v1905_v52, %v1868_v61 }
0x1116   :  { %v1909_v20 = vmul.f32 0.5, %v1908_v31  ;;  %v1887_v21 = vpop.xlane.xlu0 %1886 }
0x1117   :  { %v1944_v23 = vmul.f32 %v2039_v17, %v1936_v19  ;;  %v1891_v24 = vmul.f32 %v1887_v21, %v2692_v22 }
0x1118   :  { %v1910_v26 = vsub.f32 1.5, %v1909_v20 }
0x1119   :  { %v2184_v27 = vpop.eup %2183  ;;  %v1952_v29 = vadd.f32 %v2040_v18, %v1944_v23  ;;  %v1895_v0 = vadd.f32 1e-05, %v1891_v24 }
0x111a   :  { %v1911_v32 = vmul.f32 %v2182_v14, %v1910_v26  ;;  %v1917_v33 = vmul.f32 %v2184_v27, %v1894_v28  ;;  %vm1923_vm8 = vweird.f32 %v2184_v27 }
0x111b   :  { %1956 = vst.msk [vmem:[%s2887_s13] sm:$0xff] %vm81_vm0, %v1952_v29  ;;  %2185 = vrsqrt.f32 %v1895_v0  ;;  %vm1924_vm10 = vmor %vm1922_vm9, %vm1923_vm8  ;;  %vm1932_vm12 = vweird.f32 %v1895_v0 }
0x111c   :  { %v1915_v37 = vsel %vm1914_vm7, %v2182_v14, %v1911_v32  ;;  %v1918_v34 = vmul.f32 %v2184_v27, %v1917_v33 }
0x111d   :  { %v1937_v25 = vmul.f32 %v1915_v37, %v1869_v35 }
0x111e   :  { %v1919_v41 = vmul.f32 0.5, %v1918_v34 }
0x111f   :  { %v1945_v22 = vmul.f32 %v2039_v17, %v1937_v25 }
0x1120   :  { %v1920_v42 = vsub.f32 1.5, %v1919_v41 }
0x1121   :  { %v2186_v44 = vpop.eup %2185  ;;  %v1953_v48 = vadd.f32 %v2040_v18, %v1945_v22 }
0x1122   :  { %v1921_v49 = vmul.f32 %v2184_v27, %v1920_v42  ;;  %v1927_v50 = vmul.f32 %v2186_v44, %v1895_v0  ;;  %vm1933_vm11 = vweird.f32 %v2186_v44 }
0x1123   :  { %1957 = vst.msk [vmem:[%s2887_s13 + $0x8] sm:$0xff] %vm81_vm0, %v1953_v48  ;;  %vm1934_vm13 = vmor %vm1932_vm12, %vm1933_vm11 }
0x1124   :  { %v1925_v53 = vsel %vm1924_vm10, %v2184_v27, %v1921_v49  ;;  %v1928_v54 = vmul.f32 %v2186_v44, %v1927_v50 }
0x1125   :  { %v1938_v55 = vmul.f32 %v1925_v53, %v2835_v60 }
0x1126   :  { %v1929_v57 = vmul.f32 0.5, %v1928_v54 }
0x1127   :  { %v1946_v61 = vmul.f32 %v2039_v17, %v1938_v55 }
0x1128   :  { %v1930_v58 = vsub.f32 1.5, %v1929_v57 }
0x1129   :  { %v1954_v30 = vadd.f32 %v2040_v18, %v1946_v61 }
0x112a   :  { %v1931_v62 = vmul.f32 %v2186_v44, %v1930_v58 }
0x112b   :  { %1958 = vst.msk [vmem:[%s2887_s13 + $0x10] sm:$0xff] %vm81_vm0, %v1954_v30 }
0x112c   :  { %v1935_v36 = vsel %vm1934_vm13, %v2186_v44, %v1931_v62 }
0x112d   :  { %v1939_v35 = vmul.f32 %v1935_v36, %v2841_v7 }
0x112f   :  { %v1947_v1 = vmul.f32 %v2039_v17, %v1939_v35 }
0x1131   :  { %v1955_v2 = vadd.f32 %v2040_v18, %v1947_v1 }
0x1133   :  { %1959 = vst.msk [vmem:[%s2887_s13 + $0x18] sm:$0xff] %vm81_vm0, %v1955_v2 }

// kernel: seq2seq_forward.9
= control target key start
LH: loop header
LB: loop body
LE: loop exit
PB: predicated region body
PF: predicated region fallthrough
CT: control target
= control target key end

     0   :  { %vm115_vm0 = vcmask 523264   ;;  %vm156_vm1 = vcmask 64512   ;;  %s4056_s29 = smov 48   ;;  %s4058_s30 = smov 104   ;;  %vm233_vm2 = vcmask 1043456   ;;  %vm1491_vm10 = vcmask 130048   ;;  %s4008_s4 = inlined_call_operand.vmem [shape: f32[64,192], index: 4, kind: input, shape index: {}]   ;;  %s4009_s0 = inlined_call_operand.vmem [shape: f32[16,64], index: 0, kind: input, shape index: {}]   ;;  %s4010_s5 = inlined_call_operand.vmem [shape: f32[1,192], index: 5, kind: input, shape index: {}]   ;;  %s4011_s2 = inlined_call_operand.vmem [shape: f32[2,8,8], index: 2, kind: input, shape index: {}]   ;;  %s4012_s6 = inlined_call_operand.vmem [shape: f32[64,64], index: 6, kind: input, shape index: {}]   ;;  %s4013_s7 = inlined_call_operand.vmem [shape: f32[1,64], index: 7, kind: input, shape index: {}]   ;;  %s4014_s8 = inlined_call_operand.vmem [shape: f32[1,64], index: 8, kind: input, shape index: {}]   ;;  %s4015_s9 = inlined_call_operand.vmem [shape: f32[1,64], index: 9, kind: input, shape index: {}]   ;;  %s4016_s12 = inlined_call_operand.vmem [shape: f32[64,128], index: 12, kind: input, shape index: {}]   ;;  %s4017_s13 = inlined_call_operand.vmem [shape: f32[1,128], index: 13, kind: input, shape index: {}]   ;;  %s4018_s1 = inlined_call_operand.vmem [shape: f32[32,64], index: 1, kind: input, shape index: {}]   ;;  %s4019_s10 = inlined_call_operand.vmem [shape: f32[64,64], index: 10, kind: input, shape index: {}]   ;;  %s4020_s11 = inlined_call_operand.vmem [shape: f32[1,64], index: 11, kind: input, shape index: {}]   ;;  %s4021_s3 = inlined_call_operand.vmem [shape: f32[2,8,16], index: 3, kind: input, shape index: {}]   ;;  %s4022_s14 = inlined_call_operand.vmem [shape: f32[64,64], index: 14, kind: input, shape index: {}]   ;;  %s4023_s15 = inlined_call_operand.vmem [shape: f32[1,64], index: 15, kind: input, shape index: {}]   ;;  %s4024_s16 = inlined_call_operand.vmem [shape: f32[1,64], index: 16, kind: input, shape index: {}]   ;;  %s4025_s17 = inlined_call_operand.vmem [shape: f32[1,64], index: 17, kind: input, shape index: {}]   ;;  %s4026_s19 = inlined_call_operand.vmem [shape: f32[1,128], index: 19, kind: input, shape index: {}]   ;;  %s4027_s18 = inlined_call_operand.vmem [shape: f32[64,128], index: 18, kind: input, shape index: {}]   ;;  %s4028_s20 = inlined_call_operand.vmem [shape: f32[128,64], index: 20, kind: input, shape index: {}]   ;;  %s4029_s21 = inlined_call_operand.vmem [shape: f32[1,64], index: 21, kind: input, shape index: {}]   ;;  %s4030_s22 = inlined_call_operand.vmem [shape: f32[1,64], index: 22, kind: input, shape index: {}]   ;;  %s4031_s23 = inlined_call_operand.vmem [shape: f32[1,64], index: 23, kind: input, shape index: {}]   ;;  %s4032_s24 = inlined_call_operand.vmem [shape: f32[16,64], index: 24, kind: output, shape index: {}]  }
   0x1   :  { %4060 = sst [smem:[#allocation2_spill]] %s4008_s4  ;;  %s3010_s4 = smov 112  }
   0x2   :  { %4061 = sst [smem:[#allocation3_spill]] %s4009_s0  ;;  %s3005_s0 = smov 120  }
   0x3   :  { %4062 = sst [smem:[#allocation4_spill]] %s4010_s5  ;;  %s4044_s25 = smov 40  }
   0x4   :  { %4063 = sst [smem:[#allocation5_spill]] %s4011_s2  ;;  %s4040_s2 = smov 32  }
   0x5   :  { %4064 = sst [smem:[#allocation6_spill]] %s4012_s6  ;;  %s4054_s6 = smov 88  }
   0x6   :  { %4065 = sst [smem:[#allocation7_spill]] %s4013_s7  ;;  %s3006_s7 = smov 64  }
   0x7   :  { %4066 = sst [smem:[#allocation8_spill]] %s4014_s8  ;;  %s4042_s28 = smov 16  }
   0x8   :  { %4067 = sst [smem:[#allocation9_spill]] %s4015_s9  ;;  %s4046_s9 = smov 96  }
   0x9   :  { %4068 = sst [smem:[#allocation10_spill]] %s4016_s12  ;;  %s4038_s12 = smov 24  }
   0xa   :  { %s4069_s27 = sld [smem:[#allocation2_spill]] }
   0xb   :  { %s4070_s5 = sld [smem:[#allocation3_spill]] }
   0xc   :  { %s4071_s26 = sld [smem:[#allocation4_spill]] }
   0xd   :  { %s4072_s8 = sld [smem:[#allocation5_spill]] }
  0x10   :  { %v96_v0 = vld [vmem:[%s4069_s27 + $0x60] sm:$0xff]  ;;  %v98_v1 = vld [vmem:[%s4069_s27 + $0x70] sm:$0xff]  ;;  %v97_v15 = vld [vmem:[%s4069_s27 + $0x68] sm:$0xff] }
  0x11   :  { %v92_v2 = vld [vmem:[%s4069_s27 + $0x40] sm:$0xff]  ;;  %v107_v3 = vpack.c.bf16 %v98_v1, %v96_v0  ;;  %v94_v4 = vld [vmem:[%s4069_s27 + $0x50] sm:$0xff]  ;;  %v79_v13 = vld [vmem:[%s4070_s5 + $0x8] sm:$0xff] }
  0x12   :  { %v105_v5 = vpack.c.bf16 %v94_v4, %v92_v2  ;;  %v88_v6 = vld [vmem:[%s4069_s27 + $0x20] sm:$0xff]  ;;  %v90_v7 = vld [vmem:[%s4069_s27 + $0x30] sm:$0xff]  ;;  %v99_v16 = vld [vmem:[%s4069_s27 + $0x78] sm:$0xff] }
  0x13   :  { %123 = vmatpush.bf16.msra.mxu1 %v107_v3  ;;  %v103_v8 = vpack.c.bf16 %v90_v7, %v88_v6  ;;  %v84_v9 = vld [vmem:[%s4069_s27] sm:$0xff]  ;;  %v86_v10 = vld [vmem:[%s4069_s27 + $0x10] sm:$0xff]  ;;  %v93_v17 = vld [vmem:[%s4069_s27 + $0x48] sm:$0xff]  ;;  %v108_v19 = vpack.c.bf16 %v99_v16, %v97_v15 }
  0x14   :  { %v101_v11 = vpack.c.bf16 %v86_v10, %v84_v9  ;;  %v78_v12 = vld [vmem:[%s4070_s5] sm:$0xff]  ;;  %v95_v20 = vld [vmem:[%s4069_s27 + $0x58] sm:$0xff]  ;;  %v89_v23 = vld [vmem:[%s4069_s27 + $0x28] sm:$0xff] }
  0x15   :  { %v100_v14 = vpack.c.bf16 %v79_v13, %v78_v12  ;;  %v3189_v18 = vld [vmem:[%s4071_s26] sm:$0x3]  ;;  %v106_v21 = vpack.c.bf16 %v95_v20, %v93_v17  ;;  %v91_v24 = vld [vmem:[%s4069_s27 + $0x38] sm:$0xff]  ;;  %v85_v28 = vld [vmem:[%s4069_s27 + $0x8] sm:$0xff]  ;;  %s4073_s26 = sld [smem:[#allocation6_spill]] }
  0x16   :  { %v111_v22 = vperm.slane %v3189_v18, 0  ;;  %v104_v26 = vpack.c.bf16 %v91_v24, %v89_v23  ;;  %v87_v29 = vld [vmem:[%s4069_s27 + $0x18] sm:$0xff]  ;;  %s3007_s27 = smov 56   ;;  %v3235_v54 = vld [vmem:[%s4072_s8] sm:$0xff]  ;;  %v112_v60 = vperm.slane %v3189_v18, 1 }
  0x17   :  { %124 = vmatpush.bf16.msra.mxu1 %v105_v5  ;;  %v102_v31 = vpack.c.bf16 %v87_v29, %v85_v28 }
  0x1b   :  { %125 = vmatpush.bf16.msra.mxu1 %v103_v8  ;;  %v3251_v8 = vld [vmem:[%s4072_s8 + $0x8] sm:$0xff]  ;;  %s4052_s8 = smov 80  }
  0x1f   :  { %126 = vmatpush.bf16.msra.mxu1 %v101_v11 }
  0x22   :  { %2747 = vmatmul.msk.bf16.vlgmr.msra.gmra.mxu1 %vm115_vm0, %v100_v14 }
  0x23   :  { %137 = vmatpush.bf16.msrb.mxu1 %v108_v19 }
  0x27   :  { %138 = vmatpush.bf16.msrb.mxu1 %v106_v21 }
  0x2b   :  { %139 = vmatpush.bf16.msrb.mxu1 %v104_v26 }
  0x2f   :  { %140 = vmatpush.bf16.msrb.mxu1 %v102_v31 }
  0x32   :  { %2748 = vmatmul.msk.bf16.vlgmr.msrb.gmra.mxu1 %vm115_vm0, %v100_v14 }
  0x9f   :  { %v128_v25 = vpop.f32.mrf.mxu1 }
  0xa0   :  { %v129_v27 = vadd.f32 %v128_v25, %v111_v22 }
  0xa2   :  { %v149_v30 = vpack.c.bf16 %v129_v27, %v129_v27 }
  0xa4   :  { %v152_v32 = vunpack.c.l.b16 %v149_v30 }
  0xa6   :  { %v3207_v33 = vpack.c.b16 %v152_v32, %v152_v32 }
  0xa7   :  { %v130_v34 = vpop.f32.mrf.mxu1 }
  0xa8   :  { %v131_v35 = vadd.f32 %v130_v34, %v111_v22  ;;  %272 = vrot.lane.b32.xlu1 %v3207_v33, %s3005_s0  ;;  %154 = vrot.lane.b32.xlu0 %v3207_v33, %s3006_s7 }
  0xaa   :  { %v150_v36 = vpack.c.bf16 %v131_v35, %v131_v35 }
  0xac   :  { %v177_v37 = vunpack.c.l.b16 %v150_v36 }
  0xae   :  { %v3214_v38 = vpack.c.b16 %v177_v37, %v177_v37 }
  0xaf   :  { %v142_v49 = vpop.f32.mrf.mxu1 }
  0xb0   :  { %297 = vrot.lane.b32.xlu2 %v3214_v38, %s3007_s27  ;;  %179 = vrot.lane.b32.xlu1 %v3214_v38, %s3006_s7  ;;  %v143_v1 = vadd.f32 %v142_v49, %v112_v60 }
  0xb1   :  { %274 = vrot.lane.b32.xlu0 %v3207_v33, %s3007_s27 }
  0xb2   :  { %v228_v3 = vpack.c.bf16 %v143_v1, %v143_v1 }
  0xb4   :  { %v347_v5 = vunpack.c.l.b16 %v228_v3  ;;  %v235_v18 = vsel %vm233_vm2, %v228_v3, 0 }
  0xb6   :  { %v3242_v6 = vpack.c.b16 %v347_v5, %v347_v5 }
  0xb7   :  { %v144_v50 = vpop.f32.mrf.mxu1 }
  0xb8   :  { %295 = vrot.lane.b32.xlu2 %v3214_v38, %s3005_s0  ;;  %v145_v14 = vadd.f32 %v144_v50, %v112_v60 }
  0xba   :  { %v229_v15 = vpack.c.bf16 %v145_v14, %v145_v14 }
  0xbc   :  { %v371_v16 = vunpack.c.l.b16 %v229_v15  ;;  %v254_v19 = vsel %vm233_vm2, %v229_v15, 0 }
  0xbe   :  { %v3257_v17 = vpack.c.b16 %v371_v16, %v371_v16 }
 0x10a   :  { %v298_v39 = vpop.permute.xlu2 %297 }
 0x10b   :  { %v303_v40 = vsel %vm156_vm1, %v298_v39, 0 }
 0x10c   :  { %312 = vmatpush.bf16.xpose.msra.mxu1 %v303_v40 }
 0x112   :  { %v296_v41 = vpop.permute.xlu2 %295 }
 0x113   :  { %2754 = vmatmul.msk.bf16.vlgmr.msra.gmra.mxu1 %vm156_vm1, %v296_v41 }
 0x11a   :  { %v273_v42 = vpop.permute.xlu1 %272  ;;  %v155_v43 = vpop.permute.xlu0 %154 }
 0x11b   :  { %v161_v44 = vsel %vm156_vm1, %v155_v43, 0 }
 0x11c   :  { %170 = vmatpush.bf16.xpose.msra.mxu2 %v161_v44 }
 0x122   :  { %v180_v45 = vpop.permute.xlu1 %179 }
 0x123   :  { %v275_v46 = vpop.permute.xlu0 %274  ;;  %2749 = vmatmul.msk.bf16.vlgmr.msra.gmra.mxu2 %vm156_vm1, %v149_v30  ;;  %v185_v47 = vsel %vm156_vm1, %v180_v45, 0 }
 0x124   :  { %194 = vmatpush.bf16.xpose.msra.mxu3 %v185_v47  ;;  %v280_v48 = vsel %vm156_vm1, %v275_v46, 0  ;;  %244 = vmatpush.bf16.msrb.mxu2 %v235_v18 }
 0x125   :  { %289 = vmatpush.bf16.xpose.msra.mxu0 %v280_v48  ;;  %v394_v48 = vld [vmem:[%s4073_s26 + $0x8] sm:$0xff] }
 0x126   :  { %v396_v50 = vpack.c.bf16 %v394_v48, %v394_v48 }
 0x12b   :  { %2750 = vmatmul.msk.bf16.vlgmr.msra.gmra.mxu3 %vm156_vm1, %v150_v36 }
 0x12c   :  { %2753 = vmatmul.msk.bf16.vlgmr.msra.gmra.mxu0 %vm156_vm1, %v273_v42  ;;  %263 = vmatpush.bf16.msrb.mxu3 %v254_v19 }
 0x190   :  { %v314_v51 = vpop.f32.mrf.mxu1 }
 0x191   :  { %v319_v10 = vmul.f32 0.35355338, %v314_v51 }
 0x193   :  { %v321_v12 = vadd.f32 %v319_v10, %v3251_v8 }
 0x195   :  { %v325_v13 = vsel %vm156_vm1, %v321_v12, -inf }
 0x198   :  { %v316_v52 = vpop.f32.mrf.mxu1 }
 0x199   :  { %v401_v52 = vsel %vm233_vm2, %v396_v50, 0 }
 0x19a   :  { %410 = vmatpush.bf16.msrb.mxu0 %v401_v52 }
 0x1a6   :  { %v172_v53 = vpop.f32.mrf.mxu2 }
 0x1a7   :  { %v200_v55 = vmul.f32 0.35355338, %v172_v53 }
 0x1a9   :  { %v291_v56 = vpop.f32.mrf.mxu0  ;;  %v202_v57 = vadd.f32 %v200_v55, %v3235_v54 }
 0x1aa   :  { %v318_v58 = vmul.f32 0.35355338, %v291_v56 }
 0x1ab   :  { %v204_v59 = vsel %vm156_vm1, %v202_v57, -inf }
 0x1ac   :  { %205 = vmax.xlane.f32.xlu0 %v204_v59  ;;  %v320_v61 = vadd.f32 %v318_v58, %v3235_v54 }
 0x1ae   :  { %v174_v62 = vpop.f32.mrf.mxu2  ;;  %v196_v63 = vpop.f32.mrf.mxu3  ;;  %v322_v0 = vsel %vm156_vm1, %v320_v61, -inf }
 0x1af   :  { %323 = vmax.xlane.f32.xlu1 %v322_v0  ;;  %v201_v7 = vmul.f32 0.35355338, %v196_v63 }
 0x1b1   :  { %v293_v2 = vpop.f32.mrf.mxu0  ;;  %v203_v9 = vadd.f32 %v201_v7, %v3251_v8 }
 0x1b3   :  { %v207_v11 = vsel %vm156_vm1, %v203_v9, -inf }
 0x1b6   :  { %v198_v4 = vpop.f32.mrf.mxu3 }
 0x1c0   :  { %349 = vrot.lane.b32.xlu0 %v3242_v6, %s3005_s0 }
 0x1c8   :  { %439 = vrot.lane.b32.xlu1 %v3207_v33, %s4056_s29 }
 0x1ea   :  { %208 = vmax.xlane.f32.xlu0 %v207_v11 }
 0x1f2   :  { %326 = vmax.xlane.f32.xlu1 %v325_v13 }
 0x20b   :  { %373 = vrot.lane.b32.xlu1 %v3257_v17, %s3005_s0 }
 0x213   :  { %578 = vrot.lane.b32.xlu1 %v3207_v33, %s4058_s30 }
 0x21b   :  { %511 = vrot.lane.b32.xlu1 %v3242_v6, %s3010_s4 }
 0x21f   :  { %v206_v20 = vpop.xlane.xlu0 %205 }
 0x220   :  { %v210_v21 = vsub.f32 %v202_v57, %v206_v20 }
 0x222   :  { %v212_v22 = vmul.f32 1.442695, %v210_v21  ;;  %v324_v23 = vpop.xlane.xlu1 %323 }
 0x223   :  { %v328_v24 = vsub.f32 %v320_v61, %v324_v23  ;;  %603 = vrot.lane.b32.xlu1 %v3214_v38, %s4044_s25 }
 0x224   :  { %2861 = vpow2.f32 %v212_v22 }
 0x225   :  { %v330_v25 = vmul.f32 1.442695, %v328_v24  ;;  %v269_v24 = vld [vmem:[%s4073_s26] sm:$0xff] }
 0x227   :  { %2863 = vpow2.f32 %v330_v25  ;;  %v271_v25 = vpack.c.bf16 %v269_v24, %v269_v24 }
 0x22a   :  { %v2862_v26 = vpop.eup %2861 }
 0x22b   :  { %601 = vrot.lane.b32.xlu1 %v3214_v38, %s4058_s30  ;;  %v216_v27 = vsel %vm156_vm1, %v2862_v26, 0.0 }
 0x22c   :  { %217 = vadd.xlane.f32.xlu2 %v216_v27  ;;  %v421_v27 = vsel %vm233_vm2, %v271_v25, 0 }
 0x22d   :  { %v2864_v28 = vpop.eup %2863  ;;  %430 = vmatpush.bf16.msrb.mxu1 %v421_v27 }
 0x22e   :  { %v334_v30 = vsel %vm156_vm1, %v2864_v28, 0.0 }
 0x232   :  { %v350_v29 = vpop.permute.xlu0 %349 }
 0x233   :  { %v355_v31 = vsel %vm233_vm2, %v350_v29, 0 }
 0x234   :  { %335 = vadd.xlane.f32.xlu2 %v334_v30  ;;  %364 = vmatpush.bf16.msra.mxu2 %v355_v31 }
 0x23a   :  { %v440_v32 = vpop.permute.xlu1 %439 }
 0x23b   :  { %v445_v59 = vsel %vm156_vm1, %v440_v32, 0 }
 0x24c   :  { %437 = vrot.lane.b32.xlu2 %v3207_v33, %s3010_s4 }
 0x25d   :  { %v209_v34 = vpop.xlane.xlu0 %208 }
 0x25e   :  { %v211_v35 = vsub.f32 %v203_v9, %v209_v34 }
 0x260   :  { %v214_v39 = vmul.f32 1.442695, %v211_v35 }
 0x265   :  { %v327_v36 = vpop.xlane.xlu1 %326 }
 0x266   :  { %v329_v37 = vsub.f32 %v321_v12, %v327_v36 }
 0x268   :  { %v332_v40 = vmul.f32 1.442695, %v329_v37 }
 0x26a   :  { %2865 = vpow2.f32 %v332_v40 }
 0x26b   :  { %2867 = vpow2.f32 %v214_v39 }
 0x270   :  { %v2866_v41 = vpop.eup %2865 }
 0x271   :  { %v2868_v42 = vpop.eup %2867  ;;  %v337_v43 = vsel %vm156_vm1, %v2866_v41, 0.0 }
 0x272   :  { %338 = vadd.xlane.f32.xlu0 %v337_v43  ;;  %v219_v44 = vsel %vm156_vm1, %v2868_v42, 0.0 }
 0x275   :  { %220 = vadd.xlane.f32.xlu2 %v219_v44 }
 0x27d   :  { %v374_v45 = vpop.permute.xlu1 %373 }
 0x27e   :  { %v379_v46 = vsel %vm233_vm2, %v374_v45, 0 }
 0x27f   :  { %388 = vmatpush.bf16.msra.mxu3 %v379_v46 }
 0x285   :  { %v579_v47 = vpop.permute.xlu1 %578 }
 0x286   :  { %462 = vrot.lane.b32.xlu0 %v3214_v38, %s4056_s29  ;;  %s4076_s29 = sld [smem:[#allocation8_spill]] }
 0x28d   :  { %460 = vrot.lane.b32.xlu2 %v3214_v38, %s3010_s4  ;;  %v512_v49 = vpop.permute.xlu1 %511 }
 0x28e   :  { %580 = vrot.lane.b32.xlu0 %v3207_v33, %s4044_s25  ;;  %v517_v51 = vsel %vm233_vm2, %v512_v49, 0  ;;  %s4050_s25 = smov 72  }
 0x28f   :  { %526 = vmatpush.bf16.msra.mxu0 %v517_v51 }
 0x295   :  { %v604_v31 = vpop.permute.xlu1 %603 }
 0x296   :  { %v609_v35 = vsel %vm156_vm1, %v604_v31, 0 }
 0x29d   :  { %v602_v52 = vpop.permute.xlu1 %601 }
 0x29f   :  { %v218_v53 = vpop.xlane.xlu2 %217 }
 0x2a0   :  { %2869 = vrcp.f32 %v218_v53 }
 0x2a6   :  { %v2870_v55 = vpop.eup %2869 }
 0x2a7   :  { %v224_v56 = vmul.f32 %v2870_v55, %v2862_v26  ;;  %v336_v57 = vpop.xlane.xlu2 %335 }
 0x2a8   :  { %2871 = vrcp.f32 %v336_v57 }
 0x2a9   :  { %v226_v58 = vpack.c.bf16 %v224_v56, %v224_v56 }
 0x2ab   :  { %2751 = vmatmul.msk.bf16.vlgmr.msrb.gmra.mxu2 %vm156_vm1, %v226_v58 }
 0x2ac   :  { %454 = vmatpush.bf16.xpose.msrb.mxu2 %v445_v59 }
 0x2ae   :  { %v2872_v60 = vpop.eup %2871 }
 0x2af   :  { %v342_v61 = vmul.f32 %v2872_v60, %v2864_v28  ;;  %v438_v63 = vpop.permute.xlu2 %437 }
 0x2b1   :  { %v344_v62 = vpack.c.bf16 %v342_v61, %v342_v61 }
 0x2bb   :  { %2755 = vmatmul.msk.bf16.vlgmr.msra.gmra.mxu2 %vm156_vm1, %v344_v62 }
 0x2cb   :  { %2759 = vmatmul.msk.bf16.vlgmr.msrb.gmra.mxu2 %vm156_vm1, %v438_v63 }
 0x2e5   :  { %v339_v2 = vpop.xlane.xlu0 %338 }
 0x2e8   :  { %v221_v0 = vpop.xlane.xlu2 %220 }
 0x2e9   :  { %2873 = vrcp.f32 %v221_v0 }
 0x2ea   :  { %2875 = vrcp.f32 %v339_v2 }
 0x2ef   :  { %v2874_v1 = vpop.eup %2873 }
 0x2f0   :  { %v225_v3 = vmul.f32 %v2874_v1, %v2868_v42  ;;  %v2876_v9 = vpop.eup %2875  ;;  %v461_v14 = vpop.permute.xlu2 %460 }
 0x2f1   :  { %v343_v10 = vmul.f32 %v2876_v9, %v2866_v41 }
 0x2f2   :  { %v227_v4 = vpack.c.bf16 %v225_v3, %v225_v3 }
 0x2f3   :  { %v345_v12 = vpack.c.bf16 %v343_v10, %v343_v10 }
 0x2f4   :  { %2752 = vmatmul.msk.bf16.vlgmr.msrb.gmra.mxu3 %vm156_vm1, %v227_v4 }
 0x2f8   :  { %v463_v5 = vpop.permute.xlu0 %462 }
 0x2f9   :  { %v468_v7 = vsel %vm156_vm1, %v463_v5, 0 }
 0x2fa   :  { %477 = vmatpush.bf16.xpose.msrb.mxu3 %v468_v7 }
 0x300   :  { %v581_v11 = vpop.permute.xlu0 %580 }
 0x301   :  { %v586_v13 = vsel %vm156_vm1, %v581_v11, 0 }
 0x304   :  { %2756 = vmatmul.msk.bf16.vlgmr.msra.gmra.mxu3 %vm156_vm1, %v345_v12 }
 0x305   :  { %595 = vmatpush.bf16.xpose.msra.mxu3 %v586_v13 }
 0x314   :  { %2760 = vmatmul.msk.bf16.vlgmr.msrb.gmra.mxu3 %vm156_vm1, %v461_v14 }
 0x324   :  { %2764 = vmatmul.msk.bf16.vlgmr.msra.gmra.mxu3 %vm156_vm1, %v579_v47 }
 0x32e   :  { %v246_v15 = vpop.f32.mrf.mxu2 }
 0x336   :  { %v248_v16 = vpop.f32.mrf.mxu2 }
 0x33e   :  { %v366_v18 = vpop.f32.mrf.mxu2 }
 0x346   :  { %v368_v19 = vpop.f32.mrf.mxu2 }
 0x34e   :  { %v456_v20 = vpop.f32.mrf.mxu2 }
 0x34f   :  { %v483_v21 = vmul.f32 0.35355338, %v456_v20 }
 0x351   :  { %v485_v22 = vadd.f32 %v483_v21, %v3235_v54 }
 0x353   :  { %v487_v23 = vsel %vm156_vm1, %v485_v22, -inf }
 0x354   :  { %488 = vmax.xlane.f32.xlu2 %v487_v23 }
 0x356   :  { %v458_v26 = vpop.f32.mrf.mxu2 }
 0x36c   :  { %721 = vrot.lane.b32.xlu2 %v3207_v33, %s4040_s2 }
 0x377   :  { %v265_v28 = vpop.f32.mrf.mxu3 }
 0x378   :  { %v270_v29 = vpack.c.bf16 %v265_v28, %v246_v15 }
 0x37a   :  { %2758 = vmatmul.msk.bf16.vlgmr.msrb.gmra.mxu1 %vm156_vm1, %v270_v29 }
 0x37f   :  { %v267_v30 = vpop.f32.mrf.mxu3 }
 0x387   :  { %v390_v32 = vpop.f32.mrf.mxu3 }
 0x388   :  { %v395_v34 = vpack.c.bf16 %v390_v32, %v366_v18 }
 0x38a   :  { %2757 = vmatmul.msk.bf16.vlgmr.msrb.gmra.mxu0 %vm156_vm1, %v395_v34 }
 0x38b   :  { %618 = vmatpush.bf16.xpose.msrb.mxu0 %v609_v35 }
 0x38f   :  { %v392_v36 = vpop.f32.mrf.mxu3 }
 0x397   :  { %v479_v37 = vpop.f32.mrf.mxu3 }
 0x398   :  { %v484_v39 = vmul.f32 0.35355338, %v479_v37  ;;  %v553_v37 = vld [vmem:[%s4073_s26 + $0x10] sm:$0xff] }
 0x39a   :  { %v486_v40 = vadd.f32 %v484_v39, %v3251_v8  ;;  %v555_v39 = vpack.c.bf16 %v553_v37, %v553_v37 }
 0x39c   :  { %v490_v41 = vsel %vm156_vm1, %v486_v40, -inf }
 0x39d   :  { %491 = vmax.xlane.f32.xlu1 %v490_v41  ;;  %v560_v41 = vsel %vm233_vm2, %v555_v39, 0 }
 0x39e   :  { %569 = vmatpush.bf16.msra.mxu2 %v560_v41 }
 0x39f   :  { %v481_v42 = vpop.f32.mrf.mxu3 }
 0x3a7   :  { %v597_v43 = vpop.f32.mrf.mxu3 }
 0x3a8   :  { %v624_v55 = vmul.f32 0.35355338, %v597_v43 }
 0x3aa   :  { %v626_v56 = vadd.f32 %v624_v55, %v3235_v54 }
 0x3ac   :  { %v628_v59 = vsel %vm156_vm1, %v626_v56, -inf }
 0x3af   :  { %v599_v44 = vpop.f32.mrf.mxu3 }
 0x3b6   :  { %532 = vrot.lane.b32.xlu1 %v3257_v17, %s3010_s4 }
 0x3c7   :  { %v489_v45 = vpop.xlane.xlu2 %488 }
 0x3c8   :  { %v493_v46 = vsub.f32 %v485_v22, %v489_v45 }
 0x3ca   :  { %v495_v47 = vmul.f32 1.442695, %v493_v46 }
 0x3cc   :  { %2877 = vpow2.f32 %v495_v47 }
 0x3cf   :  { %v722_v4 = vpop.permute.xlu2 %721 }
 0x3d0   :  { %v727_v7 = vsel %vm156_vm1, %v722_v4, 0 }
 0x3d2   :  { %v2878_v48 = vpop.eup %2877 }
 0x3d3   :  { %v499_v49 = vsel %vm156_vm1, %v2878_v48, 0.0 }
 0x3d4   :  { %500 = vadd.xlane.f32.xlu0 %v499_v49 }
 0x3e8   :  { %719 = vrot.lane.b32.xlu0 %v3207_v33, %s4046_s9 }
 0x3f7   :  { %v432_v50 = vpop.f32.mrf.mxu1 }
 0x407   :  { %v412_v51 = vpop.f32.mrf.mxu0 }
 0x408   :  { %v3318_v53 = vadd.f32 %v432_v50, %v412_v51 }
 0x40f   :  { %v3342_v24 = vpop.f32.mrf.mxu0 }
 0x410   :  { %v492_v57 = vpop.xlane.xlu1 %491 }
 0x411   :  { %v494_v58 = vsub.f32 %v486_v40, %v492_v57 }
 0x412   :  { %629 = vmax.xlane.f32.xlu0 %v628_v59 }
 0x413   :  { %v497_v60 = vmul.f32 1.442695, %v494_v58 }
 0x415   :  { %2879 = vpow2.f32 %v497_v60 }
 0x41b   :  { %v2880_v61 = vpop.eup %2879 }
 0x41c   :  { %v502_v62 = vsel %vm156_vm1, %v2880_v61, 0.0 }
 0x41d   :  { %503 = vadd.xlane.f32.xlu2 %v502_v62 }
 0x426   :  { %652 = vrot.lane.b32.xlu0 %v3242_v6, %s4058_s30 }
 0x428   :  { %v533_v63 = vpop.permute.xlu1 %532 }
 0x429   :  { %v538_v0 = vsel %vm233_vm2, %v533_v63, 0 }
 0x42a   :  { %547 = vmatpush.bf16.msra.mxu1 %v538_v0 }
 0x42e   :  { %742 = vrot.lane.b32.xlu0 %v3214_v38, %s4046_s9 }
 0x435   :  { %744 = vrot.lane.b32.xlu2 %v3214_v38, %s4040_s2  ;;  %s4048_s2 = smov 8  }
 0x436   :  { %862 = vrot.lane.b32.xlu0 %v3207_v33, %s4038_s12 }
 0x447   :  { %v501_v1 = vpop.xlane.xlu0 %500 }
 0x448   :  { %2881 = vrcp.f32 %v501_v1 }
 0x44e   :  { %v2882_v2 = vpop.eup %2881 }
 0x44f   :  { %v507_v3 = vmul.f32 %v2882_v2, %v2878_v48  ;;  %v3358_v48 = vpop.f32.mrf.mxu1 }
 0x451   :  { %v509_v5 = vpack.c.bf16 %v507_v3, %v507_v3 }
 0x453   :  { %2761 = vmatmul.msk.bf16.vlgmr.msra.gmra.mxu0 %vm156_vm1, %v509_v5 }
 0x454   :  { %736 = vmatpush.bf16.xpose.msra.mxu0 %v727_v7 }
 0x45a   :  { %v720_v9 = vpop.permute.xlu0 %719 }
 0x463   :  { %2765 = vmatmul.msk.bf16.vlgmr.msrb.gmra.mxu0 %vm156_vm1, %v602_v52 }
 0x473   :  { %2769 = vmatmul.msk.bf16.vlgmr.msra.gmra.mxu0 %vm156_vm1, %v720_v9 }
 0x485   :  { %v630_v10 = vpop.xlane.xlu0 %629 }
 0x486   :  { %v634_v11 = vsub.f32 %v626_v56, %v630_v10 }
 0x488   :  { %v636_v12 = vmul.f32 1.442695, %v634_v11 }
 0x48a   :  { %2883 = vpow2.f32 %v636_v12 }
 0x490   :  { %v2884_v13 = vpop.eup %2883  ;;  %v504_v14 = vpop.xlane.xlu2 %503 }
 0x491   :  { %2885 = vrcp.f32 %v504_v14  ;;  %v640_v15 = vsel %vm156_vm1, %v2884_v13, 0.0 }
 0x492   :  { %641 = vadd.xlane.f32.xlu1 %v640_v15 }
 0x497   :  { %v2886_v16 = vpop.eup %2885 }
 0x498   :  { %v508_v18 = vmul.f32 %v2886_v16, %v2880_v61  ;;  %v653_v19 = vpop.permute.xlu0 %652  ;;  %v745_v20 = vpop.permute.xlu2 %744 }
 0x499   :  { %v658_v21 = vsel %vm233_vm2, %v653_v19, 0  ;;  %v750_v23 = vsel %vm156_vm1, %v745_v20, 0 }
 0x49a   :  { %v510_v22 = vpack.c.bf16 %v508_v18, %v508_v18  ;;  %667 = vmatpush.bf16.msrb.mxu1 %v658_v21 }
 0x49c   :  { %2762 = vmatmul.msk.bf16.vlgmr.msra.gmra.mxu1 %vm156_vm1, %v510_v22 }
 0x49e   :  { %759 = vmatpush.bf16.xpose.msra.mxu1 %v750_v23 }
 0x4a0   :  { %v743_v42 = vpop.permute.xlu0 %742 }
 0x4a8   :  { %v863_v46 = vpop.permute.xlu0 %862 }
 0x4a9   :  { %v868_v49 = vsel %vm156_vm1, %v863_v46, 0 }
 0x4ab   :  { %860 = vrot.lane.b32.xlu1 %v3207_v33, %s4054_s6 }
 0x4d0   :  { %v528_v25 = vpop.f32.mrf.mxu0 }
 0x4d8   :  { %v530_v26 = vpop.f32.mrf.mxu0 }
 0x4d9   :  { %v694_v26 = vld [vmem:[%s4073_s26 + $0x18] sm:$0xff] }
 0x4e0   :  { %v620_v27 = vpop.f32.mrf.mxu0 }
 0x4e1   :  { %v625_v28 = vmul.f32 0.35355338, %v620_v27  ;;  %v696_v27 = vpack.c.bf16 %v694_v26, %v694_v26 }
 0x4e3   :  { %v627_v29 = vadd.f32 %v625_v28, %v3251_v8  ;;  %v701_v28 = vsel %vm233_vm2, %v696_v27, 0 }
 0x4e4   :  { %710 = vmatpush.bf16.msrb.mxu3 %v701_v28  ;;  %v835_v28 = vld [vmem:[%s4073_s26 + $0x20] sm:$0xff] }
 0x4e5   :  { %v631_v30 = vsel %vm156_vm1, %v627_v29, -inf }
 0x4e6   :  { %632 = vmax.xlane.f32.xlu2 %v631_v30 }
 0x4e8   :  { %v622_v31 = vpop.f32.mrf.mxu0 }
 0x4f0   :  { %v738_v32 = vpop.f32.mrf.mxu0 }
 0x4f1   :  { %v765_v34 = vmul.f32 0.35355338, %v738_v32 }
 0x4f3   :  { %v767_v35 = vadd.f32 %v765_v34, %v3235_v54 }
 0x4f5   :  { %v769_v36 = vsel %vm156_vm1, %v767_v35, -inf }
 0x4f6   :  { %770 = vmax.xlane.f32.xlu0 %v769_v36 }
 0x4f8   :  { %v740_v40 = vpop.f32.mrf.mxu0 }
 0x4fe   :  { %673 = vrot.lane.b32.xlu2 %v3257_v17, %s4058_s30  ;;  %s4087_s30 = smov 16  }
 0x505   :  { %v642_v43 = vpop.xlane.xlu1 %641 }
 0x506   :  { %2887 = vrcp.f32 %v642_v43  ;;  %885 = vrot.lane.b32.xlu2 %v3214_v38, %s4038_s12  ;;  %s4084_s12 = smov 80  }
 0x50c   :  { %v2888_v44 = vpop.eup %2887 }
 0x50d   :  { %v648_v45 = vmul.f32 %v2888_v44, %v2884_v13 }
 0x50e   :  { %883 = vrot.lane.b32.xlu2 %v3214_v38, %s4054_s6 }
 0x50f   :  { %v650_v47 = vpack.c.bf16 %v648_v45, %v648_v45 }
 0x511   :  { %2766 = vmatmul.msk.bf16.vlgmr.msrb.gmra.mxu1 %vm156_vm1, %v650_v47 }
 0x512   :  { %877 = vmatpush.bf16.xpose.msrb.mxu1 %v868_v49 }
 0x516   :  { %1003 = vrot.lane.b32.xlu2 %v3207_v33, %s4042_s28 }
 0x519   :  { %v549_v50 = vpop.f32.mrf.mxu1 }
 0x51a   :  { %v554_v51 = vpack.c.bf16 %v549_v50, %v528_v25 }
 0x51c   :  { %2763 = vmatmul.msk.bf16.vlgmr.msra.gmra.mxu2 %vm156_vm1, %v554_v51 }
 0x51d   :  { %v861_v55 = vpop.permute.xlu1 %860 }
 0x521   :  { %v551_v52 = vpop.f32.mrf.mxu1  ;;  %2770 = vmatmul.msk.bf16.vlgmr.msra.gmra.mxu1 %vm156_vm1, %v743_v42 }
 0x531   :  { %2774 = vmatmul.msk.bf16.vlgmr.msrb.gmra.mxu1 %vm156_vm1, %v861_v55 }
 0x559   :  { %v633_v56 = vpop.xlane.xlu2 %632 }
 0x55a   :  { %v635_v57 = vsub.f32 %v627_v29, %v633_v56 }
 0x55c   :  { %v638_v58 = vmul.f32 1.442695, %v635_v57 }
 0x55e   :  { %2889 = vpow2.f32 %v638_v58 }
 0x561   :  { %v674_v59 = vpop.permute.xlu2 %673 }
 0x562   :  { %v679_v60 = vsel %vm233_vm2, %v674_v59, 0 }
 0x563   :  { %688 = vmatpush.bf16.msrb.mxu2 %v679_v60 }
 0x564   :  { %v2890_v61 = vpop.eup %2889 }
 0x565   :  { %v643_v62 = vsel %vm156_vm1, %v2890_v61, 0.0 }
 0x566   :  { %644 = vadd.xlane.f32.xlu1 %v643_v62 }
 0x569   :  { %v771_v63 = vpop.xlane.xlu0 %770  ;;  %v886_v25 = vpop.permute.xlu2 %885 }
 0x56a   :  { %v775_v0 = vsub.f32 %v767_v35, %v771_v63  ;;  %v891_v36 = vsel %vm156_vm1, %v886_v25, 0 }
 0x56c   :  { %v777_v1 = vmul.f32 1.442695, %v775_v0 }
 0x56e   :  { %2891 = vpow2.f32 %v777_v1 }
 0x571   :  { %v884_v30 = vpop.permute.xlu2 %883 }
 0x574   :  { %v2892_v2 = vpop.eup %2891 }
 0x575   :  { %v781_v3 = vsel %vm156_vm1, %v2892_v2, 0.0 }
 0x576   :  { %782 = vadd.xlane.f32.xlu0 %v781_v3 }
 0x579   :  { %v1004_v37 = vpop.permute.xlu2 %1003 }
 0x57a   :  { %v1009_v40 = vsel %vm156_vm1, %v1004_v37, 0 }
 0x58a   :  { %793 = vrot.lane.b32.xlu0 %v3242_v6, %s4046_s9 }
 0x58e   :  { %v3372_v4 = vpop.f32.mrf.mxu1 }
 0x592   :  { %1001 = vrot.lane.b32.xlu0 %v3207_v33, %s4052_s8 }
 0x596   :  { %v671_v5 = vpop.f32.mrf.mxu1 }
 0x59a   :  { %814 = vrot.lane.b32.xlu0 %v3257_v17, %s4046_s9  ;;  %s4075_s9 = sld [smem:[#allocation10_spill]] }
 0x59e   :  { %v761_v7 = vpop.f32.mrf.mxu1 }
 0x59f   :  { %v766_v9 = vmul.f32 0.35355338, %v761_v7  ;;  %v571_v10 = vpop.f32.mrf.mxu2 }
 0x5a0   :  { %v3379_v11 = vadd.f32 %v571_v10, %v3318_v53 }
 0x5a1   :  { %v768_v12 = vadd.f32 %v766_v9, %v3251_v8 }
 0x5a2   :  { %934 = vrot.lane.b32.xlu0 %v3242_v6, %s4054_s6 }
 0x5a3   :  { %v772_v13 = vsel %vm156_vm1, %v768_v12, -inf }
 0x5a4   :  { %773 = vmax.xlane.f32.xlu1 %v772_v13 }
 0x5a6   :  { %v763_v14 = vpop.f32.mrf.mxu1 }
 0x5a7   :  { %v3405_v57 = vpop.f32.mrf.mxu2 }
 0x5aa   :  { %1024 = vrot.lane.b32.xlu0 %v3214_v38, %s4052_s8 }
 0x5ae   :  { %v879_v15 = vpop.f32.mrf.mxu1 }
 0x5af   :  { %v906_v16 = vmul.f32 0.35355338, %v879_v15 }
 0x5b1   :  { %v908_v18 = vadd.f32 %v906_v16, %v3235_v54 }
 0x5b3   :  { %v910_v19 = vsel %vm156_vm1, %v908_v18, -inf }
 0x5b4   :  { %911 = vmax.xlane.f32.xlu1 %v910_v19 }
 0x5b6   :  { %v881_v53 = vpop.f32.mrf.mxu1 }
 0x5d9   :  { %v645_v20 = vpop.xlane.xlu1 %644 }
 0x5da   :  { %2893 = vrcp.f32 %v645_v20 }
 0x5e0   :  { %v2894_v21 = vpop.eup %2893 }
 0x5e1   :  { %v649_v22 = vmul.f32 %v2894_v21, %v2890_v61 }
 0x5e3   :  { %v651_v23 = vpack.c.bf16 %v649_v22, %v649_v22 }
 0x5e5   :  { %2767 = vmatmul.msk.bf16.vlgmr.msrb.gmra.mxu2 %vm156_vm1, %v651_v23 }
 0x5e9   :  { %v783_v29 = vpop.xlane.xlu0 %782 }
 0x5ea   :  { %2895 = vrcp.f32 %v783_v29  ;;  %v837_v29 = vpack.c.bf16 %v835_v28, %v835_v28 }
 0x5f0   :  { %v2896_v31 = vpop.eup %2895 }
 0x5f1   :  { %v789_v32 = vmul.f32 %v2896_v31, %v2892_v2 }
 0x5f3   :  { %v791_v39 = vpack.c.bf16 %v789_v32, %v789_v32 }
 0x5fc   :  { %v794_v34 = vpop.permute.xlu0 %793 }
 0x5fd   :  { %v799_v35 = vsel %vm233_vm2, %v794_v34, 0 }
 0x5fe   :  { %808 = vmatpush.bf16.msra.mxu2 %v799_v35 }
 0x601   :  { %2771 = vmatmul.msk.bf16.vlgmr.msra.gmra.mxu2 %vm156_vm1, %v791_v39 }
 0x602   :  { %900 = vmatpush.bf16.xpose.msrb.mxu2 %v891_v36 }
 0x604   :  { %v1002_v41 = vpop.permute.xlu0 %1001 }
 0x60a   :  { %1018 = vmatpush.bf16.xpose.msra.mxu2 %v1009_v40 }
 0x60c   :  { %v815_v42 = vpop.permute.xlu0 %814 }
 0x60d   :  { %v820_v43 = vsel %vm233_vm2, %v815_v42, 0 }
 0x60e   :  { %829 = vmatpush.bf16.msra.mxu3 %v820_v43 }
 0x611   :  { %2775 = vmatmul.msk.bf16.vlgmr.msrb.gmra.mxu2 %vm156_vm1, %v884_v30  ;;  %v842_v30 = vsel %vm233_vm2, %v837_v29, 0 }
 0x612   :  { %851 = vmatpush.bf16.msrb.mxu0 %v842_v30 }
 0x614   :  { %v935_v58 = vpop.permute.xlu0 %934 }
 0x615   :  { %v940_v61 = vsel %vm233_vm2, %v935_v58, 0 }
 0x617   :  { %v774_v44 = vpop.xlane.xlu1 %773 }
 0x618   :  { %v776_v45 = vsub.f32 %v768_v12, %v774_v44 }
 0x61a   :  { %v779_v46 = vmul.f32 1.442695, %v776_v45 }
 0x61c   :  { %2897 = vpow2.f32 %v779_v46  ;;  %v1025_v25 = vpop.permute.xlu0 %1024 }
 0x621   :  { %2779 = vmatmul.msk.bf16.vlgmr.msra.gmra.mxu2 %vm156_vm1, %v1002_v41 }
 0x622   :  { %v2898_v47 = vpop.eup %2897 }
 0x623   :  { %v784_v49 = vsel %vm156_vm1, %v2898_v47, 0.0 }
 0x624   :  { %785 = vadd.xlane.f32.xlu2 %v784_v49 }
 0x627   :  { %v912_v50 = vpop.xlane.xlu1 %911 }
 0x628   :  { %v916_v51 = vsub.f32 %v908_v18, %v912_v50 }
 0x62a   :  { %v918_v52 = vmul.f32 1.442695, %v916_v51 }
 0x62c   :  { %2899 = vpow2.f32 %v918_v52 }
 0x632   :  { %v2900_v55 = vpop.eup %2899 }
 0x633   :  { %v922_v56 = vsel %vm156_vm1, %v2900_v55, 0.0 }
 0x634   :  { %923 = vadd.xlane.f32.xlu1 %v922_v56 }
 0x64d   :  { %1026 = vrot.lane.b32.xlu1 %v3214_v38, %s4042_s28  ;;  %s4080_s28 = smov 96  }
 0x668   :  { %v690_v59 = vpop.f32.mrf.mxu2 }
 0x669   :  { %v695_v60 = vpack.c.bf16 %v690_v59, %v3372_v4 }
 0x66b   :  { %2768 = vmatmul.msk.bf16.vlgmr.msrb.gmra.mxu3 %vm156_vm1, %v695_v60 }
 0x66c   :  { %949 = vmatpush.bf16.msrb.mxu3 %v940_v61 }
 0x670   :  { %v692_v62 = vpop.f32.mrf.mxu2 }
 0x684   :  { %v810_v63 = vpop.f32.mrf.mxu2 }
 0x68c   :  { %v812_v0 = vpop.f32.mrf.mxu2 }
 0x694   :  { %v902_v1 = vpop.f32.mrf.mxu2 }
 0x695   :  { %v907_v2 = vmul.f32 0.35355338, %v902_v1 }
 0x697   :  { %v786_v3 = vpop.xlane.xlu2 %785  ;;  %v909_v5 = vadd.f32 %v907_v2, %v3251_v8 }
 0x698   :  { %2901 = vrcp.f32 %v786_v3 }
 0x699   :  { %v913_v7 = vsel %vm156_vm1, %v909_v5, -inf }
 0x69a   :  { %914 = vmax.xlane.f32.xlu0 %v913_v7 }
 0x69c   :  { %v904_v9 = vpop.f32.mrf.mxu2 }
 0x69e   :  { %v2902_v10 = vpop.eup %2901 }
 0x69f   :  { %v790_v4 = vmul.f32 %v2902_v10, %v2898_v47 }
 0x6a1   :  { %v792_v12 = vpack.c.bf16 %v790_v4, %v790_v4 }
 0x6a3   :  { %2772 = vmatmul.msk.bf16.vlgmr.msra.gmra.mxu3 %vm156_vm1, %v792_v12 }
 0x6a4   :  { %v1020_v13 = vpop.f32.mrf.mxu2 }
 0x6a5   :  { %v1047_v14 = vmul.f32 0.35355338, %v1020_v13 }
 0x6a7   :  { %v924_v15 = vpop.xlane.xlu1 %923  ;;  %v1049_v16 = vadd.f32 %v1047_v14, %v3235_v54 }
 0x6a8   :  { %2903 = vrcp.f32 %v924_v15 }
 0x6a9   :  { %v1051_v18 = vsel %vm156_vm1, %v1049_v16, -inf }
 0x6aa   :  { %1052 = vmax.xlane.f32.xlu1 %v1051_v18 }
 0x6ac   :  { %v1022_v19 = vpop.f32.mrf.mxu2 }
 0x6ae   :  { %v2904_v53 = vpop.eup %2903 }
 0x6af   :  { %v930_v20 = vmul.f32 %v2904_v53, %v2900_v55 }
 0x6b1   :  { %v932_v21 = vpack.c.bf16 %v930_v20, %v930_v20 }
 0x6b3   :  { %2776 = vmatmul.msk.bf16.vlgmr.msrb.gmra.mxu3 %vm156_vm1, %v932_v21 }
 0x6bf   :  { %v1027_v22 = vpop.permute.xlu1 %1026 }
 0x6c0   :  { %v1032_v23 = vsel %vm156_vm1, %v1027_v22, 0 }
 0x6c1   :  { %1041 = vmatpush.bf16.xpose.msra.mxu3 %v1032_v23 }
 0x6c3   :  { %1167 = vrot.lane.b32.xlu1 %v3214_v38, %s4048_s2 }
 0x6c8   :  { %2780 = vmatmul.msk.bf16.vlgmr.msra.gmra.mxu3 %vm156_vm1, %v1025_v25 }
 0x6cb   :  { %1096 = vrot.lane.b32.xlu1 %v3257_v17, %s4052_s8 }
 0x6ee   :  { %v712_v26 = vpop.f32.mrf.mxu3 }
 0x6ef   :  { %v3423_v27 = vadd.f32 %v712_v26, %v3379_v11  ;;  %v976_v11 = vld [vmem:[%s4073_s26 + $0x28] sm:$0xff] }
 0x6f0   :  { %v978_v37 = vpack.c.bf16 %v976_v11, %v976_v11 }
 0x6f2   :  { %v983_v42 = vsel %vm233_vm2, %v978_v37, 0 }
 0x6f3   :  { %992 = vmatpush.bf16.msra.mxu1 %v983_v42 }
 0x6f6   :  { %v3433_v40 = vpop.f32.mrf.mxu3 }
 0x70d   :  { %v915_v31 = vpop.xlane.xlu0 %914 }
 0x70e   :  { %v917_v32 = vsub.f32 %v909_v5, %v915_v31 }
 0x710   :  { %v920_v34 = vmul.f32 1.442695, %v917_v32 }
 0x712   :  { %2905 = vpow2.f32 %v920_v34 }
 0x718   :  { %v2906_v35 = vpop.eup %2905 }
 0x719   :  { %v925_v36 = vsel %vm156_vm1, %v2906_v35, 0.0 }
 0x71a   :  { %926 = vadd.xlane.f32.xlu2 %v925_v36 }
 0x71d   :  { %v1053_v39 = vpop.xlane.xlu1 %1052 }
 0x71e   :  { %v1057_v41 = vsub.f32 %v1049_v16, %v1053_v39 }
 0x720   :  { %v1059_v43 = vmul.f32 1.442695, %v1057_v41 }
 0x722   :  { %2907 = vpow2.f32 %v1059_v43 }
 0x726   :  { %v831_v44 = vpop.f32.mrf.mxu3 }
 0x727   :  { %v836_v45 = vpack.c.bf16 %v831_v44, %v810_v63 }
 0x728   :  { %v2908_v46 = vpop.eup %2907 }
 0x729   :  { %2773 = vmatmul.msk.bf16.vlgmr.msrb.gmra.mxu0 %vm156_vm1, %v836_v45  ;;  %v1063_v47 = vsel %vm156_vm1, %v2908_v46, 0.0 }
 0x72a   :  { %1064 = vadd.xlane.f32.xlu0 %v1063_v47 }
 0x72e   :  { %v833_v49 = vpop.f32.mrf.mxu3 }
 0x732   :  { %955 = vrot.lane.b32.xlu2 %v3257_v17, %s4054_s6 }
 0x735   :  { %v1168_v50 = vpop.permute.xlu1 %1167 }
 0x736   :  { %v951_v51 = vpop.f32.mrf.mxu3  ;;  %v1173_v9 = vsel %vm156_vm1, %v1168_v50, 0 }
 0x73a   :  { %1075 = vrot.lane.b32.xlu2 %v3242_v6, %s4052_s8 }
 0x73d   :  { %v1097_v52 = vpop.permute.xlu1 %1096 }
 0x73e   :  { %v1102_v55 = vsel %vm233_vm2, %v1097_v52, 0  ;;  %1144 = vrot.lane.b32.xlu0 %v3207_v33, %s4048_s2  ;;  %v953_v56 = vpop.f32.mrf.mxu3 }
 0x73f   :  { %1111 = vmatpush.bf16.msrb.mxu1 %v1102_v55 }
 0x742   :  { %1142 = vrot.lane.b32.xlu2 %v3207_v33, %s4050_s25 }
 0x74a   :  { %1165 = vrot.lane.b32.xlu2 %v3214_v38, %s4050_s25 }
 0x74b   :  { %v1043_v58 = vpop.f32.mrf.mxu3 }
 0x74c   :  { %v1048_v60 = vmul.f32 0.35355338, %v1043_v58 }
 0x74e   :  { %v1050_v61 = vadd.f32 %v1048_v60, %v3251_v8  ;;  %v1117_v60 = vld [vmem:[%s4073_s26 + $0x30] sm:$0xff] }
 0x750   :  { %v1054_v62 = vsel %vm156_vm1, %v1050_v61, -inf }
 0x753   :  { %v1045_v59 = vpop.f32.mrf.mxu3 }
 0x768   :  { %1055 = vmax.xlane.f32.xlu0 %v1054_v62 }
 0x78d   :  { %v927_v63 = vpop.xlane.xlu2 %926 }
 0x78e   :  { %2909 = vrcp.f32 %v927_v63 }
 0x794   :  { %v2910_v0 = vpop.eup %2909 }
 0x795   :  { %v931_v1 = vmul.f32 %v2910_v0, %v2906_v35  ;;  %v956_v2 = vpop.permute.xlu2 %955 }
 0x796   :  { %v961_v3 = vsel %vm233_vm2, %v956_v2, 0 }
 0x797   :  { %v933_v5 = vpack.c.bf16 %v931_v1, %v931_v1  ;;  %970 = vmatpush.bf16.msra.mxu0 %v961_v3 }
 0x79a   :  { %2777 = vmatmul.msk.bf16.vlgmr.msra.gmra.mxu0 %vm156_vm1, %v933_v5 }
 0x79d   :  { %v1076_v33 = vpop.permute.xlu2 %1075  ;;  %v1065_v38 = vpop.xlane.xlu0 %1064 }
 0x79e   :  { %v1081_v7 = vsel %vm233_vm2, %v1076_v33, 0  ;;  %2911 = vrcp.f32 %v1065_v38 }
 0x79f   :  { %1090 = vmatpush.bf16.msrb.mxu0 %v1081_v7 }
 0x7a3   :  { %1182 = vmatpush.bf16.xpose.msra.mxu0 %v1173_v9 }
 0x7a4   :  { %v2912_v10 = vpop.eup %2911 }
 0x7a5   :  { %v1071_v4 = vmul.f32 %v2912_v10, %v2908_v46  ;;  %v1143_v15 = vpop.permute.xlu2 %1142 }
 0x7a6   :  { %v853_v12 = vpop.f32.mrf.mxu0 }
 0x7a7   :  { %v1073_v13 = vpack.c.bf16 %v1071_v4, %v1071_v4  ;;  %v858_v14 = vadd.f32 %v853_v12, %v3423_v27 }
 0x7aa   :  { %2781 = vmatmul.msk.bf16.vlgmr.msrb.gmra.mxu0 %vm156_vm1, %v1073_v13 }
 0x7ad   :  { %v1166_v19 = vpop.permute.xlu2 %1165 }
 0x7ae   :  { %v3461_v25 = vpop.f32.mrf.mxu0 }
 0x7b0   :  { %v1145_v16 = vpop.permute.xlu0 %1144 }
 0x7b1   :  { %v1150_v18 = vsel %vm156_vm1, %v1145_v16, 0 }
 0x7b2   :  { %1159 = vmatpush.bf16.xpose.msrb.mxu3 %v1150_v18  ;;  %v1258_v18 = vld [vmem:[%s4073_s26 + $0x38] sm:$0xff]  ;;  %s4074_s26 = sld [smem:[#allocation7_spill]] }
 0x7b9   :  { %2784 = vmatmul.msk.bf16.vlgmr.msrb.gmra.mxu3 %vm156_vm1, %v1143_v15 }
 0x7ba   :  { %2785 = vmatmul.msk.bf16.vlgmr.msra.gmra.mxu0 %vm156_vm1, %v1166_v19  ;;  %v1260_v19 = vpack.c.bf16 %v1258_v18, %v1258_v18  ;;  %v83_v18 = vld [vmem:[%s4018_s1 + $0x18] sm:$0xff] }
 0x7db   :  { %v1056_v53 = vpop.xlane.xlu0 %1055 }
 0x7dc   :  { %v1058_v20 = vsub.f32 %v1050_v61, %v1056_v53  ;;  %v1119_v61 = vpack.c.bf16 %v1117_v60, %v1117_v60  ;;  %v1265_v53 = vsel %vm233_vm2, %v1260_v19, 0 }
 0x7dd   :  { %1274 = vmatpush.bf16.msra.mxu3 %v1265_v53  ;;  %v1358_v53 = vld [vmem:[%s4019_s10 + $0x20] sm:$0xff] }
 0x7de   :  { %v1061_v21 = vmul.f32 1.442695, %v1058_v20  ;;  %v1124_v62 = vsel %vm233_vm2, %v1119_v61, 0 }
 0x7df   :  { %1133 = vmatpush.bf16.msrb.mxu2 %v1124_v62 }
 0x7e0   :  { %2913 = vpow2.f32 %v1061_v21 }
 0x7e6   :  { %v2914_v22 = vpop.eup %2913 }
 0x7e7   :  { %v1066_v23 = vsel %vm156_vm1, %v2914_v22, 0.0 }
 0x7e8   :  { %1067 = vadd.xlane.f32.xlu2 %v1066_v23 }
 0x817   :  { %v972_v26 = vpop.f32.mrf.mxu0 }
 0x818   :  { %v977_v27 = vpack.c.bf16 %v972_v26, %v951_v51 }
 0x81a   :  { %2778 = vmatmul.msk.bf16.vlgmr.msra.gmra.mxu1 %vm156_vm1, %v977_v27 }
 0x81f   :  { %v974_v28 = vpop.f32.mrf.mxu0 }
 0x820   :  { %v435_v28 = vadd.f32 %v3358_v48, %v3342_v24 }
 0x827   :  { %v1092_v29 = vpop.f32.mrf.mxu0 }
 0x82f   :  { %v1094_v30 = vpop.f32.mrf.mxu0 }
 0x830   :  { %v2849_v30 = vld [vmem:[%s4074_s26] ss:$0 sm:$0xff]  ;;  %s4079_s26 = smov 48  }
 0x837   :  { %v1184_v31 = vpop.f32.mrf.mxu0 }
 0x838   :  { %v1189_v32 = vmul.f32 0.35355338, %v1184_v31 }
 0x83a   :  { %v1191_v34 = vadd.f32 %v1189_v32, %v3251_v8 }
 0x83c   :  { %v1161_v35 = vpop.f32.mrf.mxu3  ;;  %v1195_v36 = vsel %vm156_vm1, %v1191_v34, -inf }
 0x83d   :  { %v1188_v11 = vmul.f32 0.35355338, %v1161_v35  ;;  %1196 = vmax.xlane.f32.xlu1 %v1195_v36 }
 0x83f   :  { %v1186_v37 = vpop.f32.mrf.mxu0  ;;  %v1190_v39 = vadd.f32 %v1188_v11, %v3235_v54 }
 0x840   :  { %v3003_v37 = vld [vmem:[%s4070_s5] sm:$0xff] }
 0x841   :  { %v1192_v41 = vsel %vm156_vm1, %v1190_v39, -inf }
 0x842   :  { %1193 = vmax.xlane.f32.xlu0 %v1192_v41 }
 0x844   :  { %v1163_v42 = vpop.f32.mrf.mxu3 }
 0x856   :  { %1216 = vrot.lane.b32.xlu1 %v3242_v6, %s4050_s25 }
 0x85b   :  { %v1068_v43 = vpop.xlane.xlu2 %1067 }
 0x85c   :  { %2915 = vrcp.f32 %v1068_v43 }
 0x862   :  { %v2916_v44 = vpop.eup %2915 }
 0x863   :  { %v1072_v45 = vmul.f32 %v2916_v44, %v2914_v22  ;;  %v3020_v44 = vmov 64.0  }
 0x865   :  { %v1074_v8 = vpack.c.bf16 %v1072_v45, %v1072_v45 }
 0x867   :  { %2782 = vmatmul.msk.bf16.vlgmr.msrb.gmra.mxu1 %vm156_vm1, %v1074_v8 }
 0x897   :  { %v994_v46 = vpop.f32.mrf.mxu1 }
 0x898   :  { %v999_v47 = vadd.f32 %v994_v46, %v858_v14  ;;  %v1394_v46 = vld [vmem:[%s4075_s9 + $0x30] sm:$0xff] }
 0x89f   :  { %v996_v1 = vpop.f32.mrf.mxu1 }
 0x8b0   :  { %v1197_v49 = vpop.xlane.xlu1 %1196 }
 0x8b1   :  { %v1199_v50 = vsub.f32 %v1191_v34, %v1197_v49  ;;  %v1392_v49 = vld [vmem:[%s4075_s9 + $0x20] sm:$0xff] }
 0x8b3   :  { %v1202_v51 = vmul.f32 1.442695, %v1199_v50 }
 0x8b5   :  { %2917 = vpow2.f32 %v1202_v51  ;;  %v1194_v54 = vpop.xlane.xlu0 %1193  ;;  %v1393_v51 = vld [vmem:[%s4075_s9 + $0x28] sm:$0xff] }
 0x8b6   :  { %v1198_v52 = vsub.f32 %v1190_v39, %v1194_v54 }
 0x8b8   :  { %v1200_v55 = vmul.f32 1.442695, %v1198_v52  ;;  %v1400_v52 = vpack.c.bf16 %v1393_v51, %v1392_v49 }
 0x8ba   :  { %2919 = vpow2.f32 %v1200_v55 }
 0x8bb   :  { %v2918_v56 = vpop.eup %2917 }
 0x8bc   :  { %v1207_v6 = vsel %vm156_vm1, %v2918_v56, 0.0 }
 0x8bd   :  { %1208 = vadd.xlane.f32.xlu2 %v1207_v6 }
 0x8c0   :  { %v2920_v58 = vpop.eup %2919 }
 0x8c1   :  { %v1204_v59 = vsel %vm156_vm1, %v2920_v58, 0.0 }
 0x8c2   :  { %1205 = vadd.xlane.f32.xlu0 %v1204_v59 }
 0x8c8   :  { %v1217_v63 = vpop.permute.xlu1 %1216 }
 0x8c9   :  { %v1222_v0 = vsel %vm233_vm2, %v1217_v63, 0 }
 0x8ca   :  { %1231 = vmatpush.bf16.msra.mxu1 %v1222_v0 }
 0x8d5   :  { %1237 = vrot.lane.b32.xlu2 %v3257_v17, %s4050_s25  ;;  %s4077_s25 = sld [smem:[#allocation9_spill]] }
 0x8db   :  { %v2851_v49 = vld [vmem:[%s4077_s25] ss:$0 sm:$0xff]  ;;  %s4083_s25 = smov 32  }
 0x8e4   :  { %v1113_v2 = vpop.f32.mrf.mxu1 }
 0x8e5   :  { %v1118_v3 = vpack.c.bf16 %v1113_v2, %v1092_v29  ;;  %v577_v29 = vadd.f32 %v3405_v57, %v435_v28 }
 0x8e7   :  { %2783 = vmatmul.msk.bf16.vlgmr.msrb.gmra.mxu2 %vm156_vm1, %v1118_v3  ;;  %v718_v32 = vadd.f32 %v3433_v40, %v577_v29  ;;  %v3004_v40 = vld [vmem:[%s4070_s5 + $0x8] sm:$0xff]  ;;  %v1354_v29 = vld [vmem:[%s4019_s10] sm:$0xff] }
 0x8e9   :  { %v859_v35 = vadd.f32 %v3461_v25, %v718_v32 }
 0x8eb   :  { %v1000_v11 = vadd.f32 %v996_v1, %v859_v35 }
 0x8ec   :  { %v1115_v5 = vpop.f32.mrf.mxu1 }
 0x8ed   :  { %v1390_v5 = vld [vmem:[%s4075_s9 + $0x10] sm:$0xff] }
 0x930   :  { %v1209_v33 = vpop.xlane.xlu2 %1208 }
 0x931   :  { %2921 = vrcp.f32 %v1209_v33  ;;  %v1391_v33 = vld [vmem:[%s4075_s9 + $0x18] sm:$0xff] }
 0x935   :  { %v1206_v38 = vpop.xlane.xlu0 %1205 }
 0x936   :  { %2923 = vrcp.f32 %v1206_v38  ;;  %v1399_v38 = vpack.c.bf16 %v1391_v33, %v1390_v5 }
 0x937   :  { %v2922_v7 = vpop.eup %2921  ;;  %2925 = vrcp.f32 %v3020_v44 }
 0x938   :  { %v1213_v9 = vmul.f32 %v2922_v7, %v2918_v56  ;;  %v1238_v10 = vpop.permute.xlu2 %1237  ;;  %v1388_v7 = vld [vmem:[%s4075_s9] sm:$0xff] }
 0x939   :  { %v1243_v4 = vsel %vm233_vm2, %v1238_v10, 0 }
 0x93a   :  { %v1215_v12 = vpack.c.bf16 %v1213_v9, %v1213_v9  ;;  %1252 = vmatpush.bf16.msra.mxu2 %v1243_v4  ;;  %v1389_v9 = vld [vmem:[%s4075_s9 + $0x8] sm:$0xff]  ;;  %v80_v4 = vld [vmem:[%s4018_s1] sm:$0xff] }
 0x93b   :  { %v1398_v10 = vpack.c.bf16 %v1389_v9, %v1388_v7 }
 0x93c   :  { %v2924_v13 = vpop.eup %2923 }
 0x93d   :  { %v1212_v14 = vmul.f32 %v2924_v13, %v2920_v58  ;;  %2787 = vmatmul.msk.bf16.vlgmr.msra.gmra.mxu2 %vm156_vm1, %v1215_v12  ;;  %v2926_v45 = vpop.eup %2925  ;;  %v81_v12 = vld [vmem:[%s4018_s1 + $0x8] sm:$0xff] }
 0x93e   :  { %v1298_v8 = vmul.f32 64.0, %v2926_v45  ;;  %vm1302_vm3 = vweird.f32 %v2926_v45  ;;  %v1396_v13 = vpack.c.bf16 %v81_v12, %v80_v4 }
 0x93f   :  { %v1214_v17 = vpack.c.bf16 %v1212_v14, %v1212_v14  ;;  %v1360_v14 = vld [vmem:[%s4019_s10 + $0x30] sm:$0xff] }
 0x940   :  { %v1299_v54 = vsub.f32 1.0, %v1298_v8 }
 0x941   :  { %2786 = vmatmul.msk.bf16.vlgmr.msra.gmra.mxu1 %vm156_vm1, %v1214_v17  ;;  %v1361_v17 = vld [vmem:[%s4019_s10 + $0x38] sm:$0xff] }
 0x942   :  { %v1300_v55 = vmul.f32 %v2926_v45, %v1299_v54 }
 0x944   :  { %v1301_v56 = vadd.f32 %v2926_v45, %v1300_v55 }
 0x946   :  { %v3517_v6 = vsel %vm1302_vm3, %v2926_v45, %v1301_v56  ;;  %v2850_v45 = vld [vmem:[%s4076_s29] ss:$0 sm:$0xff]  ;;  %s4082_s29 = smov 88  }
 0x96a   :  { %v1135_v15 = vpop.f32.mrf.mxu2 }
 0x96b   :  { %v1140_v16 = vadd.f32 %v1135_v15, %v999_v47  ;;  %v1395_v47 = vld [vmem:[%s4075_s9 + $0x38] sm:$0xff]  ;;  %v1366_v15 = vpack.c.bf16 %v1361_v17, %v1360_v14  ;;  %s4085_s9 = smov 24  }
 0x96c   :  { %v1401_v50 = vpack.c.bf16 %v1395_v47, %v1394_v46 }
 0x96d   :  { %1378 = vmatpush.bf16.msrb.mxu0 %v1366_v15  ;;  %v2853_v15 = vld [vmem:[%s4020_s11] ss:$0 sm:$0xff]  ;;  %s4086_s11 = smov 72  }
 0x96e   :  { %1416 = vmatpush.bf16.msrb.mxu1 %v1401_v50 }
 0x972   :  { %v1137_v20 = vpop.f32.mrf.mxu2  ;;  %1417 = vmatpush.bf16.msrb.mxu1 %v1400_v52 }
 0x973   :  { %v1141_v24 = vadd.f32 %v1137_v20, %v1000_v11  ;;  %v1359_v20 = vld [vmem:[%s4019_s10 + $0x28] sm:$0xff] }
 0x976   :  { %1418 = vmatpush.bf16.msrb.mxu1 %v1399_v38 }
 0x97a   :  { %1419 = vmatpush.bf16.msrb.mxu1 %v1398_v10 }
 0x97d   :  { %2790 = vmatmul.msk.bf16.vlgmr.msrb.gmra.mxu1 %vm115_vm0, %v1396_v13 }
 0x9be   :  { %v1233_v21 = vpop.f32.mrf.mxu1 }
 0x9c0   :  { %v1254_v22 = vpop.f32.mrf.mxu2 }
 0x9c1   :  { %v1259_v23 = vpack.c.bf16 %v1254_v22, %v1233_v21  ;;  %v1365_v21 = vpack.c.bf16 %v1359_v20, %v1358_v53  ;;  %v1356_v22 = vld [vmem:[%s4019_s10 + $0x10] sm:$0xff] }
 0x9c3   :  { %2788 = vmatmul.msk.bf16.vlgmr.msra.gmra.mxu3 %vm156_vm1, %v1259_v23  ;;  %1379 = vmatpush.bf16.msrb.mxu0 %v1365_v21  ;;  %v1357_v23 = vld [vmem:[%s4019_s10 + $0x18] sm:$0xff] }
 0x9c6   :  { %v1235_v26 = vpop.f32.mrf.mxu1 }
 0x9c7   :  { %v1364_v26 = vpack.c.bf16 %v1357_v23, %v1356_v22 }
 0x9c8   :  { %v1256_v27 = vpop.f32.mrf.mxu2 }
 0x9c9   :  { %1380 = vmatpush.bf16.msrb.mxu0 %v1364_v26 }
 0xa46   :  { %v1276_v31 = vpop.f32.mrf.mxu3 }
 0xa47   :  { %v1281_v34 = vadd.f32 %v1276_v31, %v1140_v16  ;;  %v82_v16 = vld [vmem:[%s4018_s1 + $0x10] sm:$0xff] }
 0xa48   :  { %v1397_v19 = vpack.c.bf16 %v83_v18, %v82_v16 }
 0xa49   :  { %v1287_v36 = vadd.f32 %v2849_v30, %v1281_v34 }
 0xa4a   :  { %2791 = vmatmul.msk.bf16.gmra.mxu1 %vm115_vm0, %v1397_v19 }
 0xa4b   :  { %v1289_v39 = vadd.f32 %v3003_v37, %v1287_v36 }
 0xa4d   :  { %v1291_v48 = vsel %vm115_vm0, %v1289_v39, 0.0 }
 0xa4e   :  { %1292 = vadd.xlane.f32.xlu0 %v1291_v48  ;;  %v1278_v57 = vpop.f32.mrf.mxu3 }
 0xa4f   :  { %v1282_v41 = vadd.f32 %v1278_v57, %v1141_v24 }
 0xa51   :  { %v1288_v42 = vadd.f32 %v2849_v30, %v1282_v41  ;;  %v1355_v30 = vld [vmem:[%s4019_s10 + $0x8] sm:$0xff] }
 0xa52   :  { %v1363_v32 = vpack.c.bf16 %v1355_v30, %v1354_v29 }
 0xa53   :  { %v1290_v43 = vadd.f32 %v3004_v40, %v1288_v42 }
 0xa54   :  { %1381 = vmatpush.bf16.msrb.mxu0 %v1363_v32 }
 0xa55   :  { %v1294_v25 = vsel %vm115_vm0, %v1290_v43, 0.0 }
 0xa56   :  { %1295 = vadd.xlane.f32.xlu0 %v1294_v25 }
 0xac1   :  { %v1293_v58 = vpop.xlane.xlu0 %1292 }
 0xac2   :  { %v1304_v59 = vmul.f32 %v3517_v6, %v1293_v58  ;;  %v2852_v58 = vld [vmem:[%s4017_s13] ss:$0 sm:$0xff] }
 0xac4   :  { %v3520_v60 = vsub.f32 %v1289_v39, %v1304_v59  ;;  %v1421_v59 = vpop.f32.mrf.mxu1 }
 0xac6   :  { %v1308_v61 = vmul.f32 %v3520_v60, %v3520_v60 }
 0xac8   :  { %v1310_v62 = vsel %vm115_vm0, %v1308_v61, 0.0 }
 0xac9   :  { %1311 = vadd.xlane.f32.xlu0 %v1310_v62  ;;  %v1296_v63 = vpop.xlane.xlu0 %1295 }
 0xaca   :  { %v1305_v0 = vmul.f32 %v3517_v6, %v1296_v63 }
 0xacc   :  { %v3526_v1 = vsub.f32 %v1290_v43, %v1305_v0  ;;  %v1423_v62 = vpop.f32.mrf.mxu1 }
 0xacd   :  { %v1424_v63 = vadd.f32 %v2852_v58, %v1423_v62 }
 0xace   :  { %v1309_v2 = vmul.f32 %v3526_v1, %v3526_v1 }
 0xad0   :  { %v1313_v3 = vsel %vm115_vm0, %v1309_v2, 0.0 }
 0xad1   :  { %1314 = vadd.xlane.f32.xlu2 %v1313_v3 }
 0xad4   :  { %v1426_v5 = vpop.f32.mrf.mxu1 }
 0xad5   :  { %v1427_v38 = vadd.f32 %v2852_v58, %v1426_v5 }
 0xad7   :  { %v1437_v7 = vpack.c.bf16 %v1427_v38, %v1427_v38 }
 0xad9   :  { %v1465_v4 = vunpack.c.l.b16 %v1437_v7 }
 0xadc   :  { %v1428_v9 = vpop.f32.mrf.mxu1 }
 0xadd   :  { %v1429_v10 = vadd.f32 %v2852_v58, %v1428_v9 }
 0xadf   :  { %v1438_v12 = vpack.c.bf16 %v1429_v10, %v1429_v10 }
 0xae1   :  { %v1466_v13 = vunpack.c.l.b16 %v1438_v12 }
 0xae3   :  { %v3609_v14 = vpack.c.b16 %v1466_v13, %v1465_v4 }
 0xae5   :  { %v1472_v17 = vsel %vm156_vm1, %v3609_v14, 0 }
 0xae6   :  { %1481 = vmatpush.bf16.xpose.msrb.mxu3 %v1472_v17 }
 0xb3c   :  { %v1312_v27 = vpop.xlane.xlu0 %1311 }
 0xb3d   :  { %v1316_v28 = vmul.f32 %v1312_v27, %v3517_v6 }
 0xb3f   :  { %v1318_v31 = vadd.f32 1e-05, %v1316_v28 }
 0xb41   :  { %2927 = vrsqrt.f32 %v1318_v31  ;;  %vm1326_vm5 = vweird.f32 %v1318_v31 }
 0xb44   :  { %v1315_v34 = vpop.xlane.xlu2 %1314 }
 0xb45   :  { %v1317_v35 = vmul.f32 %v1315_v34, %v3517_v6  ;;  %v3631_v34 = vld [vmem:[%s4021_s3] sm:$0xff] }
 0xb47   :  { %v2928_v36 = vpop.eup %2927  ;;  %v1319_v11 = vadd.f32 1e-05, %v1317_v35 }
 0xb48   :  { %v1321_v37 = vmul.f32 %v2928_v36, %v1318_v31  ;;  %vm1327_vm4 = vweird.f32 %v2928_v36 }
 0xb49   :  { %2929 = vrsqrt.f32 %v1319_v11  ;;  %vm1328_vm6 = vmor %vm1326_vm5, %vm1327_vm4  ;;  %vm1336_vm8 = vweird.f32 %v1319_v11 }
 0xb4a   :  { %v1322_v39 = vmul.f32 %v2928_v36, %v1321_v37 }
 0xb4c   :  { %v1323_v24 = vmul.f32 0.5, %v1322_v39 }
 0xb4e   :  { %v1324_v48 = vsub.f32 1.5, %v1323_v24 }
 0xb4f   :  { %v2930_v57 = vpop.eup %2929 }
 0xb50   :  { %v1325_v41 = vmul.f32 %v2928_v36, %v1324_v48  ;;  %v1331_v42 = vmul.f32 %v2930_v57, %v1319_v11  ;;  %vm1337_vm7 = vweird.f32 %v2930_v57 }
 0xb51   :  { %vm1338_vm9 = vmor %vm1336_vm8, %vm1337_vm7 }
 0xb52   :  { %v1332_v40 = vmul.f32 %v2930_v57, %v1331_v42  ;;  %v1329_v43 = vsel %vm1328_vm6, %v2928_v36, %v1325_v41 }
 0xb53   :  { %v1340_v8 = vmul.f32 %v1329_v43, %v3520_v60  ;;  %v1422_v60 = vadd.f32 %v2852_v58, %v1421_v59 }
 0xb54   :  { %v1333_v25 = vmul.f32 0.5, %v1332_v40 }
 0xb55   :  { %v1346_v50 = vmul.f32 %v2850_v45, %v1340_v8  ;;  %v1435_v61 = vpack.c.bf16 %v1422_v60, %v1422_v60 }
 0xb56   :  { %v1334_v44 = vsub.f32 1.5, %v1333_v25 }
 0xb57   :  { %v3591_v52 = vadd.f32 %v2851_v49, %v1346_v50  ;;  %v1441_v0 = vunpack.c.l.b16 %v1435_v61  ;;  %v3650_v50 = vld [vmem:[%s4021_s3 + $0x8] sm:$0xff]  ;;  %s4078_s3 = smov 104  }
 0xb58   :  { %v1335_v46 = vmul.f32 %v2930_v57, %v1334_v44 }
 0xb5a   :  { %v1339_v47 = vsel %vm1338_vm9, %v2930_v57, %v1335_v46 }
 0xb5b   :  { %v1341_v51 = vmul.f32 %v1339_v47, %v3526_v1  ;;  %v1436_v1 = vpack.c.bf16 %v1424_v63, %v1424_v63 }
 0xb5d   :  { %v1347_v54 = vmul.f32 %v2850_v45, %v1341_v51  ;;  %v1442_v2 = vunpack.c.l.b16 %v1436_v1 }
 0xb5f   :  { %v3593_v55 = vadd.f32 %v2851_v49, %v1347_v54  ;;  %v3601_v3 = vpack.c.b16 %v1442_v2, %v1441_v0 }
 0xb61   :  { %v1362_v56 = vpack.c.bf16 %v3593_v55, %v3591_v52  ;;  %1516 = vrot.lane.b32.xlu2 %v3601_v3, %s3006_s7  ;;  %1562 = vrot.lane.b32.xlu1 %v3601_v3, %s3005_s0  ;;  %v1448_v33 = vsel %vm156_vm1, %v3601_v3, 0 }
 0xb62   :  { %1457 = vmatpush.bf16.xpose.msrb.mxu2 %v1448_v33 }
 0xb63   :  { %2789 = vmatmul.msk.bf16.vlgmr.msrb.gmra.mxu0 %vm115_vm0, %v1362_v56 }
 0xbbb   :  { %v1517_v28 = vpop.permute.xlu2 %1516 }
 0xbbc   :  { %1529 = vmatpush.bf16.msra.mxu0 %v1517_v28 }
 0xbd3   :  { %v1563_v29 = vpop.permute.xlu1 %1562 }
 0xbd4   :  { %v1568_v30 = vsel %vm156_vm1, %v1563_v29, 0 }
 0xbd5   :  { %1577 = vmatpush.bf16.xpose.msra.mxu3 %v1568_v30  ;;  %v1675_v30 = vld [vmem:[%s4022_s14 + $0x8] sm:$0xff] }
 0xbe0   :  { %v1383_v16 = vpop.f32.mrf.mxu0 }
 0xbe1   :  { %v1384_v18 = vadd.f32 %v2853_v15, %v1383_v16 }
 0xbe3   :  { %v1433_v19 = vpack.c.bf16 %v1384_v18, %v1384_v18 }
 0xbe5   :  { %v1558_v53 = vunpack.c.l.b16 %v1433_v19  ;;  %2792 = vmatmul.msk.bf16.vlgmr.msrb.gmra.mxu2 %vm156_vm1, %v1433_v19 }
 0xbe7   :  { %v3617_v20 = vpack.c.b16 %v1558_v53, %v1558_v53 }
 0xbe8   :  { %v1385_v21 = vpop.f32.mrf.mxu0 }
 0xbe9   :  { %v1386_v22 = vadd.f32 %v2853_v15, %v1385_v21  ;;  %1560 = vrot.lane.b32.xlu0 %v3617_v20, %s3005_s0 }
 0xbeb   :  { %v1434_v23 = vpack.c.bf16 %v1386_v22, %v1386_v22 }
 0xbed   :  { %v1584_v26 = vunpack.c.l.b16 %v1434_v23  ;;  %2793 = vmatmul.msk.bf16.vlgmr.msrb.gmra.mxu3 %vm156_vm1, %v1434_v23 }
 0xbef   :  { %v3622_v27 = vpack.c.b16 %v1584_v26, %v1584_v26 }
 0xbf1   :  { %1586 = vrot.lane.b32.xlu2 %v3622_v27, %s3005_s0 }
 0xc4b   :  { %v1587_v5 = vpop.permute.xlu2 %1586 }
 0xc5b   :  { %v1561_v31 = vpop.permute.xlu0 %1560 }
 0xc5c   :  { %2796 = vmatmul.msk.bf16.vlgmr.msra.gmra.mxu3 %vm156_vm1, %v1561_v31  ;;  %v1677_v31 = vpack.c.bf16 %v1675_v30, %v1675_v30 }
 0xc68   :  { %v1459_v32 = vpop.f32.mrf.mxu2 }
 0xc69   :  { %v1487_v35 = vmul.f32 0.35355338, %v1459_v32  ;;  %v1682_v32 = vsel %vm233_vm2, %v1677_v31, 0 }
 0xc6a   :  { %1691 = vmatpush.bf16.msrb.mxu3 %v1682_v32 }
 0xc6b   :  { %v1489_v36 = vadd.f32 %v1487_v35, %v3631_v34 }
 0xc6d   :  { %v1492_v11 = vsel %vm1491_vm10, %v1489_v36, -inf }
 0xc6e   :  { %1493 = vmax.xlane.f32.xlu1 %v1492_v11 }
 0xc70   :  { %v1461_v37 = vpop.f32.mrf.mxu2  ;;  %v1483_v39 = vpop.f32.mrf.mxu3 }
 0xc71   :  { %v1488_v49 = vmul.f32 0.35355338, %v1483_v39 }
 0xc73   :  { %v1490_v51 = vadd.f32 %v1488_v49, %v3650_v50 }
 0xc75   :  { %v1495_v54 = vsel %vm1491_vm10, %v1490_v51, -inf }
 0xc78   :  { %v1485_v24 = vpop.f32.mrf.mxu3 }
 0xc87   :  { %1588 = vrot.lane.b32.xlu1 %v3609_v14, %s3005_s0 }
 0xc8f   :  { %1720 = vrot.lane.b32.xlu1 %v3601_v3, %s3010_s4 }
 0xc97   :  { %1718 = vrot.lane.b32.xlu1 %v3617_v20, %s3010_s4 }
 0xcdf   :  { %v1579_v48 = vpop.f32.mrf.mxu3 }
 0xce0   :  { %v1609_v25 = vmul.f32 0.35355338, %v1579_v48 }
 0xce1   :  { %v1494_v57 = vpop.xlane.xlu1 %1493 }
 0xce2   :  { %v1498_v41 = vsub.f32 %v1489_v36, %v1494_v57  ;;  %v1611_v45 = vadd.f32 %v1609_v25, %v3631_v34 }
 0xce4   :  { %v1500_v42 = vmul.f32 1.442695, %v1498_v41  ;;  %v1613_v8 = vsel %vm1491_vm10, %v1611_v45, -inf }
 0xce6   :  { %2931 = vpow2.f32 %v1500_v42 }
 0xce7   :  { %v1581_v40 = vpop.f32.mrf.mxu3 }
 0xcec   :  { %v2932_v43 = vpop.eup %2931 }
 0xced   :  { %v1504_v44 = vsel %vm1491_vm10, %v2932_v43, 0.0 }
 0xcee   :  { %1505 = vadd.xlane.f32.xlu0 %v1504_v44 }
 0xcf6   :  { %1614 = vmax.xlane.f32.xlu0 %v1613_v8 }
 0xcf9   :  { %v1589_v46 = vpop.permute.xlu1 %1588 }
 0xcfa   :  { %v1594_v47 = vsel %vm156_vm1, %v1589_v46, 0 }
 0xcfb   :  { %1603 = vmatpush.bf16.xpose.msrb.mxu0 %v1594_v47 }
 0xd01   :  { %v1721_v2 = vpop.permute.xlu1 %1720 }
 0xd02   :  { %v1726_v38 = vsel %vm156_vm1, %v1721_v2, 0 }
 0xd09   :  { %v1719_v28 = vpop.permute.xlu1 %1718 }
 0xd0a   :  { %1637 = vrot.lane.b32.xlu0 %v3601_v3, %s3007_s27 }
 0xd34   :  { %1496 = vmax.xlane.f32.xlu0 %v1495_v54 }
 0xd61   :  { %v1506_v56 = vpop.xlane.xlu0 %1505 }
 0xd62   :  { %2933 = vrcp.f32 %v1506_v56 }
 0xd68   :  { %v2934_v58 = vpop.eup %2933 }
 0xd69   :  { %v1512_v59 = vmul.f32 %v2934_v58, %v2932_v43  ;;  %v1615_v60 = vpop.xlane.xlu0 %1614  ;;  %v1554_v58 = vld [vmem:[%s4022_s14] sm:$0xff] }
 0xd6a   :  { %v1619_v61 = vsub.f32 %v1611_v45, %v1615_v60 }
 0xd6b   :  { %v1514_v62 = vpack.c.bf16 %v1512_v59, %v1512_v59  ;;  %v1556_v59 = vpack.c.bf16 %v1554_v58, %v1554_v58 }
 0xd6c   :  { %v1621_v63 = vmul.f32 1.442695, %v1619_v61 }
 0xd6d   :  { %2794 = vmatmul.msk.bf16.vlgmr.msra.gmra.mxu0 %vm1491_vm10, %v1514_v62  ;;  %v1702_v60 = vsel %vm233_vm2, %v1556_v59, 0 }
 0xd6e   :  { %2935 = vpow2.f32 %v1621_v63  ;;  %1711 = vmatpush.bf16.msra.mxu0 %v1702_v60 }
 0xd74   :  { %v2936_v0 = vpop.eup %2935 }
 0xd75   :  { %v1625_v1 = vsel %vm1491_vm10, %v2936_v0, 0.0 }
 0xd76   :  { %1626 = vadd.xlane.f32.xlu2 %v1625_v1 }
 0xd7c   :  { %v1638_v33 = vpop.permute.xlu0 %1637 }
 0xd7d   :  { %2797 = vmatmul.msk.bf16.vlgmr.msrb.gmra.mxu0 %vm156_vm1, %v1587_v5  ;;  %1650 = vmatpush.bf16.msra.mxu1 %v1638_v33 }
 0xd81   :  { %1735 = vmatpush.bf16.xpose.msrb.mxu1 %v1726_v38 }
 0xda7   :  { %v1497_v7 = vpop.xlane.xlu0 %1496 }
 0xda8   :  { %v1499_v9 = vsub.f32 %v1490_v51, %v1497_v7 }
 0xdaa   :  { %v1502_v10 = vmul.f32 1.442695, %v1499_v9 }
 0xdac   :  { %2937 = vpow2.f32 %v1502_v10 }
 0xdb2   :  { %v2938_v4 = vpop.eup %2937 }
 0xdb3   :  { %v1507_v12 = vsel %vm1491_vm10, %v2938_v4, 0.0 }
 0xdb4   :  { %1508 = vadd.xlane.f32.xlu2 %v1507_v12 }
 0xdcc   :  { %1535 = vrot.lane.b32.xlu2 %v3609_v14, %s3006_s7  ;;  %s4088_s7 = smov 8  }
 0xdd4   :  { %1743 = vrot.lane.b32.xlu2 %v3609_v14, %s3010_s4 }
 0xddc   :  { %1857 = vrot.lane.b32.xlu2 %v3601_v3, %s4078_s3 }
 0xde4   :  { %1855 = vrot.lane.b32.xlu2 %v3617_v20, %s4078_s3 }
 0xde9   :  { %v1627_v13 = vpop.xlane.xlu2 %1626 }
 0xdea   :  { %2939 = vrcp.f32 %v1627_v13  ;;  %v3667_v17 = vpop.f32.mrf.mxu0 }
 0xdec   :  { %1792 = vrot.lane.b32.xlu2 %v3601_v3, %s4079_s26 }
 0xdf0   :  { %v2940_v15 = vpop.eup %2939 }
 0xdf1   :  { %v1633_v16 = vmul.f32 %v2940_v15, %v2936_v0 }
 0xdf2   :  { %v1533_v18 = vpop.f32.mrf.mxu0 }
 0xdf3   :  { %v1635_v19 = vpack.c.bf16 %v1633_v16, %v1633_v16 }
 0xdf4   :  { %1880 = vrot.lane.b32.xlu2 %v3609_v14, %s4078_s3 }
 0xdf5   :  { %2798 = vmatmul.msk.bf16.vlgmr.msra.gmra.mxu1 %vm1491_vm10, %v1635_v19 }
 0xdfa   :  { %v1605_v53 = vpop.f32.mrf.mxu0 }
 0xdfb   :  { %v1610_v21 = vmul.f32 0.35355338, %v1605_v53 }
 0xdfc   :  { %1878 = vrot.lane.b32.xlu2 %v3622_v27, %s4078_s3 }
 0xdfd   :  { %v1612_v22 = vadd.f32 %v1610_v21, %v3650_v50 }
 0xdff   :  { %v1616_v23 = vsel %vm1491_vm10, %v1612_v22, -inf }
 0xe00   :  { %1617 = vmax.xlane.f32.xlu1 %v1616_v23 }
 0xe02   :  { %v1607_v26 = vpop.f32.mrf.mxu0 }
 0xe05   :  { %2802 = vmatmul.msk.bf16.vlgmr.msrb.gmra.mxu1 %vm156_vm1, %v1719_v28 }
 0xe19   :  { %1656 = vrot.lane.b32.xlu1 %v3609_v14, %s3007_s27 }
 0xe27   :  { %v1509_v29 = vpop.xlane.xlu2 %1508 }
 0xe28   :  { %2941 = vrcp.f32 %v1509_v29 }
 0xe2e   :  { %v2942_v35 = vpop.eup %2941 }
 0xe2f   :  { %v1513_v36 = vmul.f32 %v2942_v35, %v2938_v4  ;;  %v1536_v11 = vpop.permute.xlu2 %1535 }
 0xe30   :  { %1548 = vmatpush.bf16.msra.mxu2 %v1536_v11 }
 0xe31   :  { %v1515_v37 = vpack.c.bf16 %v1513_v36, %v1513_v36 }
 0xe33   :  { %2795 = vmatmul.msk.bf16.vlgmr.msra.gmra.mxu2 %vm1491_vm10, %v1515_v37 }
 0xe37   :  { %v1744_v39 = vpop.permute.xlu2 %1743 }
 0xe38   :  { %v1749_v56 = vsel %vm156_vm1, %v1744_v39, 0 }
 0xe3f   :  { %v1858_v24 = vpop.permute.xlu2 %1857 }
 0xe40   :  { %v1863_v9 = vsel %vm156_vm1, %v1858_v24, 0 }
 0xe47   :  { %v1856_v48 = vpop.permute.xlu2 %1855 }
 0xe4f   :  { %v1793_v57 = vpop.permute.xlu2 %1792 }
 0xe50   :  { %1805 = vmatpush.bf16.msra.mxu3 %v1793_v57 }
 0xe57   :  { %v1881_v13 = vpop.permute.xlu2 %1880 }
 0xe58   :  { %v1886_v18 = vsel %vm156_vm1, %v1881_v13, 0 }
 0xe5f   :  { %v1879_v11 = vpop.permute.xlu2 %1878 }
 0xe72   :  { %v1652_v41 = vpop.f32.mrf.mxu1 }
 0xe73   :  { %v1618_v42 = vpop.xlane.xlu1 %1617 }
 0xe74   :  { %v1620_v40 = vsub.f32 %v1612_v22, %v1618_v42 }
 0xe76   :  { %v1623_v43 = vmul.f32 1.442695, %v1620_v40 }
 0xe78   :  { %2943 = vpow2.f32 %v1623_v43 }
 0xe7a   :  { %v1654_v25 = vpop.f32.mrf.mxu1 }
 0xe7e   :  { %v2944_v44 = vpop.eup %2943 }
 0xe7f   :  { %v1628_v45 = vsel %vm1491_vm10, %v2944_v44, 0.0 }
 0xe80   :  { %1629 = vadd.xlane.f32.xlu0 %v1628_v45 }
 0xe82   :  { %v1737_v8 = vpop.f32.mrf.mxu1 }
 0xe83   :  { %v1764_v46 = vmul.f32 0.35355338, %v1737_v8 }
 0xe85   :  { %v1766_v47 = vadd.f32 %v1764_v46, %v3631_v34 }
 0xe87   :  { %v1768_v49 = vsel %vm1491_vm10, %v1766_v47, -inf }
 0xe88   :  { %1769 = vmax.xlane.f32.xlu1 %v1768_v49 }
 0xe8a   :  { %v1739_v51 = vpop.f32.mrf.mxu1 }
 0xe8b   :  { %v1657_v54 = vpop.permute.xlu1 %1656 }
 0xe8c   :  { %1669 = vmatpush.bf16.msrb.mxu2 %v1657_v54 }
 0xe90   :  { %1758 = vmatpush.bf16.xpose.msra.mxu2 %v1749_v56 }
 0xe94   :  { %1741 = vrot.lane.b32.xlu0 %v3622_v27, %s3010_s4  ;;  %s4081_s4 = smov 40  }
 0xea1   :  { %1994 = vrot.lane.b32.xlu1 %v3601_v3, %s4080_s28 }
 0xeb6   :  { %v1550_v61 = vpop.f32.mrf.mxu2 }
 0xeb7   :  { %v1555_v62 = vpack.c.bf16 %v1550_v61, %v3667_v17 }
 0xeb9   :  { %2801 = vmatmul.msk.bf16.vlgmr.msra.gmra.mxu0 %vm156_vm1, %v1555_v62 }
 0xebe   :  { %v1552_v63 = vpop.f32.mrf.mxu2 }
 0xef3   :  { %v1630_v0 = vpop.xlane.xlu0 %1629 }
 0xef4   :  { %2945 = vrcp.f32 %v1630_v0 }
 0xefa   :  { %v2946_v1 = vpop.eup %2945 }
 0xefb   :  { %v1634_v2 = vmul.f32 %v2946_v1, %v2944_v44  ;;  %v1770_v5 = vpop.xlane.xlu1 %1769 }
 0xefc   :  { %v1774_v33 = vsub.f32 %v1766_v47, %v1770_v5 }
 0xefd   :  { %v1636_v38 = vpack.c.bf16 %v1634_v2, %v1634_v2 }
 0xefe   :  { %v1776_v7 = vmul.f32 1.442695, %v1774_v33 }
 0xeff   :  { %2799 = vmatmul.msk.bf16.vlgmr.msrb.gmra.mxu2 %vm1491_vm10, %v1636_v38 }
 0xf00   :  { %2947 = vpow2.f32 %v1776_v7  ;;  %1872 = vmatpush.bf16.xpose.msrb.mxu2 %v1863_v9 }
 0xf06   :  { %v2948_v10 = vpop.eup %2947  ;;  %v1742_v12 = vpop.permute.xlu0 %1741 }
 0xf07   :  { %v1780_v4 = vsel %vm1491_vm10, %v2948_v10, 0.0 }
 0xf08   :  { %1781 = vadd.xlane.f32.xlu0 %v1780_v4 }
 0xf0f   :  { %2803 = vmatmul.msk.bf16.vlgmr.msra.gmra.mxu2 %vm156_vm1, %v1742_v12 }
 0xf13   :  { %v1995_v22 = vpop.permute.xlu1 %1994 }
 0xf14   :  { %v2000_v29 = vsel %vm156_vm1, %v1995_v22, 0 }
 0xf1c   :  { %1992 = vrot.lane.b32.xlu0 %v3617_v20, %s4080_s28 }
 0xf1f   :  { %2807 = vmatmul.msk.bf16.vlgmr.msrb.gmra.mxu2 %vm156_vm1, %v1856_v48 }
 0xf7b   :  { %v1782_v15 = vpop.xlane.xlu0 %1781 }
 0xf7c   :  { %2949 = vrcp.f32 %v1782_v15 }
 0xf82   :  { %v1671_v17 = vpop.f32.mrf.mxu2  ;;  %v2950_v53 = vpop.eup %2949 }
 0xf83   :  { %v1676_v16 = vpack.c.bf16 %v1671_v17, %v1652_v41  ;;  %v1788_v21 = vmul.f32 %v2950_v53, %v2948_v10 }
 0xf85   :  { %2800 = vmatmul.msk.bf16.vlgmr.msrb.gmra.mxu3 %vm156_vm1, %v1676_v16  ;;  %v1790_v26 = vpack.c.bf16 %v1788_v21, %v1788_v21 }
 0xf86   :  { %1895 = vmatpush.bf16.xpose.msrb.mxu3 %v1886_v18 }
 0xf8a   :  { %v1673_v19 = vpop.f32.mrf.mxu2 }
 0xf8e   :  { %v1993_v48 = vpop.permute.xlu0 %1992 }
 0xf92   :  { %v1760_v23 = vpop.f32.mrf.mxu2 }
 0xf93   :  { %v1765_v28 = vmul.f32 0.35355338, %v1760_v23 }
 0xf95   :  { %2804 = vmatmul.msk.bf16.vlgmr.msra.gmra.mxu3 %vm1491_vm10, %v1790_v26  ;;  %v1767_v30 = vadd.f32 %v1765_v28, %v3650_v50 }
 0xf96   :  { %2009 = vmatpush.bf16.xpose.msra.mxu3 %v2000_v29  ;;  %v1830_v29 = vld [vmem:[%s4022_s14 + $0x10] sm:$0xff] }
 0xf97   :  { %v1771_v31 = vsel %vm1491_vm10, %v1767_v30, -inf }
 0xf98   :  { %1772 = vmax.xlane.f32.xlu2 %v1771_v31 }
 0xf9a   :  { %v1762_v32 = vpop.f32.mrf.mxu2 }
 0xfa2   :  { %v1874_v35 = vpop.f32.mrf.mxu2 }
 0xfa3   :  { %v1901_v36 = vmul.f32 0.35355338, %v1874_v35 }
 0xfa5   :  { %2808 = vmatmul.msk.bf16.vlgmr.msrb.gmra.mxu3 %vm156_vm1, %v1879_v11  ;;  %v1903_v37 = vadd.f32 %v1901_v36, %v3631_v34 }
 0xfa7   :  { %v1905_v39 = vsel %vm1491_vm10, %v1903_v37, -inf }
 0xfa8   :  { %1906 = vmax.xlane.f32.xlu0 %v1905_v39 }
 0xfaa   :  { %v1876_v24 = vpop.f32.mrf.mxu2 }
 0xfb0   :  { %1811 = vrot.lane.b32.xlu2 %v3609_v14, %s4079_s26 }
 0xfb5   :  { %2812 = vmatmul.msk.bf16.vlgmr.msra.gmra.mxu3 %vm156_vm1, %v1993_v48  ;;  %v1713_v48 = vpop.f32.mrf.mxu0 }
 0xfbc   :  { %1929 = vrot.lane.b32.xlu0 %v3601_v3, %s4081_s4 }
 0xfc4   :  { %2015 = vrot.lane.b32.xlu0 %v3622_v27, %s4080_s28 }
 0xfcc   :  { %2131 = vrot.lane.b32.xlu0 %v3601_v3, %s4082_s29 }
0x1008   :  { %v3725_v57 = vpop.f32.mrf.mxu3 }
0x100b   :  { %v1773_v41 = vpop.xlane.xlu2 %1772 }
0x100c   :  { %v1775_v42 = vsub.f32 %v1767_v30, %v1773_v41  ;;  %v1832_v30 = vpack.c.bf16 %v1830_v29, %v1830_v29  ;;  %v1715_v41 = vpop.f32.mrf.mxu0 }
0x100e   :  { %v1778_v40 = vmul.f32 1.442695, %v1775_v42  ;;  %v1837_v31 = vsel %vm233_vm2, %v1832_v30, 0 }
0x100f   :  { %1846 = vmatpush.bf16.msra.mxu1 %v1837_v31 }
0x1010   :  { %2951 = vpow2.f32 %v1778_v40  ;;  %v3727_v43 = vpop.f32.mrf.mxu3 }
0x1013   :  { %v1812_v25 = vpop.permute.xlu2 %1811 }
0x1014   :  { %1824 = vmatpush.bf16.msrb.mxu0 %v1812_v25 }
0x1016   :  { %v2952_v44 = vpop.eup %2951 }
0x1017   :  { %v1783_v45 = vsel %vm1491_vm10, %v2952_v44, 0.0 }
0x1018   :  { %v3730_v8 = vpop.f32.mrf.mxu3  ;;  %1784 = vadd.xlane.f32.xlu1 %v1783_v45 }
0x101b   :  { %v1907_v46 = vpop.xlane.xlu0 %1906 }
0x101c   :  { %v1911_v47 = vsub.f32 %v1903_v37, %v1907_v46 }
0x101e   :  { %v1913_v49 = vmul.f32 1.442695, %v1911_v47 }
0x1020   :  { %2953 = vpow2.f32 %v1913_v49  ;;  %v1809_v51 = vpop.f32.mrf.mxu3 }
0x1026   :  { %v2954_v54 = vpop.eup %2953 }
0x1027   :  { %v1917_v56 = vsel %vm1491_vm10, %v2954_v54, 0.0 }
0x1028   :  { %v1897_v58 = vpop.f32.mrf.mxu3  ;;  %1918 = vadd.xlane.f32.xlu2 %v1917_v56 }
0x1029   :  { %v1902_v2 = vmul.f32 0.35355338, %v1897_v58 }
0x102b   :  { %v1904_v5 = vadd.f32 %v1902_v2, %v3650_v50 }
0x102d   :  { %v1908_v33 = vsel %vm1491_vm10, %v1904_v5, -inf }
0x102e   :  { %v1930_v59 = vpop.permute.xlu0 %1929 }
0x102f   :  { %1942 = vmatpush.bf16.msra.mxu0 %v1930_v59 }
0x1030   :  { %v1899_v60 = vpop.f32.mrf.mxu3 }
0x1031   :  { %2017 = vrot.lane.b32.xlu1 %v3609_v14, %s4080_s28 }
0x1036   :  { %v2016_v4 = vpop.permute.xlu0 %2015 }
0x1038   :  { %v2011_v61 = vpop.f32.mrf.mxu3 }
0x1039   :  { %v2038_v62 = vmul.f32 0.35355338, %v2011_v61 }
0x103b   :  { %v2040_v63 = vadd.f32 %v2038_v62, %v3631_v34 }
0x103d   :  { %v2042_v0 = vsel %vm1491_vm10, %v2040_v63, -inf }
0x103e   :  { %2043 = vmax.xlane.f32.xlu0 %v2042_v0  ;;  %v2132_v16 = vpop.permute.xlu0 %2131 }
0x103f   :  { %v2137_v53 = vsel %vm156_vm1, %v2132_v16, 0 }
0x1040   :  { %v2013_v1 = vpop.f32.mrf.mxu3  ;;  %2129 = vrot.lane.b32.xlu2 %v3617_v20, %s4082_s29 }
0x105b   :  { %1909 = vmax.xlane.f32.xlu1 %v1908_v33 }
0x1074   :  { %1948 = vrot.lane.b32.xlu1 %v3609_v14, %s4081_s4 }
0x107c   :  { %2154 = vrot.lane.b32.xlu1 %v3609_v14, %s4082_s29 }
0x108b   :  { %v1785_v38 = vpop.xlane.xlu1 %1784 }
0x108c   :  { %2955 = vrcp.f32 %v1785_v38 }
0x1092   :  { %v2956_v7 = vpop.eup %2955 }
0x1093   :  { %v1789_v9 = vmul.f32 %v2956_v7, %v2952_v44 }
0x1095   :  { %v1791_v10 = vpack.c.bf16 %v1789_v9, %v1789_v9 }
0x1097   :  { %2805 = vmatmul.msk.bf16.vlgmr.msrb.gmra.mxu0 %vm1491_vm10, %v1791_v10 }
0x109b   :  { %v1919_v12 = vpop.xlane.xlu2 %1918 }
0x109c   :  { %2957 = vrcp.f32 %v1919_v12 }
0x10a2   :  { %v2958_v13 = vpop.eup %2957 }
0x10a3   :  { %v1925_v17 = vmul.f32 %v2958_v13, %v2954_v54  ;;  %v2018_v15 = vpop.permute.xlu1 %2017  ;;  %v2130_v32 = vpop.permute.xlu2 %2129 }
0x10a4   :  { %v2023_v18 = vsel %vm156_vm1, %v2018_v15, 0 }
0x10a5   :  { %v1927_v19 = vpack.c.bf16 %v1925_v17, %v1925_v17  ;;  %2032 = vmatpush.bf16.xpose.msrb.mxu0 %v2023_v18  ;;  %v1714_v17 = vadd.f32 %v1713_v48, %v3725_v57  ;;  %v1716_v18 = vadd.f32 %v1715_v41, %v3727_v43 }
0x10a7   :  { %2809 = vmatmul.msk.bf16.vlgmr.msra.gmra.mxu0 %vm1491_vm10, %v1927_v19 }
0x10ad   :  { %2146 = vmatpush.bf16.xpose.msra.mxu0 %v2137_v53 }
0x10b1   :  { %v2044_v21 = vpop.xlane.xlu0 %2043 }
0x10b2   :  { %v2048_v22 = vsub.f32 %v2040_v63, %v2044_v21  ;;  %v1967_v21 = vld [vmem:[%s4022_s14 + $0x18] sm:$0xff] }
0x10b4   :  { %v2050_v23 = vmul.f32 1.442695, %v2048_v22  ;;  %v1969_v22 = vpack.c.bf16 %v1967_v21, %v1967_v21 }
0x10b6   :  { %2959 = vpow2.f32 %v2050_v23  ;;  %v1974_v23 = vsel %vm233_vm2, %v1969_v22, 0 }
0x10b7   :  { %2813 = vmatmul.msk.bf16.vlgmr.msrb.gmra.mxu0 %vm156_vm1, %v2016_v4  ;;  %1983 = vmatpush.bf16.msra.mxu2 %v1974_v23 }
0x10bc   :  { %v2960_v26 = vpop.eup %2959 }
0x10bd   :  { %v2054_v28 = vsel %vm1491_vm10, %v2960_v26, 0.0 }
0x10be   :  { %2055 = vadd.xlane.f32.xlu0 %v2054_v28 }
0x10c7   :  { %2817 = vmatmul.msk.bf16.vlgmr.msra.gmra.mxu0 %vm156_vm1, %v2130_v32 }
0x10ce   :  { %v1910_v35 = vpop.xlane.xlu1 %1909 }
0x10cf   :  { %v1912_v36 = vsub.f32 %v1904_v5, %v1910_v35 }
0x10d1   :  { %v1915_v11 = vmul.f32 1.442695, %v1912_v36 }
0x10d2   :  { %2066 = vrot.lane.b32.xlu0 %v3601_v3, %s4083_s25 }
0x10d3   :  { %2961 = vpow2.f32 %v1915_v11 }
0x10d9   :  { %v2962_v37 = vpop.eup %2961 }
0x10da   :  { %2268 = vrot.lane.b32.xlu0 %v3601_v3, %s4084_s12  ;;  %v1920_v39 = vsel %vm1491_vm10, %v2962_v37, 0.0 }
0x10db   :  { %1921 = vadd.xlane.f32.xlu2 %v1920_v39 }
0x10e2   :  { %2266 = vrot.lane.b32.xlu0 %v3617_v20, %s4084_s12 }
0x10e6   :  { %v1949_v24 = vpop.permute.xlu1 %1948 }
0x10e7   :  { %1961 = vmatpush.bf16.msrb.mxu1 %v1949_v24 }
0x10ee   :  { %v2155_v2 = vpop.permute.xlu1 %2154 }
0x10ef   :  { %v2160_v33 = vsel %vm156_vm1, %v2155_v2, 0 }
0x10f3   :  { %2152 = vrot.lane.b32.xlu2 %v3622_v27, %s4082_s29 }
0x1114   :  { %v1826_v42 = vpop.f32.mrf.mxu0 }
0x1115   :  { %v1831_v40 = vpack.c.bf16 %v1826_v42, %v3730_v8 }
0x1117   :  { %2806 = vmatmul.msk.bf16.vlgmr.msra.gmra.mxu1 %vm156_vm1, %v1831_v40 }
0x111c   :  { %v1828_v25 = vpop.f32.mrf.mxu0 }
0x1124   :  { %v3767_v44 = vpop.f32.mrf.mxu0 }
0x112c   :  { %v1946_v45 = vpop.f32.mrf.mxu0 }
0x1131   :  { %v2056_v54 = vpop.xlane.xlu0 %2055 }
0x1134   :  { %v2034_v46 = vpop.f32.mrf.mxu0 }
0x1135   :  { %v2039_v47 = vmul.f32 0.35355338, %v2034_v46 }
0x1137   :  { %v2041_v49 = vadd.f32 %v2039_v47, %v3650_v50 }
0x1139   :  { %v2045_v51 = vsel %vm1491_vm10, %v2041_v49, -inf }
0x113a   :  { %2046 = vmax.xlane.f32.xlu1 %v2045_v51 }
0x113c   :  { %v2036_v56 = vpop.f32.mrf.mxu0 }
0x1144   :  { %v2148_v58 = vpop.f32.mrf.mxu0  ;;  %v2067_v59 = vpop.permute.xlu0 %2066 }
0x1145   :  { %v2175_v60 = vmul.f32 0.35355338, %v2148_v58  ;;  %2079 = vmatpush.bf16.msra.mxu1 %v2067_v59 }
0x1147   :  { %v2177_v8 = vadd.f32 %v2175_v60, %v3631_v34 }
0x1149   :  { %v2179_v61 = vsel %vm1491_vm10, %v2177_v8, -inf }
0x114a   :  { %2180 = vmax.xlane.f32.xlu2 %v2179_v61 }
0x114c   :  { %v2150_v62 = vpop.f32.mrf.mxu0  ;;  %v2269_v9 = vpop.permute.xlu0 %2268 }
0x114d   :  { %v2274_v4 = vsel %vm156_vm1, %v2269_v9, 0 }
0x114e   :  { %v1922_v63 = vpop.xlane.xlu2 %1921 }
0x114f   :  { %2963 = vrcp.f32 %v1922_v63 }
0x1150   :  { %2965 = vrcp.f32 %v2056_v54 }
0x1153   :  { %2085 = vrot.lane.b32.xlu1 %v3609_v14, %s4083_s25 }
0x1154   :  { %v2267_v13 = vpop.permute.xlu0 %2266 }
0x1155   :  { %v2964_v0 = vpop.eup %2963 }
0x1156   :  { %v1926_v1 = vmul.f32 %v2964_v0, %v2962_v37  ;;  %v2966_v38 = vpop.eup %2965  ;;  %v2153_v12 = vpop.permute.xlu2 %2152 }
0x1157   :  { %v2062_v7 = vmul.f32 %v2966_v38, %v2960_v26  ;;  %v2104_v38 = vld [vmem:[%s4022_s14 + $0x20] sm:$0xff] }
0x1158   :  { %v1928_v5 = vpack.c.bf16 %v1926_v1, %v1926_v1 }
0x1159   :  { %v2064_v10 = vpack.c.bf16 %v2062_v7, %v2062_v7  ;;  %v2106_v7 = vpack.c.bf16 %v2104_v38, %v2104_v38 }
0x115a   :  { %2810 = vmatmul.msk.bf16.vlgmr.msrb.gmra.mxu1 %vm1491_vm10, %v1928_v5 }
0x115b   :  { %2169 = vmatpush.bf16.xpose.msrb.mxu1 %v2160_v33  ;;  %2289 = vrot.lane.b32.xlu1 %v3622_v27, %s4084_s12  ;;  %v2111_v9 = vsel %vm233_vm2, %v2106_v7, 0 }
0x115c   :  { %2120 = vmatpush.bf16.msrb.mxu3 %v2111_v9 }
0x116a   :  { %2814 = vmatmul.msk.bf16.vlgmr.msra.gmra.mxu1 %vm1491_vm10, %v2064_v10 }
0x116b   :  { %2283 = vmatpush.bf16.xpose.msra.mxu1 %v2274_v4 }
0x117a   :  { %2818 = vmatmul.msk.bf16.vlgmr.msrb.gmra.mxu1 %vm156_vm1, %v2153_v12 }
0x118a   :  { %2822 = vmatmul.msk.bf16.vlgmr.msra.gmra.mxu1 %vm156_vm1, %v2267_v13 }
0x1194   :  { %v1848_v15 = vpop.f32.mrf.mxu1 }
0x1195   :  { %v3784_v16 = vadd.f32 %v1848_v15, %v1714_v17 }
0x119c   :  { %v1850_v19 = vpop.f32.mrf.mxu1 }
0x119d   :  { %v3787_v53 = vadd.f32 %v1850_v19, %v1716_v18 }
0x11ad   :  { %v2047_v26 = vpop.xlane.xlu1 %2046 }
0x11ae   :  { %v2049_v28 = vsub.f32 %v2041_v49, %v2047_v26 }
0x11b0   :  { %v2052_v29 = vmul.f32 1.442695, %v2049_v28 }
0x11b2   :  { %2967 = vpow2.f32 %v2052_v29 }
0x11b8   :  { %v2968_v57 = vpop.eup %2967 }
0x11b9   :  { %v2057_v30 = vsel %vm1491_vm10, %v2968_v57, 0.0 }
0x11ba   :  { %2058 = vadd.xlane.f32.xlu0 %v2057_v30 }
0x11bd   :  { %v2181_v43 = vpop.xlane.xlu2 %2180 }
0x11be   :  { %v2185_v31 = vsub.f32 %v2177_v8, %v2181_v43 }
0x11c0   :  { %v2187_v32 = vmul.f32 1.442695, %v2185_v31 }
0x11c2   :  { %2969 = vpow2.f32 %v2187_v32 }
0x11c5   :  { %v2086_v35 = vpop.permute.xlu1 %2085 }
0x11c6   :  { %2098 = vmatpush.bf16.msrb.mxu2 %v2086_v35 }
0x11c8   :  { %v2970_v36 = vpop.eup %2969 }
0x11c9   :  { %v2191_v11 = vsel %vm1491_vm10, %v2970_v36, 0.0 }
0x11ca   :  { %2192 = vadd.xlane.f32.xlu2 %v2191_v11 }
0x11ce   :  { %2203 = vrot.lane.b32.xlu0 %v3601_v3, %s4085_s9 }
0x11d7   :  { %v1963_v37 = vpop.f32.mrf.mxu1 }
0x11d8   :  { %v1968_v39 = vpack.c.bf16 %v1963_v37, %v3767_v44 }
0x11da   :  { %2811 = vmatmul.msk.bf16.vlgmr.msra.gmra.mxu2 %vm156_vm1, %v1968_v39 }
0x11df   :  { %v1965_v24 = vpop.f32.mrf.mxu1 }
0x11e2   :  { %2291 = vrot.lane.b32.xlu2 %v3609_v14, %s4084_s12 }
0x11e7   :  { %v3801_v48 = vpop.f32.mrf.mxu1 }
0x11ef   :  { %v2083_v41 = vpop.f32.mrf.mxu1 }
0x11f0   :  { %v2241_v41 = vld [vmem:[%s4022_s14 + $0x28] sm:$0xff] }
0x11f7   :  { %v2171_v42 = vpop.f32.mrf.mxu1 }
0x11f8   :  { %v2176_v40 = vmul.f32 0.35355338, %v2171_v42 }
0x11fa   :  { %v2178_v25 = vadd.f32 %v2176_v40, %v3650_v50 }
0x11fc   :  { %v2182_v45 = vsel %vm1491_vm10, %v2178_v25, -inf }
0x11fd   :  { %2183 = vmax.xlane.f32.xlu1 %v2182_v45 }
0x11ff   :  { %v2173_v46 = vpop.f32.mrf.mxu1 }
0x1207   :  { %v2285_v47 = vpop.f32.mrf.mxu1 }
0x1208   :  { %v2312_v49 = vmul.f32 0.35355338, %v2285_v47 }
0x120a   :  { %v2314_v44 = vadd.f32 %v2312_v49, %v3631_v34 }
0x120c   :  { %v2316_v51 = vsel %vm1491_vm10, %v2314_v44, -inf }
0x120d   :  { %2317 = vmax.xlane.f32.xlu0 %v2316_v51 }
0x120f   :  { %v2287_v54 = vpop.f32.mrf.mxu1 }
0x1216   :  { %2222 = vrot.lane.b32.xlu1 %v3609_v14, %s4085_s9 }
0x121e   :  { %2428 = vrot.lane.b32.xlu1 %v3609_v14, %s4086_s11 }
0x1221   :  { %2405 = vrot.lane.b32.xlu0 %v3601_v3, %s4086_s11 }
0x1226   :  { %2403 = vrot.lane.b32.xlu1 %v3617_v20, %s4086_s11  ;;  %v2290_v20 = vpop.permute.xlu1 %2289 }
0x122d   :  { %v2059_v56 = vpop.xlane.xlu0 %2058 }
0x122e   :  { %2971 = vrcp.f32 %v2059_v56 }
0x1234   :  { %v2972_v58 = vpop.eup %2971 }
0x1235   :  { %v2063_v59 = vmul.f32 %v2972_v58, %v2968_v57 }
0x1237   :  { %v2065_v60 = vpack.c.bf16 %v2063_v59, %v2063_v59 }
0x1239   :  { %2815 = vmatmul.msk.bf16.vlgmr.msrb.gmra.mxu2 %vm1491_vm10, %v2065_v60 }
0x123d   :  { %v2193_v8 = vpop.xlane.xlu2 %2192 }
0x123e   :  { %2973 = vrcp.f32 %v2193_v8 }
0x1240   :  { %v2204_v61 = vpop.permute.xlu0 %2203 }
0x1241   :  { %2216 = vmatpush.bf16.msra.mxu2 %v2204_v61 }
0x1244   :  { %v2974_v62 = vpop.eup %2973 }
0x1245   :  { %v2199_v63 = vmul.f32 %v2974_v62, %v2970_v36  ;;  %v2292_v0 = vpop.permute.xlu2 %2291 }
0x1246   :  { %v2297_v1 = vsel %vm156_vm1, %v2292_v0, 0 }
0x1247   :  { %v2201_v2 = vpack.c.bf16 %v2199_v63, %v2199_v63  ;;  %2306 = vmatpush.bf16.xpose.msrb.mxu2 %v2297_v1 }
0x1249   :  { %2819 = vmatmul.msk.bf16.vlgmr.msra.gmra.mxu2 %vm1491_vm10, %v2201_v2 }
0x1259   :  { %2823 = vmatmul.msk.bf16.vlgmr.msrb.gmra.mxu2 %vm156_vm1, %v2290_v20 }
0x125d   :  { %v1985_v5 = vpop.f32.mrf.mxu2 }
0x125e   :  { %v3820_v33 = vadd.f32 %v1985_v5, %v3784_v16 }
0x1265   :  { %v1987_v57 = vpop.f32.mrf.mxu2 }
0x1266   :  { %v1991_v1 = vadd.f32 %v1987_v57, %v3787_v53  ;;  %v2378_v53 = vld [vmem:[%s4022_s14 + $0x30] sm:$0xff] }
0x1270   :  { %v2184_v10 = vpop.xlane.xlu1 %2183 }
0x1271   :  { %v2186_v4 = vsub.f32 %v2178_v25, %v2184_v10 }
0x1273   :  { %v2189_v12 = vmul.f32 1.442695, %v2186_v4 }
0x1275   :  { %2975 = vpow2.f32 %v2189_v12 }
0x127b   :  { %v2976_v13 = vpop.eup %2975 }
0x127c   :  { %v2194_v17 = vsel %vm1491_vm10, %v2976_v13, 0.0 }
0x127d   :  { %2195 = vadd.xlane.f32.xlu2 %v2194_v17 }
0x1280   :  { %v2318_v15 = vpop.xlane.xlu0 %2317 }
0x1281   :  { %v2322_v18 = vsub.f32 %v2314_v44, %v2318_v15 }
0x1283   :  { %v2324_v16 = vmul.f32 1.442695, %v2322_v18 }
0x1285   :  { %2977 = vpow2.f32 %v2324_v16 }
0x1288   :  { %v2223_v19 = vpop.permute.xlu1 %2222 }
0x1289   :  { %2235 = vmatpush.bf16.msra.mxu3 %v2223_v19 }
0x128b   :  { %v2978_v21 = vpop.eup %2977 }
0x128c   :  { %v2328_v22 = vsel %vm1491_vm10, %v2978_v21, 0.0 }
0x128d   :  { %2329 = vadd.xlane.f32.xlu0 %v2328_v22 }
0x1290   :  { %v2429_v23 = vpop.permute.xlu1 %2428 }
0x1291   :  { %v2434_v47 = vsel %vm156_vm1, %v2429_v23, 0 }
0x1293   :  { %v2406_v26 = vpop.permute.xlu0 %2405 }
0x1294   :  { %v2411_v28 = vsel %vm156_vm1, %v2406_v26, 0 }
0x1295   :  { %2340 = vrot.lane.b32.xlu2 %v3601_v3, %s4087_s30  ;;  %2420 = vmatpush.bf16.xpose.msra.mxu2 %v2411_v28 }
0x1298   :  { %v2404_v29 = vpop.permute.xlu1 %2403 }
0x129c   :  { %2827 = vmatmul.msk.bf16.vlgmr.msra.gmra.mxu2 %vm156_vm1, %v2404_v29 }
0x12a1   :  { %2426 = vrot.lane.b32.xlu0 %v3622_v27, %s4086_s11 }
0x12a9   :  { %2359 = vrot.lane.b32.xlu0 %v3609_v14, %s4087_s30 }
0x12bc   :  { %v2100_v30 = vpop.f32.mrf.mxu2 }
0x12bd   :  { %v2105_v43 = vpack.c.bf16 %v2100_v30, %v3801_v48  ;;  %v2243_v48 = vpack.c.bf16 %v2241_v41, %v2241_v41 }
0x12bf   :  { %2816 = vmatmul.msk.bf16.vlgmr.msrb.gmra.mxu3 %vm156_vm1, %v2105_v43  ;;  %v2248_v42 = vsel %vm233_vm2, %v2243_v48, 0 }
0x12c0   :  { %2257 = vmatpush.bf16.msrb.mxu0 %v2248_v42 }
0x12c4   :  { %v2102_v31 = vpop.f32.mrf.mxu2 }
0x12cc   :  { %v2218_v32 = vpop.f32.mrf.mxu2 }
0x12d4   :  { %v2220_v35 = vpop.f32.mrf.mxu2 }
0x12dc   :  { %v2308_v36 = vpop.f32.mrf.mxu2 }
0x12dd   :  { %v2313_v11 = vmul.f32 0.35355338, %v2308_v36 }
0x12df   :  { %v2315_v37 = vadd.f32 %v2313_v11, %v3650_v50 }
0x12e1   :  { %v2319_v39 = vsel %vm1491_vm10, %v2315_v37, -inf }
0x12e2   :  { %2320 = vmax.xlane.f32.xlu2 %v2319_v39 }
0x12e4   :  { %v2310_v27 = vpop.f32.mrf.mxu2 }
0x12f0   :  { %v2196_v24 = vpop.xlane.xlu2 %2195 }
0x12f1   :  { %2979 = vrcp.f32 %v2196_v24 }
0x12f7   :  { %v2980_v40 = vpop.eup %2979 }
0x12f8   :  { %v2200_v25 = vmul.f32 %v2980_v40, %v2976_v13  ;;  %v2341_v45 = vpop.permute.xlu2 %2340 }
0x12f9   :  { %2353 = vmatpush.bf16.msrb.mxu3 %v2341_v45 }
0x12fa   :  { %v2202_v46 = vpack.c.bf16 %v2200_v25, %v2200_v25 }
0x12fc   :  { %2820 = vmatmul.msk.bf16.vlgmr.msra.gmra.mxu3 %vm1491_vm10, %v2202_v46 }
0x12fd   :  { %2443 = vmatpush.bf16.xpose.msra.mxu3 %v2434_v47 }
0x1300   :  { %v2330_v49 = vpop.xlane.xlu0 %2329 }
0x1301   :  { %2981 = vrcp.f32 %v2330_v49 }
0x1307   :  { %v2982_v44 = vpop.eup %2981 }
0x1308   :  { %v2336_v51 = vmul.f32 %v2982_v44, %v2978_v21 }
0x130a   :  { %v2338_v54 = vpack.c.bf16 %v2336_v51, %v2336_v51 }
0x130c   :  { %2824 = vmatmul.msk.bf16.vlgmr.msrb.gmra.mxu3 %vm1491_vm10, %v2338_v54 }
0x1313   :  { %v2427_v56 = vpop.permute.xlu0 %2426 }
0x131b   :  { %v2360_v58 = vpop.permute.xlu0 %2359 }
0x131c   :  { %2372 = vmatpush.bf16.msra.mxu0 %v2360_v58  ;;  %2828 = vmatmul.msk.bf16.vlgmr.msra.gmra.mxu3 %vm156_vm1, %v2427_v56 }
0x131f   :  { %v2422_v59 = vpop.f32.mrf.mxu2 }
0x1320   :  { %v2449_v60 = vmul.f32 0.35355338, %v2422_v59 }
0x1322   :  { %v2451_v8 = vadd.f32 %v2449_v60, %v3631_v34 }
0x1324   :  { %v2453_v61 = vsel %vm1491_vm10, %v2451_v8, -inf }
0x1325   :  { %2454 = vmax.xlane.f32.xlu0 %v2453_v61 }
0x1327   :  { %v2424_v62 = vpop.f32.mrf.mxu2 }
0x1328   :  { %v2515_v62 = vld [vmem:[%s4022_s14 + $0x38] sm:$0xff] }
0x1339   :  { %2496 = vrot.lane.b32.xlu0 %v3609_v14, %s4088_s7 }
0x1342   :  { %v2122_v63 = vpop.f32.mrf.mxu3 }
0x1343   :  { %v2127_v0 = vadd.f32 %v2122_v63, %v3820_v33  ;;  %v2380_v33 = vpack.c.bf16 %v2378_v53, %v2378_v53  ;;  %v2517_v63 = vpack.c.bf16 %v2515_v62, %v2515_v62 }
0x1345   :  { %v2385_v12 = vsel %vm233_vm2, %v2380_v33, 0 }
0x1346   :  { %2394 = vmatpush.bf16.msrb.mxu1 %v2385_v12 }
0x134a   :  { %v2124_v2 = vpop.f32.mrf.mxu3 }
0x134b   :  { %v3854_v20 = vadd.f32 %v2124_v2, %v1991_v1 }
0x1355   :  { %v2321_v5 = vpop.xlane.xlu2 %2320 }
0x1356   :  { %v2323_v38 = vsub.f32 %v2315_v37, %v2321_v5 }
0x1358   :  { %v2326_v7 = vmul.f32 1.442695, %v2323_v38  ;;  %v2854_v38 = vld [vmem:[%s4023_s15] ss:$0 sm:$0xff] }
0x135a   :  { %2983 = vpow2.f32 %v2326_v7 }
0x1360   :  { %v2984_v34 = vpop.eup %2983 }
0x1361   :  { %v2331_v9 = vsel %vm1491_vm10, %v2984_v34, 0.0 }
0x1362   :  { %2332 = vadd.xlane.f32.xlu1 %v2331_v9 }
0x137f   :  { %v2237_v10 = vpop.f32.mrf.mxu3 }
0x1380   :  { %v2242_v4 = vpack.c.bf16 %v2237_v10, %v2218_v32 }
0x1382   :  { %2821 = vmatmul.msk.bf16.vlgmr.msrb.gmra.mxu0 %vm156_vm1, %v2242_v4 }
0x1387   :  { %v2239_v14 = vpop.f32.mrf.mxu3 }
0x138f   :  { %v2355_v13 = vpop.f32.mrf.mxu3 }
0x1397   :  { %v2357_v17 = vpop.f32.mrf.mxu3 }
0x1398   :  { %v2455_v15 = vpop.xlane.xlu0 %2454 }
0x1399   :  { %v2459_v18 = vsub.f32 %v2451_v8, %v2455_v15 }
0x139b   :  { %v2461_v16 = vmul.f32 1.442695, %v2459_v18 }
0x139d   :  { %2985 = vpow2.f32 %v2461_v16 }
0x139f   :  { %v2445_v19 = vpop.f32.mrf.mxu3 }
0x13a0   :  { %v2450_v21 = vmul.f32 0.35355338, %v2445_v19 }
0x13a2   :  { %v2452_v22 = vadd.f32 %v2450_v21, %v3650_v50 }
0x13a3   :  { %v2986_v23 = vpop.eup %2985 }
0x13a4   :  { %v2456_v26 = vsel %vm1491_vm10, %v2452_v22, -inf  ;;  %v2465_v28 = vsel %vm1491_vm10, %v2986_v23, 0.0 }
0x13a5   :  { %2457 = vmax.xlane.f32.xlu2 %v2456_v26  ;;  %2466 = vadd.xlane.f32.xlu1 %v2465_v28  ;;  %v2611_v26 = vld [vmem:[%s4027_s18 + $0x38] sm:$0xff] }
0x13a7   :  { %v2447_v29 = vpop.f32.mrf.mxu3 }
0x13a8   :  { %v2608_v29 = vld [vmem:[%s4027_s18 + $0x20] sm:$0xff] }
0x13ab   :  { %v2497_v57 = vpop.permute.xlu0 %2496 }
0x13ac   :  { %2509 = vmatpush.bf16.msra.mxu1 %v2497_v57  ;;  %v2609_v57 = vld [vmem:[%s4027_s18 + $0x28] sm:$0xff] }
0x13be   :  { %2477 = vrot.lane.b32.xlu1 %v3601_v3, %s4088_s7 }
0x13d5   :  { %v2333_v30 = vpop.xlane.xlu1 %2332 }
0x13d6   :  { %2987 = vrcp.f32 %v2333_v30  ;;  %v2615_v30 = vpack.c.bf16 %v2609_v57, %v2608_v29  ;;  %v2857_v29 = vld [vmem:[%s4026_s19] ss:$0 sm:$0xff] }
0x13dc   :  { %v2988_v43 = vpop.eup %2987 }
0x13dd   :  { %v2337_v31 = vmul.f32 %v2988_v43, %v2984_v34  ;;  %v2606_v43 = vld [vmem:[%s4027_s18 + $0x10] sm:$0xff] }
0x13df   :  { %v2339_v32 = vpack.c.bf16 %v2337_v31, %v2337_v31  ;;  %v2607_v31 = vld [vmem:[%s4027_s18 + $0x18] sm:$0xff] }
0x13e1   :  { %2825 = vmatmul.msk.bf16.vlgmr.msra.gmra.mxu0 %vm1491_vm10, %v2339_v32  ;;  %v2614_v32 = vpack.c.bf16 %v2607_v31, %v2606_v43 }
0x13ff   :  { %v2259_v50 = vpop.f32.mrf.mxu0 }
0x1400   :  { %v2264_v35 = vadd.f32 %v2259_v50, %v2127_v0  ;;  %v2522_v0 = vsel %vm233_vm2, %v2517_v63, 0 }
0x1401   :  { %2531 = vmatpush.bf16.msrb.mxu2 %v2522_v0 }
0x1407   :  { %v2261_v40 = vpop.f32.mrf.mxu0 }
0x1408   :  { %v2265_v60 = vadd.f32 %v2261_v40, %v3854_v20 }
0x1418   :  { %v2458_v36 = vpop.xlane.xlu2 %2457  ;;  %v2467_v39 = vpop.xlane.xlu1 %2466 }
0x1419   :  { %v2460_v11 = vsub.f32 %v2452_v22, %v2458_v36  ;;  %v2604_v36 = vld [vmem:[%s4027_s18] sm:$0xff] }
0x141b   :  { %v2463_v37 = vmul.f32 1.442695, %v2460_v11  ;;  %v2605_v11 = vld [vmem:[%s4027_s18 + $0x8] sm:$0xff] }
0x141d   :  { %2989 = vpow2.f32 %v2463_v37 }
0x141e   :  { %2991 = vrcp.f32 %v2467_v39  ;;  %v2613_v39 = vpack.c.bf16 %v2605_v11, %v2604_v36 }
0x1423   :  { %v2990_v27 = vpop.eup %2989 }
0x1424   :  { %v2468_v24 = vsel %vm1491_vm10, %v2990_v27, 0.0  ;;  %v2992_v3 = vpop.eup %2991 }
0x1425   :  { %2469 = vadd.xlane.f32.xlu2 %v2468_v24  ;;  %v2473_v41 = vmul.f32 %v2992_v3, %v2986_v23  ;;  %v2610_v23 = vld [vmem:[%s4027_s18 + $0x30] sm:$0xff]  ;;  %v2655_v24 = vld [vmem:[%s4028_s20 + $0x78] sm:$0xff]  ;;  %v2652_v3 = vld [vmem:[%s4028_s20 + $0x60] sm:$0xff] }
0x1426   :  { %v2616_v28 = vpack.c.bf16 %v2611_v26, %v2610_v23  ;;  %v2641_v23 = vld [vmem:[%s4028_s20 + $0x8] sm:$0xff] }
0x1427   :  { %v2475_v42 = vpack.c.bf16 %v2473_v41, %v2473_v41 }
0x1428   :  { %2628 = vmatpush.bf16.msrb.mxu3 %v2616_v28 }
0x142c   :  { %2629 = vmatpush.bf16.msrb.mxu3 %v2615_v30 }
0x1430   :  { %v2478_v48 = vpop.permute.xlu1 %2477  ;;  %2630 = vmatpush.bf16.msrb.mxu3 %v2614_v32 }
0x1431   :  { %2490 = vmatpush.bf16.msrb.mxu0 %v2478_v48 }
0x1434   :  { %2829 = vmatmul.msk.bf16.vlgmr.msrb.gmra.mxu0 %vm1491_vm10, %v2475_v42  ;;  %2631 = vmatpush.bf16.msrb.mxu3 %v2613_v39  ;;  %v2653_v42 = vld [vmem:[%s4028_s20 + $0x68] sm:$0xff] }
0x145e   :  { %v2374_v25 = vpop.f32.mrf.mxu0 }
0x145f   :  { %v2379_v45 = vpack.c.bf16 %v2374_v25, %v2355_v13  ;;  %v2663_v25 = vpack.c.bf16 %v2653_v42, %v2652_v3 }
0x1461   :  { %2826 = vmatmul.msk.bf16.vlgmr.msrb.gmra.mxu1 %vm156_vm1, %v2379_v45 }
0x1466   :  { %v2376_v46 = vpop.f32.mrf.mxu0 }
0x1498   :  { %v2470_v47 = vpop.xlane.xlu2 %2469 }
0x1499   :  { %2993 = vrcp.f32 %v2470_v47  ;;  %v2650_v47 = vld [vmem:[%s4028_s20 + $0x50] sm:$0xff] }
0x149f   :  { %v2994_v49 = vpop.eup %2993 }
0x14a0   :  { %v2474_v44 = vmul.f32 %v2994_v49, %v2990_v27  ;;  %v2654_v27 = vld [vmem:[%s4028_s20 + $0x70] sm:$0xff]  ;;  %v2651_v49 = vld [vmem:[%s4028_s20 + $0x58] sm:$0xff] }
0x14a1   :  { %v2664_v48 = vpack.c.bf16 %v2655_v24, %v2654_v27 }
0x14a2   :  { %v2476_v51 = vpack.c.bf16 %v2474_v44, %v2474_v44 }
0x14a3   :  { %2669 = vmatpush.bf16.msra.mxu0 %v2664_v48 }
0x14a4   :  { %2830 = vmatmul.msk.bf16.vlgmr.msra.gmra.mxu1 %vm1491_vm10, %v2476_v51 }
0x14a7   :  { %2670 = vmatpush.bf16.msra.mxu0 %v2663_v25 }
0x14b1   :  { %v2492_v54 = vpop.f32.mrf.mxu0 }
0x14b9   :  { %v2494_v56 = vpop.f32.mrf.mxu0 }
0x14ba   :  { %v2648_v56 = vld [vmem:[%s4028_s20 + $0x40] sm:$0xff] }
0x14de   :  { %v2396_v58 = vpop.f32.mrf.mxu1 }
0x14df   :  { %v2401_v59 = vadd.f32 %v2396_v58, %v2264_v35  ;;  %v2649_v58 = vld [vmem:[%s4028_s20 + $0x48] sm:$0xff] }
0x14e6   :  { %v2398_v8 = vpop.f32.mrf.mxu1 }
0x14e7   :  { %v2402_v61 = vadd.f32 %v2398_v8, %v2265_v60  ;;  %v2661_v8 = vpack.c.bf16 %v2649_v58, %v2648_v56 }
0x1521   :  { %v2511_v1 = vpop.f32.mrf.mxu1 }
0x1522   :  { %v2516_v2 = vpack.c.bf16 %v2511_v1, %v2492_v54  ;;  %v2662_v54 = vpack.c.bf16 %v2651_v49, %v2650_v47 }
0x1524   :  { %2831 = vmatmul.msk.bf16.vlgmr.msrb.gmra.mxu2 %vm156_vm1, %v2516_v2  ;;  %2671 = vmatpush.bf16.msra.mxu0 %v2662_v54 }
0x1528   :  { %2672 = vmatpush.bf16.msra.mxu0 %v2661_v8 }
0x1529   :  { %v2513_v5 = vpop.f32.mrf.mxu1 }
0x15a7   :  { %v2533_v20 = vpop.f32.mrf.mxu2 }
0x15a8   :  { %v2538_v7 = vadd.f32 %v2533_v20, %v2401_v59 }
0x15aa   :  { %v2544_v34 = vadd.f32 %v2854_v38, %v2538_v7 }
0x15ac   :  { %v2546_v9 = vadd.f32 %v2544_v34, %v3591_v52 }
0x15ae   :  { %v2548_v10 = vsel %vm115_vm0, %v2546_v9, 0.0 }
0x15af   :  { %2549 = vadd.xlane.f32.xlu2 %v2548_v10  ;;  %v2535_v4 = vpop.f32.mrf.mxu2 }
0x15b0   :  { %v2539_v14 = vadd.f32 %v2535_v4, %v2402_v61 }
0x15b2   :  { %v2545_v53 = vadd.f32 %v2854_v38, %v2539_v14  ;;  %v2855_v38 = vld [vmem:[%s4024_s16] ss:$0 sm:$0xff] }
0x15b4   :  { %v2547_v33 = vadd.f32 %v2545_v53, %v3593_v55 }
0x15b6   :  { %v2551_v12 = vsel %vm115_vm0, %v2547_v33, 0.0 }
0x15b7   :  { %2552 = vadd.xlane.f32.xlu2 %v2551_v12 }
0x1622   :  { %v2550_v13 = vpop.xlane.xlu2 %2549 }
0x1623   :  { %v2554_v17 = vmul.f32 %v2550_v13, %v3517_v6  ;;  %v2646_v13 = vld [vmem:[%s4028_s20 + $0x30] sm:$0xff] }
0x1625   :  { %v3886_v15 = vsub.f32 %v2546_v9, %v2554_v17  ;;  %v2856_v9 = vld [vmem:[%s4025_s17] ss:$0 sm:$0xff]  ;;  %v2647_v17 = vld [vmem:[%s4028_s20 + $0x38] sm:$0xff] }
0x1627   :  { %v2558_v18 = vmul.f32 %v3886_v15, %v3886_v15 }
0x1629   :  { %v2560_v52 = vsel %vm115_vm0, %v2558_v18, 0.0  ;;  %v2644_v18 = vld [vmem:[%s4028_s20 + $0x20] sm:$0xff] }
0x162a   :  { %2561 = vadd.xlane.f32.xlu2 %v2560_v52  ;;  %v2553_v16 = vpop.xlane.xlu2 %2552  ;;  %v2645_v52 = vld [vmem:[%s4028_s20 + $0x28] sm:$0xff] }
0x162b   :  { %v2555_v19 = vmul.f32 %v2553_v16, %v3517_v6  ;;  %v2659_v16 = vpack.c.bf16 %v2645_v52, %v2644_v18 }
0x162d   :  { %v3892_v21 = vsub.f32 %v2547_v33, %v2555_v19  ;;  %v2642_v19 = vld [vmem:[%s4028_s20 + $0x10] sm:$0xff] }
0x162f   :  { %v2559_v55 = vmul.f32 %v3892_v21, %v3892_v21 }
0x1631   :  { %v2563_v22 = vsel %vm115_vm0, %v2559_v55, 0.0 }
0x1632   :  { %2564 = vadd.xlane.f32.xlu0 %v2563_v22  ;;  %v2640_v22 = vld [vmem:[%s4028_s20] sm:$0xff] }
0x1633   :  { %v2657_v26 = vpack.c.bf16 %v2641_v23, %v2640_v22 }
0x169d   :  { %v2562_v50 = vpop.xlane.xlu2 %2561 }
0x169e   :  { %v2566_v35 = vmul.f32 %v2562_v50, %v3517_v6 }
0x16a0   :  { %v2568_v37 = vadd.f32 1e-05, %v2566_v35  ;;  %v2858_v35 = vld [vmem:[%s4029_s21] ss:$0 sm:$0xff] }
0x16a2   :  { %2995 = vrsqrt.f32 %v2568_v37  ;;  %vm2576_vm12 = vweird.f32 %v2568_v37 }
0x16a5   :  { %v2565_v41 = vpop.xlane.xlu0 %2564 }
0x16a6   :  { %v2567_v40 = vmul.f32 %v2565_v41, %v3517_v6 }
0x16a8   :  { %v2996_v45 = vpop.eup %2995  ;;  %v2569_v46 = vadd.f32 1e-05, %v2567_v40 }
0x16a9   :  { %v2571_v44 = vmul.f32 %v2996_v45, %v2568_v37  ;;  %vm2577_vm11 = vweird.f32 %v2996_v45 }
0x16aa   :  { %2997 = vrsqrt.f32 %v2569_v46  ;;  %vm2578_vm13 = vmor %vm2576_vm12, %vm2577_vm11  ;;  %vm2586_vm15 = vweird.f32 %v2569_v46 }
0x16ab   :  { %v2572_v51 = vmul.f32 %v2996_v45, %v2571_v44 }
0x16ad   :  { %v2573_v59 = vmul.f32 0.5, %v2572_v51 }
0x16af   :  { %v2574_v60 = vsub.f32 1.5, %v2573_v59 }
0x16b0   :  { %v2998_v61 = vpop.eup %2997 }
0x16b1   :  { %v2575_v62 = vmul.f32 %v2996_v45, %v2574_v60  ;;  %v2581_v63 = vmul.f32 %v2998_v61, %v2569_v46  ;;  %vm2587_vm14 = vweird.f32 %v2998_v61 }
0x16b2   :  { %vm2588_vm1 = vmor %vm2586_vm15, %vm2587_vm14 }
0x16b3   :  { %v2582_v0 = vmul.f32 %v2998_v61, %v2581_v63  ;;  %v2579_v1 = vsel %vm2578_vm13, %v2996_v45, %v2575_v62 }
0x16b4   :  { %v2590_v20 = vmul.f32 %v2579_v1, %v3886_v15  ;;  %v2660_v15 = vpack.c.bf16 %v2647_v17, %v2646_v13 }
0x16b5   :  { %v2583_v2 = vmul.f32 0.5, %v2582_v0 }
0x16b6   :  { %v2596_v10 = vmul.f32 %v2855_v38, %v2590_v20  ;;  %2673 = vmatpush.bf16.msra.mxu0 %v2660_v15  ;;  %v2859_v20 = vld [vmem:[%s4030_s22] ss:$0 sm:$0xff] }
0x16b7   :  { %v2584_v5 = vsub.f32 1.5, %v2583_v2 }
0x16b8   :  { %v2602_v53 = vadd.f32 %v2856_v9, %v2596_v10 }
0x16b9   :  { %v2585_v7 = vmul.f32 %v2998_v61, %v2584_v5 }
0x16ba   :  { %2674 = vmatpush.bf16.msra.mxu0 %v2659_v16 }
0x16bb   :  { %v2589_v34 = vsel %vm2588_vm1, %v2998_v61, %v2585_v7 }
0x16bc   :  { %v2591_v4 = vmul.f32 %v2589_v34, %v3892_v21  ;;  %v2643_v21 = vld [vmem:[%s4028_s20 + $0x18] sm:$0xff] }
0x16bd   :  { %v2658_v55 = vpack.c.bf16 %v2643_v21, %v2642_v19 }
0x16be   :  { %v2597_v14 = vmul.f32 %v2855_v38, %v2591_v4 }
0x16bf   :  { %2675 = vmatpush.bf16.msra.mxu0 %v2658_v55 }
0x16c0   :  { %v2603_v33 = vadd.f32 %v2856_v9, %v2597_v14 }
0x16c2   :  { %v2612_v12 = vpack.c.bf16 %v2603_v33, %v2602_v53 }
0x16c3   :  { %2676 = vmatpush.bf16.msra.mxu0 %v2657_v26 }
0x16c4   :  { %2832 = vmatmul.msk.bf16.vlgmr.msrb.gmra.mxu3 %vm115_vm0, %v2612_v12 }
0x1747   :  { %v2633_v28 = vpop.f32.mrf.mxu3 }
0x1748   :  { %v2634_v57 = vadd.f32 %v2857_v29, %v2633_v28 }
0x174a   :  { %v2638_v31 = vmax.f32 %v2634_v57, 0.0 }
0x174f   :  { %v2635_v30 = vpop.f32.mrf.mxu3 }
0x1750   :  { %v2636_v43 = vadd.f32 %v2857_v29, %v2635_v30 }
0x1752   :  { %v2639_v32 = vmax.f32 %v2636_v43, 0.0 }
0x1754   :  { %v2656_v50 = vpack.c.bf16 %v2639_v32, %v2638_v31 }
0x1756   :  { %2677 = vmatmul.bf16.vlgmr.msra.gmra.mxu0 %v2656_v50 }
0x17d3   :  { %v2678_v36 = vpop.f32.mrf.mxu0 }
0x17d4   :  { %v2679_v11 = vadd.f32 %v2858_v35, %v2678_v36 }
0x17d6   :  { %v2683_v37 = vadd.f32 %v2679_v11, %v2602_v53 }
0x17d8   :  { %v2685_v39 = vsel %vm115_vm0, %v2683_v37, 0.0 }
0x17d9   :  { %2686 = vadd.xlane.f32.xlu1 %v2685_v39 }
0x17db   :  { %v2680_v27 = vpop.f32.mrf.mxu0 }
0x17dc   :  { %v2681_v24 = vadd.f32 %v2858_v35, %v2680_v27 }
0x17de   :  { %v2684_v3 = vadd.f32 %v2681_v24, %v2603_v33 }
0x17e0   :  { %v2688_v41 = vsel %vm115_vm0, %v2684_v3, 0.0 }
0x17e1   :  { %2689 = vadd.xlane.f32.xlu2 %v2688_v41 }
0x184c   :  { %v2687_v48 = vpop.xlane.xlu1 %2686 }
0x184d   :  { %v2691_v42 = vmul.f32 %v2687_v48, %v3517_v6 }
0x184f   :  { %v2693_v40 = vsub.f32 %v2683_v37, %v2691_v42 }
0x1851   :  { %v2695_v25 = vmul.f32 %v2693_v40, %v2693_v40 }
0x1853   :  { %v2697_v45 = vsel %vm115_vm0, %v2695_v25, 0.0 }
0x1854   :  { %v2690_v46 = vpop.xlane.xlu2 %2689  ;;  %2698 = vadd.xlane.f32.xlu2 %v2697_v45 }
0x1855   :  { %v2692_v47 = vmul.f32 %v2690_v46, %v3517_v6 }
0x1857   :  { %v2694_v49 = vsub.f32 %v2684_v3, %v2692_v47 }
0x1859   :  { %v2696_v44 = vmul.f32 %v2694_v49, %v2694_v49 }
0x185b   :  { %v2700_v51 = vsel %vm115_vm0, %v2696_v44, 0.0 }
0x185c   :  { %2701 = vadd.xlane.f32.xlu2 %v2700_v51 }
0x18c7   :  { %v2699_v54 = vpop.xlane.xlu2 %2698 }
0x18c8   :  { %v2703_v56 = vmul.f32 %v2699_v54, %v3517_v6 }
0x18ca   :  { %v2705_v58 = vadd.f32 1e-05, %v2703_v56 }
0x18cc   :  { %2999 = vrsqrt.f32 %v2705_v58  ;;  %vm2713_vm3 = vweird.f32 %v2705_v58 }
0x18cf   :  { %v2702_v59 = vpop.xlane.xlu2 %2701 }
0x18d0   :  { %v2704_v60 = vmul.f32 %v2702_v59, %v3517_v6  ;;  %v2860_v6 = vld [vmem:[%s4031_s23] ss:$0 sm:$0xff] }
0x18d2   :  { %v3000_v8 = vpop.eup %2999  ;;  %v2706_v61 = vadd.f32 1e-05, %v2704_v60 }
0x18d3   :  { %v2708_v62 = vmul.f32 %v3000_v8, %v2705_v58  ;;  %vm2714_vm2 = vweird.f32 %v3000_v8 }
0x18d4   :  { %3001 = vrsqrt.f32 %v2706_v61  ;;  %vm2715_vm4 = vmor %vm2713_vm3, %vm2714_vm2  ;;  %vm2723_vm6 = vweird.f32 %v2706_v61 }
0x18d5   :  { %v2709_v63 = vmul.f32 %v3000_v8, %v2708_v62 }
0x18d7   :  { %v2710_v0 = vmul.f32 0.5, %v2709_v63 }
0x18d9   :  { %v2711_v1 = vsub.f32 1.5, %v2710_v0 }
0x18da   :  { %v3002_v2 = vpop.eup %3001 }
0x18db   :  { %v2712_v5 = vmul.f32 %v3000_v8, %v2711_v1  ;;  %v2718_v38 = vmul.f32 %v3002_v2, %v2706_v61  ;;  %vm2724_vm5 = vweird.f32 %v3002_v2 }
0x18dc   :  { %vm2725_vm7 = vmor %vm2723_vm6, %vm2724_vm5 }
0x18dd   :  { %v2716_v7 = vsel %vm2715_vm4, %v3000_v8, %v2712_v5  ;;  %v2719_v34 = vmul.f32 %v3002_v2, %v2718_v38 }
0x18de   :  { %v2727_v9 = vmul.f32 %v2716_v7, %v2693_v40 }
0x18df   :  { %v2720_v10 = vmul.f32 0.5, %v2719_v34 }
0x18e0   :  { %v2733_v4 = vmul.f32 %v2859_v20, %v2727_v9 }
0x18e1   :  { %v2721_v14 = vsub.f32 1.5, %v2720_v10 }
0x18e2   :  { %v2739_v53 = vadd.f32 %v2860_v6, %v2733_v4 }
0x18e3   :  { %v2722_v33 = vmul.f32 %v3002_v2, %v2721_v14 }
0x18e4   :  { %2741 = vst.msk [vmem:[%s4032_s24] sm:$0xff] %vm115_vm0, %v2739_v53 }
0x18e5   :  { %v2726_v12 = vsel %vm2725_vm7, %v3002_v2, %v2722_v33 }
0x18e6   :  { %v2728_v13 = vmul.f32 %v2726_v12, %v2694_v49 }
0x18e8   :  { %v2734_v17 = vmul.f32 %v2859_v20, %v2728_v13 }
0x18ea   :  { %v2740_v15 = vadd.f32 %v2860_v6, %v2734_v17 }
0x18ec   :  { %2742 = vst.msk [vmem:[%s4032_s24 + $0x8] sm:$0xff] %vm115_vm0, %v2740_v15 }

</bundles_post_ra>
